<compile_context>
chip_gen: v7x
topology: tpu7x:2x2x1
jax: 0.10.0
libtpu: 0.0.40
codegen_flags: <defaults>
</compile_context>

<pallas_src>
import functools

import jax
import jax.numpy as jnp
from jax.experimental import pallas as pl
from jax.experimental.pallas import tpu as pltpu

EPS = 1e-5  # PyTorch GroupNorm default eps


# ---------------------------------------------------------------------------
# Single fused kernel: encoder + 4 fuse layers, feat resident in VMEM/vregs.
# ---------------------------------------------------------------------------
def boundary_kernel(x_ref, adj_ref, encw_ref, fusew_ref, gn_ref,
                    out_ref, s_ref, *, n_layers, n_edge_keys, n_nodes, n_map):
    N, C, K = n_nodes, n_map, n_edge_keys
    inv_c = 1.0 / C

    def gn(h, row):
        # GroupNorm(1 group) over C per row; single-pass sums -> the two XLU
        # reductions are independent and can pipeline.
        gw = gn_ref[row:row + 1, :]
        gb = gn_ref[row + 1:row + 2, :]
        s1 = jnp.sum(h, axis=-1, keepdims=True)
        s2 = jnp.sum(h * h, axis=-1, keepdims=True)
        mu = s1 * inv_c
        var = s2 * inv_c - mu * mu
        return (h - mu) * jax.lax.rsqrt(var + EPS) * gw + gb

    def branch(x, w1_off, b_row, w2_off, g_row):
        # Linear(2->C)+bias, ReLU, Linear(C->C, no bias), GroupNorm.
        w1 = encw_ref[w1_off:w1_off + 8, :]          # zero-padded (8, C)
        w2 = encw_ref[w2_off:w2_off + C, :]
        b1 = gn_ref[b_row:b_row + 1, :]
        h = jnp.maximum(jnp.dot(x, w1, preferred_element_type=jnp.float32) + b1, 0.0)
        h = jnp.dot(h, w2, preferred_element_type=jnp.float32)
        return gn(h, g_row)

    # ---- input / seg encoders ------------------------------------------------
    feat = jnp.maximum(
        branch(x_ref[0:N, :], 0, 0, 16, 2)            # ctrs branch
        + branch(x_ref[N:2 * N, :], 8, 1, 16 + C, 4), # feats branch
        0.0)

    # ---- fuse layers (statically unrolled; feat never leaves the chip) -------
    for l in range(n_layers):
        # S = vstack_k(feat @ W_k)  for the K edge keys plus the 'ctr' weight,
        # written straight to VMEM scratch (never held live as vregs).
        for k in range(K + 1):
            s_ref[k * N:(k + 1) * N, :] = jnp.dot(
                feat, fusew_ref[l, k], preferred_element_type=jnp.float32)
        # temp = [A_0|...|A_{K-1}|I] @ S == sum_k A_k (feat W_k) + feat W_ctr.
        # Adjacency is streamed from VMEM here each layer (not hoisted).
        temp = jnp.dot(adj_ref[...], s_ref[...], preferred_element_type=jnp.float32)
        base = 6 + 4 * l
        h = jnp.maximum(gn(temp, base), 0.0)
        h = jnp.dot(h, fusew_ref[l, K + 1], preferred_element_type=jnp.float32)
        h = gn(h, base + 2)
        feat = jnp.maximum(h + feat, 0.0)             # residual == layer input

    out_ref[...] = feat


# ---------------------------------------------------------------------------
# Wrapper: pack inputs/weights into 5 arrays, one pallas_call, no grid.
# ---------------------------------------------------------------------------
def boundary_net_forward(graph, params):
    ctrs = jnp.concatenate(graph['ctrs'], axis=0)
    feats = graph['feats']
    enc = params['enc']
    fuse = params['fuse']

    n = ctrs.shape[0]
    c = enc['wi2'].shape[1]
    n_layers = len(fuse)
    n_keys = fuse[0]['wedge'].shape[0]

    # Node inputs stacked along sublanes, columns zero-padded 2 -> 8.
    x_in = jnp.concatenate([
        jnp.pad(ctrs, ((0, 0), (0, 8 - ctrs.shape[1]))),
        jnp.pad(feats, ((0, 0), (0, 8 - feats.shape[1]))),
    ], axis=0)                                                  # (2N, 8)

    # Encoder weights: [wi1 (pad->8); ws1 (pad->8); wi2; ws2]   (16+2C, C)
    enc_w = jnp.concatenate([
        jnp.pad(enc['wi1'], ((0, 8 - enc['wi1'].shape[0]), (0, 0))),
        jnp.pad(enc['ws1'], ((0, 8 - enc['ws1'].shape[0]), (0, 0))),
        enc['wi2'], enc['ws2'],
    ], axis=0)

    # Per-layer (C, C) weights: slots 0..K-1 = wedge, K = wctr, K+1 = wctr2.
    fuse_w = jnp.stack([
        jnp.concatenate([ly['wedge'], ly['wctr'][None], ly['wctr2'][None]], axis=0)
        for ly in fuse], axis=0)                                # (L, K+2, C, C)

    # All (1, C) bias / GN vectors stacked along sublanes.
    gn_rows = [enc['bi1'], enc['bs1'], enc['giw'], enc['gib'], enc['gsw'], enc['gsb']]
    for ly in fuse:
        gn_rows += [ly['g1w'], ly['g1b'], ly['g2w'], ly['g2b']]
    gn_vec = jnp.concatenate(gn_rows, axis=0)                   # (6+4L, C)

    # Lane-dense horizontal adjacency with identity appended (folds wctr in):
    #   adj_h[u, k*N + v] = A_k[u, v],  adj_h[:, K*N:] = I.
    adj = graph['adj']                                          # (K, N, N)
    adj_h = jnp.concatenate(
        [jnp.transpose(adj, (1, 0, 2)).reshape(n, n_keys * n),
         jnp.eye(n, dtype=jnp.float32)], axis=1)                # (N, (K+1)*N)

    kern = functools.partial(boundary_kernel, n_layers=n_layers,
                             n_edge_keys=n_keys, n_nodes=n, n_map=c)
    feat = pl.pallas_call(
        kern,
        out_shape=jax.ShapeDtypeStruct((n, c), jnp.float32),
        scratch_shapes=[pltpu.VMEM(((n_keys + 1) * n, c), jnp.float32)],
    )(x_in, adj_h, enc_w, fuse_w, gn_vec)
    return feat, graph['idcs'], graph['ctrs']


# ---------------------------------------------------------------------------
# Pure-JAX reference (index_add semantics + two-pass GN, like PyTorch).
# ---------------------------------------------------------------------------
def _gn_ref(h, gw, gb):
    mu = jnp.mean(h, axis=-1, keepdims=True)
    var = jnp.mean((h - mu) ** 2, axis=-1, keepdims=True)
    return (h - mu) * jax.lax.rsqrt(var + EPS) * gw + gb


def reference_forward(graph, edges, params):
    ctrs = jnp.concatenate(graph['ctrs'], axis=0)

    def branch(x, w1, b1, w2, gw, gb):
        h = jnp.maximum(x @ w1 + b1, 0.0)
        return _gn_ref(h @ w2, gw, gb)

    enc = params['enc']
    feat = jnp.maximum(
        branch(ctrs, enc['wi1'], enc['bi1'], enc['wi2'], enc['giw'], enc['gib'])
        + branch(graph['feats'], enc['ws1'], enc['bs1'], enc['ws2'], enc['gsw'], enc['gsb']),
        0.0)
    res = feat
    for layer in params['fuse']:
        temp = feat @ layer['wctr']
        for k, (u, v) in enumerate(edges):
            temp = temp.at[u].add(feat[v] @ layer['wedge'][k])
        h = jnp.maximum(_gn_ref(temp, layer['g1w'], layer['g1b']), 0.0)
        h = _gn_ref(h @ layer['wctr2'], layer['g2w'], layer['g2b'])
        feat = jnp.maximum(h + res, 0.0)
        res = feat
    return feat


# ---------------------------------------------------------------------------
# Deterministic parameter / graph construction
# ---------------------------------------------------------------------------
def init_params(key, c, n_edge_keys, n_layers=4):
    def nrm(k, shape, scale=0.1):
        return (scale * jax.random.normal(k, shape)).astype(jnp.float32)

    keys = iter(jax.random.split(key, 64))
    enc = dict(
        wi1=nrm(next(keys), (2, c), 0.5), bi1=nrm(next(keys), (1, c)),
        wi2=nrm(next(keys), (c, c)),
        giw=1.0 + nrm(next(keys), (1, c)), gib=nrm(next(keys), (1, c)),
        ws1=nrm(next(keys), (2, c), 0.5), bs1=nrm(next(keys), (1, c)),
        ws2=nrm(next(keys), (c, c)),
        gsw=1.0 + nrm(next(keys), (1, c)), gsb=nrm(next(keys), (1, c)),
    )
    fuse = []
    for _ in range(n_layers):
        fuse.append(dict(
            wctr=nrm(next(keys), (c, c)),
            wedge=nrm(next(keys), (n_edge_keys, c, c)),
            g1w=1.0 + nrm(next(keys), (1, c)), g1b=nrm(next(keys), (1, c)),
            wctr2=nrm(next(keys), (c, c)),
            g2w=1.0 + nrm(next(keys), (1, c)), g2b=nrm(next(keys), (1, c)),
        ))
    return dict(enc=enc, fuse=fuse)


def dense_adj(u, v, n):
    return jnp.zeros((n, n), jnp.float32).at[u, v].add(1.0)


if __name__ == "__main__":
    N, C = 64, 32                  # n_map = 32, 64 map nodes
    NUM_SCALES = 2                 # edge keys: pre0, pre1, suc0, suc1, left, right
    E = 48                         # edges per key

    key = jax.random.PRNGKey(0)
    k_ctr, k_feat, k_edges, k_par = jax.random.split(key, 4)

    ctrs_all = jax.random.normal(k_ctr, (N, 2), jnp.float32)
    graph_ctrs = [ctrs_all[:N // 2], ctrs_all[N // 2:]]
    graph_feats = jax.random.normal(k_feat, (N, 2), jnp.float32)
    graph_idcs = [jnp.arange(N // 2, dtype=jnp.int32),
                  jnp.arange(N // 2, N, dtype=jnp.int32)]

    edge_keys = [f'pre{i}' for i in range(NUM_SCALES)] \
              + [f'suc{i}' for i in range(NUM_SCALES)] + ['left', 'right']
    edges = []
    ek = jax.random.split(k_edges, 2 * len(edge_keys))
    for j, _ in enumerate(edge_keys):
        u = jax.random.randint(ek[2 * j], (E,), 0, N, jnp.int32)
        v = jax.random.randint(ek[2 * j + 1], (E,), 0, N, jnp.int32)
        edges.append((u, v))
    adj = jnp.stack([dense_adj(u, v, N) for (u, v) in edges], axis=0)  # [K, N, N]

    graph = dict(ctrs=graph_ctrs, feats=graph_feats, idcs=graph_idcs, adj=adj)
    params = init_params(k_par, C, len(edge_keys))

    feat, idcs, ctrs_out = boundary_net_forward(graph, params)
    jax.block_until_ready(feat)

    ref = reference_forward(graph, edges, params)
    assert feat.shape == (N, C) and feat.dtype == jnp.float32
    assert jnp.allclose(feat, ref, rtol=1e-3, atol=1e-3), \
        f"max err {jnp.max(jnp.abs(feat - ref))}"

    print("KERNEL_OK")
</pallas_src>

<mosaic_0001>
module attributes {stable_mosaic.version = 11 : i64} {
  func.func @boundary_kernel(%arg0: memref<128x8xf32, #tpu.memory_space<vmem>>, %arg1: memref<64x448xf32, #tpu.memory_space<vmem>>, %arg2: memref<80x32xf32, #tpu.memory_space<vmem>>, %arg3: memref<4x8x32x32xf32, #tpu.memory_space<vmem>>, %arg4: memref<22x32xf32, #tpu.memory_space<vmem>>, %arg5: memref<64x32xf32, #tpu.memory_space<vmem>>, %arg6: memref<448x32xf32, #tpu.memory_space<vmem>>) attributes {dimension_semantics = [], scalar_prefetch = 0 : i64, scratch_operands = 1 : i64, tpu.core_type = #tpu.core_type<tc>} {
    %c0 = arith.constant 0 : index
    %c0_0 = arith.constant 0 : index
    %0 = vector.load %arg0[%c0, %c0_0] : memref<128x8xf32, #tpu.memory_space<vmem>>, vector<64x8xf32>
    %c0_1 = arith.constant 0 : index
    %c0_2 = arith.constant 0 : index
    %1 = vector.load %arg2[%c0_1, %c0_2] : memref<80x32xf32, #tpu.memory_space<vmem>>, vector<8x32xf32>
    %c16 = arith.constant 16 : index
    %c0_3 = arith.constant 0 : index
    %2 = vector.load %arg2[%c16, %c0_3] : memref<80x32xf32, #tpu.memory_space<vmem>>, vector<32x32xf32>
    %c0_4 = arith.constant 0 : index
    %c0_5 = arith.constant 0 : index
    %3 = vector.load %arg4[%c0_4, %c0_5] : memref<22x32xf32, #tpu.memory_space<vmem>>, vector<1x32xf32>
    %cst = arith.constant dense<0.000000e+00> : vector<64x32xf32>
    %4 = tpu.matmul %0, %1, %cst {dimension_numbers = #tpu.dot_dimension_numbers<[1], [0], [0], [1], [0, 0, 1, 1], [], []>} : vector<64x8xf32>, vector<8x32xf32>, vector<64x32xf32> -> vector<64x32xf32>
    %5 = vector.broadcast %3 : vector<1x32xf32> to vector<64x32xf32>
    %6 = arith.addf %4, %5 : vector<64x32xf32>
    %cst_6 = arith.constant 0.000000e+00 : f32
    %7 = vector.broadcast %cst_6 : f32 to vector<64x32xf32>
    %8 = arith.maximumf %6, %7 : vector<64x32xf32>
    %cst_7 = arith.constant dense<0.000000e+00> : vector<64x32xf32>
    %9 = tpu.matmul %8, %2, %cst_7 {dimension_numbers = #tpu.dot_dimension_numbers<[1], [0], [0], [1], [0, 0, 1, 1], [], []>} : vector<64x32xf32>, vector<32x32xf32>, vector<64x32xf32> -> vector<64x32xf32>
    %c2 = arith.constant 2 : index
    %c0_8 = arith.constant 0 : index
    %10 = vector.load %arg4[%c2, %c0_8] : memref<22x32xf32, #tpu.memory_space<vmem>>, vector<1x32xf32>
    %c3 = arith.constant 3 : index
    %c0_9 = arith.constant 0 : index
    %11 = vector.load %arg4[%c3, %c0_9] : memref<22x32xf32, #tpu.memory_space<vmem>>, vector<1x32xf32>
    %cst_10 = arith.constant dense<0.000000e+00> : vector<64xf32>
    %12 = vector.multi_reduction <add>, %9, %cst_10 [1] : vector<64x32xf32> to vector<64xf32>
    %13 = vector.shape_cast %12 : vector<64xf32> to vector<64x1xf32>
    %14 = arith.mulf %9, %9 : vector<64x32xf32>
    %cst_11 = arith.constant dense<0.000000e+00> : vector<64xf32>
    %15 = vector.multi_reduction <add>, %14, %cst_11 [1] : vector<64x32xf32> to vector<64xf32>
    %16 = vector.shape_cast %15 : vector<64xf32> to vector<64x1xf32>
    %cst_12 = arith.constant 3.125000e-02 : f32
    %17 = vector.broadcast %cst_12 : f32 to vector<64x1xf32>
    %18 = arith.mulf %13, %17 : vector<64x1xf32>
    %cst_13 = arith.constant 3.125000e-02 : f32
    %19 = vector.broadcast %cst_13 : f32 to vector<64x1xf32>
    %20 = arith.mulf %16, %19 : vector<64x1xf32>
    %21 = arith.mulf %18, %18 : vector<64x1xf32>
    %22 = arith.subf %20, %21 : vector<64x1xf32>
    %23 = vector.broadcast %18 : vector<64x1xf32> to vector<64x32xf32>
    %24 = arith.subf %9, %23 : vector<64x32xf32>
    %cst_14 = arith.constant 9.99999974E-6 : f32
    %25 = vector.broadcast %cst_14 : f32 to vector<64x1xf32>
    %26 = arith.addf %22, %25 : vector<64x1xf32>
    %27 = math.rsqrt %26 : vector<64x1xf32>
    %28 = vector.broadcast %27 : vector<64x1xf32> to vector<64x32xf32>
    %29 = arith.mulf %24, %28 : vector<64x32xf32>
    %30 = vector.broadcast %10 : vector<1x32xf32> to vector<64x32xf32>
    %31 = arith.mulf %29, %30 : vector<64x32xf32>
    %32 = vector.broadcast %11 : vector<1x32xf32> to vector<64x32xf32>
    %33 = arith.addf %31, %32 : vector<64x32xf32>
    %c64 = arith.constant 64 : index
    %c0_15 = arith.constant 0 : index
    %34 = vector.load %arg0[%c64, %c0_15] : memref<128x8xf32, #tpu.memory_space<vmem>>, vector<64x8xf32>
    %c8 = arith.constant 8 : index
    %c0_16 = arith.constant 0 : index
    %35 = vector.load %arg2[%c8, %c0_16] : memref<80x32xf32, #tpu.memory_space<vmem>>, vector<8x32xf32>
    %c48 = arith.constant 48 : index
    %c0_17 = arith.constant 0 : index
    %36 = vector.load %arg2[%c48, %c0_17] : memref<80x32xf32, #tpu.memory_space<vmem>>, vector<32x32xf32>
    %c1 = arith.constant 1 : index
    %c0_18 = arith.constant 0 : index
    %37 = vector.load %arg4[%c1, %c0_18] : memref<22x32xf32, #tpu.memory_space<vmem>>, vector<1x32xf32>
    %cst_19 = arith.constant dense<0.000000e+00> : vector<64x32xf32>
    %38 = tpu.matmul %34, %35, %cst_19 {dimension_numbers = #tpu.dot_dimension_numbers<[1], [0], [0], [1], [0, 0, 1, 1], [], []>} : vector<64x8xf32>, vector<8x32xf32>, vector<64x32xf32> -> vector<64x32xf32>
    %39 = vector.broadcast %37 : vector<1x32xf32> to vector<64x32xf32>
    %40 = arith.addf %38, %39 : vector<64x32xf32>
    %cst_20 = arith.constant 0.000000e+00 : f32
    %41 = vector.broadcast %cst_20 : f32 to vector<64x32xf32>
    %42 = arith.maximumf %40, %41 : vector<64x32xf32>
    %cst_21 = arith.constant dense<0.000000e+00> : vector<64x32xf32>
    %43 = tpu.matmul %42, %36, %cst_21 {dimension_numbers = #tpu.dot_dimension_numbers<[1], [0], [0], [1], [0, 0, 1, 1], [], []>} : vector<64x32xf32>, vector<32x32xf32>, vector<64x32xf32> -> vector<64x32xf32>
    %c4 = arith.constant 4 : index
    %c0_22 = arith.constant 0 : index
    %44 = vector.load %arg4[%c4, %c0_22] : memref<22x32xf32, #tpu.memory_space<vmem>>, vector<1x32xf32>
    %c5 = arith.constant 5 : index
    %c0_23 = arith.constant 0 : index
    %45 = vector.load %arg4[%c5, %c0_23] : memref<22x32xf32, #tpu.memory_space<vmem>>, vector<1x32xf32>
    %cst_24 = arith.constant dense<0.000000e+00> : vector<64xf32>
    %46 = vector.multi_reduction <add>, %43, %cst_24 [1] : vector<64x32xf32> to vector<64xf32>
    %47 = vector.shape_cast %46 : vector<64xf32> to vector<64x1xf32>
    %48 = arith.mulf %43, %43 : vector<64x32xf32>
    %cst_25 = arith.constant dense<0.000000e+00> : vector<64xf32>
    %49 = vector.multi_reduction <add>, %48, %cst_25 [1] : vector<64x32xf32> to vector<64xf32>
    %50 = vector.shape_cast %49 : vector<64xf32> to vector<64x1xf32>
    %cst_26 = arith.constant 3.125000e-02 : f32
    %51 = vector.broadcast %cst_26 : f32 to vector<64x1xf32>
    %52 = arith.mulf %47, %51 : vector<64x1xf32>
    %cst_27 = arith.constant 3.125000e-02 : f32
    %53 = vector.broadcast %cst_27 : f32 to vector<64x1xf32>
    %54 = arith.mulf %50, %53 : vector<64x1xf32>
    %55 = arith.mulf %52, %52 : vector<64x1xf32>
    %56 = arith.subf %54, %55 : vector<64x1xf32>
    %57 = vector.broadcast %52 : vector<64x1xf32> to vector<64x32xf32>
    %58 = arith.subf %43, %57 : vector<64x32xf32>
    %cst_28 = arith.constant 9.99999974E-6 : f32
    %59 = vector.broadcast %cst_28 : f32 to vector<64x1xf32>
    %60 = arith.addf %56, %59 : vector<64x1xf32>
    %61 = math.rsqrt %60 : vector<64x1xf32>
    %62 = vector.broadcast %61 : vector<64x1xf32> to vector<64x32xf32>
    %63 = arith.mulf %58, %62 : vector<64x32xf32>
    %64 = vector.broadcast %44 : vector<1x32xf32> to vector<64x32xf32>
    %65 = arith.mulf %63, %64 : vector<64x32xf32>
    %66 = vector.broadcast %45 : vector<1x32xf32> to vector<64x32xf32>
    %67 = arith.addf %65, %66 : vector<64x32xf32>
    %68 = arith.addf %33, %67 : vector<64x32xf32>
    %cst_29 = arith.constant 0.000000e+00 : f32
    %69 = vector.broadcast %cst_29 : f32 to vector<64x32xf32>
    %70 = arith.maximumf %68, %69 : vector<64x32xf32>
    %c0_30 = arith.constant 0 : index
    %c0_31 = arith.constant 0 : index
    %c0_32 = arith.constant 0 : index
    %c0_33 = arith.constant 0 : index
    %71 = vector.load %arg3[%c0_30, %c0_31, %c0_32, %c0_33] : memref<4x8x32x32xf32, #tpu.memory_space<vmem>>, vector<1x1x32x32xf32>
    %72 = vector.shape_cast %71 : vector<1x1x32x32xf32> to vector<32x32xf32>
    %cst_34 = arith.constant dense<0.000000e+00> : vector<64x32xf32>
    %73 = tpu.matmul %70, %72, %cst_34 {dimension_numbers = #tpu.dot_dimension_numbers<[1], [0], [0], [1], [0, 0, 1, 1], [], []>} : vector<64x32xf32>, vector<32x32xf32>, vector<64x32xf32> -> vector<64x32xf32>
    %c0_35 = arith.constant 0 : index
    %c0_36 = arith.constant 0 : index
    %74 = vector.load %arg6[%c0_35, %c0_36] : memref<448x32xf32, #tpu.memory_space<vmem>>, vector<64x32xf32>
    tpu.vector_store %arg6[%c0_35, %c0_36], %73 {strides = array<i32>} : memref<448x32xf32, #tpu.memory_space<vmem>>, vector<64x32xf32>,
    %c0_37 = arith.constant 0 : index
    %c1_38 = arith.constant 1 : index
    %c0_39 = arith.constant 0 : index
    %c0_40 = arith.constant 0 : index
    %75 = vector.load %arg3[%c0_37, %c1_38, %c0_39, %c0_40] : memref<4x8x32x32xf32, #tpu.memory_space<vmem>>, vector<1x1x32x32xf32>
    %76 = vector.shape_cast %75 : vector<1x1x32x32xf32> to vector<32x32xf32>
    %cst_41 = arith.constant dense<0.000000e+00> : vector<64x32xf32>
    %77 = tpu.matmul %70, %76, %cst_41 {dimension_numbers = #tpu.dot_dimension_numbers<[1], [0], [0], [1], [0, 0, 1, 1], [], []>} : vector<64x32xf32>, vector<32x32xf32>, vector<64x32xf32> -> vector<64x32xf32>
    %c64_42 = arith.constant 64 : index
    %c0_43 = arith.constant 0 : index
    %78 = vector.load %arg6[%c64_42, %c0_43] : memref<448x32xf32, #tpu.memory_space<vmem>>, vector<64x32xf32>
    tpu.vector_store %arg6[%c64_42, %c0_43], %77 {strides = array<i32>} : memref<448x32xf32, #tpu.memory_space<vmem>>, vector<64x32xf32>,
    %c0_44 = arith.constant 0 : index
    %c2_45 = arith.constant 2 : index
    %c0_46 = arith.constant 0 : index
    %c0_47 = arith.constant 0 : index
    %79 = vector.load %arg3[%c0_44, %c2_45, %c0_46, %c0_47] : memref<4x8x32x32xf32, #tpu.memory_space<vmem>>, vector<1x1x32x32xf32>
    %80 = vector.shape_cast %79 : vector<1x1x32x32xf32> to vector<32x32xf32>
    %cst_48 = arith.constant dense<0.000000e+00> : vector<64x32xf32>
    %81 = tpu.matmul %70, %80, %cst_48 {dimension_numbers = #tpu.dot_dimension_numbers<[1], [0], [0], [1], [0, 0, 1, 1], [], []>} : vector<64x32xf32>, vector<32x32xf32>, vector<64x32xf32> -> vector<64x32xf32>
    %c128 = arith.constant 128 : index
    %c0_49 = arith.constant 0 : index
    %82 = vector.load %arg6[%c128, %c0_49] : memref<448x32xf32, #tpu.memory_space<vmem>>, vector<64x32xf32>
    tpu.vector_store %arg6[%c128, %c0_49], %81 {strides = array<i32>} : memref<448x32xf32, #tpu.memory_space<vmem>>, vector<64x32xf32>,
    %c0_50 = arith.constant 0 : index
    %c3_51 = arith.constant 3 : index
    %c0_52 = arith.constant 0 : index
    %c0_53 = arith.constant 0 : index
    %83 = vector.load %arg3[%c0_50, %c3_51, %c0_52, %c0_53] : memref<4x8x32x32xf32, #tpu.memory_space<vmem>>, vector<1x1x32x32xf32>
    %84 = vector.shape_cast %83 : vector<1x1x32x32xf32> to vector<32x32xf32>
    %cst_54 = arith.constant dense<0.000000e+00> : vector<64x32xf32>
    %85 = tpu.matmul %70, %84, %cst_54 {dimension_numbers = #tpu.dot_dimension_numbers<[1], [0], [0], [1], [0, 0, 1, 1], [], []>} : vector<64x32xf32>, vector<32x32xf32>, vector<64x32xf32> -> vector<64x32xf32>
    %c192 = arith.constant 192 : index
    %c0_55 = arith.constant 0 : index
    %86 = vector.load %arg6[%c192, %c0_55] : memref<448x32xf32, #tpu.memory_space<vmem>>, vector<64x32xf32>
    tpu.vector_store %arg6[%c192, %c0_55], %85 {strides = array<i32>} : memref<448x32xf32, #tpu.memory_space<vmem>>, vector<64x32xf32>,
    %c0_56 = arith.constant 0 : index
    %c4_57 = arith.constant 4 : index
    %c0_58 = arith.constant 0 : index
    %c0_59 = arith.constant 0 : index
    %87 = vector.load %arg3[%c0_56, %c4_57, %c0_58, %c0_59] : memref<4x8x32x32xf32, #tpu.memory_space<vmem>>, vector<1x1x32x32xf32>
    %88 = vector.shape_cast %87 : vector<1x1x32x32xf32> to vector<32x32xf32>
    %cst_60 = arith.constant dense<0.000000e+00> : vector<64x32xf32>
    %89 = tpu.matmul %70, %88, %cst_60 {dimension_numbers = #tpu.dot_dimension_numbers<[1], [0], [0], [1], [0, 0, 1, 1], [], []>} : vector<64x32xf32>, vector<32x32xf32>, vector<64x32xf32> -> vector<64x32xf32>
    %c256 = arith.constant 256 : index
    %c0_61 = arith.constant 0 : index
    %90 = vector.load %arg6[%c256, %c0_61] : memref<448x32xf32, #tpu.memory_space<vmem>>, vector<64x32xf32>
    tpu.vector_store %arg6[%c256, %c0_61], %89 {strides = array<i32>} : memref<448x32xf32, #tpu.memory_space<vmem>>, vector<64x32xf32>,
    %c0_62 = arith.constant 0 : index
    %c5_63 = arith.constant 5 : index
    %c0_64 = arith.constant 0 : index
    %c0_65 = arith.constant 0 : index
    %91 = vector.load %arg3[%c0_62, %c5_63, %c0_64, %c0_65] : memref<4x8x32x32xf32, #tpu.memory_space<vmem>>, vector<1x1x32x32xf32>
    %92 = vector.shape_cast %91 : vector<1x1x32x32xf32> to vector<32x32xf32>
    %cst_66 = arith.constant dense<0.000000e+00> : vector<64x32xf32>
    %93 = tpu.matmul %70, %92, %cst_66 {dimension_numbers = #tpu.dot_dimension_numbers<[1], [0], [0], [1], [0, 0, 1, 1], [], []>} : vector<64x32xf32>, vector<32x32xf32>, vector<64x32xf32> -> vector<64x32xf32>
    %c320 = arith.constant 320 : index
    %c0_67 = arith.constant 0 : index
    %94 = vector.load %arg6[%c320, %c0_67] : memref<448x32xf32, #tpu.memory_space<vmem>>, vector<64x32xf32>
    tpu.vector_store %arg6[%c320, %c0_67], %93 {strides = array<i32>} : memref<448x32xf32, #tpu.memory_space<vmem>>, vector<64x32xf32>,
    %c0_68 = arith.constant 0 : index
    %c6 = arith.constant 6 : index
    %c0_69 = arith.constant 0 : index
    %c0_70 = arith.constant 0 : index
    %95 = vector.load %arg3[%c0_68, %c6, %c0_69, %c0_70] : memref<4x8x32x32xf32, #tpu.memory_space<vmem>>, vector<1x1x32x32xf32>
    %96 = vector.shape_cast %95 : vector<1x1x32x32xf32> to vector<32x32xf32>
    %cst_71 = arith.constant dense<0.000000e+00> : vector<64x32xf32>
    %97 = tpu.matmul %70, %96, %cst_71 {dimension_numbers = #tpu.dot_dimension_numbers<[1], [0], [0], [1], [0, 0, 1, 1], [], []>} : vector<64x32xf32>, vector<32x32xf32>, vector<64x32xf32> -> vector<64x32xf32>
    %c384 = arith.constant 384 : index
    %c0_72 = arith.constant 0 : index
    %98 = vector.load %arg6[%c384, %c0_72] : memref<448x32xf32, #tpu.memory_space<vmem>>, vector<64x32xf32>
    tpu.vector_store %arg6[%c384, %c0_72], %97 {strides = array<i32>} : memref<448x32xf32, #tpu.memory_space<vmem>>, vector<64x32xf32>,
    %c0_73 = arith.constant 0 : index
    %c0_74 = arith.constant 0 : index
    %99 = vector.load %arg1[%c0_73, %c0_74] : memref<64x448xf32, #tpu.memory_space<vmem>>, vector<64x448xf32>
    %c0_75 = arith.constant 0 : index
    %c0_76 = arith.constant 0 : index
    %100 = vector.load %arg6[%c0_75, %c0_76] : memref<448x32xf32, #tpu.memory_space<vmem>>, vector<448x32xf32>
    %cst_77 = arith.constant dense<0.000000e+00> : vector<64x32xf32>
    %101 = tpu.matmul %99, %100, %cst_77 {dimension_numbers = #tpu.dot_dimension_numbers<[1], [0], [0], [1], [0, 0, 1, 1], [], []>} : vector<64x448xf32>, vector<448x32xf32>, vector<64x32xf32> -> vector<64x32xf32>
    %c6_78 = arith.constant 6 : index
    %c0_79 = arith.constant 0 : index
    %102 = vector.load %arg4[%c6_78, %c0_79] : memref<22x32xf32, #tpu.memory_space<vmem>>, vector<1x32xf32>
    %c7 = arith.constant 7 : index
    %c0_80 = arith.constant 0 : index
    %103 = vector.load %arg4[%c7, %c0_80] : memref<22x32xf32, #tpu.memory_space<vmem>>, vector<1x32xf32>
    %cst_81 = arith.constant dense<0.000000e+00> : vector<64xf32>
    %104 = vector.multi_reduction <add>, %101, %cst_81 [1] : vector<64x32xf32> to vector<64xf32>
    %105 = vector.shape_cast %104 : vector<64xf32> to vector<64x1xf32>
    %106 = arith.mulf %101, %101 : vector<64x32xf32>
    %cst_82 = arith.constant dense<0.000000e+00> : vector<64xf32>
    %107 = vector.multi_reduction <add>, %106, %cst_82 [1] : vector<64x32xf32> to vector<64xf32>
    %108 = vector.shape_cast %107 : vector<64xf32> to vector<64x1xf32>
    %cst_83 = arith.constant 3.125000e-02 : f32
    %109 = vector.broadcast %cst_83 : f32 to vector<64x1xf32>
    %110 = arith.mulf %105, %109 : vector<64x1xf32>
    %cst_84 = arith.constant 3.125000e-02 : f32
    %111 = vector.broadcast %cst_84 : f32 to vector<64x1xf32>
    %112 = arith.mulf %108, %111 : vector<64x1xf32>
    %113 = arith.mulf %110, %110 : vector<64x1xf32>
    %114 = arith.subf %112, %113 : vector<64x1xf32>
    %115 = vector.broadcast %110 : vector<64x1xf32> to vector<64x32xf32>
    %116 = arith.subf %101, %115 : vector<64x32xf32>
    %cst_85 = arith.constant 9.99999974E-6 : f32
    %117 = vector.broadcast %cst_85 : f32 to vector<64x1xf32>
    %118 = arith.addf %114, %117 : vector<64x1xf32>
    %119 = math.rsqrt %118 : vector<64x1xf32>
    %120 = vector.broadcast %119 : vector<64x1xf32> to vector<64x32xf32>
    %121 = arith.mulf %116, %120 : vector<64x32xf32>
    %122 = vector.broadcast %102 : vector<1x32xf32> to vector<64x32xf32>
    %123 = arith.mulf %121, %122 : vector<64x32xf32>
    %124 = vector.broadcast %103 : vector<1x32xf32> to vector<64x32xf32>
    %125 = arith.addf %123, %124 : vector<64x32xf32>
    %cst_86 = arith.constant 0.000000e+00 : f32
    %126 = vector.broadcast %cst_86 : f32 to vector<64x32xf32>
    %127 = arith.maximumf %125, %126 : vector<64x32xf32>
    %c0_87 = arith.constant 0 : index
    %c7_88 = arith.constant 7 : index
    %c0_89 = arith.constant 0 : index
    %c0_90 = arith.constant 0 : index
    %128 = vector.load %arg3[%c0_87, %c7_88, %c0_89, %c0_90] : memref<4x8x32x32xf32, #tpu.memory_space<vmem>>, vector<1x1x32x32xf32>
    %129 = vector.shape_cast %128 : vector<1x1x32x32xf32> to vector<32x32xf32>
    %cst_91 = arith.constant dense<0.000000e+00> : vector<64x32xf32>
    %130 = tpu.matmul %127, %129, %cst_91 {dimension_numbers = #tpu.dot_dimension_numbers<[1], [0], [0], [1], [0, 0, 1, 1], [], []>} : vector<64x32xf32>, vector<32x32xf32>, vector<64x32xf32> -> vector<64x32xf32>
    %c8_92 = arith.constant 8 : index
    %c0_93 = arith.constant 0 : index
    %131 = vector.load %arg4[%c8_92, %c0_93] : memref<22x32xf32, #tpu.memory_space<vmem>>, vector<1x32xf32>
    %c9 = arith.constant 9 : index
    %c0_94 = arith.constant 0 : index
    %132 = vector.load %arg4[%c9, %c0_94] : memref<22x32xf32, #tpu.memory_space<vmem>>, vector<1x32xf32>
    %cst_95 = arith.constant dense<0.000000e+00> : vector<64xf32>
    %133 = vector.multi_reduction <add>, %130, %cst_95 [1] : vector<64x32xf32> to vector<64xf32>
    %134 = vector.shape_cast %133 : vector<64xf32> to vector<64x1xf32>
    %135 = arith.mulf %130, %130 : vector<64x32xf32>
    %cst_96 = arith.constant dense<0.000000e+00> : vector<64xf32>
    %136 = vector.multi_reduction <add>, %135, %cst_96 [1] : vector<64x32xf32> to vector<64xf32>
    %137 = vector.shape_cast %136 : vector<64xf32> to vector<64x1xf32>
    %cst_97 = arith.constant 3.125000e-02 : f32
    %138 = vector.broadcast %cst_97 : f32 to vector<64x1xf32>
    %139 = arith.mulf %134, %138 : vector<64x1xf32>
    %cst_98 = arith.constant 3.125000e-02 : f32
    %140 = vector.broadcast %cst_98 : f32 to vector<64x1xf32>
    %141 = arith.mulf %137, %140 : vector<64x1xf32>
    %142 = arith.mulf %139, %139 : vector<64x1xf32>
    %143 = arith.subf %141, %142 : vector<64x1xf32>
    %144 = vector.broadcast %139 : vector<64x1xf32> to vector<64x32xf32>
    %145 = arith.subf %130, %144 : vector<64x32xf32>
    %cst_99 = arith.constant 9.99999974E-6 : f32
    %146 = vector.broadcast %cst_99 : f32 to vector<64x1xf32>
    %147 = arith.addf %143, %146 : vector<64x1xf32>
    %148 = math.rsqrt %147 : vector<64x1xf32>
    %149 = vector.broadcast %148 : vector<64x1xf32> to vector<64x32xf32>
    %150 = arith.mulf %145, %149 : vector<64x32xf32>
    %151 = vector.broadcast %131 : vector<1x32xf32> to vector<64x32xf32>
    %152 = arith.mulf %150, %151 : vector<64x32xf32>
    %153 = vector.broadcast %132 : vector<1x32xf32> to vector<64x32xf32>
    %154 = arith.addf %152, %153 : vector<64x32xf32>
    %155 = arith.addf %154, %70 : vector<64x32xf32>
    %cst_100 = arith.constant 0.000000e+00 : f32
    %156 = vector.broadcast %cst_100 : f32 to vector<64x32xf32>
    %157 = arith.maximumf %155, %156 : vector<64x32xf32>
    %c1_101 = arith.constant 1 : index
    %c0_102 = arith.constant 0 : index
    %c0_103 = arith.constant 0 : index
    %c0_104 = arith.constant 0 : index
    %158 = vector.load %arg3[%c1_101, %c0_102, %c0_103, %c0_104] : memref<4x8x32x32xf32, #tpu.memory_space<vmem>>, vector<1x1x32x32xf32>
    %159 = vector.shape_cast %158 : vector<1x1x32x32xf32> to vector<32x32xf32>
    %cst_105 = arith.constant dense<0.000000e+00> : vector<64x32xf32>
    %160 = tpu.matmul %157, %159, %cst_105 {dimension_numbers = #tpu.dot_dimension_numbers<[1], [0], [0], [1], [0, 0, 1, 1], [], []>} : vector<64x32xf32>, vector<32x32xf32>, vector<64x32xf32> -> vector<64x32xf32>
    %c0_106 = arith.constant 0 : index
    %c0_107 = arith.constant 0 : index
    %161 = vector.load %arg6[%c0_106, %c0_107] : memref<448x32xf32, #tpu.memory_space<vmem>>, vector<64x32xf32>
    tpu.vector_store %arg6[%c0_106, %c0_107], %160 {strides = array<i32>} : memref<448x32xf32, #tpu.memory_space<vmem>>, vector<64x32xf32>,
    %c1_108 = arith.constant 1 : index
    %c1_109 = arith.constant 1 : index
    %c0_110 = arith.constant 0 : index
    %c0_111 = arith.constant 0 : index
    %162 = vector.load %arg3[%c1_108, %c1_109, %c0_110, %c0_111] : memref<4x8x32x32xf32, #tpu.memory_space<vmem>>, vector<1x1x32x32xf32>
    %163 = vector.shape_cast %162 : vector<1x1x32x32xf32> to vector<32x32xf32>
    %cst_112 = arith.constant dense<0.000000e+00> : vector<64x32xf32>
    %164 = tpu.matmul %157, %163, %cst_112 {dimension_numbers = #tpu.dot_dimension_numbers<[1], [0], [0], [1], [0, 0, 1, 1], [], []>} : vector<64x32xf32>, vector<32x32xf32>, vector<64x32xf32> -> vector<64x32xf32>
    %c64_113 = arith.constant 64 : index
    %c0_114 = arith.constant 0 : index
    %165 = vector.load %arg6[%c64_113, %c0_114] : memref<448x32xf32, #tpu.memory_space<vmem>>, vector<64x32xf32>
    tpu.vector_store %arg6[%c64_113, %c0_114], %164 {strides = array<i32>} : memref<448x32xf32, #tpu.memory_space<vmem>>, vector<64x32xf32>,
    %c1_115 = arith.constant 1 : index
    %c2_116 = arith.constant 2 : index
    %c0_117 = arith.constant 0 : index
    %c0_118 = arith.constant 0 : index
    %166 = vector.load %arg3[%c1_115, %c2_116, %c0_117, %c0_118] : memref<4x8x32x32xf32, #tpu.memory_space<vmem>>, vector<1x1x32x32xf32>
    %167 = vector.shape_cast %166 : vector<1x1x32x32xf32> to vector<32x32xf32>
    %cst_119 = arith.constant dense<0.000000e+00> : vector<64x32xf32>
    %168 = tpu.matmul %157, %167, %cst_119 {dimension_numbers = #tpu.dot_dimension_numbers<[1], [0], [0], [1], [0, 0, 1, 1], [], []>} : vector<64x32xf32>, vector<32x32xf32>, vector<64x32xf32> -> vector<64x32xf32>
    %c128_120 = arith.constant 128 : index
    %c0_121 = arith.constant 0 : index
    %169 = vector.load %arg6[%c128_120, %c0_121] : memref<448x32xf32, #tpu.memory_space<vmem>>, vector<64x32xf32>
    tpu.vector_store %arg6[%c128_120, %c0_121], %168 {strides = array<i32>} : memref<448x32xf32, #tpu.memory_space<vmem>>, vector<64x32xf32>,
    %c1_122 = arith.constant 1 : index
    %c3_123 = arith.constant 3 : index
    %c0_124 = arith.constant 0 : index
    %c0_125 = arith.constant 0 : index
    %170 = vector.load %arg3[%c1_122, %c3_123, %c0_124, %c0_125] : memref<4x8x32x32xf32, #tpu.memory_space<vmem>>, vector<1x1x32x32xf32>
    %171 = vector.shape_cast %170 : vector<1x1x32x32xf32> to vector<32x32xf32>
    %cst_126 = arith.constant dense<0.000000e+00> : vector<64x32xf32>
    %172 = tpu.matmul %157, %171, %cst_126 {dimension_numbers = #tpu.dot_dimension_numbers<[1], [0], [0], [1], [0, 0, 1, 1], [], []>} : vector<64x32xf32>, vector<32x32xf32>, vector<64x32xf32> -> vector<64x32xf32>
    %c192_127 = arith.constant 192 : index
    %c0_128 = arith.constant 0 : index
    %173 = vector.load %arg6[%c192_127, %c0_128] : memref<448x32xf32, #tpu.memory_space<vmem>>, vector<64x32xf32>
    tpu.vector_store %arg6[%c192_127, %c0_128], %172 {strides = array<i32>} : memref<448x32xf32, #tpu.memory_space<vmem>>, vector<64x32xf32>,
    %c1_129 = arith.constant 1 : index
    %c4_130 = arith.constant 4 : index
    %c0_131 = arith.constant 0 : index
    %c0_132 = arith.constant 0 : index
    %174 = vector.load %arg3[%c1_129, %c4_130, %c0_131, %c0_132] : memref<4x8x32x32xf32, #tpu.memory_space<vmem>>, vector<1x1x32x32xf32>
    %175 = vector.shape_cast %174 : vector<1x1x32x32xf32> to vector<32x32xf32>
    %cst_133 = arith.constant dense<0.000000e+00> : vector<64x32xf32>
    %176 = tpu.matmul %157, %175, %cst_133 {dimension_numbers = #tpu.dot_dimension_numbers<[1], [0], [0], [1], [0, 0, 1, 1], [], []>} : vector<64x32xf32>, vector<32x32xf32>, vector<64x32xf32> -> vector<64x32xf32>
    %c256_134 = arith.constant 256 : index
    %c0_135 = arith.constant 0 : index
    %177 = vector.load %arg6[%c256_134, %c0_135] : memref<448x32xf32, #tpu.memory_space<vmem>>, vector<64x32xf32>
    tpu.vector_store %arg6[%c256_134, %c0_135], %176 {strides = array<i32>} : memref<448x32xf32, #tpu.memory_space<vmem>>, vector<64x32xf32>,
    %c1_136 = arith.constant 1 : index
    %c5_137 = arith.constant 5 : index
    %c0_138 = arith.constant 0 : index
    %c0_139 = arith.constant 0 : index
    %178 = vector.load %arg3[%c1_136, %c5_137, %c0_138, %c0_139] : memref<4x8x32x32xf32, #tpu.memory_space<vmem>>, vector<1x1x32x32xf32>
    %179 = vector.shape_cast %178 : vector<1x1x32x32xf32> to vector<32x32xf32>
    %cst_140 = arith.constant dense<0.000000e+00> : vector<64x32xf32>
    %180 = tpu.matmul %157, %179, %cst_140 {dimension_numbers = #tpu.dot_dimension_numbers<[1], [0], [0], [1], [0, 0, 1, 1], [], []>} : vector<64x32xf32>, vector<32x32xf32>, vector<64x32xf32> -> vector<64x32xf32>
    %c320_141 = arith.constant 320 : index
    %c0_142 = arith.constant 0 : index
    %181 = vector.load %arg6[%c320_141, %c0_142] : memref<448x32xf32, #tpu.memory_space<vmem>>, vector<64x32xf32>
    tpu.vector_store %arg6[%c320_141, %c0_142], %180 {strides = array<i32>} : memref<448x32xf32, #tpu.memory_space<vmem>>, vector<64x32xf32>,
    %c1_143 = arith.constant 1 : index
    %c6_144 = arith.constant 6 : index
    %c0_145 = arith.constant 0 : index
    %c0_146 = arith.constant 0 : index
    %182 = vector.load %arg3[%c1_143, %c6_144, %c0_145, %c0_146] : memref<4x8x32x32xf32, #tpu.memory_space<vmem>>, vector<1x1x32x32xf32>
    %183 = vector.shape_cast %182 : vector<1x1x32x32xf32> to vector<32x32xf32>
    %cst_147 = arith.constant dense<0.000000e+00> : vector<64x32xf32>
    %184 = tpu.matmul %157, %183, %cst_147 {dimension_numbers = #tpu.dot_dimension_numbers<[1], [0], [0], [1], [0, 0, 1, 1], [], []>} : vector<64x32xf32>, vector<32x32xf32>, vector<64x32xf32> -> vector<64x32xf32>
    %c384_148 = arith.constant 384 : index
    %c0_149 = arith.constant 0 : index
    %185 = vector.load %arg6[%c384_148, %c0_149] : memref<448x32xf32, #tpu.memory_space<vmem>>, vector<64x32xf32>
    tpu.vector_store %arg6[%c384_148, %c0_149], %184 {strides = array<i32>} : memref<448x32xf32, #tpu.memory_space<vmem>>, vector<64x32xf32>,
    %c0_150 = arith.constant 0 : index
    %c0_151 = arith.constant 0 : index
    %186 = vector.load %arg1[%c0_150, %c0_151] : memref<64x448xf32, #tpu.memory_space<vmem>>, vector<64x448xf32>
    %c0_152 = arith.constant 0 : index
    %c0_153 = arith.constant 0 : index
    %187 = vector.load %arg6[%c0_152, %c0_153] : memref<448x32xf32, #tpu.memory_space<vmem>>, vector<448x32xf32>
    %cst_154 = arith.constant dense<0.000000e+00> : vector<64x32xf32>
    %188 = tpu.matmul %186, %187, %cst_154 {dimension_numbers = #tpu.dot_dimension_numbers<[1], [0], [0], [1], [0, 0, 1, 1], [], []>} : vector<64x448xf32>, vector<448x32xf32>, vector<64x32xf32> -> vector<64x32xf32>
    %c10 = arith.constant 10 : index
    %c0_155 = arith.constant 0 : index
    %189 = vector.load %arg4[%c10, %c0_155] : memref<22x32xf32, #tpu.memory_space<vmem>>, vector<1x32xf32>
    %c11 = arith.constant 11 : index
    %c0_156 = arith.constant 0 : index
    %190 = vector.load %arg4[%c11, %c0_156] : memref<22x32xf32, #tpu.memory_space<vmem>>, vector<1x32xf32>
    %cst_157 = arith.constant dense<0.000000e+00> : vector<64xf32>
    %191 = vector.multi_reduction <add>, %188, %cst_157 [1] : vector<64x32xf32> to vector<64xf32>
    %192 = vector.shape_cast %191 : vector<64xf32> to vector<64x1xf32>
    %193 = arith.mulf %188, %188 : vector<64x32xf32>
    %cst_158 = arith.constant dense<0.000000e+00> : vector<64xf32>
    %194 = vector.multi_reduction <add>, %193, %cst_158 [1] : vector<64x32xf32> to vector<64xf32>
    %195 = vector.shape_cast %194 : vector<64xf32> to vector<64x1xf32>
    %cst_159 = arith.constant 3.125000e-02 : f32
    %196 = vector.broadcast %cst_159 : f32 to vector<64x1xf32>
    %197 = arith.mulf %192, %196 : vector<64x1xf32>
    %cst_160 = arith.constant 3.125000e-02 : f32
    %198 = vector.broadcast %cst_160 : f32 to vector<64x1xf32>
    %199 = arith.mulf %195, %198 : vector<64x1xf32>
    %200 = arith.mulf %197, %197 : vector<64x1xf32>
    %201 = arith.subf %199, %200 : vector<64x1xf32>
    %202 = vector.broadcast %197 : vector<64x1xf32> to vector<64x32xf32>
    %203 = arith.subf %188, %202 : vector<64x32xf32>
    %cst_161 = arith.constant 9.99999974E-6 : f32
    %204 = vector.broadcast %cst_161 : f32 to vector<64x1xf32>
    %205 = arith.addf %201, %204 : vector<64x1xf32>
    %206 = math.rsqrt %205 : vector<64x1xf32>
    %207 = vector.broadcast %206 : vector<64x1xf32> to vector<64x32xf32>
    %208 = arith.mulf %203, %207 : vector<64x32xf32>
    %209 = vector.broadcast %189 : vector<1x32xf32> to vector<64x32xf32>
    %210 = arith.mulf %208, %209 : vector<64x32xf32>
    %211 = vector.broadcast %190 : vector<1x32xf32> to vector<64x32xf32>
    %212 = arith.addf %210, %211 : vector<64x32xf32>
    %cst_162 = arith.constant 0.000000e+00 : f32
    %213 = vector.broadcast %cst_162 : f32 to vector<64x32xf32>
    %214 = arith.maximumf %212, %213 : vector<64x32xf32>
    %c1_163 = arith.constant 1 : index
    %c7_164 = arith.constant 7 : index
    %c0_165 = arith.constant 0 : index
    %c0_166 = arith.constant 0 : index
    %215 = vector.load %arg3[%c1_163, %c7_164, %c0_165, %c0_166] : memref<4x8x32x32xf32, #tpu.memory_space<vmem>>, vector<1x1x32x32xf32>
    %216 = vector.shape_cast %215 : vector<1x1x32x32xf32> to vector<32x32xf32>
    %cst_167 = arith.constant dense<0.000000e+00> : vector<64x32xf32>
    %217 = tpu.matmul %214, %216, %cst_167 {dimension_numbers = #tpu.dot_dimension_numbers<[1], [0], [0], [1], [0, 0, 1, 1], [], []>} : vector<64x32xf32>, vector<32x32xf32>, vector<64x32xf32> -> vector<64x32xf32>
    %c12 = arith.constant 12 : index
    %c0_168 = arith.constant 0 : index
    %218 = vector.load %arg4[%c12, %c0_168] : memref<22x32xf32, #tpu.memory_space<vmem>>, vector<1x32xf32>
    %c13 = arith.constant 13 : index
    %c0_169 = arith.constant 0 : index
    %219 = vector.load %arg4[%c13, %c0_169] : memref<22x32xf32, #tpu.memory_space<vmem>>, vector<1x32xf32>
    %cst_170 = arith.constant dense<0.000000e+00> : vector<64xf32>
    %220 = vector.multi_reduction <add>, %217, %cst_170 [1] : vector<64x32xf32> to vector<64xf32>
    %221 = vector.shape_cast %220 : vector<64xf32> to vector<64x1xf32>
    %222 = arith.mulf %217, %217 : vector<64x32xf32>
    %cst_171 = arith.constant dense<0.000000e+00> : vector<64xf32>
    %223 = vector.multi_reduction <add>, %222, %cst_171 [1] : vector<64x32xf32> to vector<64xf32>
    %224 = vector.shape_cast %223 : vector<64xf32> to vector<64x1xf32>
    %cst_172 = arith.constant 3.125000e-02 : f32
    %225 = vector.broadcast %cst_172 : f32 to vector<64x1xf32>
    %226 = arith.mulf %221, %225 : vector<64x1xf32>
    %cst_173 = arith.constant 3.125000e-02 : f32
    %227 = vector.broadcast %cst_173 : f32 to vector<64x1xf32>
    %228 = arith.mulf %224, %227 : vector<64x1xf32>
    %229 = arith.mulf %226, %226 : vector<64x1xf32>
    %230 = arith.subf %228, %229 : vector<64x1xf32>
    %231 = vector.broadcast %226 : vector<64x1xf32> to vector<64x32xf32>
    %232 = arith.subf %217, %231 : vector<64x32xf32>
    %cst_174 = arith.constant 9.99999974E-6 : f32
    %233 = vector.broadcast %cst_174 : f32 to vector<64x1xf32>
    %234 = arith.addf %230, %233 : vector<64x1xf32>
    %235 = math.rsqrt %234 : vector<64x1xf32>
    %236 = vector.broadcast %235 : vector<64x1xf32> to vector<64x32xf32>
    %237 = arith.mulf %232, %236 : vector<64x32xf32>
    %238 = vector.broadcast %218 : vector<1x32xf32> to vector<64x32xf32>
    %239 = arith.mulf %237, %238 : vector<64x32xf32>
    %240 = vector.broadcast %219 : vector<1x32xf32> to vector<64x32xf32>
    %241 = arith.addf %239, %240 : vector<64x32xf32>
    %242 = arith.addf %241, %157 : vector<64x32xf32>
    %cst_175 = arith.constant 0.000000e+00 : f32
    %243 = vector.broadcast %cst_175 : f32 to vector<64x32xf32>
    %244 = arith.maximumf %242, %243 : vector<64x32xf32>
    %c2_176 = arith.constant 2 : index
    %c0_177 = arith.constant 0 : index
    %c0_178 = arith.constant 0 : index
    %c0_179 = arith.constant 0 : index
    %245 = vector.load %arg3[%c2_176, %c0_177, %c0_178, %c0_179] : memref<4x8x32x32xf32, #tpu.memory_space<vmem>>, vector<1x1x32x32xf32>
    %246 = vector.shape_cast %245 : vector<1x1x32x32xf32> to vector<32x32xf32>
    %cst_180 = arith.constant dense<0.000000e+00> : vector<64x32xf32>
    %247 = tpu.matmul %244, %246, %cst_180 {dimension_numbers = #tpu.dot_dimension_numbers<[1], [0], [0], [1], [0, 0, 1, 1], [], []>} : vector<64x32xf32>, vector<32x32xf32>, vector<64x32xf32> -> vector<64x32xf32>
    %c0_181 = arith.constant 0 : index
    %c0_182 = arith.constant 0 : index
    %248 = vector.load %arg6[%c0_181, %c0_182] : memref<448x32xf32, #tpu.memory_space<vmem>>, vector<64x32xf32>
    tpu.vector_store %arg6[%c0_181, %c0_182], %247 {strides = array<i32>} : memref<448x32xf32, #tpu.memory_space<vmem>>, vector<64x32xf32>,
    %c2_183 = arith.constant 2 : index
    %c1_184 = arith.constant 1 : index
    %c0_185 = arith.constant 0 : index
    %c0_186 = arith.constant 0 : index
    %249 = vector.load %arg3[%c2_183, %c1_184, %c0_185, %c0_186] : memref<4x8x32x32xf32, #tpu.memory_space<vmem>>, vector<1x1x32x32xf32>
    %250 = vector.shape_cast %249 : vector<1x1x32x32xf32> to vector<32x32xf32>
    %cst_187 = arith.constant dense<0.000000e+00> : vector<64x32xf32>
    %251 = tpu.matmul %244, %250, %cst_187 {dimension_numbers = #tpu.dot_dimension_numbers<[1], [0], [0], [1], [0, 0, 1, 1], [], []>} : vector<64x32xf32>, vector<32x32xf32>, vector<64x32xf32> -> vector<64x32xf32>
    %c64_188 = arith.constant 64 : index
    %c0_189 = arith.constant 0 : index
    %252 = vector.load %arg6[%c64_188, %c0_189] : memref<448x32xf32, #tpu.memory_space<vmem>>, vector<64x32xf32>
    tpu.vector_store %arg6[%c64_188, %c0_189], %251 {strides = array<i32>} : memref<448x32xf32, #tpu.memory_space<vmem>>, vector<64x32xf32>,
    %c2_190 = arith.constant 2 : index
    %c2_191 = arith.constant 2 : index
    %c0_192 = arith.constant 0 : index
    %c0_193 = arith.constant 0 : index
    %253 = vector.load %arg3[%c2_190, %c2_191, %c0_192, %c0_193] : memref<4x8x32x32xf32, #tpu.memory_space<vmem>>, vector<1x1x32x32xf32>
    %254 = vector.shape_cast %253 : vector<1x1x32x32xf32> to vector<32x32xf32>
    %cst_194 = arith.constant dense<0.000000e+00> : vector<64x32xf32>
    %255 = tpu.matmul %244, %254, %cst_194 {dimension_numbers = #tpu.dot_dimension_numbers<[1], [0], [0], [1], [0, 0, 1, 1], [], []>} : vector<64x32xf32>, vector<32x32xf32>, vector<64x32xf32> -> vector<64x32xf32>
    %c128_195 = arith.constant 128 : index
    %c0_196 = arith.constant 0 : index
    %256 = vector.load %arg6[%c128_195, %c0_196] : memref<448x32xf32, #tpu.memory_space<vmem>>, vector<64x32xf32>
    tpu.vector_store %arg6[%c128_195, %c0_196], %255 {strides = array<i32>} : memref<448x32xf32, #tpu.memory_space<vmem>>, vector<64x32xf32>,
    %c2_197 = arith.constant 2 : index
    %c3_198 = arith.constant 3 : index
    %c0_199 = arith.constant 0 : index
    %c0_200 = arith.constant 0 : index
    %257 = vector.load %arg3[%c2_197, %c3_198, %c0_199, %c0_200] : memref<4x8x32x32xf32, #tpu.memory_space<vmem>>, vector<1x1x32x32xf32>
    %258 = vector.shape_cast %257 : vector<1x1x32x32xf32> to vector<32x32xf32>
    %cst_201 = arith.constant dense<0.000000e+00> : vector<64x32xf32>
    %259 = tpu.matmul %244, %258, %cst_201 {dimension_numbers = #tpu.dot_dimension_numbers<[1], [0], [0], [1], [0, 0, 1, 1], [], []>} : vector<64x32xf32>, vector<32x32xf32>, vector<64x32xf32> -> vector<64x32xf32>
    %c192_202 = arith.constant 192 : index
    %c0_203 = arith.constant 0 : index
    %260 = vector.load %arg6[%c192_202, %c0_203] : memref<448x32xf32, #tpu.memory_space<vmem>>, vector<64x32xf32>
    tpu.vector_store %arg6[%c192_202, %c0_203], %259 {strides = array<i32>} : memref<448x32xf32, #tpu.memory_space<vmem>>, vector<64x32xf32>,
    %c2_204 = arith.constant 2 : index
    %c4_205 = arith.constant 4 : index
    %c0_206 = arith.constant 0 : index
    %c0_207 = arith.constant 0 : index
    %261 = vector.load %arg3[%c2_204, %c4_205, %c0_206, %c0_207] : memref<4x8x32x32xf32, #tpu.memory_space<vmem>>, vector<1x1x32x32xf32>
    %262 = vector.shape_cast %261 : vector<1x1x32x32xf32> to vector<32x32xf32>
    %cst_208 = arith.constant dense<0.000000e+00> : vector<64x32xf32>
    %263 = tpu.matmul %244, %262, %cst_208 {dimension_numbers = #tpu.dot_dimension_numbers<[1], [0], [0], [1], [0, 0, 1, 1], [], []>} : vector<64x32xf32>, vector<32x32xf32>, vector<64x32xf32> -> vector<64x32xf32>
    %c256_209 = arith.constant 256 : index
    %c0_210 = arith.constant 0 : index
    %264 = vector.load %arg6[%c256_209, %c0_210] : memref<448x32xf32, #tpu.memory_space<vmem>>, vector<64x32xf32>
    tpu.vector_store %arg6[%c256_209, %c0_210], %263 {strides = array<i32>} : memref<448x32xf32, #tpu.memory_space<vmem>>, vector<64x32xf32>,
    %c2_211 = arith.constant 2 : index
    %c5_212 = arith.constant 5 : index
    %c0_213 = arith.constant 0 : index
    %c0_214 = arith.constant 0 : index
    %265 = vector.load %arg3[%c2_211, %c5_212, %c0_213, %c0_214] : memref<4x8x32x32xf32, #tpu.memory_space<vmem>>, vector<1x1x32x32xf32>
    %266 = vector.shape_cast %265 : vector<1x1x32x32xf32> to vector<32x32xf32>
    %cst_215 = arith.constant dense<0.000000e+00> : vector<64x32xf32>
    %267 = tpu.matmul %244, %266, %cst_215 {dimension_numbers = #tpu.dot_dimension_numbers<[1], [0], [0], [1], [0, 0, 1, 1], [], []>} : vector<64x32xf32>, vector<32x32xf32>, vector<64x32xf32> -> vector<64x32xf32>
    %c320_216 = arith.constant 320 : index
    %c0_217 = arith.constant 0 : index
    %268 = vector.load %arg6[%c320_216, %c0_217] : memref<448x32xf32, #tpu.memory_space<vmem>>, vector<64x32xf32>
    tpu.vector_store %arg6[%c320_216, %c0_217], %267 {strides = array<i32>} : memref<448x32xf32, #tpu.memory_space<vmem>>, vector<64x32xf32>,
    %c2_218 = arith.constant 2 : index
    %c6_219 = arith.constant 6 : index
    %c0_220 = arith.constant 0 : index
    %c0_221 = arith.constant 0 : index
    %269 = vector.load %arg3[%c2_218, %c6_219, %c0_220, %c0_221] : memref<4x8x32x32xf32, #tpu.memory_space<vmem>>, vector<1x1x32x32xf32>
    %270 = vector.shape_cast %269 : vector<1x1x32x32xf32> to vector<32x32xf32>
    %cst_222 = arith.constant dense<0.000000e+00> : vector<64x32xf32>
    %271 = tpu.matmul %244, %270, %cst_222 {dimension_numbers = #tpu.dot_dimension_numbers<[1], [0], [0], [1], [0, 0, 1, 1], [], []>} : vector<64x32xf32>, vector<32x32xf32>, vector<64x32xf32> -> vector<64x32xf32>
    %c384_223 = arith.constant 384 : index
    %c0_224 = arith.constant 0 : index
    %272 = vector.load %arg6[%c384_223, %c0_224] : memref<448x32xf32, #tpu.memory_space<vmem>>, vector<64x32xf32>
    tpu.vector_store %arg6[%c384_223, %c0_224], %271 {strides = array<i32>} : memref<448x32xf32, #tpu.memory_space<vmem>>, vector<64x32xf32>,
    %c0_225 = arith.constant 0 : index
    %c0_226 = arith.constant 0 : index
    %273 = vector.load %arg1[%c0_225, %c0_226] : memref<64x448xf32, #tpu.memory_space<vmem>>, vector<64x448xf32>
    %c0_227 = arith.constant 0 : index
    %c0_228 = arith.constant 0 : index
    %274 = vector.load %arg6[%c0_227, %c0_228] : memref<448x32xf32, #tpu.memory_space<vmem>>, vector<448x32xf32>
    %cst_229 = arith.constant dense<0.000000e+00> : vector<64x32xf32>
    %275 = tpu.matmul %273, %274, %cst_229 {dimension_numbers = #tpu.dot_dimension_numbers<[1], [0], [0], [1], [0, 0, 1, 1], [], []>} : vector<64x448xf32>, vector<448x32xf32>, vector<64x32xf32> -> vector<64x32xf32>
    %c14 = arith.constant 14 : index
    %c0_230 = arith.constant 0 : index
    %276 = vector.load %arg4[%c14, %c0_230] : memref<22x32xf32, #tpu.memory_space<vmem>>, vector<1x32xf32>
    %c15 = arith.constant 15 : index
    %c0_231 = arith.constant 0 : index
    %277 = vector.load %arg4[%c15, %c0_231] : memref<22x32xf32, #tpu.memory_space<vmem>>, vector<1x32xf32>
    %cst_232 = arith.constant dense<0.000000e+00> : vector<64xf32>
    %278 = vector.multi_reduction <add>, %275, %cst_232 [1] : vector<64x32xf32> to vector<64xf32>
    %279 = vector.shape_cast %278 : vector<64xf32> to vector<64x1xf32>
    %280 = arith.mulf %275, %275 : vector<64x32xf32>
    %cst_233 = arith.constant dense<0.000000e+00> : vector<64xf32>
    %281 = vector.multi_reduction <add>, %280, %cst_233 [1] : vector<64x32xf32> to vector<64xf32>
    %282 = vector.shape_cast %281 : vector<64xf32> to vector<64x1xf32>
    %cst_234 = arith.constant 3.125000e-02 : f32
    %283 = vector.broadcast %cst_234 : f32 to vector<64x1xf32>
    %284 = arith.mulf %279, %283 : vector<64x1xf32>
    %cst_235 = arith.constant 3.125000e-02 : f32
    %285 = vector.broadcast %cst_235 : f32 to vector<64x1xf32>
    %286 = arith.mulf %282, %285 : vector<64x1xf32>
    %287 = arith.mulf %284, %284 : vector<64x1xf32>
    %288 = arith.subf %286, %287 : vector<64x1xf32>
    %289 = vector.broadcast %284 : vector<64x1xf32> to vector<64x32xf32>
    %290 = arith.subf %275, %289 : vector<64x32xf32>
    %cst_236 = arith.constant 9.99999974E-6 : f32
    %291 = vector.broadcast %cst_236 : f32 to vector<64x1xf32>
    %292 = arith.addf %288, %291 : vector<64x1xf32>
    %293 = math.rsqrt %292 : vector<64x1xf32>
    %294 = vector.broadcast %293 : vector<64x1xf32> to vector<64x32xf32>
    %295 = arith.mulf %290, %294 : vector<64x32xf32>
    %296 = vector.broadcast %276 : vector<1x32xf32> to vector<64x32xf32>
    %297 = arith.mulf %295, %296 : vector<64x32xf32>
    %298 = vector.broadcast %277 : vector<1x32xf32> to vector<64x32xf32>
    %299 = arith.addf %297, %298 : vector<64x32xf32>
    %cst_237 = arith.constant 0.000000e+00 : f32
    %300 = vector.broadcast %cst_237 : f32 to vector<64x32xf32>
    %301 = arith.maximumf %299, %300 : vector<64x32xf32>
    %c2_238 = arith.constant 2 : index
    %c7_239 = arith.constant 7 : index
    %c0_240 = arith.constant 0 : index
    %c0_241 = arith.constant 0 : index
    %302 = vector.load %arg3[%c2_238, %c7_239, %c0_240, %c0_241] : memref<4x8x32x32xf32, #tpu.memory_space<vmem>>, vector<1x1x32x32xf32>
    %303 = vector.shape_cast %302 : vector<1x1x32x32xf32> to vector<32x32xf32>
    %cst_242 = arith.constant dense<0.000000e+00> : vector<64x32xf32>
    %304 = tpu.matmul %301, %303, %cst_242 {dimension_numbers = #tpu.dot_dimension_numbers<[1], [0], [0], [1], [0, 0, 1, 1], [], []>} : vector<64x32xf32>, vector<32x32xf32>, vector<64x32xf32> -> vector<64x32xf32>
    %c16_243 = arith.constant 16 : index
    %c0_244 = arith.constant 0 : index
    %305 = vector.load %arg4[%c16_243, %c0_244] : memref<22x32xf32, #tpu.memory_space<vmem>>, vector<1x32xf32>
    %c17 = arith.constant 17 : index
    %c0_245 = arith.constant 0 : index
    %306 = vector.load %arg4[%c17, %c0_245] : memref<22x32xf32, #tpu.memory_space<vmem>>, vector<1x32xf32>
    %cst_246 = arith.constant dense<0.000000e+00> : vector<64xf32>
    %307 = vector.multi_reduction <add>, %304, %cst_246 [1] : vector<64x32xf32> to vector<64xf32>
    %308 = vector.shape_cast %307 : vector<64xf32> to vector<64x1xf32>
    %309 = arith.mulf %304, %304 : vector<64x32xf32>
    %cst_247 = arith.constant dense<0.000000e+00> : vector<64xf32>
    %310 = vector.multi_reduction <add>, %309, %cst_247 [1] : vector<64x32xf32> to vector<64xf32>
    %311 = vector.shape_cast %310 : vector<64xf32> to vector<64x1xf32>
    %cst_248 = arith.constant 3.125000e-02 : f32
    %312 = vector.broadcast %cst_248 : f32 to vector<64x1xf32>
    %313 = arith.mulf %308, %312 : vector<64x1xf32>
    %cst_249 = arith.constant 3.125000e-02 : f32
    %314 = vector.broadcast %cst_249 : f32 to vector<64x1xf32>
    %315 = arith.mulf %311, %314 : vector<64x1xf32>
    %316 = arith.mulf %313, %313 : vector<64x1xf32>
    %317 = arith.subf %315, %316 : vector<64x1xf32>
    %318 = vector.broadcast %313 : vector<64x1xf32> to vector<64x32xf32>
    %319 = arith.subf %304, %318 : vector<64x32xf32>
    %cst_250 = arith.constant 9.99999974E-6 : f32
    %320 = vector.broadcast %cst_250 : f32 to vector<64x1xf32>
    %321 = arith.addf %317, %320 : vector<64x1xf32>
    %322 = math.rsqrt %321 : vector<64x1xf32>
    %323 = vector.broadcast %322 : vector<64x1xf32> to vector<64x32xf32>
    %324 = arith.mulf %319, %323 : vector<64x32xf32>
    %325 = vector.broadcast %305 : vector<1x32xf32> to vector<64x32xf32>
    %326 = arith.mulf %324, %325 : vector<64x32xf32>
    %327 = vector.broadcast %306 : vector<1x32xf32> to vector<64x32xf32>
    %328 = arith.addf %326, %327 : vector<64x32xf32>
    %329 = arith.addf %328, %244 : vector<64x32xf32>
    %cst_251 = arith.constant 0.000000e+00 : f32
    %330 = vector.broadcast %cst_251 : f32 to vector<64x32xf32>
    %331 = arith.maximumf %329, %330 : vector<64x32xf32>
    %c3_252 = arith.constant 3 : index
    %c0_253 = arith.constant 0 : index
    %c0_254 = arith.constant 0 : index
    %c0_255 = arith.constant 0 : index
    %332 = vector.load %arg3[%c3_252, %c0_253, %c0_254, %c0_255] : memref<4x8x32x32xf32, #tpu.memory_space<vmem>>, vector<1x1x32x32xf32>
    %333 = vector.shape_cast %332 : vector<1x1x32x32xf32> to vector<32x32xf32>
    %cst_256 = arith.constant dense<0.000000e+00> : vector<64x32xf32>
    %334 = tpu.matmul %331, %333, %cst_256 {dimension_numbers = #tpu.dot_dimension_numbers<[1], [0], [0], [1], [0, 0, 1, 1], [], []>} : vector<64x32xf32>, vector<32x32xf32>, vector<64x32xf32> -> vector<64x32xf32>
    %c0_257 = arith.constant 0 : index
    %c0_258 = arith.constant 0 : index
    %335 = vector.load %arg6[%c0_257, %c0_258] : memref<448x32xf32, #tpu.memory_space<vmem>>, vector<64x32xf32>
    tpu.vector_store %arg6[%c0_257, %c0_258], %334 {strides = array<i32>} : memref<448x32xf32, #tpu.memory_space<vmem>>, vector<64x32xf32>,
    %c3_259 = arith.constant 3 : index
    %c1_260 = arith.constant 1 : index
    %c0_261 = arith.constant 0 : index
    %c0_262 = arith.constant 0 : index
    %336 = vector.load %arg3[%c3_259, %c1_260, %c0_261, %c0_262] : memref<4x8x32x32xf32, #tpu.memory_space<vmem>>, vector<1x1x32x32xf32>
    %337 = vector.shape_cast %336 : vector<1x1x32x32xf32> to vector<32x32xf32>
    %cst_263 = arith.constant dense<0.000000e+00> : vector<64x32xf32>
    %338 = tpu.matmul %331, %337, %cst_263 {dimension_numbers = #tpu.dot_dimension_numbers<[1], [0], [0], [1], [0, 0, 1, 1], [], []>} : vector<64x32xf32>, vector<32x32xf32>, vector<64x32xf32> -> vector<64x32xf32>
    %c64_264 = arith.constant 64 : index
    %c0_265 = arith.constant 0 : index
    %339 = vector.load %arg6[%c64_264, %c0_265] : memref<448x32xf32, #tpu.memory_space<vmem>>, vector<64x32xf32>
    tpu.vector_store %arg6[%c64_264, %c0_265], %338 {strides = array<i32>} : memref<448x32xf32, #tpu.memory_space<vmem>>, vector<64x32xf32>,
    %c3_266 = arith.constant 3 : index
    %c2_267 = arith.constant 2 : index
    %c0_268 = arith.constant 0 : index
    %c0_269 = arith.constant 0 : index
    %340 = vector.load %arg3[%c3_266, %c2_267, %c0_268, %c0_269] : memref<4x8x32x32xf32, #tpu.memory_space<vmem>>, vector<1x1x32x32xf32>
    %341 = vector.shape_cast %340 : vector<1x1x32x32xf32> to vector<32x32xf32>
    %cst_270 = arith.constant dense<0.000000e+00> : vector<64x32xf32>
    %342 = tpu.matmul %331, %341, %cst_270 {dimension_numbers = #tpu.dot_dimension_numbers<[1], [0], [0], [1], [0, 0, 1, 1], [], []>} : vector<64x32xf32>, vector<32x32xf32>, vector<64x32xf32> -> vector<64x32xf32>
    %c128_271 = arith.constant 128 : index
    %c0_272 = arith.constant 0 : index
    %343 = vector.load %arg6[%c128_271, %c0_272] : memref<448x32xf32, #tpu.memory_space<vmem>>, vector<64x32xf32>
    tpu.vector_store %arg6[%c128_271, %c0_272], %342 {strides = array<i32>} : memref<448x32xf32, #tpu.memory_space<vmem>>, vector<64x32xf32>,
    %c3_273 = arith.constant 3 : index
    %c3_274 = arith.constant 3 : index
    %c0_275 = arith.constant 0 : index
    %c0_276 = arith.constant 0 : index
    %344 = vector.load %arg3[%c3_273, %c3_274, %c0_275, %c0_276] : memref<4x8x32x32xf32, #tpu.memory_space<vmem>>, vector<1x1x32x32xf32>
    %345 = vector.shape_cast %344 : vector<1x1x32x32xf32> to vector<32x32xf32>
    %cst_277 = arith.constant dense<0.000000e+00> : vector<64x32xf32>
    %346 = tpu.matmul %331, %345, %cst_277 {dimension_numbers = #tpu.dot_dimension_numbers<[1], [0], [0], [1], [0, 0, 1, 1], [], []>} : vector<64x32xf32>, vector<32x32xf32>, vector<64x32xf32> -> vector<64x32xf32>
    %c192_278 = arith.constant 192 : index
    %c0_279 = arith.constant 0 : index
    %347 = vector.load %arg6[%c192_278, %c0_279] : memref<448x32xf32, #tpu.memory_space<vmem>>, vector<64x32xf32>
    tpu.vector_store %arg6[%c192_278, %c0_279], %346 {strides = array<i32>} : memref<448x32xf32, #tpu.memory_space<vmem>>, vector<64x32xf32>,
    %c3_280 = arith.constant 3 : index
    %c4_281 = arith.constant 4 : index
    %c0_282 = arith.constant 0 : index
    %c0_283 = arith.constant 0 : index
    %348 = vector.load %arg3[%c3_280, %c4_281, %c0_282, %c0_283] : memref<4x8x32x32xf32, #tpu.memory_space<vmem>>, vector<1x1x32x32xf32>
    %349 = vector.shape_cast %348 : vector<1x1x32x32xf32> to vector<32x32xf32>
    %cst_284 = arith.constant dense<0.000000e+00> : vector<64x32xf32>
    %350 = tpu.matmul %331, %349, %cst_284 {dimension_numbers = #tpu.dot_dimension_numbers<[1], [0], [0], [1], [0, 0, 1, 1], [], []>} : vector<64x32xf32>, vector<32x32xf32>, vector<64x32xf32> -> vector<64x32xf32>
    %c256_285 = arith.constant 256 : index
    %c0_286 = arith.constant 0 : index
    %351 = vector.load %arg6[%c256_285, %c0_286] : memref<448x32xf32, #tpu.memory_space<vmem>>, vector<64x32xf32>
    tpu.vector_store %arg6[%c256_285, %c0_286], %350 {strides = array<i32>} : memref<448x32xf32, #tpu.memory_space<vmem>>, vector<64x32xf32>,
    %c3_287 = arith.constant 3 : index
    %c5_288 = arith.constant 5 : index
    %c0_289 = arith.constant 0 : index
    %c0_290 = arith.constant 0 : index
    %352 = vector.load %arg3[%c3_287, %c5_288, %c0_289, %c0_290] : memref<4x8x32x32xf32, #tpu.memory_space<vmem>>, vector<1x1x32x32xf32>
    %353 = vector.shape_cast %352 : vector<1x1x32x32xf32> to vector<32x32xf32>
    %cst_291 = arith.constant dense<0.000000e+00> : vector<64x32xf32>
    %354 = tpu.matmul %331, %353, %cst_291 {dimension_numbers = #tpu.dot_dimension_numbers<[1], [0], [0], [1], [0, 0, 1, 1], [], []>} : vector<64x32xf32>, vector<32x32xf32>, vector<64x32xf32> -> vector<64x32xf32>
    %c320_292 = arith.constant 320 : index
    %c0_293 = arith.constant 0 : index
    %355 = vector.load %arg6[%c320_292, %c0_293] : memref<448x32xf32, #tpu.memory_space<vmem>>, vector<64x32xf32>
    tpu.vector_store %arg6[%c320_292, %c0_293], %354 {strides = array<i32>} : memref<448x32xf32, #tpu.memory_space<vmem>>, vector<64x32xf32>,
    %c3_294 = arith.constant 3 : index
    %c6_295 = arith.constant 6 : index
    %c0_296 = arith.constant 0 : index
    %c0_297 = arith.constant 0 : index
    %356 = vector.load %arg3[%c3_294, %c6_295, %c0_296, %c0_297] : memref<4x8x32x32xf32, #tpu.memory_space<vmem>>, vector<1x1x32x32xf32>
    %357 = vector.shape_cast %356 : vector<1x1x32x32xf32> to vector<32x32xf32>
    %cst_298 = arith.constant dense<0.000000e+00> : vector<64x32xf32>
    %358 = tpu.matmul %331, %357, %cst_298 {dimension_numbers = #tpu.dot_dimension_numbers<[1], [0], [0], [1], [0, 0, 1, 1], [], []>} : vector<64x32xf32>, vector<32x32xf32>, vector<64x32xf32> -> vector<64x32xf32>
    %c384_299 = arith.constant 384 : index
    %c0_300 = arith.constant 0 : index
    %359 = vector.load %arg6[%c384_299, %c0_300] : memref<448x32xf32, #tpu.memory_space<vmem>>, vector<64x32xf32>
    tpu.vector_store %arg6[%c384_299, %c0_300], %358 {strides = array<i32>} : memref<448x32xf32, #tpu.memory_space<vmem>>, vector<64x32xf32>,
    %c0_301 = arith.constant 0 : index
    %c0_302 = arith.constant 0 : index
    %360 = vector.load %arg1[%c0_301, %c0_302] : memref<64x448xf32, #tpu.memory_space<vmem>>, vector<64x448xf32>
    %c0_303 = arith.constant 0 : index
    %c0_304 = arith.constant 0 : index
    %361 = vector.load %arg6[%c0_303, %c0_304] : memref<448x32xf32, #tpu.memory_space<vmem>>, vector<448x32xf32>
    %cst_305 = arith.constant dense<0.000000e+00> : vector<64x32xf32>
    %362 = tpu.matmul %360, %361, %cst_305 {dimension_numbers = #tpu.dot_dimension_numbers<[1], [0], [0], [1], [0, 0, 1, 1], [], []>} : vector<64x448xf32>, vector<448x32xf32>, vector<64x32xf32> -> vector<64x32xf32>
    %c18 = arith.constant 18 : index
    %c0_306 = arith.constant 0 : index
    %363 = vector.load %arg4[%c18, %c0_306] : memref<22x32xf32, #tpu.memory_space<vmem>>, vector<1x32xf32>
    %c19 = arith.constant 19 : index
    %c0_307 = arith.constant 0 : index
    %364 = vector.load %arg4[%c19, %c0_307] : memref<22x32xf32, #tpu.memory_space<vmem>>, vector<1x32xf32>
    %cst_308 = arith.constant dense<0.000000e+00> : vector<64xf32>
    %365 = vector.multi_reduction <add>, %362, %cst_308 [1] : vector<64x32xf32> to vector<64xf32>
    %366 = vector.shape_cast %365 : vector<64xf32> to vector<64x1xf32>
    %367 = arith.mulf %362, %362 : vector<64x32xf32>
    %cst_309 = arith.constant dense<0.000000e+00> : vector<64xf32>
    %368 = vector.multi_reduction <add>, %367, %cst_309 [1] : vector<64x32xf32> to vector<64xf32>
    %369 = vector.shape_cast %368 : vector<64xf32> to vector<64x1xf32>
    %cst_310 = arith.constant 3.125000e-02 : f32
    %370 = vector.broadcast %cst_310 : f32 to vector<64x1xf32>
    %371 = arith.mulf %366, %370 : vector<64x1xf32>
    %cst_311 = arith.constant 3.125000e-02 : f32
    %372 = vector.broadcast %cst_311 : f32 to vector<64x1xf32>
    %373 = arith.mulf %369, %372 : vector<64x1xf32>
    %374 = arith.mulf %371, %371 : vector<64x1xf32>
    %375 = arith.subf %373, %374 : vector<64x1xf32>
    %376 = vector.broadcast %371 : vector<64x1xf32> to vector<64x32xf32>
    %377 = arith.subf %362, %376 : vector<64x32xf32>
    %cst_312 = arith.constant 9.99999974E-6 : f32
    %378 = vector.broadcast %cst_312 : f32 to vector<64x1xf32>
    %379 = arith.addf %375, %378 : vector<64x1xf32>
    %380 = math.rsqrt %379 : vector<64x1xf32>
    %381 = vector.broadcast %380 : vector<64x1xf32> to vector<64x32xf32>
    %382 = arith.mulf %377, %381 : vector<64x32xf32>
    %383 = vector.broadcast %363 : vector<1x32xf32> to vector<64x32xf32>
    %384 = arith.mulf %382, %383 : vector<64x32xf32>
    %385 = vector.broadcast %364 : vector<1x32xf32> to vector<64x32xf32>
    %386 = arith.addf %384, %385 : vector<64x32xf32>
    %cst_313 = arith.constant 0.000000e+00 : f32
    %387 = vector.broadcast %cst_313 : f32 to vector<64x32xf32>
    %388 = arith.maximumf %386, %387 : vector<64x32xf32>
    %c3_314 = arith.constant 3 : index
    %c7_315 = arith.constant 7 : index
    %c0_316 = arith.constant 0 : index
    %c0_317 = arith.constant 0 : index
    %389 = vector.load %arg3[%c3_314, %c7_315, %c0_316, %c0_317] : memref<4x8x32x32xf32, #tpu.memory_space<vmem>>, vector<1x1x32x32xf32>
    %390 = vector.shape_cast %389 : vector<1x1x32x32xf32> to vector<32x32xf32>
    %cst_318 = arith.constant dense<0.000000e+00> : vector<64x32xf32>
    %391 = tpu.matmul %388, %390, %cst_318 {dimension_numbers = #tpu.dot_dimension_numbers<[1], [0], [0], [1], [0, 0, 1, 1], [], []>} : vector<64x32xf32>, vector<32x32xf32>, vector<64x32xf32> -> vector<64x32xf32>
    %c20 = arith.constant 20 : index
    %c0_319 = arith.constant 0 : index
    %392 = vector.load %arg4[%c20, %c0_319] : memref<22x32xf32, #tpu.memory_space<vmem>>, vector<1x32xf32>
    %c21 = arith.constant 21 : index
    %c0_320 = arith.constant 0 : index
    %393 = vector.load %arg4[%c21, %c0_320] : memref<22x32xf32, #tpu.memory_space<vmem>>, vector<1x32xf32>
    %cst_321 = arith.constant dense<0.000000e+00> : vector<64xf32>
    %394 = vector.multi_reduction <add>, %391, %cst_321 [1] : vector<64x32xf32> to vector<64xf32>
    %395 = vector.shape_cast %394 : vector<64xf32> to vector<64x1xf32>
    %396 = arith.mulf %391, %391 : vector<64x32xf32>
    %cst_322 = arith.constant dense<0.000000e+00> : vector<64xf32>
    %397 = vector.multi_reduction <add>, %396, %cst_322 [1] : vector<64x32xf32> to vector<64xf32>
    %398 = vector.shape_cast %397 : vector<64xf32> to vector<64x1xf32>
    %cst_323 = arith.constant 3.125000e-02 : f32
    %399 = vector.broadcast %cst_323 : f32 to vector<64x1xf32>
    %400 = arith.mulf %395, %399 : vector<64x1xf32>
    %cst_324 = arith.constant 3.125000e-02 : f32
    %401 = vector.broadcast %cst_324 : f32 to vector<64x1xf32>
    %402 = arith.mulf %398, %401 : vector<64x1xf32>
    %403 = arith.mulf %400, %400 : vector<64x1xf32>
    %404 = arith.subf %402, %403 : vector<64x1xf32>
    %405 = vector.broadcast %400 : vector<64x1xf32> to vector<64x32xf32>
    %406 = arith.subf %391, %405 : vector<64x32xf32>
    %cst_325 = arith.constant 9.99999974E-6 : f32
    %407 = vector.broadcast %cst_325 : f32 to vector<64x1xf32>
    %408 = arith.addf %404, %407 : vector<64x1xf32>
    %409 = math.rsqrt %408 : vector<64x1xf32>
    %410 = vector.broadcast %409 : vector<64x1xf32> to vector<64x32xf32>
    %411 = arith.mulf %406, %410 : vector<64x32xf32>
    %412 = vector.broadcast %392 : vector<1x32xf32> to vector<64x32xf32>
    %413 = arith.mulf %411, %412 : vector<64x32xf32>
    %414 = vector.broadcast %393 : vector<1x32xf32> to vector<64x32xf32>
    %415 = arith.addf %413, %414 : vector<64x32xf32>
    %416 = arith.addf %415, %331 : vector<64x32xf32>
    %cst_326 = arith.constant 0.000000e+00 : f32
    %417 = vector.broadcast %cst_326 : f32 to vector<64x32xf32>
    %418 = arith.maximumf %416, %417 : vector<64x32xf32>
    %c0_327 = arith.constant 0 : index
    %c0_328 = arith.constant 0 : index
    %419 = vector.load %arg5[%c0_327, %c0_328] : memref<64x32xf32, #tpu.memory_space<vmem>>, vector<64x32xf32>
    tpu.vector_store %arg5[%c0_327, %c0_328], %418 {strides = array<i32>} : memref<64x32xf32, #tpu.memory_space<vmem>>, vector<64x32xf32>,
    return
  }
}

</mosaic_0001>

<bundles_post_ra>
// kernel: tpu_custom_call.1
= control target key start
LH: loop header
LB: loop body
LE: loop exit
PB: predicated region body
PF: predicated region fallthrough
CT: control target
= control target key end

     0   :  { %10 = vsyncpa [#allocation4], 0  ;;  %s12164_s0 = inlined_call_operand.vmem [shape: f32[128,8], index: 0, kind: input, shape index: {}]   ;;  %s12165_s1 = inlined_call_operand.hbm [shape: f32[64,448], index: 1, kind: input, shape index: {}]   ;;  %s12166_s2 = inlined_call_operand.vmem [shape: f32[80,32], index: 2, kind: input, shape index: {}]   ;;  %s12167_s3 = inlined_call_operand.hbm [shape: f32[4,8,32,32], index: 3, kind: input, shape index: {}]   ;;  %s12168_s4 = inlined_call_operand.vmem [shape: f32[22,32], index: 4, kind: input, shape index: {}]   ;;  %s12169_s5 = inlined_call_operand.vmem [shape: f32[64,32], index: 5, kind: output, shape index: {}]  }
   0x1   :  { %11 = vsyncpa [#allocation6], 0  ;;  %s9887_s18 = smov [#allocation3]   ;;  %s9839_s22 = scalar_lea.hbm %s12165_s1, 4096 }
   0x2   :  { %s19_s19 = sshll.u32 %s9887_s18, 4  ;;  %p9840_p0 = scmp.ne.s32.totalorder %s12165_s1, %s9839_s22  ;;  %s20_s19 = int_to_ptr.vmem [resolvable:$true] %s19_s19 }
   0x3   :  { %p9843_p1 = scmp.lt.u32.totalorder %s9839_s22, %s12165_s1 }
   0x5   :  { %p9845_p2 = pnand %p9843_p1, %p9840_p0 }
   0x7   :  { %9848 = shalt.err (!%p9845_p2)
}
   0x8   :  { %s9849_s27 = scalar_lea.vmem %s20_s19, 4096  ;;  %p9854_p4 = scmp.lt.s32.totalorder %s20_s19, %s20_s19 }
   0x9   :  { %p9850_p3 = scmp.ne.s32.totalorder %s20_s19, %s9849_s27  ;;  %p9855_p5 = scmp.lt.s32.totalorder %s9849_s27, %s9849_s27 }
   0xb   :  { %p9856_p6 = por %p9855_p5, %p9854_p4 }
   0xd   :  { %p9857_p7 = pnand %p9856_p6, %p9850_p3 }
   0xf   :  { %9860 = shalt.err (!%p9857_p7)
}
  0x10   :  { %s9888_s28 = smov 512   ;;  %s9889_s29 = smov 32  }
  0x11   :  { %25 = dma.hbm_to_vmem [thread:$0]  %s12165_s1, 4096, %s20_s19, [#allocation4], %s9888_s28, %s9888_s28, %s9889_s29  }
  0x12   :  { %s9890_s7 = smov [#allocation5]   ;;  %s9861_s11 = scalar_lea.hbm %s12167_s3, 16384 }
  0x13   :  { %s33_s8 = sshll.u32 %s9890_s7, 4  ;;  %p9862_p8 = scmp.ne.s32.totalorder %s12167_s3, %s9861_s11  ;;  %s34_s8 = int_to_ptr.vmem [resolvable:$true] %s33_s8 }
  0x14   :  { %p9865_p9 = scmp.lt.u32.totalorder %s9861_s11, %s12167_s3 }
  0x16   :  { %p9867_p10 = pnand %p9865_p9, %p9862_p8 }
  0x18   :  { %9870 = shalt.err (!%p9867_p10)
}
  0x19   :  { %s9871_s16 = scalar_lea.vmem %s34_s8, 16384  ;;  %p9876_p12 = scmp.lt.s32.totalorder %s34_s8, %s34_s8 }
  0x1a   :  { %p9872_p11 = scmp.ne.s32.totalorder %s34_s8, %s9871_s16  ;;  %p9877_p13 = scmp.lt.s32.totalorder %s9871_s16, %s9871_s16 }
  0x1c   :  { %p9878_p0 = por %p9877_p13, %p9876_p12 }
  0x1e   :  { %p9879_p1 = pnand %p9878_p0, %p9872_p11 }
  0x20   :  { %9882 = shalt.err (!%p9879_p1)
}
  0x21   :  { %s9891_s1 = smov 128   ;;  %s9892_s17 = smov 8  }
  0x22   :  { %39 = dma.hbm_to_vmem [thread:$0]  %s12167_s3, 16384, %s34_s8, [#allocation6], %s9891_s1, %s9891_s1, %s9892_s17  }
  0x23   :  { %9883 = dma.done.wait [#allocation4], 4096  }
  0x24   :  { %9884 = vsyncadd [#allocation4], 4294963200 }
  0x25   :  { %9885 = dma.done.wait [#allocation6], 16384  }
  0x26   :  { %9886 = vsyncadd [#allocation6], 4294950912  ;;  %vm66_vm0 = vcmask 64512   ;;  %v56_v0 = vld [vmem:[%s12166_s2] sm:$0xff]  ;;  %v49_v2 = vld [vmem:[%s12164_s0 + $0x8] sm:$0xff]  ;;  %vm204_vm1 = vcmask 261120  }
  0x27   :  { %v48_v1 = vld [vmem:[%s12164_s0] sm:$0xff]  ;;  %8420 = vmatprep.subr.mxu0 %v56_v0  ;;  %v488_v3 = vld [vmem:[%s12166_s2 + $0x8] sm:$0xff]  ;;  %v50_v4 = vld [vmem:[%s12164_s0 + $0x10] sm:$0xff]  ;;  %vm1863_vm2 = vcmask 523264  }
  0x28   :  { %8422 = vmatprep.mubr.msk.f32.mxu0 %vm66_vm0, %v48_v1  ;;  %8421 = vmatpush3.msra.mxu0 %v56_v0  ;;  %v51_v5 = vld [vmem:[%s12164_s0 + $0x18] sm:$0xff]  ;;  %v52_v6 = vld [vmem:[%s12164_s0 + $0x20] sm:$0xff]  ;;  %v57_v7 = vld [vmem:[%s12166_s2 + $0x10] sm:$0xff] }
  0x29   :  { %8423 = vmatmul.mubr.msk.f32.vlgmr.msra.gmra.mrb[0].mxu0 %vm66_vm0, %v49_v2  ;;  %8454 = vmatprep.subr.mxu0 %v488_v3  ;;  %v58_v8 = vld [vmem:[%s12166_s2 + $0x18] sm:$0xff]  ;;  %v53_v10 = vld [vmem:[%s12164_s0 + $0x28] sm:$0xff]  ;;  %v54_v11 = vld [vmem:[%s12164_s0 + $0x30] sm:$0xff] }
  0x2a   :  { %8455 = vmatpush3.msra.mxu0 %v488_v3  ;;  %8425 = vmatprep.mubr.msk.f32.mxu0 %vm66_vm0, %v50_v4  ;;  %v9128_v9 = vpack.c.bf16 %v58_v8, %v57_v7  ;;  %v55_v12 = vld [vmem:[%s12164_s0 + $0x38] sm:$0xff]  ;;  %v480_v13 = vld [vmem:[%s12164_s0 + $0x40] sm:$0xff]  ;;  %v481_v14 = vld [vmem:[%s12164_s0 + $0x48] sm:$0xff] }
  0x2b   :  { %v482_v15 = vld [vmem:[%s12164_s0 + $0x50] sm:$0xff]  ;;  %v483_v16 = vld [vmem:[%s12164_s0 + $0x58] sm:$0xff]  ;;  %v484_v17 = vld [vmem:[%s12164_s0 + $0x60] sm:$0xff] }
  0x2c   :  { %9129 = vmatprep.subr.bf16.mxu1 %v9128_v9  ;;  %v485_v18 = vld [vmem:[%s12164_s0 + $0x68] sm:$0xff]  ;;  %v486_v19 = vld [vmem:[%s12164_s0 + $0x70] sm:$0xff]  ;;  %v487_v20 = vld [vmem:[%s12164_s0 + $0x78] sm:$0xff] }
  0x2d   :  { %8426 = vmatmul.mubr.msk.f32.gmra.mrb[2].mxu0 %vm66_vm0, %v51_v5  ;;  %9131 = vmatpush3.bf16.msra.mxu1 %v9128_v9  ;;  %v59_v21 = vld [vmem:[%s12166_s2 + $0x20] sm:$0xff]  ;;  %v60_v22 = vld [vmem:[%s12166_s2 + $0x28] sm:$0xff]  ;;  %v489_v24 = vld [vmem:[%s12166_s2 + $0x30] sm:$0xff] }
  0x2e   :  { %8428 = vmatprep.mubr.msk.f32.mxu0 %vm66_vm0, %v52_v6  ;;  %v9132_v23 = vpack.c.bf16 %v60_v22, %v59_v21  ;;  %v490_v25 = vld [vmem:[%s12166_s2 + $0x38] sm:$0xff]  ;;  %v7428_v27 = vld [vmem:[%s12168_s4] ss:$0 sm:$0xff]  ;;  %v492_v33 = vld [vmem:[%s12166_s2 + $0x48] sm:$0xff] }
  0x2f   :  { %v9136_v26 = vpack.c.bf16 %v490_v25, %v489_v24  ;;  %v491_v32 = vld [vmem:[%s12166_s2 + $0x40] sm:$0xff] }
  0x30   :  { %9133 = vmatprep.subr.bf16.mxu1 %v9132_v23  ;;  %v9140_v39 = vpack.c.bf16 %v492_v33, %v491_v32  ;;  %v7447_v53 = vld [vmem:[%s12168_s4 + $0x1] ss:$0 sm:$0xff] }
  0x31   :  { %8429 = vmatmul.mubr.msk.f32.gmra.mrb[4].mxu0 %vm66_vm0, %v53_v10  ;;  %9135 = vmatpush3.bf16.msra.mxu1 %v9132_v23 }
  0x32   :  { %8431 = vmatprep.mubr.msk.f32.mxu0 %vm66_vm0, %v54_v11  ;;  %9137 = vmatprep.subr.bf16.mxu1 %v9136_v26 }
  0x35   :  { %8432 = vmatmul.mubr.msk.f32.gmra.mrb[6].mxu0 %vm66_vm0, %v55_v12 }
  0x36   :  { %8456 = vmatprep.mubr.msk.f32.mxu0 %vm66_vm0, %v480_v13 }
  0x39   :  { %8457 = vmatmul.mubr.msk.f32.vlgmr.msra.gmra.mrb[8].mxu0 %vm66_vm0, %v481_v14 }
  0x3a   :  { %8459 = vmatprep.mubr.msk.f32.mxu0 %vm66_vm0, %v482_v15 }
  0x3d   :  { %8460 = vmatmul.mubr.msk.f32.gmra.mrb[10].mxu0 %vm66_vm0, %v483_v16 }
  0x3e   :  { %8462 = vmatprep.mubr.msk.f32.mxu0 %vm66_vm0, %v484_v17 }
  0x41   :  { %8463 = vmatmul.mubr.msk.f32.gmra.mrb[12].mxu0 %vm66_vm0, %v485_v18 }
  0x42   :  { %8465 = vmatprep.mubr.msk.f32.mxu0 %vm66_vm0, %v486_v19 }
  0x45   :  { %8466 = vmatmul.mubr.msk.f32.gmra.mrb[14].mxu0 %vm66_vm0, %v487_v20 }
  0xfc   :  { %v8424_v28 = vpop.f32.mrb[0].mxu0 }
  0xfd   :  { %v163_v29 = vadd.f32 %v8424_v28, %v7428_v27  ;;  %v157_v30 = vpop.f32.mrb[1].mxu0 }
  0xfe   :  { %v158_v31 = vadd.f32 %v7428_v27, %v157_v30 }
  0xff   :  { %v197_v36 = vmax.f32 %v163_v29, 0.0 }
 0x100   :  { %v196_v34 = vmax.f32 %v158_v31, 0.0  ;;  %v8427_v35 = vpop.f32.mrb[2].mxu0 }
 0x101   :  { %v173_v37 = vadd.f32 %v8427_v35, %v7428_v27  ;;  %v167_v38 = vpop.f32.mrb[3].mxu0 }
 0x102   :  { %v168_v40 = vadd.f32 %v7428_v27, %v167_v38  ;;  %8442 = vmatprep.mubr.msk.f32.mxu1 %vm204_vm1, %v196_v34 }
 0x103   :  { %8443 = vmatmul.mubr.msk.f32.vlgmr.msra.gmra.mrb[0].mxu1 %vm204_vm1, %v197_v36  ;;  %v199_v43 = vmax.f32 %v173_v37, 0.0 }
 0x104   :  { %v198_v41 = vmax.f32 %v168_v40, 0.0  ;;  %v8430_v42 = vpop.f32.mrb[4].mxu0  ;;  %9139 = vmatpush3.bf16.msra.mxu1 %v9136_v26 }
 0x105   :  { %v183_v44 = vadd.f32 %v8430_v42, %v7428_v27  ;;  %v177_v45 = vpop.f32.mrb[5].mxu0  ;;  %9141 = vmatprep.subr.bf16.mxu1 %v9140_v39 }
 0x106   :  { %v178_v46 = vadd.f32 %v7428_v27, %v177_v45  ;;  %8445 = vmatprep.mubr.msk.f32.mxu1 %vm204_vm1, %v198_v41 }
 0x107   :  { %8446 = vmatmul.mubr.msk.f32.gmra.mrb[2].mxu1 %vm204_vm1, %v199_v43  ;;  %v201_v49 = vmax.f32 %v183_v44, 0.0 }
 0x108   :  { %v200_v47 = vmax.f32 %v178_v46, 0.0  ;;  %v8433_v48 = vpop.f32.mrb[6].mxu0  ;;  %9143 = vmatpush3.bf16.msra.mxu1 %v9140_v39 }
 0x109   :  { %v193_v50 = vadd.f32 %v8433_v48, %v7428_v27  ;;  %v187_v51 = vpop.f32.mrb[7].mxu0 }
 0x10a   :  { %v188_v52 = vadd.f32 %v7428_v27, %v187_v51  ;;  %8448 = vmatprep.mubr.msk.f32.mxu1 %vm204_vm1, %v200_v47 }
 0x10b   :  { %8449 = vmatmul.mubr.msk.f32.gmra.mrb[4].mxu1 %vm204_vm1, %v201_v49  ;;  %v203_v56 = vmax.f32 %v193_v50, 0.0 }
 0x10c   :  { %v202_v54 = vmax.f32 %v188_v52, 0.0  ;;  %v8458_v55 = vpop.f32.mrb[8].mxu0 }
 0x10d   :  { %v594_v57 = vadd.f32 %v8458_v55, %v7447_v53  ;;  %v588_v58 = vpop.f32.mrb[9].mxu0 }
 0x10e   :  { %v589_v59 = vadd.f32 %v7447_v53, %v588_v58  ;;  %8451 = vmatprep.mubr.msk.f32.mxu1 %vm204_vm1, %v202_v54 }
 0x10f   :  { %8452 = vmatmul.mubr.msk.f32.gmra.mrb[6].mxu1 %vm204_vm1, %v203_v56  ;;  %v628_v62 = vmax.f32 %v594_v57, 0.0 }
 0x110   :  { %v627_v60 = vmax.f32 %v589_v59, 0.0  ;;  %v8461_v61 = vpop.f32.mrb[10].mxu0 }
 0x111   :  { %v604_v63 = vadd.f32 %v8461_v61, %v7447_v53  ;;  %v598_v0 = vpop.f32.mrb[11].mxu0 }
 0x112   :  { %8476 = vmatprep.mubr.msk.f32.mxu1 %vm204_vm1, %v627_v60  ;;  %v599_v1 = vadd.f32 %v7447_v53, %v598_v0 }
 0x113   :  { %8477 = vmatmul.mubr.msk.f32.vlgmr.msra.gmra.mrb[8].mxu1 %vm204_vm1, %v628_v62  ;;  %v630_v2 = vmax.f32 %v604_v63, 0.0 }
 0x114   :  { %v629_v3 = vmax.f32 %v599_v1, 0.0  ;;  %v8464_v4 = vpop.f32.mrb[12].mxu0 }
 0x115   :  { %v614_v5 = vadd.f32 %v8464_v4, %v7447_v53  ;;  %v608_v6 = vpop.f32.mrb[13].mxu0 }
 0x116   :  { %8479 = vmatprep.mubr.msk.f32.mxu1 %vm204_vm1, %v629_v3  ;;  %v609_v7 = vadd.f32 %v7447_v53, %v608_v6 }
 0x117   :  { %8480 = vmatmul.mubr.msk.f32.gmra.mrb[10].mxu1 %vm204_vm1, %v630_v2  ;;  %v632_v8 = vmax.f32 %v614_v5, 0.0 }
 0x118   :  { %v631_v9 = vmax.f32 %v609_v7, 0.0  ;;  %v8467_v10 = vpop.f32.mrb[14].mxu0 }
 0x119   :  { %v624_v11 = vadd.f32 %v8467_v10, %v7447_v53  ;;  %v618_v12 = vpop.f32.mrb[15].mxu0 }
 0x11a   :  { %8482 = vmatprep.mubr.msk.f32.mxu1 %vm204_vm1, %v631_v9  ;;  %v619_v13 = vadd.f32 %v7447_v53, %v618_v12 }
 0x11b   :  { %8483 = vmatmul.mubr.msk.f32.gmra.mrb[12].mxu1 %vm204_vm1, %v632_v8  ;;  %v634_v14 = vmax.f32 %v624_v11, 0.0 }
 0x11c   :  { %v633_v15 = vmax.f32 %v619_v13, 0.0 }
 0x11e   :  { %8485 = vmatprep.mubr.msk.f32.mxu1 %vm204_vm1, %v633_v15 }
 0x11f   :  { %8486 = vmatmul.mubr.msk.f32.gmra.mrb[14].mxu1 %vm204_vm1, %v634_v14 }
 0x1d6   :  { %v10064_v16 = vpop.f32.mrb[0].mxu1 }
 0x1d7   :  { %v10066_v17 = vpop.f32.mrb[1].mxu1  ;;  %v339_v18 = vsel %vm204_vm1, %v10064_v16, 0.0  ;;  %v361_v20 = vmul.f32 %v10064_v16, %v10064_v16 }
 0x1d8   :  { %340 = vadd.xlane.f32.xlu1 %v339_v18  ;;  %v336_v19 = vsel %vm204_vm1, %v10066_v17, 0.0  ;;  %v360_v24 = vmul.f32 %v10066_v17, %v10066_v17  ;;  %v926_v18 = vld [vmem:[#allocation5] sm:$0xff] }
 0x1d9   :  { %337 = vadd.xlane.f32.xlu0 %v336_v19  ;;  %v371_v23 = vsel %vm204_vm1, %v361_v20, 0.0  ;;  %v927_v19 = vld [vmem:[#allocation5 + $0x8] sm:$0xff]  ;;  %v1068_v20 = vld [vmem:[#allocation5 + $0x20] sm:$0xff] }
 0x1da   :  { %v10074_v21 = vpop.f32.mrb[2].mxu1  ;;  %v368_v27 = vsel %vm204_vm1, %v360_v24, 0.0  ;;  %v1069_v24 = vld [vmem:[#allocation5 + $0x28] sm:$0xff] }
 0x1db   :  { %v10076_v22 = vpop.f32.mrb[3].mxu1  ;;  %v345_v30 = vsel %vm204_vm1, %v10074_v21, 0.0  ;;  %v363_v36 = vmul.f32 %v10074_v21, %v10074_v21 }
 0x1dc   :  { %v342_v35 = vsel %vm204_vm1, %v10076_v22, 0.0  ;;  %v362_v42 = vmul.f32 %v10076_v22, %v10076_v22 }
 0x1dd   :  { %372 = vadd.xlane.f32.xlu0 %v371_v23  ;;  %v377_v41 = vsel %vm204_vm1, %v363_v36, 0.0  ;;  %v9144_v23 = vpack.c.bf16 %v927_v19, %v926_v18  ;;  %v1071_v36 = vld [vmem:[#allocation5 + $0x38] sm:$0xff] }
 0x1de   :  { %v10081_v25 = vpop.f32.mrb[4].mxu1  ;;  %v374_v46 = vsel %vm204_vm1, %v362_v42, 0.0  ;;  %v1304_v42 = vld [vmem:[#allocation5 + $0x60] sm:$0xff] }
 0x1df   :  { %v10083_v26 = vpop.f32.mrb[5].mxu1  ;;  %v351_v50 = vsel %vm204_vm1, %v10081_v25, 0.0  ;;  %v365_v54 = vmul.f32 %v10081_v25, %v10081_v25  ;;  %9145 = vmatprep.subr.bf16.mxu0 %v9144_v23 }
 0x1e0   :  { %v348_v53 = vsel %vm204_vm1, %v10083_v26, 0.0  ;;  %v364_v58 = vmul.f32 %v10083_v26, %v10083_v26  ;;  %9147 = vmatpush3.bf16.msra.mxu0 %v9144_v23 }
 0x1e1   :  { %369 = vadd.xlane.f32.xlu0 %v368_v27  ;;  %v383_v57 = vsel %vm204_vm1, %v365_v54, 0.0  ;;  %v9152_v27 = vpack.c.bf16 %v1069_v24, %v1068_v20 }
 0x1e2   :  { %v10086_v28 = vpop.f32.mrb[6].mxu1  ;;  %v380_v60 = vsel %vm204_vm1, %v364_v58, 0.0 }
 0x1e3   :  { %v10088_v29 = vpop.f32.mrb[7].mxu1  ;;  %v357_v4 = vsel %vm204_vm1, %v10086_v28, 0.0  ;;  %v367_v8 = vmul.f32 %v10086_v28, %v10086_v28  ;;  %9153 = vmatprep.subr.bf16.mxu1 %v9152_v27 }
 0x1e4   :  { %v354_v1 = vsel %vm204_vm1, %v10088_v29, 0.0  ;;  %v366_v5 = vmul.f32 %v10088_v29, %v10088_v29  ;;  %9155 = vmatpush3.bf16.msra.mxu1 %v9152_v27 }
 0x1e5   :  { %346 = vadd.xlane.f32.xlu0 %v345_v30  ;;  %v389_v10 = vsel %vm204_vm1, %v367_v8, 0.0  ;;  %v928_v30 = vld [vmem:[#allocation5 + $0x10] sm:$0xff] }
 0x1e6   :  { %v10092_v31 = vpop.f32.mrb[8].mxu1  ;;  %v386_v7 = vsel %vm204_vm1, %v366_v5, 0.0 }
 0x1e7   :  { %v10094_v32 = vpop.f32.mrb[9].mxu1  ;;  %v769_v33 = vsel %vm204_vm1, %v10092_v31, 0.0  ;;  %v791_v34 = vmul.f32 %v10092_v31, %v10092_v31 }
 0x1e8   :  { %770 = vadd.xlane.f32.xlu1 %v769_v33  ;;  %v790_v39 = vmul.f32 %v10094_v32, %v10094_v32  ;;  %v766_v62 = vsel %vm204_vm1, %v10094_v32, 0.0  ;;  %v929_v33 = vld [vmem:[#allocation5 + $0x18] sm:$0xff] }
 0x1e9   :  { %343 = vadd.xlane.f32.xlu0 %v342_v35  ;;  %v801_v38 = vsel %vm204_vm1, %v791_v34, 0.0  ;;  %v1070_v34 = vld [vmem:[#allocation5 + $0x30] sm:$0xff]  ;;  %v9148_v35 = vpack.c.bf16 %v929_v33, %v928_v30 }
 0x1ea   :  { %v10104_v37 = vpop.f32.mrb[10].mxu1  ;;  %v798_v44 = vsel %vm204_vm1, %v790_v39, 0.0  ;;  %v1186_v39 = vld [vmem:[#allocation5 + $0x40] sm:$0xff] }
 0x1eb   :  { %v10109_v40 = vpop.f32.mrb[11].mxu1  ;;  %v775_v48 = vsel %vm204_vm1, %v10104_v37, 0.0  ;;  %v793_v52 = vmul.f32 %v10104_v37, %v10104_v37  ;;  %9149 = vmatprep.subr.bf16.mxu0 %v9148_v35 }
 0x1ec   :  { %802 = vadd.xlane.f32.xlu1 %v801_v38  ;;  %v772_v51 = vsel %vm204_vm1, %v10109_v40, 0.0  ;;  %v792_v56 = vmul.f32 %v10109_v40, %v10109_v40  ;;  %v9156_v38 = vpack.c.bf16 %v1071_v36, %v1070_v34  ;;  %9151 = vmatpush3.bf16.msra.mxu0 %v9148_v35  ;;  %v10200_v36 = vld [vmem:[%s12168_s4 + $0x2] ss:$0 sm:$0xff] }
 0x1ed   :  { %378 = vadd.xlane.f32.xlu0 %v377_v41  ;;  %v807_v55 = vsel %vm204_vm1, %v793_v52, 0.0  ;;  %v1187_v41 = vld [vmem:[#allocation5 + $0x48] sm:$0xff] }
 0x1ee   :  { %v10114_v43 = vpop.f32.mrb[12].mxu1  ;;  %v804_v59 = vsel %vm204_vm1, %v792_v56, 0.0  ;;  %9157 = vmatprep.subr.bf16.mxu1 %v9156_v38 }
 0x1ef   :  { %v10117_v45 = vpop.f32.mrb[13].mxu1  ;;  %v781_v61 = vsel %vm204_vm1, %v10114_v43, 0.0  ;;  %v795_v0 = vmul.f32 %v10114_v43, %v10114_v43  ;;  %9159 = vmatpush3.bf16.msra.mxu1 %v9156_v38 }
 0x1f0   :  { %799 = vadd.xlane.f32.xlu1 %v798_v44  ;;  %v778_v63 = vsel %vm204_vm1, %v10117_v45, 0.0  ;;  %v794_v3 = vmul.f32 %v10117_v45, %v10117_v45  ;;  %v10176_v44 = vpack.c.bf16 %v1187_v41, %v1186_v39 }
 0x1f1   :  { %375 = vadd.xlane.f32.xlu0 %v374_v46  ;;  %v813_v2 = vsel %vm204_vm1, %v795_v0, 0.0  ;;  %v1305_v46 = vld [vmem:[#allocation5 + $0x68] sm:$0xff] }
 0x1f2   :  { %v10120_v47 = vpop.f32.mrb[14].mxu1  ;;  %v810_v6 = vsel %vm204_vm1, %v794_v3, 0.0  ;;  %9161 = vmatprep.subr.bf16.mxu0 %v10176_v44 }
 0x1f3   :  { %v10124_v49 = vpop.f32.mrb[15].mxu1  ;;  %v787_v9 = vsel %vm204_vm1, %v10120_v47, 0.0  ;;  %v797_v14 = vmul.f32 %v10120_v47, %v10120_v47 }
 0x1f4   :  { %776 = vadd.xlane.f32.xlu1 %v775_v48  ;;  %v784_v11 = vsel %vm204_vm1, %v10124_v49, 0.0  ;;  %v796_v12 = vmul.f32 %v10124_v49, %v10124_v49  ;;  %v10178_v48 = vpack.c.bf16 %v1305_v46, %v1304_v42  ;;  %v10208_v46 = vld [vmem:[%s12168_s4 + $0x4] ss:$0 sm:$0xff] }
 0x1f5   :  { %352 = vadd.xlane.f32.xlu0 %v351_v50  ;;  %v819_v15 = vsel %vm204_vm1, %v797_v14, 0.0 }
 0x1f6   :  { %v816_v13 = vsel %vm204_vm1, %v796_v12, 0.0  ;;  %9169 = vmatprep.subr.bf16.mxu1 %v10178_v48 }
 0x1f8   :  { %773 = vadd.xlane.f32.xlu1 %v772_v51 }
 0x1f9   :  { %349 = vadd.xlane.f32.xlu0 %v348_v53 }
 0x1fc   :  { %808 = vadd.xlane.f32.xlu1 %v807_v55 }
 0x1fd   :  { %384 = vadd.xlane.f32.xlu0 %v383_v57 }
 0x200   :  { %805 = vadd.xlane.f32.xlu1 %v804_v59 }
 0x201   :  { %381 = vadd.xlane.f32.xlu0 %v380_v60 }
 0x204   :  { %782 = vadd.xlane.f32.xlu1 %v781_v61 }
 0x205   :  { %767 = vadd.xlane.f32.xlu0 %v766_v62 }
 0x208   :  { %779 = vadd.xlane.f32.xlu1 %v778_v63 }
 0x209   :  { %355 = vadd.xlane.f32.xlu0 %v354_v1 }
 0x20c   :  { %814 = vadd.xlane.f32.xlu1 %v813_v2 }
 0x20d   :  { %358 = vadd.xlane.f32.xlu0 %v357_v4 }
 0x210   :  { %811 = vadd.xlane.f32.xlu1 %v810_v6 }
 0x211   :  { %387 = vadd.xlane.f32.xlu0 %v386_v7 }
 0x214   :  { %788 = vadd.xlane.f32.xlu1 %v787_v9 }
 0x215   :  { %390 = vadd.xlane.f32.xlu0 %v389_v10 }
 0x218   :  { %785 = vadd.xlane.f32.xlu1 %v784_v11 }
 0x21c   :  { %817 = vadd.xlane.f32.xlu1 %v816_v13 }
 0x220   :  { %820 = vadd.xlane.f32.xlu1 %v819_v15 }
 0x265   :  { %v341_v51 = vpop.xlane.xlu1 %340 }
 0x266   :  { %v338_v50 = vpop.xlane.xlu0 %337  ;;  %v393_v53 = vmul.f32 0.03125, %v341_v51 }
 0x267   :  { %v10193_v24 = vmul.f32 0.03125, %v338_v50 }
 0x268   :  { %v409_v56 = vmul.f32 %v393_v53, %v393_v53  ;;  %v425_v23 = vsub.f32 %v10064_v16, %v393_v53 }
 0x269   :  { %v408_v39 = vmul.f32 %v10193_v24, %v10193_v24 }
 0x26a   :  { %v373_v52 = vpop.xlane.xlu0 %372 }
 0x26b   :  { %v401_v54 = vmul.f32 0.03125, %v373_v52 }
 0x26d   :  { %v417_v57 = vsub.f32 %v401_v54, %v409_v56 }
 0x26e   :  { %v370_v55 = vpop.xlane.xlu0 %369 }
 0x26f   :  { %v433_v60 = vadd.f32 1e-05, %v417_v57  ;;  %v400_v35 = vmul.f32 0.03125, %v370_v55 }
 0x271   :  { %9679 = vrsqrt.f32 %v433_v60  ;;  %v416_v55 = vsub.f32 %v400_v35, %v408_v39 }
 0x272   :  { %v347_v58 = vpop.xlane.xlu0 %346 }
 0x273   :  { %v10182_v0 = vmul.f32 0.03125, %v347_v58  ;;  %v10225_v58 = vld [vmem:[%s12168_s4 + $0x5] ss:$0 sm:$0xff] }
 0x275   :  { %v771_v59 = vpop.xlane.xlu1 %770  ;;  %v411_v7 = vmul.f32 %v10182_v0, %v10182_v0 }
 0x276   :  { %v823_v61 = vmul.f32 0.03125, %v771_v59  ;;  %v344_v62 = vpop.xlane.xlu0 %343 }
 0x277   :  { %v10188_v8 = vmul.f32 0.03125, %v344_v62 }
 0x278   :  { %v839_v1 = vmul.f32 %v823_v61, %v823_v61  ;;  %v855_v16 = vsub.f32 %v10092_v31, %v823_v61  ;;  %v10220_v31 = vld [vmem:[%s12168_s4 + $0x3] ss:$0 sm:$0xff] }
 0x279   :  { %v803_v63 = vpop.xlane.xlu1 %802  ;;  %v410_v14 = vmul.f32 %v10188_v8, %v10188_v8 }
 0x27a   :  { %v831_v2 = vmul.f32 0.03125, %v803_v63  ;;  %v379_v3 = vpop.xlane.xlu0 %378 }
 0x27b   :  { %v403_v5 = vmul.f32 0.03125, %v379_v3  ;;  %v9680_v18 = vpop.eup %9679 }
 0x27c   :  { %v847_v4 = vsub.f32 %v831_v2, %v839_v1  ;;  %v449_v34 = vmul.f32 %v9680_v18, %v425_v23  ;;  %v427_v23 = vsub.f32 %v10074_v21, %v10182_v0  ;;  %v426_v21 = vsub.f32 %v10076_v22, %v10188_v8 }
 0x27d   :  { %v10184_v6 = vpop.xlane.xlu1 %799  ;;  %v419_v11 = vsub.f32 %v403_v5, %v411_v7  ;;  %v432_v5 = vadd.f32 1e-05, %v416_v55 }
 0x27e   :  { %v863_v9 = vadd.f32 1e-05, %v847_v4  ;;  %v376_v10 = vpop.xlane.xlu0 %375  ;;  %v461_v54 = vmul.f32 %v10200_v36, %v449_v34  ;;  %v830_v35 = vmul.f32 0.03125, %v10184_v6 }
 0x27f   :  { %v402_v12 = vmul.f32 0.03125, %v376_v10  ;;  %v435_v19 = vadd.f32 1e-05, %v419_v11 }
 0x280   :  { %9681 = vrsqrt.f32 %v863_v9  ;;  %v473_v4 = vadd.f32 %v10220_v31, %v461_v54 }
 0x281   :  { %v777_v13 = vpop.xlane.xlu1 %776  ;;  %v418_v20 = vsub.f32 %v402_v12, %v410_v14  ;;  %9683 = vrsqrt.f32 %v435_v19 }
 0x282   :  { %v353_v15 = vpop.xlane.xlu0 %352  ;;  %v10195_v30 = vmul.f32 0.03125, %v777_v13 }
 0x283   :  { %v434_v38 = vadd.f32 1e-05, %v418_v20  ;;  %v10215_v57 = vmul.f32 0.03125, %v353_v15 }
 0x284   :  { %v841_v50 = vmul.f32 %v10195_v30, %v10195_v30 }
 0x285   :  { %v774_v27 = vpop.xlane.xlu1 %773  ;;  %9685 = vrsqrt.f32 %v434_v38  ;;  %v413_v9 = vmul.f32 %v10215_v57, %v10215_v57 }
 0x286   :  { %v350_v33 = vpop.xlane.xlu0 %349  ;;  %v10212_v51 = vmul.f32 0.03125, %v774_v27 }
 0x287   :  { %v10234_v10 = vmul.f32 0.03125, %v350_v33 }
 0x288   :  { %v840_v63 = vmul.f32 %v10212_v51, %v10212_v51 }
 0x289   :  { %v809_v41 = vpop.xlane.xlu1 %808  ;;  %v412_v33 = vmul.f32 %v10234_v10, %v10234_v10 }
 0x28a   :  { %v9682_v42 = vpop.eup %9681  ;;  %v833_v52 = vmul.f32 0.03125, %v809_v41  ;;  %v385_v53 = vpop.xlane.xlu0 %384 }
 0x28b   :  { %v879_v56 = vmul.f32 %v9682_v42, %v855_v16  ;;  %v405_v61 = vmul.f32 0.03125, %v385_v53  ;;  %v9684_v15 = vpop.eup %9683  ;;  %v857_v53 = vsub.f32 %v10104_v37, %v10195_v30  ;;  %v424_v37 = vsub.f32 %v10066_v17, %v10193_v24 }
 0x28c   :  { %v849_v59 = vsub.f32 %v833_v52, %v841_v50  ;;  %v451_v34 = vmul.f32 %v9684_v15, %v427_v23 }
 0x28d   :  { %v891_v60 = vmul.f32 %v10208_v46, %v879_v56  ;;  %v806_v62 = vpop.xlane.xlu1 %805  ;;  %v421_v13 = vsub.f32 %v405_v61, %v413_v9 }
 0x28e   :  { %v865_v1 = vadd.f32 1e-05, %v849_v59  ;;  %v832_v2 = vmul.f32 0.03125, %v806_v62  ;;  %v382_v3 = vpop.xlane.xlu0 %381  ;;  %v463_v54 = vmul.f32 %v10200_v36, %v451_v34 }
 0x28f   :  { %v903_v7 = vadd.f32 %v10225_v58, %v891_v60  ;;  %v404_v19 = vmul.f32 0.03125, %v382_v3  ;;  %v437_v38 = vadd.f32 1e-05, %v421_v13  ;;  %v9686_v41 = vpop.eup %9685 }
 0x290   :  { %9687 = vrsqrt.f32 %v865_v1  ;;  %v848_v11 = vsub.f32 %v832_v2, %v840_v63  ;;  %v450_v6 = vmul.f32 %v9686_v41, %v426_v21  ;;  %v475_v3 = vadd.f32 %v10220_v31, %v463_v54 }
 0x291   :  { %v10236_v12 = vadd.f32 %v903_v7, %v473_v4  ;;  %v783_v14 = vpop.xlane.xlu1 %782  ;;  %9689 = vrsqrt.f32 %v432_v5  ;;  %v420_v42 = vsub.f32 %v404_v19, %v412_v33  ;;  %v856_v5 = vsub.f32 %v10109_v40, %v10212_v51 }
 0x292   :  { %v864_v18 = vadd.f32 1e-05, %v848_v11  ;;  %v768_v20 = vpop.xlane.xlu0 %767  ;;  %v10247_v50 = vmul.f32 0.03125, %v783_v14  ;;  %v462_v4 = vmul.f32 %v10200_v36, %v450_v6 }
 0x293   :  { %v10240_v27 = vmul.f32 0.03125, %v768_v20  ;;  %v436_v60 = vadd.f32 1e-05, %v420_v42 }
 0x294   :  { %9691 = vrsqrt.f32 %v864_v18  ;;  %v843_v61 = vmul.f32 %v10247_v50, %v10247_v50  ;;  %v474_v42 = vadd.f32 %v10220_v31, %v462_v4  ;;  %v1189_v4 = vld [vmem:[#allocation5 + $0x58] sm:$0xff] }
 0x295   :  { %v838_v39 = vmul.f32 %v10240_v27, %v10240_v27  ;;  %v780_v16 = vpop.xlane.xlu1 %779  ;;  %9693 = vrsqrt.f32 %v437_v38 }
 0x296   :  { %v356_v52 = vpop.xlane.xlu0 %355  ;;  %v10256_v62 = vmul.f32 0.03125, %v780_v16 }
 0x297   :  { %v846_v0 = vsub.f32 %v830_v35, %v838_v39  ;;  %v10258_v8 = vmul.f32 0.03125, %v356_v52 }
 0x298   :  { %v842_v13 = vmul.f32 %v10256_v62, %v10256_v62 }
 0x299   :  { %v862_v55 = vadd.f32 1e-05, %v846_v0  ;;  %v815_v56 = vpop.xlane.xlu1 %814  ;;  %v414_v19 = vmul.f32 %v10258_v8, %v10258_v8 }
 0x29a   :  { %v9688_v59 = vpop.eup %9687  ;;  %v835_v63 = vmul.f32 0.03125, %v815_v56  ;;  %v359_v1 = vpop.xlane.xlu0 %358 }
 0x29b   :  { %v881_v22 = vmul.f32 %v9688_v59, %v857_v53  ;;  %9695 = vrsqrt.f32 %v862_v55  ;;  %v9690_v2 = vpop.eup %9689  ;;  %v10272_v40 = vmul.f32 0.03125, %v359_v1  ;;  %v854_v53 = vsub.f32 %v10094_v32, %v10240_v27 }
 0x29c   :  { %v851_v30 = vsub.f32 %v835_v63, %v843_v61  ;;  %9697 = vrsqrt.f32 %v436_v60  ;;  %v448_v23 = vmul.f32 %v9690_v2, %v424_v37  ;;  %v429_v55 = vsub.f32 %v10081_v25, %v10215_v57 }
 0x29d   :  { %v893_v7 = vmul.f32 %v10208_v46, %v881_v22  ;;  %v812_v9 = vpop.xlane.xlu1 %811  ;;  %v415_v54 = vmul.f32 %v10272_v40, %v10272_v40  ;;  %v428_v27 = vsub.f32 %v10083_v26, %v10234_v10  ;;  %v859_v2 = vsub.f32 %v10114_v43, %v10247_v50 }
 0x29e   :  { %v9692_v11 = vpop.eup %9691  ;;  %v867_v14 = vadd.f32 1e-05, %v851_v30  ;;  %v834_v15 = vmul.f32 0.03125, %v812_v9  ;;  %v388_v17 = vpop.xlane.xlu0 %387  ;;  %v460_v0 = vmul.f32 %v10200_v36, %v448_v23  ;;  %v1306_v23 = vld [vmem:[#allocation5 + $0x70] sm:$0xff] }
 0x29f   :  { %v905_v24 = vadd.f32 %v10225_v58, %v893_v7  ;;  %v880_v18 = vmul.f32 %v9692_v11, %v856_v5  ;;  %v406_v20 = vmul.f32 0.03125, %v388_v17  ;;  %v9694_v41 = vpop.eup %9693  ;;  %v10301_v17 = vmax.f32 %v10236_v12, 0.0 }
 0x2a0   :  { %9699 = vrsqrt.f32 %v867_v14  ;;  %v850_v51 = vsub.f32 %v834_v15, %v842_v13  ;;  %v453_v22 = vmul.f32 %v9694_v41, %v429_v55  ;;  %v472_v30 = vadd.f32 %v10220_v31, %v460_v0  ;;  %v1541_v55 = vld [vmem:[#allocation5 + $0xa8] sm:$0xff] }
 0x2a1   :  { %v10274_v33 = vadd.f32 %v905_v24, %v475_v3  ;;  %v892_v34 = vmul.f32 %v10208_v46, %v880_v18  ;;  %v422_v35 = vsub.f32 %v406_v20, %v414_v19  ;;  %v789_v38 = vpop.xlane.xlu1 %788  ;;  %v1188_v3 = vld [vmem:[#allocation5 + $0x50] sm:$0xff]  ;;  %v858_v24 = vsub.f32 %v10117_v45, %v10256_v62 }
 0x2a2   :  { %v866_v39 = vadd.f32 1e-05, %v850_v51  ;;  %v391_v16 = vpop.xlane.xlu0 %390  ;;  %v10294_v25 = vmul.f32 0.03125, %v789_v38  ;;  %v465_v14 = vmul.f32 %v10200_v36, %v453_v22  ;;  %v9164_v50 = vpack.c.bf16 %v1189_v4, %v1188_v3  ;;  %v1307_v51 = vld [vmem:[#allocation5 + $0x78] sm:$0xff] }
 0x2a3   :  { %v904_v52 = vadd.f32 %v10225_v58, %v892_v34  ;;  %v407_v21 = vmul.f32 0.03125, %v391_v16  ;;  %v438_v59 = vadd.f32 1e-05, %v422_v35 }
 0x2a4   :  { %9701 = vrsqrt.f32 %v866_v39  ;;  %v845_v19 = vmul.f32 %v10294_v25, %v10294_v25  ;;  %v477_v12 = vadd.f32 %v10220_v31, %v465_v14 }
 0x2a5   :  { %v9696_v6 = vpop.eup %9695  ;;  %v912_v56 = vadd.f32 %v904_v52, %v474_v42  ;;  %v786_v60 = vpop.xlane.xlu1 %785  ;;  %v423_v63 = vsub.f32 %v407_v21, %v415_v54  ;;  %9703 = vrsqrt.f32 %v438_v59  ;;  %v9172_v52 = vpack.c.bf16 %v1307_v51, %v1306_v23  ;;  %v1422_v21 = vld [vmem:[#allocation5 + $0x80] sm:$0xff]  ;;  %v1423_v54 = vld [vmem:[#allocation5 + $0x88] sm:$0xff] }
 0x2a6   :  { %v878_v61 = vmul.f32 %v9696_v6, %v854_v53  ;;  %v10286_v1 = vmul.f32 0.03125, %v786_v60  ;;  %v9698_v37 = vpop.eup %9697  ;;  %v1540_v6 = vld [vmem:[#allocation5 + $0xa0] sm:$0xff]  ;;  %v10329_v60 = vmax.f32 %v10274_v33, 0.0  ;;  %v9176_v22 = vpack.c.bf16 %v1423_v54, %v1422_v21 }
 0x2a7   :  { %v439_v9 = vadd.f32 1e-05, %v423_v63  ;;  %v452_v26 = vmul.f32 %v9698_v37, %v428_v27  ;;  %v10313_v41 = vmax.f32 %v912_v56, 0.0  ;;  %v9184_v37 = vpack.c.bf16 %v1541_v55, %v1540_v6 }
 0x2a8   :  { %v890_v32 = vmul.f32 %v10208_v46, %v878_v61  ;;  %v844_v11 = vmul.f32 %v10286_v1, %v10286_v1  ;;  %v9893_v51 = vmov 0.0|0.0  }
 0x2a9   :  { %v818_v57 = vpop.xlane.xlu1 %817  ;;  %9705 = vrsqrt.f32 %v439_v9  ;;  %v464_v16 = vmul.f32 %v10200_v36, %v452_v26 }
 0x2aa   :  { %v9700_v5 = vpop.eup %9699  ;;  %v902_v7 = vadd.f32 %v10225_v58, %v890_v32  ;;  %v836_v13 = vmul.f32 0.03125, %v818_v57 }
 0x2ab   :  { %v883_v10 = vmul.f32 %v9700_v5, %v859_v2  ;;  %v476_v61 = vadd.f32 %v10220_v31, %v464_v16 }
 0x2ac   :  { %v910_v15 = vadd.f32 %v902_v7, %v472_v30  ;;  %v852_v43 = vsub.f32 %v836_v13, %v844_v11  ;;  %v430_v30 = vsub.f32 %v10088_v29, %v10258_v8  ;;  %v431_v29 = vsub.f32 %v10086_v28, %v10272_v40 }
 0x2ad   :  { %v895_v18 = vmul.f32 %v10208_v46, %v883_v10  ;;  %v821_v20 = vpop.xlane.xlu1 %820  ;;  %v860_v8 = vsub.f32 %v10124_v49, %v10286_v1  ;;  %v861_v49 = vsub.f32 %v10120_v47, %v10294_v25  ;;  %v1424_v25 = vld [vmem:[#allocation5 + $0x90] sm:$0xff] }
 0x2ae   :  { %v9702_v34 = vpop.eup %9701  ;;  %v10308_v35 = vmax.f32 %v910_v15, 0.0  ;;  %v868_v38 = vadd.f32 1e-05, %v852_v43  ;;  %v837_v39 = vmul.f32 0.03125, %v821_v20  ;;  %v1543_v15 = vld [vmem:[#allocation5 + $0xb8] sm:$0xff] }
 0x2af   :  { %v907_v45 = vadd.f32 %v10225_v58, %v895_v18  ;;  %v882_v62 = vmul.f32 %v9702_v34, %v858_v24  ;;  %v9704_v59 = vpop.eup %9703  ;;  %v1659_v24 = vld [vmem:[#allocation5 + $0xc8] sm:$0xff]  ;;  %v1661_v20 = vld [vmem:[#allocation5 + $0xd8] sm:$0xff] }
 0x2b0   :  { %9707 = vrsqrt.f32 %v868_v38  ;;  %v853_v42 = vsub.f32 %v837_v39, %v845_v19  ;;  %8496 = vmatprep.mubr.msk.f32.mxu0 %vm204_vm1, %v10308_v35  ;;  %8516 = vmatprep.mubr.msk.f32.mxu1 %vm204_vm1, %v10308_v35  ;;  %v1660_v19 = vld [vmem:[#allocation5 + $0xd0] sm:$0xff]  ;;  %v1776_v34 = vld [vmem:[#allocation3 + $0x8] sm:$0xff]  ;;  %v1778_v38 = vld [vmem:[#allocation3 + $0x18] sm:$0xff] }
 0x2b1   :  { %v915_v0 = vadd.f32 %v907_v45, %v477_v12  ;;  %v894_v53 = vmul.f32 %v10208_v46, %v882_v62  ;;  %8497 = vmatmul.mubr.msk.f32.vlgmr.msra.gmra.mrb[16].mxu0 %vm204_vm1, %v10301_v17  ;;  %8517 = vmatmul.mubr.msk.f32.vlgmr.msra.gmra.mrb[16].mxu1 %vm204_vm1, %v10301_v17  ;;  %v9196_v23 = vpack.c.bf16 %v1661_v20, %v1660_v19 }
 0x2b2   :  { %v869_v56 = vadd.f32 1e-05, %v853_v42  ;;  %8499 = vmatprep.mubr.msk.f32.mxu0 %vm204_vm1, %v10313_v41  ;;  %8519 = vmatprep.mubr.msk.f32.mxu1 %vm204_vm1, %v10313_v41 }
 0x2b3   :  { %v906_v63 = vadd.f32 %v10225_v58, %v894_v53  ;;  %9163 = vmatpush3.bf16.msra.mxu0 %v10176_v44  ;;  %9171 = vmatpush3.bf16.msra.mxu1 %v10178_v48  ;;  %v454_v44 = vmul.f32 %v9704_v59, %v430_v30  ;;  %v9706_v48 = vpop.eup %9705  ;;  %v10343_v27 = vmax.f32 %v915_v0, 0.0 }
 0x2b4   :  { %9709 = vrsqrt.f32 %v869_v56  ;;  %9165 = vmatprep.subr.bf16.mxu0 %v9164_v50  ;;  %9173 = vmatprep.subr.bf16.mxu1 %v9172_v52  ;;  %v455_v3 = vmul.f32 %v9706_v48, %v431_v29 }
 0x2b5   :  { %v914_v32 = vadd.f32 %v906_v63, %v476_v61  ;;  %8500 = vmatmul.mubr.msk.f32.gmra.mrb[18].mxu0 %vm204_vm1, %v10329_v60  ;;  %8520 = vmatmul.mubr.msk.f32.gmra.mrb[18].mxu1 %vm204_vm1, %v10329_v60  ;;  %v466_v57 = vmul.f32 %v10200_v36, %v454_v44 }
 0x2b6   :  { %v467_v5 = vmul.f32 %v10200_v36, %v455_v3 }
 0x2b7   :  { %v10341_v33 = vmax.f32 %v914_v32, 0.0  ;;  %9167 = vmatpush3.bf16.msra.mxu0 %v9164_v50  ;;  %9175 = vmatpush3.bf16.msra.mxu1 %v9172_v52  ;;  %v478_v4 = vadd.f32 %v10220_v31, %v466_v57  ;;  %v1658_v50 = vld [vmem:[#allocation5 + $0xc0] sm:$0xff] }
 0x2b8   :  { %9177 = vmatprep.subr.bf16.mxu0 %v9176_v22  ;;  %9185 = vmatprep.subr.bf16.mxu1 %v9184_v37  ;;  %v479_v14 = vadd.f32 %v10220_v31, %v467_v5  ;;  %v1542_v31 = vld [vmem:[#allocation5 + $0xb0] sm:$0xff]  ;;  %v9192_v18 = vpack.c.bf16 %v1659_v24, %v1658_v50 }
 0x2b9   :  { %8502 = vmatprep.mubr.msk.f32.mxu0 %vm204_vm1, %v10341_v33  ;;  %8522 = vmatprep.mubr.msk.f32.mxu1 %vm204_vm1, %v10341_v33  ;;  %v9188_v43 = vpack.c.bf16 %v1543_v15, %v1542_v31 }
 0x2ba   :  { %v9708_v2 = vpop.eup %9707  ;;  %8503 = vmatmul.mubr.msk.f32.gmra.mrb[20].mxu0 %vm204_vm1, %v10343_v27  ;;  %8523 = vmatmul.mubr.msk.f32.gmra.mrb[20].mxu1 %vm204_vm1, %v10343_v27 }
 0x2bb   :  { %v884_v28 = vmul.f32 %v9708_v2, %v860_v8 }
 0x2bd   :  { %v896_v40 = vmul.f32 %v10208_v46, %v884_v28 }
 0x2be   :  { %v9710_v1 = vpop.eup %9709 }
 0x2bf   :  { %v908_v7 = vadd.f32 %v10225_v58, %v896_v40  ;;  %v885_v9 = vmul.f32 %v9710_v1, %v861_v49 }
 0x2c1   :  { %v916_v11 = vadd.f32 %v908_v7, %v478_v4  ;;  %v897_v13 = vmul.f32 %v10208_v46, %v885_v9  ;;  %v1425_v46 = vld [vmem:[#allocation5 + $0x98] sm:$0xff] }
 0x2c3   :  { %v10366_v26 = vmax.f32 %v916_v11, 0.0  ;;  %v909_v10 = vadd.f32 %v10225_v58, %v897_v13  ;;  %v9180_v58 = vpack.c.bf16 %v1425_v46, %v1424_v25 }
 0x2c5   :  { %v917_v47 = vadd.f32 %v909_v10, %v479_v14  ;;  %8505 = vmatprep.mubr.msk.f32.mxu0 %vm204_vm1, %v10366_v26  ;;  %8525 = vmatprep.mubr.msk.f32.mxu1 %vm204_vm1, %v10366_v26 }
 0x2c7   :  { %v10373_v36 = vmax.f32 %v917_v47, 0.0 }
 0x2c9   :  { %8506 = vmatmul.mubr.msk.f32.gmra.mrb[22].mxu0 %vm204_vm1, %v10373_v36  ;;  %8526 = vmatmul.mubr.msk.f32.gmra.mrb[22].mxu1 %vm204_vm1, %v10373_v36 }
 0x2ca   :  { %8536 = vmatprep.mubr.msk.f32.mxu0 %vm204_vm1, %v10308_v35  ;;  %8556 = vmatprep.mubr.msk.f32.mxu1 %vm204_vm1, %v10308_v35 }
 0x2cd   :  { %8537 = vmatmul.mubr.msk.f32.vlgmr.msra.gmra.mrb[24].mxu0 %vm204_vm1, %v10301_v17  ;;  %8557 = vmatmul.mubr.msk.f32.vlgmr.msra.gmra.mrb[24].mxu1 %vm204_vm1, %v10301_v17 }
 0x2ce   :  { %8539 = vmatprep.mubr.msk.f32.mxu0 %vm204_vm1, %v10313_v41  ;;  %8559 = vmatprep.mubr.msk.f32.mxu1 %vm204_vm1, %v10313_v41 }
 0x2cf   :  { %9179 = vmatpush3.bf16.msra.mxu0 %v9176_v22  ;;  %9187 = vmatpush3.bf16.msra.mxu1 %v9184_v37 }
 0x2d0   :  { %9181 = vmatprep.subr.bf16.mxu0 %v9180_v58  ;;  %9189 = vmatprep.subr.bf16.mxu1 %v9188_v43 }
 0x2d1   :  { %8540 = vmatmul.mubr.msk.f32.gmra.mrb[26].mxu0 %vm204_vm1, %v10329_v60  ;;  %8560 = vmatmul.mubr.msk.f32.gmra.mrb[26].mxu1 %vm204_vm1, %v10329_v60 }
 0x2d2   :  { %8542 = vmatprep.mubr.msk.f32.mxu0 %vm204_vm1, %v10341_v33  ;;  %8562 = vmatprep.mubr.msk.f32.mxu1 %vm204_vm1, %v10341_v33 }
 0x2d3   :  { %9183 = vmatpush3.bf16.msra.mxu0 %v9180_v58  ;;  %9191 = vmatpush3.bf16.msra.mxu1 %v9188_v43 }
 0x2d4   :  { %9193 = vmatprep.subr.bf16.mxu0 %v9192_v18 }
 0x2d5   :  { %8543 = vmatmul.mubr.msk.f32.gmra.mrb[28].mxu0 %vm204_vm1, %v10343_v27  ;;  %8563 = vmatmul.mubr.msk.f32.gmra.mrb[28].mxu1 %vm204_vm1, %v10343_v27 }
 0x2d6   :  { %8545 = vmatprep.mubr.msk.f32.mxu0 %vm204_vm1, %v10366_v26  ;;  %8565 = vmatprep.mubr.msk.f32.mxu1 %vm204_vm1, %v10366_v26 }
 0x2d9   :  { %8546 = vmatmul.mubr.msk.f32.gmra.mrb[30].mxu0 %vm204_vm1, %v10373_v36  ;;  %8566 = vmatmul.mubr.msk.f32.gmra.mrb[30].mxu1 %vm204_vm1, %v10373_v36 }
 0x2da   :  { %8576 = vmatprep.mubr.msk.f32.mxu0 %vm204_vm1, %v10308_v35  ;;  %8596 = vmatprep.mubr.msk.f32.mxu1 %vm204_vm1, %v10308_v35 }
 0x2dd   :  { %8577 = vmatmul.mubr.msk.f32.vlgmr.msra.gmra.mrb[32].mxu0 %vm204_vm1, %v10301_v17  ;;  %8597 = vmatmul.mubr.msk.f32.vlgmr.msra.gmra.mrb[32].mxu1 %vm204_vm1, %v10301_v17 }
 0x2de   :  { %8579 = vmatprep.mubr.msk.f32.mxu0 %vm204_vm1, %v10313_v41  ;;  %8599 = vmatprep.mubr.msk.f32.mxu1 %vm204_vm1, %v10313_v41 }
 0x2df   :  { %9195 = vmatpush3.bf16.msra.mxu0 %v9192_v18 }
 0x2e0   :  { %9197 = vmatprep.subr.bf16.mxu0 %v9196_v23 }
 0x2e1   :  { %8580 = vmatmul.mubr.msk.f32.gmra.mrb[34].mxu0 %vm204_vm1, %v10329_v60  ;;  %8600 = vmatmul.mubr.msk.f32.gmra.mrb[34].mxu1 %vm204_vm1, %v10329_v60 }
 0x2e2   :  { %8582 = vmatprep.mubr.msk.f32.mxu0 %vm204_vm1, %v10341_v33  ;;  %8602 = vmatprep.mubr.msk.f32.mxu1 %vm204_vm1, %v10341_v33 }
 0x2e3   :  { %9199 = vmatpush3.bf16.msra.mxu0 %v9196_v23 }
 0x2e4   :  { %9232 = vmatprep.subr.bf16.mxu0 %v9893_v51 }
 0x2e5   :  { %8583 = vmatmul.mubr.msk.f32.gmra.mrb[36].mxu0 %vm204_vm1, %v10343_v27  ;;  %8603 = vmatmul.mubr.msk.f32.gmra.mrb[36].mxu1 %vm204_vm1, %v10343_v27 }
 0x2e6   :  { %8585 = vmatprep.mubr.msk.f32.mxu0 %vm204_vm1, %v10366_v26  ;;  %8605 = vmatprep.mubr.msk.f32.mxu1 %vm204_vm1, %v10366_v26 }
 0x2e9   :  { %8586 = vmatmul.mubr.msk.f32.gmra.mrb[38].mxu0 %vm204_vm1, %v10373_v36  ;;  %8606 = vmatmul.mubr.msk.f32.gmra.mrb[38].mxu1 %vm204_vm1, %v10373_v36 }
 0x2ea   :  { %8616 = vmatprep.mubr.msk.f32.mxu0 %vm204_vm1, %v10308_v35  ;;  %1952 = vmatprep.mubr.f32.mxu1 %v1776_v34 }
 0x2ed   :  { %8617 = vmatmul.mubr.msk.f32.vlgmr.msra.gmra.mrb[40].mxu0 %vm204_vm1, %v10301_v17 }
 0x2ee   :  { %8619 = vmatprep.mubr.msk.f32.mxu0 %vm204_vm1, %v10313_v41 }
 0x2f1   :  { %8620 = vmatmul.mubr.msk.f32.gmra.mrb[42].mxu0 %vm204_vm1, %v10329_v60 }
 0x2f2   :  { %8622 = vmatprep.mubr.msk.f32.mxu0 %vm204_vm1, %v10341_v33 }
 0x2f5   :  { %8623 = vmatmul.mubr.msk.f32.gmra.mrb[44].mxu0 %vm204_vm1, %v10343_v27 }
 0x2f6   :  { %8625 = vmatprep.mubr.msk.f32.mxu0 %vm204_vm1, %v10366_v26 }
 0x2f9   :  { %8626 = vmatmul.mubr.msk.f32.gmra.mrb[46].mxu0 %vm204_vm1, %v10373_v36 }
 0x2fa   :  { %7522 = vmatprep.mubr.msk.f32.mxu0 %vm1863_vm2, %v1778_v38 }
 0x384   :  { %v8498_v39 = vpop.f32.mrb[16].mxu0  ;;  %v8518_v12 = vpop.f32.mrb[16].mxu1 }
 0x385   :  { %1060 = vst.msk [vmem:[#allocation2 + $0x8] sm:$0xff] %vm204_vm1, %v8498_v39  ;;  %1178 = vst.msk [vmem:[#allocation2 + $0x48] sm:$0xff] %vm204_vm1, %v8518_v12  ;;  %v1020_v16 = vpop.f32.mrb[17].mxu0  ;;  %v1138_v45 = vpop.f32.mrb[17].mxu1 }
 0x386   :  { %1059 = vst.msk [vmem:[#allocation2] sm:$0xff] %vm204_vm1, %v1020_v16  ;;  %1177 = vst.msk [vmem:[#allocation2 + $0x40] sm:$0xff] %vm204_vm1, %v1138_v45 }
 0x388   :  { %v8501_v62 = vpop.f32.mrb[18].mxu0  ;;  %v8521_v42 = vpop.f32.mrb[18].mxu1 }
 0x389   :  { %1062 = vst.msk [vmem:[#allocation2 + $0x18] sm:$0xff] %vm204_vm1, %v8501_v62  ;;  %1180 = vst.msk [vmem:[#allocation2 + $0x58] sm:$0xff] %vm204_vm1, %v8521_v42  ;;  %v1030_v52 = vpop.f32.mrb[19].mxu0  ;;  %v1148_v21 = vpop.f32.mrb[19].mxu1 }
 0x38a   :  { %1061 = vst.msk [vmem:[#allocation2 + $0x10] sm:$0xff] %vm204_vm1, %v1030_v52  ;;  %1179 = vst.msk [vmem:[#allocation2 + $0x50] sm:$0xff] %vm204_vm1, %v1148_v21 }
 0x38c   :  { %v1808_v28 = vld [vmem:[#allocation2 + $0x8] sm:$0xff] }
 0x38d   :  { %v8504_v0 = vpop.f32.mrb[20].mxu0  ;;  %v8524_v53 = vpop.f32.mrb[20].mxu1  ;;  %v1807_v3 = vld [vmem:[#allocation2] sm:$0xff] }
 0x38e   :  { %1064 = vst.msk [vmem:[#allocation2 + $0x28] sm:$0xff] %vm204_vm1, %v8504_v0  ;;  %1182 = vst.msk [vmem:[#allocation2 + $0x68] sm:$0xff] %vm204_vm1, %v8524_v53  ;;  %v1040_v54 = vpop.f32.mrb[21].mxu0  ;;  %v1158_v6 = vpop.f32.mrb[21].mxu1  ;;  %v9202_v5 = vpack.c.bf16 %v1808_v28, %v1807_v3 }
 0x38f   :  { %1063 = vst.msk [vmem:[#allocation2 + $0x20] sm:$0xff] %vm204_vm1, %v1040_v54  ;;  %1181 = vst.msk [vmem:[#allocation2 + $0x60] sm:$0xff] %vm204_vm1, %v1158_v6 }
 0x390   :  { %v1810_v14 = vld [vmem:[#allocation2 + $0x18] sm:$0xff] }
 0x391   :  { %v1809_v13 = vld [vmem:[#allocation2 + $0x10] sm:$0xff] }
 0x392   :  { %v9206_v31 = vpack.c.bf16 %v1810_v14, %v1809_v13  ;;  %v1817_v28 = vld [vmem:[#allocation2 + $0x50] sm:$0xff] }
 0x395   :  { %v1812_v24 = vld [vmem:[#allocation2 + $0x28] sm:$0xff] }
 0x396   :  { %v1811_v50 = vld [vmem:[#allocation2 + $0x20] sm:$0xff] }
 0x397   :  { %v9210_v34 = vpack.c.bf16 %v1812_v24, %v1811_v50 }
 0x39c   :  { %v8507_v55 = vpop.f32.mrb[22].mxu0  ;;  %v8527_v56 = vpop.f32.mrb[22].mxu1 }
 0x39d   :  { %1066 = vst.msk [vmem:[#allocation2 + $0x38] sm:$0xff] %vm204_vm1, %v8507_v55  ;;  %1184 = vst.msk [vmem:[#allocation2 + $0x78] sm:$0xff] %vm204_vm1, %v8527_v56  ;;  %v1050_v59 = vpop.f32.mrb[23].mxu0  ;;  %v1168_v61 = vpop.f32.mrb[23].mxu1 }
 0x39e   :  { %1065 = vst.msk [vmem:[#allocation2 + $0x30] sm:$0xff] %vm204_vm1, %v1050_v59  ;;  %1183 = vst.msk [vmem:[#allocation2 + $0x70] sm:$0xff] %vm204_vm1, %v1168_v61  ;;  %v1815_v61 = vld [vmem:[#allocation2 + $0x40] sm:$0xff] }
 0x3a0   :  { %v8538_v63 = vpop.f32.mrb[24].mxu0  ;;  %v8558_v22 = vpop.f32.mrb[24].mxu1 }
 0x3a1   :  { %1296 = vst.msk [vmem:[#allocation2 + $0x88] sm:$0xff] %vm204_vm1, %v8538_v63  ;;  %1414 = vst.msk [vmem:[#allocation2 + $0xc8] sm:$0xff] %vm204_vm1, %v8558_v22  ;;  %v1256_v37 = vpop.f32.mrb[25].mxu0  ;;  %v1374_v30 = vpop.f32.mrb[25].mxu1  ;;  %v1816_v63 = vld [vmem:[#allocation2 + $0x48] sm:$0xff] }
 0x3a2   :  { %1295 = vst.msk [vmem:[#allocation2 + $0x80] sm:$0xff] %vm204_vm1, %v1256_v37  ;;  %1413 = vst.msk [vmem:[#allocation2 + $0xc0] sm:$0xff] %vm204_vm1, %v1374_v30 }
 0x3a4   :  { %v8541_v32 = vpop.f32.mrb[26].mxu0  ;;  %v8561_v44 = vpop.f32.mrb[26].mxu1  ;;  %v1814_v45 = vld [vmem:[#allocation2 + $0x38] sm:$0xff] }
 0x3a5   :  { %1298 = vst.msk [vmem:[#allocation2 + $0x98] sm:$0xff] %vm204_vm1, %v8541_v32  ;;  %1416 = vst.msk [vmem:[#allocation2 + $0xd8] sm:$0xff] %vm204_vm1, %v8561_v44  ;;  %v1266_v48 = vpop.f32.mrb[27].mxu0  ;;  %v1384_v29 = vpop.f32.mrb[27].mxu1  ;;  %v1813_v16 = vld [vmem:[#allocation2 + $0x30] sm:$0xff] }
 0x3a6   :  { %1297 = vst.msk [vmem:[#allocation2 + $0x90] sm:$0xff] %vm204_vm1, %v1266_v48  ;;  %1415 = vst.msk [vmem:[#allocation2 + $0xd0] sm:$0xff] %vm204_vm1, %v1384_v29  ;;  %v9214_v54 = vpack.c.bf16 %v1814_v45, %v1813_v16  ;;  %v9218_v29 = vpack.c.bf16 %v1816_v63, %v1815_v61  ;;  %v1784_v61 = vld [vmem:[#allocation3 + $0x48] sm:$0xff] }
 0x3a8   :  { %v8544_v8 = vpop.f32.mrb[28].mxu0  ;;  %v8564_v2 = vpop.f32.mrb[28].mxu1  ;;  %v1824_v57 = vld [vmem:[#allocation2 + $0x88] sm:$0xff] }
 0x3a9   :  { %1300 = vst.msk [vmem:[#allocation2 + $0xa8] sm:$0xff] %vm204_vm1, %v8544_v8  ;;  %1418 = vst.msk [vmem:[#allocation2 + $0xe8] sm:$0xff] %vm204_vm1, %v8564_v2  ;;  %v1276_v49 = vpop.f32.mrb[29].mxu0  ;;  %v1394_v40 = vpop.f32.mrb[29].mxu1  ;;  %v1823_v1 = vld [vmem:[#allocation2 + $0x80] sm:$0xff]  ;;  %v1832_v0 = vld [vmem:[#allocation2 + $0xc8] sm:$0xff] }
 0x3aa   :  { %1299 = vst.msk [vmem:[#allocation2 + $0xa0] sm:$0xff] %vm204_vm1, %v1276_v49  ;;  %1417 = vst.msk [vmem:[#allocation2 + $0xe0] sm:$0xff] %vm204_vm1, %v1394_v40  ;;  %v9200_v4 = vpack.c.bf16 %v1824_v57, %v1823_v1  ;;  %v1831_v21 = vld [vmem:[#allocation2 + $0xc0] sm:$0xff]  ;;  %v1818_v49 = vld [vmem:[#allocation2 + $0x58] sm:$0xff] }
 0x3ab   :  { %v9216_v56 = vpack.c.bf16 %v1832_v0, %v1831_v21  ;;  %v1780_v0 = vld [vmem:[#allocation3 + $0x28] sm:$0xff] }
 0x3ac   :  { %v8547_v7 = vpop.f32.mrb[30].mxu0  ;;  %v8567_v9 = vpop.f32.mrb[30].mxu1  ;;  %9201 = vmatprep.subr.bf16.mxu1 %v9200_v4  ;;  %v1826_v11 = vld [vmem:[#allocation2 + $0x98] sm:$0xff] }
 0x3ad   :  { %1302 = vst.msk [vmem:[#allocation2 + $0xb8] sm:$0xff] %vm204_vm1, %v8547_v7  ;;  %1420 = vst.msk [vmem:[#allocation2 + $0xf8] sm:$0xff] %vm204_vm1, %v8567_v9  ;;  %v1286_v10 = vpop.f32.mrb[31].mxu0  ;;  %v1404_v47 = vpop.f32.mrb[31].mxu1  ;;  %9203 = vmatpush3.bf16.msra.mxu1 %v9202_v5  ;;  %v1825_v25 = vld [vmem:[#allocation2 + $0x90] sm:$0xff]  ;;  %v1834_v44 = vld [vmem:[#allocation2 + $0xd8] sm:$0xff] }
 0x3ae   :  { %1301 = vst.msk [vmem:[#allocation2 + $0xb0] sm:$0xff] %vm204_vm1, %v1286_v10  ;;  %1419 = vst.msk [vmem:[#allocation2 + $0xf0] sm:$0xff] %vm204_vm1, %v1404_v47  ;;  %v9204_v46 = vpack.c.bf16 %v1826_v11, %v1825_v25  ;;  %v1833_v32 = vld [vmem:[#allocation2 + $0xd0] sm:$0xff]  ;;  %v9222_v11 = vpack.c.bf16 %v1818_v49, %v1817_v28  ;;  %v1819_v47 = vld [vmem:[#allocation2 + $0x60] sm:$0xff] }
 0x3af   :  { %v9220_v57 = vpack.c.bf16 %v1834_v44, %v1833_v32  ;;  %v1820_v25 = vld [vmem:[#allocation2 + $0x68] sm:$0xff]  ;;  %v1791_v28 = vld [vmem:[#allocation3 + $0x80] sm:$0xff] }
 0x3b0   :  { %v8578_v15 = vpop.f32.mrb[32].mxu0  ;;  %v8598_v58 = vpop.f32.mrb[32].mxu1  ;;  %9205 = vmatprep.subr.bf16.mxu1 %v9204_v46  ;;  %v1828_v43 = vld [vmem:[#allocation2 + $0xa8] sm:$0xff]  ;;  %v9226_v50 = vpack.c.bf16 %v1820_v25, %v1819_v47 }
 0x3b1   :  { %1532 = vst.msk [vmem:[#allocation2 + $0x108] sm:$0xff] %vm204_vm1, %v8578_v15  ;;  %1650 = vst.msk [vmem:[#allocation2 + $0x148] sm:$0xff] %vm204_vm1, %v8598_v58  ;;  %v1492_v18 = vpop.f32.mrb[33].mxu0  ;;  %v1610_v19 = vpop.f32.mrb[33].mxu1  ;;  %9207 = vmatpush3.bf16.msra.mxu1 %v9206_v31  ;;  %v1827_v20 = vld [vmem:[#allocation2 + $0xa0] sm:$0xff]  ;;  %v1836_v7 = vld [vmem:[#allocation2 + $0xe8] sm:$0xff] }
 0x3b2   :  { %1531 = vst.msk [vmem:[#allocation2 + $0x100] sm:$0xff] %vm204_vm1, %v1492_v18  ;;  %1649 = vst.msk [vmem:[#allocation2 + $0x140] sm:$0xff] %vm204_vm1, %v1610_v19  ;;  %v9208_v23 = vpack.c.bf16 %v1828_v43, %v1827_v20  ;;  %v1835_v5 = vld [vmem:[#allocation2 + $0xe0] sm:$0xff]  ;;  %v1821_v20 = vld [vmem:[#allocation2 + $0x70] sm:$0xff] }
 0x3b3   :  { %v9224_v14 = vpack.c.bf16 %v1836_v7, %v1835_v5  ;;  %v1788_v32 = vld [vmem:[#allocation3 + $0x68] sm:$0xff]  ;;  %v1795_v5 = vld [vmem:[#allocation3 + $0xa0] sm:$0xff] }
 0x3b4   :  { %v8581_v38 = vpop.f32.mrb[34].mxu0  ;;  %v8601_v39 = vpop.f32.mrb[34].mxu1  ;;  %9209 = vmatprep.subr.bf16.mxu1 %v9208_v23  ;;  %v1830_v12 = vld [vmem:[#allocation2 + $0xb8] sm:$0xff]  ;;  %v1804_v47 = vld [vmem:[#allocation3 + $0xe8] sm:$0xff] }
 0x3b5   :  { %1534 = vst.msk [vmem:[#allocation2 + $0x118] sm:$0xff] %vm204_vm1, %v8581_v38  ;;  %1652 = vst.msk [vmem:[#allocation2 + $0x158] sm:$0xff] %vm204_vm1, %v8601_v39  ;;  %v1502_v62 = vpop.f32.mrb[35].mxu0  ;;  %v1620_v42 = vpop.f32.mrb[35].mxu1  ;;  %9211 = vmatpush3.bf16.msra.mxu1 %v9210_v34  ;;  %v1829_v52 = vld [vmem:[#allocation2 + $0xb0] sm:$0xff]  ;;  %v1838_v58 = vld [vmem:[#allocation2 + $0xf8] sm:$0xff] }
 0x3b6   :  { %1533 = vst.msk [vmem:[#allocation2 + $0x110] sm:$0xff] %vm204_vm1, %v1502_v62  ;;  %1651 = vst.msk [vmem:[#allocation2 + $0x150] sm:$0xff] %vm204_vm1, %v1620_v42  ;;  %v9212_v53 = vpack.c.bf16 %v1830_v12, %v1829_v52  ;;  %v1837_v15 = vld [vmem:[#allocation2 + $0xf0] sm:$0xff]  ;;  %v1822_v23 = vld [vmem:[#allocation2 + $0x78] sm:$0xff] }
 0x3b7   :  { %v9228_v18 = vpack.c.bf16 %v1838_v58, %v1837_v15  ;;  %v9230_v12 = vpack.c.bf16 %v1822_v23, %v1821_v20  ;;  %v1775_v52 = vld [vmem:[#allocation3] sm:$0xff]  ;;  %v1777_v58 = vld [vmem:[#allocation3 + $0x10] sm:$0xff]  ;;  %v1794_v23 = vld [vmem:[#allocation3 + $0x98] sm:$0xff] }
 0x3b8   :  { %v8584_v6 = vpop.f32.mrb[36].mxu0  ;;  %v8604_v55 = vpop.f32.mrb[36].mxu1  ;;  %9213 = vmatprep.subr.bf16.mxu1 %v9212_v53  ;;  %v1840_v59 = vld [vmem:[#allocation2 + $0x108] sm:$0xff]  ;;  %v1789_v20 = vld [vmem:[#allocation3 + $0x70] sm:$0xff] }
 0x3b9   :  { %1536 = vst.msk [vmem:[#allocation2 + $0x128] sm:$0xff] %vm204_vm1, %v8584_v6  ;;  %1654 = vst.msk [vmem:[#allocation2 + $0x168] sm:$0xff] %vm204_vm1, %v8604_v55  ;;  %v1512_v22 = vpop.f32.mrb[37].mxu0  ;;  %v1630_v37 = vpop.f32.mrb[37].mxu1  ;;  %9215 = vmatpush3.bf16.msra.mxu1 %v9214_v54  ;;  %v1839_v30 = vld [vmem:[#allocation2 + $0x100] sm:$0xff]  ;;  %v1848_v45 = vld [vmem:[#allocation2 + $0x148] sm:$0xff] }
 0x3ba   :  { %1535 = vst.msk [vmem:[#allocation2 + $0x120] sm:$0xff] %vm204_vm1, %v1512_v22  ;;  %1653 = vst.msk [vmem:[#allocation2 + $0x160] sm:$0xff] %vm204_vm1, %v1630_v37  ;;  %9217 = vmatprep.subr.bf16.mxu1 %v9216_v56  ;;  %v9233_v48 = vpack.c.bf16 %v1840_v59, %v1839_v30  ;;  %v1847_v16 = vld [vmem:[#allocation2 + $0x140] sm:$0xff] }
 0x3bb   :  { %v9245_v21 = vpack.c.bf16 %v1848_v45, %v1847_v16  ;;  %v1779_v56 = vld [vmem:[#allocation3 + $0x20] sm:$0xff]  ;;  %v1801_v16 = vld [vmem:[#allocation3 + $0xd0] sm:$0xff]  ;;  %v1806_v45 = vld [vmem:[#allocation3 + $0xf8] sm:$0xff] }
 0x3bc   :  { %v8587_v8 = vpop.f32.mrb[38].mxu0  ;;  %v8607_v2 = vpop.f32.mrb[38].mxu1  ;;  %9234 = vmatpush1.bf16.msra.mxu0 %v9233_v48  ;;  %v1842_v3 = vld [vmem:[#allocation2 + $0x118] sm:$0xff]  ;;  %v1783_v37 = vld [vmem:[#allocation3 + $0x40] sm:$0xff] }
 0x3bd   :  { %1538 = vst.msk [vmem:[#allocation2 + $0x138] sm:$0xff] %vm204_vm1, %v8587_v8  ;;  %1656 = vst.msk [vmem:[#allocation2 + $0x178] sm:$0xff] %vm204_vm1, %v8607_v2  ;;  %v1522_v40 = vpop.f32.mrb[39].mxu0  ;;  %v1640_v1 = vpop.f32.mrb[39].mxu1  ;;  %9219 = vmatpush3.bf16.msra.mxu1 %v9218_v29  ;;  %9235 = vmatprep.subr.bf16.mxu0 %v9893_v51  ;;  %v1841_v4 = vld [vmem:[#allocation2 + $0x110] sm:$0xff]  ;;  %v1850_v54 = vld [vmem:[#allocation2 + $0x158] sm:$0xff] }
 0x3be   :  { %1537 = vst.msk [vmem:[#allocation2 + $0x130] sm:$0xff] %vm204_vm1, %v1522_v40  ;;  %1655 = vst.msk [vmem:[#allocation2 + $0x170] sm:$0xff] %vm204_vm1, %v1640_v1  ;;  %9221 = vmatprep.subr.bf16.mxu1 %v9220_v57  ;;  %v9236_v9 = vpack.c.bf16 %v1842_v3, %v1841_v4  ;;  %v1849_v53 = vld [vmem:[#allocation2 + $0x150] sm:$0xff]  ;;  %v1787_v29 = vld [vmem:[#allocation3 + $0x60] sm:$0xff] }
 0x3bf   :  { %v9248_v59 = vpack.c.bf16 %v1850_v54, %v1849_v53  ;;  %v1792_v2 = vld [vmem:[#allocation3 + $0x88] sm:$0xff] }
 0x3c0   :  { %v8618_v13 = vpop.f32.mrb[40].mxu0  ;;  %9237 = vmatpush1.bf16.msra.mxu0 %v9236_v9  ;;  %v1844_v10 = vld [vmem:[#allocation2 + $0x128] sm:$0xff] }
 0x3c1   :  { %1768 = vst.msk [vmem:[#allocation2 + $0x188] sm:$0xff] %vm204_vm1, %v8618_v13  ;;  %v1728_v46 = vpop.f32.mrb[41].mxu0  ;;  %9223 = vmatpush3.bf16.msra.mxu1 %v9222_v11  ;;  %9238 = vmatprep.subr.bf16.mxu0 %v9893_v51  ;;  %v1843_v31 = vld [vmem:[#allocation2 + $0x120] sm:$0xff]  ;;  %v1852_v22 = vld [vmem:[#allocation2 + $0x168] sm:$0xff] }
 0x3c2   :  { %1767 = vst.msk [vmem:[#allocation2 + $0x180] sm:$0xff] %vm204_vm1, %v1728_v46  ;;  %9225 = vmatprep.subr.bf16.mxu1 %v9224_v14  ;;  %v9239_v43 = vpack.c.bf16 %v1844_v10, %v1843_v31  ;;  %v1851_v63 = vld [vmem:[#allocation2 + $0x160] sm:$0xff]  ;;  %v1796_v40 = vld [vmem:[#allocation3 + $0xa8] sm:$0xff] }
 0x3c3   :  { %v9251_v30 = vpack.c.bf16 %v1852_v22, %v1851_v63  ;;  %v1800_v9 = vld [vmem:[#allocation3 + $0xc8] sm:$0xff]  ;;  %v1799_v14 = vld [vmem:[#allocation3 + $0xc0] sm:$0xff] }
 0x3c4   :  { %v8621_v24 = vpop.f32.mrb[42].mxu0  ;;  %9240 = vmatpush1.bf16.msra.mxu0 %v9239_v43  ;;  %v1846_v19 = vld [vmem:[#allocation2 + $0x138] sm:$0xff]  ;;  %v1803_v31 = vld [vmem:[#allocation3 + $0xe0] sm:$0xff] }
 0x3c5   :  { %1770 = vst.msk [vmem:[#allocation2 + $0x198] sm:$0xff] %vm204_vm1, %v8621_v24  ;;  %v1738_v34 = vpop.f32.mrb[43].mxu0  ;;  %9227 = vmatpush3.bf16.msra.mxu1 %v9226_v50  ;;  %9241 = vmatprep.subr.bf16.mxu0 %v9893_v51  ;;  %v1845_v38 = vld [vmem:[#allocation2 + $0x130] sm:$0xff]  ;;  %v1854_v48 = vld [vmem:[#allocation2 + $0x178] sm:$0xff] }
 0x3c6   :  { %1769 = vst.msk [vmem:[#allocation2 + $0x190] sm:$0xff] %vm204_vm1, %v1738_v34  ;;  %9229 = vmatprep.subr.bf16.mxu1 %v9228_v18  ;;  %v9242_v39 = vpack.c.bf16 %v1846_v19, %v1845_v38  ;;  %v1853_v44 = vld [vmem:[#allocation2 + $0x170] sm:$0xff]  ;;  %v1782_v43 = vld [vmem:[#allocation3 + $0x38] sm:$0xff] }
 0x3c7   :  { %v9254_v8 = vpack.c.bf16 %v1854_v48, %v1853_v44  ;;  %v1781_v50 = vld [vmem:[#allocation3 + $0x30] sm:$0xff]  ;;  %v1786_v24 = vld [vmem:[#allocation3 + $0x58] sm:$0xff] }
 0x3c8   :  { %v8624_v62 = vpop.f32.mrb[44].mxu0  ;;  %9243 = vmatpush1.bf16.msra.mxu0 %v9242_v39  ;;  %v1856_v3 = vld [vmem:[#allocation2 + $0x188] sm:$0xff]  ;;  %v1785_v18 = vld [vmem:[#allocation3 + $0x50] sm:$0xff]  ;;  %v1790_v19 = vld [vmem:[#allocation3 + $0x78] sm:$0xff] }
 0x3c9   :  { %1772 = vst.msk [vmem:[#allocation2 + $0x1a8] sm:$0xff] %vm204_vm1, %v8624_v62  ;;  %v1748_v42 = vpop.f32.mrb[45].mxu0  ;;  %9231 = vmatpush3.bf16.msra.mxu1 %v9230_v12  ;;  %9244 = vmatprep.subr.bf16.mxu0 %v9893_v51  ;;  %v1855_v57 = vld [vmem:[#allocation2 + $0x180] sm:$0xff]  ;;  %v1793_v34 = vld [vmem:[#allocation3 + $0x90] sm:$0xff]  ;;  %v1798_v38 = vld [vmem:[#allocation3 + $0xb8] sm:$0xff] }
 0x3ca   :  { %1771 = vst.msk [vmem:[#allocation2 + $0x1a0] sm:$0xff] %vm204_vm1, %v1748_v42  ;;  %v9257_v49 = vpack.c.bf16 %v1856_v3, %v1855_v57  ;;  %v1797_v39 = vld [vmem:[#allocation3 + $0xb0] sm:$0xff]  ;;  %v1802_v12 = vld [vmem:[#allocation3 + $0xd8] sm:$0xff] }
 0x3cb   :  { %v1805_v62 = vld [vmem:[#allocation3 + $0xf0] sm:$0xff] }
 0x3cc   :  { %v8627_v6 = vpop.f32.mrb[46].mxu0  ;;  %9246 = vmatpush1.bf16.msra.mxu0 %v9245_v21  ;;  %1953 = vmatmul.mubr.f32.vlgmr.msra.gmra.mrb[40].mxu1 %v1775_v52  ;;  %v1858_v4 = vld [vmem:[#allocation2 + $0x198] sm:$0xff] }
 0x3cd   :  { %1774 = vst.msk [vmem:[#allocation2 + $0x1b8] sm:$0xff] %vm204_vm1, %v8627_v6  ;;  %v1758_v55 = vpop.f32.mrb[47].mxu0  ;;  %9247 = vmatprep.subr.bf16.mxu0 %v9893_v51  ;;  %1957 = vmatprep.mubr.f32.mxu1 %v1780_v0  ;;  %v1857_v1 = vld [vmem:[#allocation2 + $0x190] sm:$0xff] }
 0x3ce   :  { %1773 = vst.msk [vmem:[#allocation2 + $0x1b0] sm:$0xff] %vm204_vm1, %v1758_v55  ;;  %v9260_v7 = vpack.c.bf16 %v1858_v4, %v1857_v1 }
 0x3d0   :  { %9249 = vmatpush1.bf16.msra.mxu0 %v9248_v59  ;;  %1958 = vmatmul.mubr.f32.gmra.mrb[42].mxu1 %v1779_v56  ;;  %v1860_v13 = vld [vmem:[#allocation2 + $0x1a8] sm:$0xff] }
 0x3d1   :  { %9250 = vmatprep.subr.bf16.mxu0 %v9893_v51  ;;  %1962 = vmatprep.mubr.f32.mxu1 %v1784_v61  ;;  %v1859_v11 = vld [vmem:[#allocation2 + $0x1a0] sm:$0xff] }
 0x3d2   :  { %v9263_v10 = vpack.c.bf16 %v1860_v13, %v1859_v11 }
 0x3d4   :  { %9252 = vmatpush1.bf16.msra.mxu0 %v9251_v30  ;;  %1963 = vmatmul.mubr.f32.gmra.mrb[44].mxu1 %v1783_v37  ;;  %v1862_v46 = vld [vmem:[#allocation2 + $0x1b8] sm:$0xff] }
 0x3d5   :  { %9253 = vmatprep.subr.bf16.mxu0 %v9893_v51  ;;  %1967 = vmatprep.mubr.f32.mxu1 %v1788_v32  ;;  %v1861_v25 = vld [vmem:[#allocation2 + $0x1b0] sm:$0xff] }
 0x3d6   :  { %v9266_v15 = vpack.c.bf16 %v1862_v46, %v1861_v25 }
 0x3d8   :  { %9255 = vmatpush1.bf16.msra.mxu0 %v9254_v8  ;;  %1968 = vmatmul.mubr.f32.gmra.mrb[46].mxu1 %v1787_v29 }
 0x3d9   :  { %9256 = vmatprep.subr.bf16.mxu0 %v9893_v51  ;;  %1972 = vmatprep.mubr.f32.mxu1 %v1792_v2 }
 0x3dc   :  { %9258 = vmatpush1.bf16.msra.mxu0 %v9257_v49  ;;  %1973 = vmatmul.mubr.f32.gmra.mrb[48].mxu1 %v1791_v28 }
 0x3dd   :  { %9259 = vmatprep.subr.bf16.mxu0 %v9893_v51  ;;  %1977 = vmatprep.mubr.f32.mxu1 %v1796_v40 }
 0x3e0   :  { %9261 = vmatpush1.bf16.msra.mxu0 %v9260_v7  ;;  %1978 = vmatmul.mubr.f32.gmra.mrb[50].mxu1 %v1795_v5 }
 0x3e1   :  { %9262 = vmatprep.subr.bf16.mxu0 %v9893_v51  ;;  %1982 = vmatprep.mubr.f32.mxu1 %v1800_v9 }
 0x3e4   :  { %9264 = vmatpush1.bf16.msra.mxu0 %v9263_v10  ;;  %1983 = vmatmul.mubr.f32.gmra.mrb[52].mxu1 %v1799_v14 }
 0x3e5   :  { %9265 = vmatprep.subr.bf16.mxu0 %v9893_v51  ;;  %1987 = vmatprep.mubr.f32.mxu1 %v1804_v47 }
 0x3e8   :  { %9267 = vmatpush1.bf16.msra.mxu0 %v9266_v15  ;;  %1988 = vmatmul.mubr.f32.gmra.mrb[54].mxu1 %v1803_v31 }
 0x3eb   :  { %2058 = vmatmul.mubr.f32.vlgmr.msra.gmra.mrb[48].mxu0 %v1777_v58 }
 0x3ec   :  { %7523 = vmatprep.mubr.msk.f32.mxu0 %vm1863_vm2, %v1782_v43 }
 0x3ef   :  { %2063 = vmatmul.mubr.f32.gmra.mrb[50].mxu0 %v1781_v50 }
 0x3f0   :  { %7524 = vmatprep.mubr.msk.f32.mxu0 %vm1863_vm2, %v1786_v24 }
 0x3f3   :  { %2068 = vmatmul.mubr.f32.gmra.mrb[52].mxu0 %v1785_v18 }
 0x3f4   :  { %7525 = vmatprep.mubr.msk.f32.mxu0 %vm1863_vm2, %v1790_v19 }
 0x3f7   :  { %2073 = vmatmul.mubr.f32.gmra.mrb[54].mxu0 %v1789_v20 }
 0x3f8   :  { %7526 = vmatprep.mubr.msk.f32.mxu0 %vm1863_vm2, %v1794_v23 }
 0x3fb   :  { %2078 = vmatmul.mubr.f32.gmra.mrb[56].mxu0 %v1793_v34 }
 0x3fc   :  { %7527 = vmatprep.mubr.msk.f32.mxu0 %vm1863_vm2, %v1798_v38 }
 0x3ff   :  { %2083 = vmatmul.mubr.f32.gmra.mrb[58].mxu0 %v1797_v39 }
 0x400   :  { %7528 = vmatprep.mubr.msk.f32.mxu0 %vm1863_vm2, %v1802_v12 }
 0x403   :  { %2088 = vmatmul.mubr.f32.gmra.mrb[60].mxu0 %v1801_v16 }
 0x404   :  { %7529 = vmatprep.mubr.msk.f32.mxu0 %vm1863_vm2, %v1806_v45 }
 0x407   :  { %2093 = vmatmul.mubr.f32.gmra.mrb[62].mxu0 %v1805_v62  ;;  %v2253_v62 = vld [vmem:[#allocation5 + $0xe0] sm:$0xff] }
 0x49f   :  { %v7928_v42 = vpop.f32.mrb[40].mxu1 }
 0x4a0   :  { %v7929_v52 = vpop.f32.mrb[41].mxu1 }
 0x4a1   :  { %v7930_v21 = vadd.f32 %v7929_v52, %v7928_v42  ;;  %v2254_v42 = vld [vmem:[#allocation5 + $0xe8] sm:$0xff] }
 0x4a3   :  { %v7931_v0 = vpop.f32.mrb[42].mxu1 }
 0x4a4   :  { %v7932_v53 = vpop.f32.mrb[43].mxu1 }
 0x4a5   :  { %v7933_v54 = vadd.f32 %v7932_v53, %v7931_v0  ;;  %v9268_v0 = vpack.c.bf16 %v2254_v42, %v2253_v62 }
 0x4a7   :  { %v7934_v6 = vpop.f32.mrb[44].mxu1  ;;  %9269 = vmatprep.subr.bf16.mxu1 %v9268_v0 }
 0x4a8   :  { %v7935_v55 = vpop.f32.mrb[45].mxu1  ;;  %9271 = vmatpush3.bf16.msra.mxu1 %v9268_v0 }
 0x4a9   :  { %v7936_v56 = vadd.f32 %v7935_v55, %v7934_v6 }
 0x4ab   :  { %v7937_v59 = vpop.f32.mrb[46].mxu1 }
 0x4ac   :  { %v7938_v61 = vpop.f32.mrb[47].mxu1 }
 0x4ad   :  { %v7939_v63 = vadd.f32 %v7938_v61, %v7937_v59 }
 0x4af   :  { %v7940_v22 = vpop.f32.mrb[48].mxu1 }
 0x4b0   :  { %v7941_v37 = vpop.f32.mrb[49].mxu1 }
 0x4b1   :  { %v7942_v30 = vadd.f32 %v7941_v37, %v7940_v22 }
 0x4b3   :  { %v7943_v32 = vpop.f32.mrb[50].mxu1 }
 0x4b4   :  { %v7944_v44 = vpop.f32.mrb[51].mxu1 }
 0x4b5   :  { %v7945_v48 = vadd.f32 %v7944_v44, %v7943_v32 }
 0x4b7   :  { %v7946_v29 = vpop.f32.mrb[52].mxu1 }
 0x4b8   :  { %v7947_v8 = vpop.f32.mrb[53].mxu1 }
 0x4b9   :  { %v7948_v2 = vadd.f32 %v7947_v8, %v7946_v29 }
 0x4bb   :  { %v7949_v57 = vpop.f32.mrb[54].mxu1 }
 0x4bc   :  { %v7950_v3 = vpop.f32.mrb[55].mxu1 }
 0x4bd   :  { %v7951_v28 = vadd.f32 %v7950_v3, %v7949_v57  ;;  %v2256_v57 = vld [vmem:[#allocation5 + $0xf8] sm:$0xff] }
 0x4be   :  { %v2059_v49 = vpop.f32.mrb[48].mxu0 }
 0x4bf   :  { %v10535_v40 = vadd.f32 %v7930_v21, %v2059_v49  ;;  %v2061_v1 = vpop.f32.mrb[49].mxu0 }
 0x4c1   :  { %v2100_v4 = vsel %vm204_vm1, %v10535_v40, 0.0  ;;  %v2124_v5 = vmul.f32 %v10535_v40, %v10535_v40 }
 0x4c2   :  { %v2064_v7 = vpop.f32.mrb[50].mxu0  ;;  %2101 = vadd.xlane.f32.xlu0 %v2100_v4 }
 0x4c3   :  { %v10541_v9 = vadd.f32 %v7933_v54, %v2064_v7  ;;  %v2066_v11 = vpop.f32.mrb[51].mxu0  ;;  %v2132_v14 = vsel %vm204_vm1, %v2124_v5, 0.0 }
 0x4c5   :  { %v2103_v13 = vsel %vm204_vm1, %v10541_v9, 0.0  ;;  %v2125_v10 = vmul.f32 %v10541_v9, %v10541_v9 }
 0x4c6   :  { %v2069_v47 = vpop.f32.mrb[52].mxu0  ;;  %2104 = vadd.xlane.f32.xlu1 %v2103_v13  ;;  %2133 = vadd.xlane.f32.xlu0 %v2132_v14 }
 0x4c7   :  { %v10548_v25 = vadd.f32 %v7936_v56, %v2069_v47  ;;  %v2071_v46 = vpop.f32.mrb[53].mxu0  ;;  %v2135_v31 = vsel %vm204_vm1, %v2125_v10, 0.0 }
 0x4c9   :  { %v2106_v15 = vsel %vm204_vm1, %v10548_v25, 0.0  ;;  %v2126_v58 = vmul.f32 %v10548_v25, %v10548_v25 }
 0x4ca   :  { %v2074_v43 = vpop.f32.mrb[54].mxu0  ;;  %2136 = vadd.xlane.f32.xlu1 %v2135_v31  ;;  %2107 = vadd.xlane.f32.xlu0 %v2106_v15 }
 0x4cb   :  { %v10555_v50 = vadd.f32 %v7939_v63, %v2074_v43  ;;  %v2076_v24 = vpop.f32.mrb[55].mxu0  ;;  %v2138_v19 = vsel %vm204_vm1, %v2126_v58, 0.0 }
 0x4cd   :  { %v2109_v18 = vsel %vm204_vm1, %v10555_v50, 0.0  ;;  %v2127_v20 = vmul.f32 %v10555_v50, %v10555_v50 }
 0x4ce   :  { %v2079_v23 = vpop.f32.mrb[56].mxu0  ;;  %2110 = vadd.xlane.f32.xlu1 %v2109_v18  ;;  %2139 = vadd.xlane.f32.xlu0 %v2138_v19 }
 0x4cf   :  { %v10562_v34 = vadd.f32 %v7942_v30, %v2079_v23  ;;  %v2081_v38 = vpop.f32.mrb[57].mxu0  ;;  %v2141_v39 = vsel %vm204_vm1, %v2127_v20, 0.0 }
 0x4d1   :  { %v2112_v12 = vsel %vm204_vm1, %v10562_v34, 0.0  ;;  %v2128_v16 = vmul.f32 %v10562_v34, %v10562_v34 }
 0x4d2   :  { %v2084_v45 = vpop.f32.mrb[58].mxu0  ;;  %2142 = vadd.xlane.f32.xlu1 %v2141_v39  ;;  %2113 = vadd.xlane.f32.xlu0 %v2112_v12 }
 0x4d3   :  { %v10569_v52 = vadd.f32 %v7945_v48, %v2084_v45  ;;  %v2086_v21 = vpop.f32.mrb[59].mxu0  ;;  %v2144_v54 = vsel %vm204_vm1, %v2128_v16, 0.0 }
 0x4d5   :  { %v2115_v53 = vsel %vm204_vm1, %v10569_v52, 0.0  ;;  %v2129_v6 = vmul.f32 %v10569_v52, %v10569_v52 }
 0x4d6   :  { %v2089_v55 = vpop.f32.mrb[60].mxu0  ;;  %2116 = vadd.xlane.f32.xlu1 %v2115_v53  ;;  %2145 = vadd.xlane.f32.xlu0 %v2144_v54 }
 0x4d7   :  { %v10576_v56 = vadd.f32 %v7948_v2, %v2089_v55  ;;  %v2091_v59 = vpop.f32.mrb[61].mxu0  ;;  %v2147_v61 = vsel %vm204_vm1, %v2129_v6, 0.0  ;;  %v2255_v2 = vld [vmem:[#allocation5 + $0xf0] sm:$0xff]  ;;  %v10601_v55 = vld [vmem:[%s12168_s4 + $0x6] ss:$0 sm:$0xff] }
 0x4d8   :  { %v9272_v3 = vpack.c.bf16 %v2256_v57, %v2255_v2 }
 0x4d9   :  { %v2118_v63 = vsel %vm204_vm1, %v10576_v56, 0.0  ;;  %v2130_v22 = vmul.f32 %v10576_v56, %v10576_v56 }
 0x4da   :  { %v2094_v37 = vpop.f32.mrb[62].mxu0  ;;  %2148 = vadd.xlane.f32.xlu1 %v2147_v61  ;;  %2119 = vadd.xlane.f32.xlu0 %v2118_v63 }
 0x4db   :  { %v10583_v30 = vadd.f32 %v7951_v28, %v2094_v37  ;;  %v2096_v32 = vpop.f32.mrb[63].mxu0  ;;  %v2150_v48 = vsel %vm204_vm1, %v2130_v22, 0.0  ;;  %9273 = vmatprep.subr.bf16.mxu1 %v9272_v3 }
 0x4dc   :  { %9275 = vmatpush3.bf16.msra.mxu1 %v9272_v3 }
 0x4dd   :  { %v2121_v44 = vsel %vm204_vm1, %v10583_v30, 0.0  ;;  %v2131_v29 = vmul.f32 %v10583_v30, %v10583_v30 }
 0x4de   :  { %2122 = vadd.xlane.f32.xlu1 %v2121_v44  ;;  %2151 = vadd.xlane.f32.xlu0 %v2150_v48 }
 0x4df   :  { %v2153_v8 = vsel %vm204_vm1, %v2131_v29, 0.0 }
 0x4e2   :  { %2154 = vadd.xlane.f32.xlu1 %v2153_v8 }
 0x54f   :  { %v2102_v28 = vpop.xlane.xlu0 %2101 }
 0x550   :  { %v2156_v49 = vmul.f32 0.03125, %v2102_v28 }
 0x552   :  { %v2172_v5 = vmul.f32 %v2156_v49, %v2156_v49  ;;  %v2188_v0 = vsub.f32 %v10535_v40, %v2156_v49  ;;  %v10610_v40 = vld [vmem:[%s12168_s4 + $0x7] ss:$0 sm:$0xff] }
 0x553   :  { %v2105_v1 = vpop.xlane.xlu1 %2104  ;;  %v2134_v4 = vpop.xlane.xlu0 %2133 }
 0x554   :  { %v2157_v7 = vmul.f32 0.03125, %v2105_v1  ;;  %v2164_v11 = vmul.f32 0.03125, %v2134_v4 }
 0x556   :  { %v2180_v13 = vsub.f32 %v2164_v11, %v2172_v5  ;;  %v2173_v47 = vmul.f32 %v2157_v7, %v2157_v7  ;;  %v2189_v44 = vsub.f32 %v10541_v9, %v2157_v7 }
 0x557   :  { %v2137_v14 = vpop.xlane.xlu1 %2136  ;;  %v2108_v10 = vpop.xlane.xlu0 %2107 }
 0x558   :  { %v2196_v46 = vadd.f32 1e-05, %v2180_v13  ;;  %v2165_v31 = vmul.f32 0.03125, %v2137_v14  ;;  %v2158_v15 = vmul.f32 0.03125, %v2108_v10 }
 0x55a   :  { %9711 = vrsqrt.f32 %v2196_v46  ;;  %v2181_v58 = vsub.f32 %v2165_v31, %v2173_v47  ;;  %v2174_v19 = vmul.f32 %v2158_v15, %v2158_v15  ;;  %v2190_v9 = vsub.f32 %v10548_v25, %v2158_v15 }
 0x55b   :  { %v2111_v43 = vpop.xlane.xlu1 %2110  ;;  %v2140_v24 = vpop.xlane.xlu0 %2139 }
 0x55c   :  { %v2197_v18 = vadd.f32 1e-05, %v2181_v58  ;;  %v10591_v20 = vmul.f32 0.03125, %v2111_v43  ;;  %v2166_v23 = vmul.f32 0.03125, %v2140_v24 }
 0x55e   :  { %9713 = vrsqrt.f32 %v2197_v18  ;;  %v2182_v38 = vsub.f32 %v2166_v23, %v2174_v19  ;;  %v2175_v16 = vmul.f32 %v10591_v20, %v10591_v20  ;;  %v2191_v19 = vsub.f32 %v10555_v50, %v10591_v20 }
 0x55f   :  { %v2143_v39 = vpop.xlane.xlu1 %2142  ;;  %v2114_v12 = vpop.xlane.xlu0 %2113 }
 0x560   :  { %v2198_v45 = vadd.f32 1e-05, %v2182_v38  ;;  %v2167_v62 = vmul.f32 0.03125, %v2143_v39  ;;  %v10595_v42 = vmul.f32 0.03125, %v2114_v12 }
 0x562   :  { %9715 = vrsqrt.f32 %v2198_v45  ;;  %v2183_v21 = vsub.f32 %v2167_v62, %v2175_v16  ;;  %v2176_v61 = vmul.f32 %v10595_v42, %v10595_v42 }
 0x563   :  { %v2117_v53 = vpop.xlane.xlu1 %2116  ;;  %v2146_v54 = vpop.xlane.xlu0 %2145 }
 0x564   :  { %v9712_v6 = vpop.eup %9711  ;;  %v2199_v59 = vadd.f32 1e-05, %v2183_v21  ;;  %v10605_v63 = vmul.f32 0.03125, %v2117_v53  ;;  %v2168_v22 = vmul.f32 0.03125, %v2146_v54 }
 0x565   :  { %v2212_v37 = vmul.f32 %v9712_v6, %v2188_v0  ;;  %v2192_v0 = vsub.f32 %v10562_v34, %v10595_v42 }
 0x566   :  { %9717 = vrsqrt.f32 %v2199_v59  ;;  %v2184_v32 = vsub.f32 %v2168_v22, %v2176_v61  ;;  %v2177_v57 = vmul.f32 %v10605_v63, %v10605_v63  ;;  %v2193_v61 = vsub.f32 %v10569_v52, %v10605_v63 }
 0x567   :  { %v2149_v48 = vpop.xlane.xlu1 %2148  ;;  %v2120_v29 = vpop.xlane.xlu0 %2119  ;;  %v2224_v8 = vmul.f32 %v10601_v55, %v2212_v37 }
 0x568   :  { %v9714_v2 = vpop.eup %9713  ;;  %v2200_v3 = vadd.f32 1e-05, %v2184_v32  ;;  %v2169_v28 = vmul.f32 0.03125, %v2149_v48  ;;  %v2162_v49 = vmul.f32 0.03125, %v2120_v29 }
 0x569   :  { %v2213_v1 = vmul.f32 %v9714_v2, %v2189_v44  ;;  %v2236_v4 = vadd.f32 %v10610_v40, %v2224_v8 }
 0x56a   :  { %9719 = vrsqrt.f32 %v2200_v3  ;;  %v2185_v5 = vsub.f32 %v2169_v28, %v2177_v57  ;;  %v2178_v46 = vmul.f32 %v2162_v49, %v2162_v49  ;;  %v2194_v44 = vsub.f32 %v10576_v56, %v2162_v49 }
 0x56b   :  { %v2225_v11 = vmul.f32 %v10601_v55, %v2213_v1  ;;  %v2123_v7 = vpop.xlane.xlu1 %2122  ;;  %v2152_v13 = vpop.xlane.xlu0 %2151  ;;  %v2244_v14 = vmax.f32 %v2236_v4, 0.0 }
 0x56c   :  { %v9716_v10 = vpop.eup %9715  ;;  %v2201_v47 = vadd.f32 1e-05, %v2185_v5  ;;  %v2163_v31 = vmul.f32 0.03125, %v2123_v7  ;;  %v2170_v58 = vmul.f32 0.03125, %v2152_v13 }
 0x56d   :  { %8636 = vmatprep.mubr.msk.f32.mxu1 %vm204_vm1, %v2244_v14  ;;  %v2237_v43 = vadd.f32 %v10610_v40, %v2225_v11  ;;  %v2214_v24 = vmul.f32 %v9716_v10, %v2190_v9 }
 0x56e   :  { %9721 = vrsqrt.f32 %v2201_v47  ;;  %v2186_v18 = vsub.f32 %v2170_v58, %v2178_v46  ;;  %v2179_v39 = vmul.f32 %v2163_v31, %v2163_v31  ;;  %v2195_v63 = vsub.f32 %v10583_v30, %v2163_v31 }
 0x56f   :  { %v2155_v23 = vpop.xlane.xlu1 %2154  ;;  %v2245_v25 = vmax.f32 %v2237_v43, 0.0  ;;  %v2226_v15 = vmul.f32 %v10601_v55, %v2214_v24 }
 0x570   :  { %v9718_v38 = vpop.eup %9717  ;;  %v2202_v12 = vadd.f32 1e-05, %v2186_v18  ;;  %v2171_v16 = vmul.f32 0.03125, %v2155_v23 }
 0x571   :  { %8637 = vmatmul.mubr.msk.f32.vlgmr.msra.gmra.mrb[56].mxu1 %vm204_vm1, %v2245_v25  ;;  %v2238_v45 = vadd.f32 %v10610_v40, %v2226_v15  ;;  %v2215_v62 = vmul.f32 %v9718_v38, %v2191_v19 }
 0x572   :  { %9723 = vrsqrt.f32 %v2202_v12  ;;  %v2187_v21 = vsub.f32 %v2171_v16, %v2179_v39 }
 0x573   :  { %v2246_v53 = vmax.f32 %v2238_v45, 0.0  ;;  %v2227_v50 = vmul.f32 %v10601_v55, %v2215_v62 }
 0x574   :  { %v9720_v20 = vpop.eup %9719  ;;  %v2203_v54 = vadd.f32 1e-05, %v2187_v21 }
 0x575   :  { %8639 = vmatprep.mubr.msk.f32.mxu1 %vm204_vm1, %v2246_v53  ;;  %v2239_v6 = vadd.f32 %v10610_v40, %v2227_v50  ;;  %v2216_v59 = vmul.f32 %v9720_v20, %v2192_v0 }
 0x576   :  { %9725 = vrsqrt.f32 %v2203_v54 }
 0x577   :  { %v2247_v22 = vmax.f32 %v2239_v6, 0.0  ;;  %v2228_v37 = vmul.f32 %v10601_v55, %v2216_v59  ;;  %v2549_v59 = vld [vmem:[#allocation5 + $0x100] sm:$0xff] }
 0x578   :  { %v9722_v32 = vpop.eup %9721 }
 0x579   :  { %8640 = vmatmul.mubr.msk.f32.gmra.mrb[58].mxu1 %vm204_vm1, %v2247_v22  ;;  %v2240_v34 = vadd.f32 %v10610_v40, %v2228_v37  ;;  %v2217_v42 = vmul.f32 %v9722_v32, %v2193_v61  ;;  %v2550_v61 = vld [vmem:[#allocation5 + $0x108] sm:$0xff]  ;;  %v2691_v22 = vld [vmem:[#allocation5 + $0x120] sm:$0xff] }
 0x57a   :  { %v9276_v37 = vpack.c.bf16 %v2550_v61, %v2549_v59  ;;  %v2692_v32 = vld [vmem:[#allocation5 + $0x128] sm:$0xff] }
 0x57b   :  { %v2248_v48 = vmax.f32 %v2240_v34, 0.0  ;;  %v2229_v29 = vmul.f32 %v10601_v55, %v2217_v42  ;;  %v9284_v34 = vpack.c.bf16 %v2692_v32, %v2691_v22  ;;  %v2551_v42 = vld [vmem:[#allocation5 + $0x110] sm:$0xff] }
 0x57c   :  { %v9724_v8 = vpop.eup %9723  ;;  %9277 = vmatprep.subr.bf16.mxu1 %v9276_v37 }
 0x57d   :  { %8642 = vmatprep.mubr.msk.f32.mxu1 %vm204_vm1, %v2248_v48  ;;  %v2241_v2 = vadd.f32 %v10610_v40, %v2229_v29  ;;  %v2218_v52 = vmul.f32 %v9724_v8, %v2194_v44  ;;  %9285 = vmatprep.subr.bf16.mxu0 %v9284_v34  ;;  %v2552_v44 = vld [vmem:[#allocation5 + $0x118] sm:$0xff]  ;;  %v2693_v48 = vld [vmem:[#allocation5 + $0x130] sm:$0xff] }
 0x57e   :  { %9279 = vmatpush3.bf16.msra.mxu1 %v9276_v37  ;;  %9287 = vmatpush3.bf16.msra.mxu0 %v9284_v34  ;;  %v9280_v29 = vpack.c.bf16 %v2552_v44, %v2551_v42  ;;  %v2694_v8 = vld [vmem:[#allocation5 + $0x138] sm:$0xff]  ;;  %v10727_v44 = vld [vmem:[%s12168_s4 + $0x8] ss:$0 sm:$0xff] }
 0x57f   :  { %v2249_v57 = vmax.f32 %v2241_v2, 0.0  ;;  %v2230_v3 = vmul.f32 %v10601_v55, %v2218_v52  ;;  %v9288_v2 = vpack.c.bf16 %v2694_v8, %v2693_v48  ;;  %v2809_v52 = vld [vmem:[#allocation5 + $0x140] sm:$0xff] }
 0x580   :  { %v9726_v28 = vpop.eup %9725  ;;  %9281 = vmatprep.subr.bf16.mxu1 %v9280_v29 }
 0x581   :  { %8643 = vmatmul.mubr.msk.f32.gmra.mrb[60].mxu1 %vm204_vm1, %v2249_v57  ;;  %v2242_v1 = vadd.f32 %v10610_v40, %v2230_v3  ;;  %v2219_v56 = vmul.f32 %v9726_v28, %v2195_v63  ;;  %9289 = vmatprep.subr.bf16.mxu0 %v9288_v2  ;;  %v2810_v63 = vld [vmem:[#allocation5 + $0x148] sm:$0xff]  ;;  %v2927_v57 = vld [vmem:[#allocation5 + $0x160] sm:$0xff] }
 0x582   :  { %9283 = vmatpush3.bf16.msra.mxu1 %v9280_v29  ;;  %9291 = vmatpush3.bf16.msra.mxu0 %v9288_v2  ;;  %v10704_v3 = vpack.c.bf16 %v2810_v63, %v2809_v52  ;;  %v2928_v28 = vld [vmem:[#allocation5 + $0x168] sm:$0xff] }
 0x583   :  { %v2250_v49 = vmax.f32 %v2242_v1, 0.0  ;;  %v2231_v4 = vmul.f32 %v10601_v55, %v2219_v56  ;;  %v10706_v1 = vpack.c.bf16 %v2928_v28, %v2927_v57 }
 0x584   :  { %9293 = vmatprep.subr.bf16.mxu1 %v10704_v3 }
 0x585   :  { %8645 = vmatprep.mubr.msk.f32.mxu1 %vm204_vm1, %v2250_v49  ;;  %v2243_v5 = vadd.f32 %v10610_v40, %v2231_v4  ;;  %9301 = vmatprep.subr.bf16.mxu0 %v10706_v1 }
 0x587   :  { %v2251_v11 = vmax.f32 %v2243_v5, 0.0 }
 0x589   :  { %8646 = vmatmul.mubr.msk.f32.gmra.mrb[62].mxu1 %vm204_vm1, %v2251_v11 }
 0x644   :  { %v10648_v30 = vpop.f32.mrb[56].mxu1 }
 0x645   :  { %v10650_v9 = vpop.f32.mrb[57].mxu1  ;;  %v2391_v7 = vsel %vm204_vm1, %v10648_v30, 0.0  ;;  %v2413_v13 = vmul.f32 %v10648_v30, %v10648_v30 }
 0x646   :  { %2392 = vadd.xlane.f32.xlu1 %v2391_v7  ;;  %v2388_v55 = vsel %vm204_vm1, %v10650_v9, 0.0  ;;  %v2412_v40 = vmul.f32 %v10650_v9, %v10650_v9 }
 0x647   :  { %2389 = vadd.xlane.f32.xlu0 %v2388_v55  ;;  %v2423_v14 = vsel %vm204_vm1, %v2413_v13, 0.0 }
 0x648   :  { %v2420_v10 = vsel %vm204_vm1, %v2412_v40, 0.0 }
 0x64a   :  { %2424 = vadd.xlane.f32.xlu1 %v2423_v14 }
 0x64b   :  { %2421 = vadd.xlane.f32.xlu0 %v2420_v10 }
 0x64c   :  { %v10662_v47 = vpop.f32.mrb[58].mxu1 }
 0x64d   :  { %v10664_v46 = vpop.f32.mrb[59].mxu1  ;;  %v2397_v31 = vsel %vm204_vm1, %v10662_v47, 0.0  ;;  %v2415_v58 = vmul.f32 %v10662_v47, %v10662_v47 }
 0x64e   :  { %2398 = vadd.xlane.f32.xlu1 %v2397_v31  ;;  %v2394_v43 = vsel %vm204_vm1, %v10664_v46, 0.0  ;;  %v2414_v24 = vmul.f32 %v10664_v46, %v10664_v46 }
 0x64f   :  { %2395 = vadd.xlane.f32.xlu0 %v2394_v43  ;;  %v2429_v18 = vsel %vm204_vm1, %v2415_v58, 0.0 }
 0x650   :  { %v2426_v19 = vsel %vm204_vm1, %v2414_v24, 0.0 }
 0x652   :  { %2430 = vadd.xlane.f32.xlu1 %v2429_v18 }
 0x653   :  { %2427 = vadd.xlane.f32.xlu0 %v2426_v19 }
 0x654   :  { %v10676_v23 = vpop.f32.mrb[60].mxu1 }
 0x655   :  { %v10678_v25 = vpop.f32.mrb[61].mxu1  ;;  %v2403_v15 = vsel %vm204_vm1, %v10676_v23, 0.0  ;;  %v2417_v38 = vmul.f32 %v10676_v23, %v10676_v23 }
 0x656   :  { %2404 = vadd.xlane.f32.xlu1 %v2403_v15  ;;  %v2400_v39 = vsel %vm204_vm1, %v10678_v25, 0.0  ;;  %v2416_v12 = vmul.f32 %v10678_v25, %v10678_v25 }
 0x657   :  { %2401 = vadd.xlane.f32.xlu0 %v2400_v39  ;;  %v2435_v16 = vsel %vm204_vm1, %v2417_v38, 0.0 }
 0x658   :  { %v2432_v45 = vsel %vm204_vm1, %v2416_v12, 0.0 }
 0x65a   :  { %2436 = vadd.xlane.f32.xlu1 %v2435_v16 }
 0x65b   :  { %2433 = vadd.xlane.f32.xlu0 %v2432_v45 }
 0x65c   :  { %v10690_v62 = vpop.f32.mrb[62].mxu1 }
 0x65d   :  { %v10692_v21 = vpop.f32.mrb[63].mxu1  ;;  %v2409_v0 = vsel %vm204_vm1, %v10690_v62, 0.0  ;;  %v2419_v53 = vmul.f32 %v10690_v62, %v10690_v62 }
 0x65e   :  { %2410 = vadd.xlane.f32.xlu1 %v2409_v0  ;;  %v2406_v50 = vsel %vm204_vm1, %v10692_v21, 0.0  ;;  %v2418_v20 = vmul.f32 %v10692_v21, %v10692_v21 }
 0x65f   :  { %2407 = vadd.xlane.f32.xlu0 %v2406_v50  ;;  %v2441_v54 = vsel %vm204_vm1, %v2419_v53, 0.0 }
 0x660   :  { %v2438_v6 = vsel %vm204_vm1, %v2418_v20, 0.0 }
 0x662   :  { %2442 = vadd.xlane.f32.xlu1 %v2441_v54 }
 0x663   :  { %2439 = vadd.xlane.f32.xlu0 %v2438_v6 }
 0x6d3   :  { %v2393_v56 = vpop.xlane.xlu1 %2392 }
 0x6d4   :  { %v2445_v49 = vmul.f32 0.03125, %v2393_v56  ;;  %v2390_v4 = vpop.xlane.xlu0 %2389 }
 0x6d5   :  { %v2444_v5 = vmul.f32 0.03125, %v2390_v4 }
 0x6d6   :  { %v2461_v7 = vmul.f32 %v2445_v49, %v2445_v49  ;;  %v2477_v37 = vsub.f32 %v10648_v30, %v2445_v49 }
 0x6d7   :  { %v2425_v11 = vpop.xlane.xlu1 %2424  ;;  %v2460_v40 = vmul.f32 %v2444_v5, %v2444_v5  ;;  %v2476_v42 = vsub.f32 %v10650_v9, %v2444_v5  ;;  %v10736_v9 = vld [vmem:[%s12168_s4 + $0x9] ss:$0 sm:$0xff] }
 0x6d8   :  { %v2453_v13 = vmul.f32 0.03125, %v2425_v11  ;;  %v2422_v55 = vpop.xlane.xlu0 %2421 }
 0x6d9   :  { %v2452_v14 = vmul.f32 0.03125, %v2422_v55 }
 0x6da   :  { %v2469_v10 = vsub.f32 %v2453_v13, %v2461_v7 }
 0x6db   :  { %v2468_v31 = vsub.f32 %v2452_v14, %v2460_v40  ;;  %v2399_v58 = vpop.xlane.xlu1 %2398 }
 0x6dc   :  { %v2485_v43 = vadd.f32 1e-05, %v2469_v10  ;;  %v10710_v24 = vmul.f32 0.03125, %v2399_v58  ;;  %v2396_v18 = vpop.xlane.xlu0 %2395 }
 0x6dd   :  { %v2484_v19 = vadd.f32 1e-05, %v2468_v31  ;;  %v10712_v15 = vmul.f32 0.03125, %v2396_v18  ;;  %v2811_v18 = vld [vmem:[#allocation5 + $0x150] sm:$0xff] }
 0x6de   :  { %9727 = vrsqrt.f32 %v2485_v43  ;;  %v2463_v39 = vmul.f32 %v10710_v24, %v10710_v24  ;;  %v2479_v58 = vsub.f32 %v10662_v47, %v10710_v24 }
 0x6df   :  { %9729 = vrsqrt.f32 %v2484_v19  ;;  %v2431_v38 = vpop.xlane.xlu1 %2430  ;;  %v2462_v45 = vmul.f32 %v10712_v15, %v10712_v15  ;;  %v2812_v19 = vld [vmem:[#allocation5 + $0x158] sm:$0xff] }
 0x6e0   :  { %v2455_v12 = vmul.f32 0.03125, %v2431_v38  ;;  %v2428_v16 = vpop.xlane.xlu0 %2427 }
 0x6e1   :  { %v2454_v0 = vmul.f32 0.03125, %v2428_v16 }
 0x6e2   :  { %v2471_v53 = vsub.f32 %v2455_v12, %v2463_v39  ;;  %v2478_v12 = vsub.f32 %v10664_v46, %v10712_v15 }
 0x6e3   :  { %v2470_v50 = vsub.f32 %v2454_v0, %v2462_v45  ;;  %v2405_v20 = vpop.xlane.xlu1 %2404 }
 0x6e4   :  { %v2487_v54 = vadd.f32 1e-05, %v2471_v53  ;;  %v10718_v6 = vmul.f32 0.03125, %v2405_v20  ;;  %v2402_v59 = vpop.xlane.xlu0 %2401  ;;  %v2929_v53 = vld [vmem:[#allocation5 + $0x170] sm:$0xff] }
 0x6e5   :  { %v2486_v61 = vadd.f32 1e-05, %v2470_v50  ;;  %v10720_v22 = vmul.f32 0.03125, %v2402_v59 }
 0x6e6   :  { %9731 = vrsqrt.f32 %v2487_v54  ;;  %v2465_v48 = vmul.f32 %v10718_v6, %v10718_v6 }
 0x6e7   :  { %9733 = vrsqrt.f32 %v2486_v61  ;;  %v2437_v32 = vpop.xlane.xlu1 %2436  ;;  %v2464_v30 = vmul.f32 %v10720_v22, %v10720_v22  ;;  %v9296_v61 = vpack.c.bf16 %v2812_v19, %v2811_v18 }
 0x6e8   :  { %v9728_v34 = vpop.eup %9727  ;;  %v2457_v29 = vmul.f32 0.03125, %v2437_v32  ;;  %v2434_v8 = vpop.xlane.xlu0 %2433 }
 0x6e9   :  { %v9730_v2 = vpop.eup %9729  ;;  %v2501_v52 = vmul.f32 %v9728_v34, %v2477_v37  ;;  %v2456_v63 = vmul.f32 0.03125, %v2434_v8  ;;  %v3045_v34 = vld [vmem:[#allocation5 + $0x180] sm:$0xff] }
 0x6ea   :  { %v2500_v57 = vmul.f32 %v9730_v2, %v2476_v42  ;;  %v2473_v28 = vsub.f32 %v2457_v29, %v2465_v48  ;;  %v3046_v42 = vld [vmem:[#allocation5 + $0x188] sm:$0xff]  ;;  %v3163_v8 = vld [vmem:[#allocation5 + $0x1a0] sm:$0xff] }
 0x6eb   :  { %v2513_v56 = vmul.f32 %v10727_v44, %v2501_v52  ;;  %v2472_v49 = vsub.f32 %v2456_v63, %v2464_v30  ;;  %v2411_v4 = vpop.xlane.xlu1 %2410  ;;  %v3164_v2 = vld [vmem:[#allocation5 + $0x1a8] sm:$0xff] }
 0x6ec   :  { %v2512_v5 = vmul.f32 %v10727_v44, %v2500_v57  ;;  %v2489_v11 = vadd.f32 1e-05, %v2473_v28  ;;  %v10740_v7 = vmul.f32 0.03125, %v2411_v4  ;;  %v2408_v13 = vpop.xlane.xlu0 %2407  ;;  %v10774_v57 = vpack.c.bf16 %v3046_v42, %v3045_v34 }
 0x6ed   :  { %v2525_v55 = vadd.f32 %v10736_v9, %v2513_v56  ;;  %v2488_v40 = vadd.f32 1e-05, %v2472_v49  ;;  %v10743_v14 = vmul.f32 0.03125, %v2408_v13  ;;  %v2481_v56 = vsub.f32 %v10676_v23, %v10718_v6 }
 0x6ee   :  { %v2524_v10 = vadd.f32 %v10736_v9, %v2512_v5  ;;  %9735 = vrsqrt.f32 %v2489_v11  ;;  %v2467_v16 = vmul.f32 %v10740_v7, %v10740_v7  ;;  %v9316_v49 = vpack.c.bf16 %v3164_v2, %v3163_v8 }
 0x6ef   :  { %v2533_v31 = vadd.f32 %v2525_v55, %v10301_v17  ;;  %9737 = vrsqrt.f32 %v2488_v40  ;;  %v2443_v43 = vpop.xlane.xlu1 %2442  ;;  %v2930_v17 = vld [vmem:[#allocation5 + $0x178] sm:$0xff]  ;;  %v2466_v47 = vmul.f32 %v10743_v14, %v10743_v14  ;;  %v2480_v11 = vsub.f32 %v10678_v25, %v10720_v22 }
 0x6f0   :  { %v9732_v38 = vpop.eup %9731  ;;  %v2532_v39 = vadd.f32 %v2524_v10, %v10308_v35  ;;  %v2459_v45 = vmul.f32 0.03125, %v2443_v43  ;;  %v2440_v0 = vpop.xlane.xlu0 %2439  ;;  %v9304_v32 = vpack.c.bf16 %v2930_v17, %v2929_v53  ;;  %v2483_v40 = vsub.f32 %v10690_v62, %v10740_v7  ;;  %v3281_v53 = vld [vmem:[#allocation5 + $0x1c0] sm:$0xff]  ;;  %v3282_v17 = vld [vmem:[#allocation5 + $0x1c8] sm:$0xff] }
 0x6f1   :  { %v9734_v50 = vpop.eup %9733  ;;  %v2503_v20 = vmul.f32 %v9732_v38, %v2479_v58  ;;  %v2458_v24 = vmul.f32 0.03125, %v2440_v0  ;;  %v10758_v37 = vmax.f32 %v2533_v31, 0.0  ;;  %v2482_v58 = vsub.f32 %v10692_v21, %v10743_v14 }
 0x6f2   :  { %v10756_v54 = vmax.f32 %v2532_v39, 0.0  ;;  %v2502_v59 = vmul.f32 %v9734_v50, %v2478_v12  ;;  %v2475_v35 = vsub.f32 %v2459_v45, %v2467_v16  ;;  %v3047_v16 = vld [vmem:[#allocation5 + $0x190] sm:$0xff]  ;;  %v9324_v50 = vpack.c.bf16 %v3282_v17, %v3281_v53 }
 0x6f3   :  { %v2515_v46 = vmul.f32 %v10727_v44, %v2503_v20  ;;  %v2474_v15 = vsub.f32 %v2458_v24, %v2466_v47  ;;  %v3283_v20 = vld [vmem:[#allocation5 + $0x1d0] sm:$0xff]  ;;  %v3284_v47 = vld [vmem:[#allocation5 + $0x1d8] sm:$0xff] }
 0x6f4   :  { %v2514_v48 = vmul.f32 %v10727_v44, %v2502_v59  ;;  %v2491_v29 = vadd.f32 1e-05, %v2475_v35  ;;  %8656 = vmatprep.mubr.msk.f32.mxu1 %vm204_vm1, %v10756_v54  ;;  %8676 = vmatprep.mubr.msk.f32.mxu0 %vm204_vm1, %v10756_v54  ;;  %v9328_v24 = vpack.c.bf16 %v3284_v47, %v3283_v20  ;;  %v3399_v59 = vld [vmem:[#allocation3 + $0x8] sm:$0xff]  ;;  %v3401_v35 = vld [vmem:[#allocation3 + $0x18] sm:$0xff] }
 0x6f5   :  { %v2527_v52 = vadd.f32 %v10736_v9, %v2515_v46  ;;  %v2490_v30 = vadd.f32 1e-05, %v2474_v15  ;;  %8657 = vmatmul.mubr.msk.f32.vlgmr.msra.gmra.mrb[64].mxu1 %vm204_vm1, %v10758_v37  ;;  %8677 = vmatmul.mubr.msk.f32.vlgmr.msra.gmra.mrb[64].mxu0 %vm204_vm1, %v10758_v37 }
 0x6f6   :  { %v2526_v63 = vadd.f32 %v10736_v9, %v2514_v48  ;;  %9739 = vrsqrt.f32 %v2491_v29  ;;  %9295 = vmatpush3.bf16.msra.mxu1 %v10704_v3  ;;  %9303 = vmatpush3.bf16.msra.mxu0 %v10706_v1 }
 0x6f7   :  { %v2535_v28 = vadd.f32 %v2527_v52, %v10329_v60  ;;  %9741 = vrsqrt.f32 %v2490_v30  ;;  %9297 = vmatprep.subr.bf16.mxu1 %v9296_v61  ;;  %9305 = vmatprep.subr.bf16.mxu0 %v9304_v32 }
 0x6f8   :  { %v9736_v4 = vpop.eup %9735  ;;  %v2534_v5 = vadd.f32 %v2526_v63, %v10313_v41 }
 0x6f9   :  { %v9738_v3 = vpop.eup %9737  ;;  %v2505_v13 = vmul.f32 %v9736_v4, %v2481_v56  ;;  %v10784_v60 = vmax.f32 %v2535_v28, 0.0 }
 0x6fa   :  { %v10782_v1 = vmax.f32 %v2534_v5, 0.0  ;;  %v2504_v55 = vmul.f32 %v9738_v3, %v2480_v11  ;;  %9299 = vmatpush3.bf16.msra.mxu1 %v9296_v61  ;;  %9307 = vmatpush3.bf16.msra.mxu0 %v9304_v32 }
 0x6fb   :  { %v2517_v23 = vmul.f32 %v10727_v44, %v2505_v13  ;;  %9309 = vmatprep.subr.bf16.mxu1 %v10774_v57  ;;  %9317 = vmatprep.subr.bf16.mxu0 %v9316_v49 }
 0x6fc   :  { %v2516_v6 = vmul.f32 %v10727_v44, %v2504_v55  ;;  %8659 = vmatprep.mubr.msk.f32.mxu1 %vm204_vm1, %v10782_v1  ;;  %8679 = vmatprep.mubr.msk.f32.mxu0 %vm204_vm1, %v10782_v1 }
 0x6fd   :  { %v2529_v41 = vadd.f32 %v10736_v9, %v2517_v23  ;;  %8660 = vmatmul.mubr.msk.f32.gmra.mrb[66].mxu1 %vm204_vm1, %v10784_v60  ;;  %8680 = vmatmul.mubr.msk.f32.gmra.mrb[66].mxu0 %vm204_vm1, %v10784_v60 }
 0x6fe   :  { %v2528_v25 = vadd.f32 %v10736_v9, %v2516_v6 }
 0x6ff   :  { %v2537_v22 = vadd.f32 %v2529_v41, %v10343_v27 }
 0x700   :  { %v9740_v10 = vpop.eup %9739  ;;  %v2536_v31 = vadd.f32 %v2528_v25, %v10341_v33 }
 0x701   :  { %v9742_v43 = vpop.eup %9741  ;;  %v2507_v18 = vmul.f32 %v9740_v10, %v2483_v40  ;;  %v10807_v39 = vmax.f32 %v2537_v22, 0.0 }
 0x702   :  { %v10805_v19 = vmax.f32 %v2536_v31, 0.0  ;;  %v2506_v38 = vmul.f32 %v9742_v43, %v2482_v58 }
 0x703   :  { %v2519_v12 = vmul.f32 %v10727_v44, %v2507_v18 }
 0x704   :  { %v2518_v27 = vmul.f32 %v10727_v44, %v2506_v38  ;;  %8662 = vmatprep.mubr.msk.f32.mxu1 %vm204_vm1, %v10805_v19  ;;  %8682 = vmatprep.mubr.msk.f32.mxu0 %vm204_vm1, %v10805_v19 }
 0x705   :  { %v2531_v33 = vadd.f32 %v10736_v9, %v2519_v12  ;;  %8663 = vmatmul.mubr.msk.f32.gmra.mrb[68].mxu1 %vm204_vm1, %v10807_v39  ;;  %8683 = vmatmul.mubr.msk.f32.gmra.mrb[68].mxu0 %vm204_vm1, %v10807_v39 }
 0x706   :  { %v2530_v62 = vadd.f32 %v10736_v9, %v2518_v27  ;;  %v3165_v9 = vld [vmem:[#allocation5 + $0x1b0] sm:$0xff] }
 0x707   :  { %v2539_v21 = vadd.f32 %v2531_v33, %v10373_v36  ;;  %v3048_v36 = vld [vmem:[#allocation5 + $0x198] sm:$0xff] }
 0x708   :  { %v2538_v44 = vadd.f32 %v2530_v62, %v10366_v26  ;;  %v3166_v26 = vld [vmem:[#allocation5 + $0x1b8] sm:$0xff]  ;;  %v9312_v45 = vpack.c.bf16 %v3048_v36, %v3047_v16 }
 0x709   :  { %v10825_v14 = vmax.f32 %v2539_v21, 0.0  ;;  %v9320_v0 = vpack.c.bf16 %v3166_v26, %v3165_v9 }
 0x70a   :  { %v10823_v7 = vmax.f32 %v2538_v44, 0.0 }
 0x70c   :  { %8665 = vmatprep.mubr.msk.f32.mxu1 %vm204_vm1, %v10823_v7  ;;  %8685 = vmatprep.mubr.msk.f32.mxu0 %vm204_vm1, %v10823_v7 }
 0x70d   :  { %8666 = vmatmul.mubr.msk.f32.gmra.mrb[70].mxu1 %vm204_vm1, %v10825_v14  ;;  %8686 = vmatmul.mubr.msk.f32.gmra.mrb[70].mxu0 %vm204_vm1, %v10825_v14 }
 0x70e   :  { %8696 = vmatprep.mubr.msk.f32.mxu1 %vm204_vm1, %v10756_v54  ;;  %8716 = vmatprep.mubr.msk.f32.mxu0 %vm204_vm1, %v10756_v54 }
 0x711   :  { %8697 = vmatmul.mubr.msk.f32.vlgmr.msra.gmra.mrb[72].mxu1 %vm204_vm1, %v10758_v37  ;;  %8717 = vmatmul.mubr.msk.f32.vlgmr.msra.gmra.mrb[72].mxu0 %vm204_vm1, %v10758_v37 }
 0x712   :  { %8699 = vmatprep.mubr.msk.f32.mxu1 %vm204_vm1, %v10782_v1  ;;  %8719 = vmatprep.mubr.msk.f32.mxu0 %vm204_vm1, %v10782_v1 }
 0x713   :  { %9311 = vmatpush3.bf16.msra.mxu1 %v10774_v57  ;;  %9319 = vmatpush3.bf16.msra.mxu0 %v9316_v49 }
 0x714   :  { %9313 = vmatprep.subr.bf16.mxu1 %v9312_v45  ;;  %9321 = vmatprep.subr.bf16.mxu0 %v9320_v0 }
 0x715   :  { %8700 = vmatmul.mubr.msk.f32.gmra.mrb[74].mxu1 %vm204_vm1, %v10784_v60  ;;  %8720 = vmatmul.mubr.msk.f32.gmra.mrb[74].mxu0 %vm204_vm1, %v10784_v60 }
 0x716   :  { %8702 = vmatprep.mubr.msk.f32.mxu1 %vm204_vm1, %v10805_v19  ;;  %8722 = vmatprep.mubr.msk.f32.mxu0 %vm204_vm1, %v10805_v19 }
 0x717   :  { %9315 = vmatpush3.bf16.msra.mxu1 %v9312_v45  ;;  %9323 = vmatpush3.bf16.msra.mxu0 %v9320_v0 }
 0x718   :  { %9325 = vmatprep.subr.bf16.mxu1 %v9324_v50 }
 0x719   :  { %8703 = vmatmul.mubr.msk.f32.gmra.mrb[76].mxu1 %vm204_vm1, %v10807_v39  ;;  %8723 = vmatmul.mubr.msk.f32.gmra.mrb[76].mxu0 %vm204_vm1, %v10807_v39 }
 0x71a   :  { %8705 = vmatprep.mubr.msk.f32.mxu1 %vm204_vm1, %v10823_v7  ;;  %8725 = vmatprep.mubr.msk.f32.mxu0 %vm204_vm1, %v10823_v7 }
 0x71d   :  { %8706 = vmatmul.mubr.msk.f32.gmra.mrb[78].mxu1 %vm204_vm1, %v10825_v14  ;;  %8726 = vmatmul.mubr.msk.f32.gmra.mrb[78].mxu0 %vm204_vm1, %v10825_v14 }
 0x71e   :  { %8736 = vmatprep.mubr.msk.f32.mxu1 %vm204_vm1, %v10756_v54  ;;  %8756 = vmatprep.mubr.msk.f32.mxu0 %vm204_vm1, %v10756_v54 }
 0x721   :  { %8737 = vmatmul.mubr.msk.f32.vlgmr.msra.gmra.mrb[80].mxu1 %vm204_vm1, %v10758_v37  ;;  %8757 = vmatmul.mubr.msk.f32.vlgmr.msra.gmra.mrb[80].mxu0 %vm204_vm1, %v10758_v37 }
 0x722   :  { %8739 = vmatprep.mubr.msk.f32.mxu1 %vm204_vm1, %v10782_v1  ;;  %8759 = vmatprep.mubr.msk.f32.mxu0 %vm204_vm1, %v10782_v1 }
 0x723   :  { %9327 = vmatpush3.bf16.msra.mxu1 %v9324_v50 }
 0x724   :  { %9329 = vmatprep.subr.bf16.mxu1 %v9328_v24 }
 0x725   :  { %8740 = vmatmul.mubr.msk.f32.gmra.mrb[82].mxu1 %vm204_vm1, %v10784_v60  ;;  %8760 = vmatmul.mubr.msk.f32.gmra.mrb[82].mxu0 %vm204_vm1, %v10784_v60 }
 0x726   :  { %8742 = vmatprep.mubr.msk.f32.mxu1 %vm204_vm1, %v10805_v19  ;;  %8762 = vmatprep.mubr.msk.f32.mxu0 %vm204_vm1, %v10805_v19 }
 0x727   :  { %9331 = vmatpush3.bf16.msra.mxu1 %v9328_v24 }
 0x728   :  { %9364 = vmatprep.subr.bf16.mxu1 %v9893_v51 }
 0x729   :  { %8743 = vmatmul.mubr.msk.f32.gmra.mrb[84].mxu1 %vm204_vm1, %v10807_v39  ;;  %8763 = vmatmul.mubr.msk.f32.gmra.mrb[84].mxu0 %vm204_vm1, %v10807_v39 }
 0x72a   :  { %8745 = vmatprep.mubr.msk.f32.mxu1 %vm204_vm1, %v10823_v7  ;;  %8765 = vmatprep.mubr.msk.f32.mxu0 %vm204_vm1, %v10823_v7 }
 0x72d   :  { %8746 = vmatmul.mubr.msk.f32.gmra.mrb[86].mxu1 %vm204_vm1, %v10825_v14  ;;  %8766 = vmatmul.mubr.msk.f32.gmra.mrb[86].mxu0 %vm204_vm1, %v10825_v14 }
 0x72e   :  { %8776 = vmatprep.mubr.msk.f32.mxu1 %vm204_vm1, %v10756_v54  ;;  %3574 = vmatprep.mubr.f32.mxu0 %v3399_v59 }
 0x731   :  { %8777 = vmatmul.mubr.msk.f32.vlgmr.msra.gmra.mrb[88].mxu1 %vm204_vm1, %v10758_v37 }
 0x732   :  { %8779 = vmatprep.mubr.msk.f32.mxu1 %vm204_vm1, %v10782_v1 }
 0x735   :  { %8780 = vmatmul.mubr.msk.f32.gmra.mrb[90].mxu1 %vm204_vm1, %v10784_v60 }
 0x736   :  { %8782 = vmatprep.mubr.msk.f32.mxu1 %vm204_vm1, %v10805_v19 }
 0x739   :  { %8783 = vmatmul.mubr.msk.f32.gmra.mrb[92].mxu1 %vm204_vm1, %v10807_v39 }
 0x73a   :  { %8785 = vmatprep.mubr.msk.f32.mxu1 %vm204_vm1, %v10823_v7 }
 0x73d   :  { %8786 = vmatmul.mubr.msk.f32.gmra.mrb[94].mxu1 %vm204_vm1, %v10825_v14 }
 0x73e   :  { %7598 = vmatprep.mubr.msk.f32.mxu1 %vm1863_vm2, %v3401_v35 }
 0x7c8   :  { %v8658_v61 = vpop.f32.mrb[64].mxu1  ;;  %v8678_v46 = vpop.f32.mrb[64].mxu0 }
 0x7c9   :  { %2683 = vst.msk [vmem:[#allocation2 + $0x8] sm:$0xff] %vm204_vm1, %v8658_v61  ;;  %2801 = vst.msk [vmem:[#allocation2 + $0x48] sm:$0xff] %vm204_vm1, %v8678_v46  ;;  %v2643_v15 = vpop.f32.mrb[65].mxu1  ;;  %v2761_v32 = vpop.f32.mrb[65].mxu0 }
 0x7ca   :  { %2682 = vst.msk [vmem:[#allocation2] sm:$0xff] %vm204_vm1, %v2643_v15  ;;  %2800 = vst.msk [vmem:[#allocation2 + $0x40] sm:$0xff] %vm204_vm1, %v2761_v32 }
 0x7d0   :  { %v8661_v34 = vpop.f32.mrb[66].mxu1  ;;  %v8681_v42 = vpop.f32.mrb[66].mxu0  ;;  %v3431_v40 = vld [vmem:[#allocation2 + $0x8] sm:$0xff] }
 0x7d1   :  { %2685 = vst.msk [vmem:[#allocation2 + $0x18] sm:$0xff] %vm204_vm1, %v8661_v34  ;;  %2803 = vst.msk [vmem:[#allocation2 + $0x58] sm:$0xff] %vm204_vm1, %v8681_v42  ;;  %v2653_v48 = vpop.f32.mrb[67].mxu1  ;;  %v2771_v29 = vpop.f32.mrb[67].mxu0  ;;  %v3430_v22 = vld [vmem:[#allocation2] sm:$0xff] }
 0x7d2   :  { %2684 = vst.msk [vmem:[#allocation2 + $0x10] sm:$0xff] %vm204_vm1, %v2653_v48  ;;  %2802 = vst.msk [vmem:[#allocation2 + $0x50] sm:$0xff] %vm204_vm1, %v2771_v29  ;;  %v9334_v18 = vpack.c.bf16 %v3431_v40, %v3430_v22 }
 0x7d8   :  { %v8664_v8 = vpop.f32.mrb[68].mxu1  ;;  %v8684_v2 = vpop.f32.mrb[68].mxu0  ;;  %v3433_v62 = vld [vmem:[#allocation2 + $0x18] sm:$0xff] }
 0x7d9   :  { %2687 = vst.msk [vmem:[#allocation2 + $0x28] sm:$0xff] %vm204_vm1, %v8664_v8  ;;  %2805 = vst.msk [vmem:[#allocation2 + $0x68] sm:$0xff] %vm204_vm1, %v8684_v2  ;;  %v2663_v52 = vpop.f32.mrb[69].mxu1  ;;  %v2781_v30 = vpop.f32.mrb[69].mxu0  ;;  %v3432_v33 = vld [vmem:[#allocation2 + $0x10] sm:$0xff] }
 0x7da   :  { %2686 = vst.msk [vmem:[#allocation2 + $0x20] sm:$0xff] %vm204_vm1, %v2663_v52  ;;  %2804 = vst.msk [vmem:[#allocation2 + $0x60] sm:$0xff] %vm204_vm1, %v2781_v30  ;;  %v9338_v9 = vpack.c.bf16 %v3433_v62, %v3432_v33  ;;  %v3440_v40 = vld [vmem:[#allocation2 + $0x50] sm:$0xff] }
 0x7e0   :  { %v8667_v63 = vpop.f32.mrb[70].mxu1  ;;  %v8687_v57 = vpop.f32.mrb[70].mxu0  ;;  %v3435_v17 = vld [vmem:[#allocation2 + $0x28] sm:$0xff] }
 0x7e1   :  { %2689 = vst.msk [vmem:[#allocation2 + $0x38] sm:$0xff] %vm204_vm1, %v8667_v63  ;;  %2807 = vst.msk [vmem:[#allocation2 + $0x78] sm:$0xff] %vm204_vm1, %v8687_v57  ;;  %v2673_v28 = vpop.f32.mrb[71].mxu1  ;;  %v2791_v56 = vpop.f32.mrb[71].mxu0  ;;  %v3434_v53 = vld [vmem:[#allocation2 + $0x20] sm:$0xff] }
 0x7e2   :  { %2688 = vst.msk [vmem:[#allocation2 + $0x30] sm:$0xff] %vm204_vm1, %v2673_v28  ;;  %2806 = vst.msk [vmem:[#allocation2 + $0x70] sm:$0xff] %vm204_vm1, %v2791_v56  ;;  %v9342_v59 = vpack.c.bf16 %v3435_v17, %v3434_v53  ;;  %v3438_v56 = vld [vmem:[#allocation2 + $0x40] sm:$0xff] }
 0x7e4   :  { %v8698_v49 = vpop.f32.mrb[72].mxu1  ;;  %v8718_v4 = vpop.f32.mrb[72].mxu0 }
 0x7e5   :  { %2919 = vst.msk [vmem:[#allocation2 + $0x88] sm:$0xff] %vm204_vm1, %v8698_v49  ;;  %3037 = vst.msk [vmem:[#allocation2 + $0xc8] sm:$0xff] %vm204_vm1, %v8718_v4  ;;  %v2879_v5 = vpop.f32.mrb[73].mxu1  ;;  %v2997_v11 = vpop.f32.mrb[73].mxu0  ;;  %v3439_v49 = vld [vmem:[#allocation2 + $0x48] sm:$0xff] }
 0x7e6   :  { %2918 = vst.msk [vmem:[#allocation2 + $0x80] sm:$0xff] %vm204_vm1, %v2879_v5  ;;  %3036 = vst.msk [vmem:[#allocation2 + $0xc0] sm:$0xff] %vm204_vm1, %v2997_v11 }
 0x7e8   :  { %v8701_v3 = vpop.f32.mrb[74].mxu1  ;;  %v8721_v13 = vpop.f32.mrb[74].mxu0  ;;  %v3437_v32 = vld [vmem:[#allocation2 + $0x38] sm:$0xff] }
 0x7e9   :  { %2921 = vst.msk [vmem:[#allocation2 + $0x98] sm:$0xff] %vm204_vm1, %v8701_v3  ;;  %3039 = vst.msk [vmem:[#allocation2 + $0xd8] sm:$0xff] %vm204_vm1, %v8721_v13  ;;  %v2889_v55 = vpop.f32.mrb[75].mxu1  ;;  %v3007_v23 = vpop.f32.mrb[75].mxu0  ;;  %v3436_v15 = vld [vmem:[#allocation2 + $0x30] sm:$0xff] }
 0x7ea   :  { %2920 = vst.msk [vmem:[#allocation2 + $0x90] sm:$0xff] %vm204_vm1, %v2889_v55  ;;  %3038 = vst.msk [vmem:[#allocation2 + $0xd0] sm:$0xff] %vm204_vm1, %v3007_v23  ;;  %v9346_v52 = vpack.c.bf16 %v3437_v32, %v3436_v15  ;;  %v9350_v23 = vpack.c.bf16 %v3439_v49, %v3438_v56  ;;  %v3407_v56 = vld [vmem:[#allocation3 + $0x48] sm:$0xff] }
 0x7ec   :  { %v8704_v6 = vpop.f32.mrb[76].mxu1  ;;  %v8724_v41 = vpop.f32.mrb[76].mxu0  ;;  %v3447_v25 = vld [vmem:[#allocation2 + $0x88] sm:$0xff] }
 0x7ed   :  { %2923 = vst.msk [vmem:[#allocation2 + $0xa8] sm:$0xff] %vm204_vm1, %v8704_v6  ;;  %3041 = vst.msk [vmem:[#allocation2 + $0xe8] sm:$0xff] %vm204_vm1, %v8724_v41  ;;  %v2899_v10 = vpop.f32.mrb[77].mxu1  ;;  %v3017_v31 = vpop.f32.mrb[77].mxu0  ;;  %v3446_v58 = vld [vmem:[#allocation2 + $0x80] sm:$0xff]  ;;  %v3455_v8 = vld [vmem:[#allocation2 + $0xc8] sm:$0xff] }
 0x7ee   :  { %2922 = vst.msk [vmem:[#allocation2 + $0xa0] sm:$0xff] %vm204_vm1, %v2899_v10  ;;  %3040 = vst.msk [vmem:[#allocation2 + $0xe0] sm:$0xff] %vm204_vm1, %v3017_v31  ;;  %v9332_v43 = vpack.c.bf16 %v3447_v25, %v3446_v58  ;;  %v3454_v29 = vld [vmem:[#allocation2 + $0xc0] sm:$0xff]  ;;  %v3441_v10 = vld [vmem:[#allocation2 + $0x58] sm:$0xff] }
 0x7ef   :  { %v9348_v57 = vpack.c.bf16 %v3455_v8, %v3454_v29  ;;  %v3403_v8 = vld [vmem:[#allocation3 + $0x28] sm:$0xff] }
 0x7f0   :  { %v8707_v38 = vpop.f32.mrb[78].mxu1  ;;  %v8727_v12 = vpop.f32.mrb[78].mxu0  ;;  %9333 = vmatprep.subr.bf16.mxu0 %v9332_v43  ;;  %v3449_v27 = vld [vmem:[#allocation2 + $0x98] sm:$0xff] }
 0x7f1   :  { %2925 = vst.msk [vmem:[#allocation2 + $0xb8] sm:$0xff] %vm204_vm1, %v8707_v38  ;;  %3043 = vst.msk [vmem:[#allocation2 + $0xf8] sm:$0xff] %vm204_vm1, %v8727_v12  ;;  %v2909_v21 = vpop.f32.mrb[79].mxu1  ;;  %v3027_v44 = vpop.f32.mrb[79].mxu0  ;;  %9335 = vmatpush3.bf16.msra.mxu0 %v9334_v18  ;;  %v3448_v16 = vld [vmem:[#allocation2 + $0x90] sm:$0xff]  ;;  %v3457_v13 = vld [vmem:[#allocation2 + $0xd8] sm:$0xff] }
 0x7f2   :  { %2924 = vst.msk [vmem:[#allocation2 + $0xb0] sm:$0xff] %vm204_vm1, %v2909_v21  ;;  %3042 = vst.msk [vmem:[#allocation2 + $0xf0] sm:$0xff] %vm204_vm1, %v3027_v44  ;;  %v9336_v36 = vpack.c.bf16 %v3449_v27, %v3448_v16  ;;  %v3456_v3 = vld [vmem:[#allocation2 + $0xd0] sm:$0xff]  ;;  %v9354_v27 = vpack.c.bf16 %v3441_v10, %v3440_v40  ;;  %v3442_v44 = vld [vmem:[#allocation2 + $0x60] sm:$0xff] }
 0x7f3   :  { %v9352_v25 = vpack.c.bf16 %v3457_v13, %v3456_v3  ;;  %v3443_v16 = vld [vmem:[#allocation2 + $0x68] sm:$0xff]  ;;  %v3414_v40 = vld [vmem:[#allocation3 + $0x80] sm:$0xff] }
 0x7f4   :  { %v8738_v26 = vpop.f32.mrb[80].mxu1  ;;  %v8758_v45 = vpop.f32.mrb[80].mxu0  ;;  %9337 = vmatprep.subr.bf16.mxu0 %v9336_v36  ;;  %v3451_v0 = vld [vmem:[#allocation2 + $0xa8] sm:$0xff]  ;;  %v9358_v53 = vpack.c.bf16 %v3443_v16, %v3442_v44 }
 0x7f5   :  { %3155 = vst.msk [vmem:[#allocation2 + $0x108] sm:$0xff] %vm204_vm1, %v8738_v26  ;;  %3273 = vst.msk [vmem:[#allocation2 + $0x148] sm:$0xff] %vm204_vm1, %v8758_v45  ;;  %v3115_v50 = vpop.f32.mrb[81].mxu1  ;;  %v3233_v20 = vpop.f32.mrb[81].mxu0  ;;  %9339 = vmatpush3.bf16.msra.mxu0 %v9338_v9  ;;  %v3450_v47 = vld [vmem:[#allocation2 + $0xa0] sm:$0xff]  ;;  %v3459_v38 = vld [vmem:[#allocation2 + $0xe8] sm:$0xff] }
 0x7f6   :  { %3154 = vst.msk [vmem:[#allocation2 + $0x100] sm:$0xff] %vm204_vm1, %v3115_v50  ;;  %3272 = vst.msk [vmem:[#allocation2 + $0x140] sm:$0xff] %vm204_vm1, %v3233_v20  ;;  %v9340_v24 = vpack.c.bf16 %v3451_v0, %v3450_v47  ;;  %v3458_v18 = vld [vmem:[#allocation2 + $0xe0] sm:$0xff]  ;;  %v3444_v47 = vld [vmem:[#allocation2 + $0x70] sm:$0xff] }
 0x7f7   :  { %v9356_v62 = vpack.c.bf16 %v3459_v38, %v3458_v18  ;;  %v3411_v3 = vld [vmem:[#allocation3 + $0x68] sm:$0xff]  ;;  %v3418_v18 = vld [vmem:[#allocation3 + $0xa0] sm:$0xff] }
 0x7f8   :  { %v8741_v35 = vpop.f32.mrb[82].mxu1  ;;  %v8761_v61 = vpop.f32.mrb[82].mxu0  ;;  %9341 = vmatprep.subr.bf16.mxu0 %v9340_v24  ;;  %v3453_v46 = vld [vmem:[#allocation2 + $0xb8] sm:$0xff]  ;;  %v3427_v44 = vld [vmem:[#allocation3 + $0xe8] sm:$0xff] }
 0x7f9   :  { %3157 = vst.msk [vmem:[#allocation2 + $0x118] sm:$0xff] %vm204_vm1, %v8741_v35  ;;  %3275 = vst.msk [vmem:[#allocation2 + $0x158] sm:$0xff] %vm204_vm1, %v8761_v61  ;;  %v3125_v34 = vpop.f32.mrb[83].mxu1  ;;  %v3243_v42 = vpop.f32.mrb[83].mxu0  ;;  %9343 = vmatpush3.bf16.msra.mxu0 %v9342_v59  ;;  %v3452_v48 = vld [vmem:[#allocation2 + $0xb0] sm:$0xff]  ;;  %v3461_v45 = vld [vmem:[#allocation2 + $0xf8] sm:$0xff] }
 0x7fa   :  { %3156 = vst.msk [vmem:[#allocation2 + $0x110] sm:$0xff] %vm204_vm1, %v3125_v34  ;;  %3274 = vst.msk [vmem:[#allocation2 + $0x150] sm:$0xff] %vm204_vm1, %v3243_v42  ;;  %v9344_v2 = vpack.c.bf16 %v3453_v46, %v3452_v48  ;;  %v3460_v26 = vld [vmem:[#allocation2 + $0xf0] sm:$0xff]  ;;  %v3445_v24 = vld [vmem:[#allocation2 + $0x78] sm:$0xff] }
 0x7fb   :  { %v9360_v50 = vpack.c.bf16 %v3461_v45, %v3460_v26  ;;  %v9362_v46 = vpack.c.bf16 %v3445_v24, %v3444_v47  ;;  %v3398_v48 = vld [vmem:[#allocation3] sm:$0xff]  ;;  %v3400_v45 = vld [vmem:[#allocation3 + $0x10] sm:$0xff]  ;;  %v3417_v24 = vld [vmem:[#allocation3 + $0x98] sm:$0xff] }
 0x7fc   :  { %v8744_v30 = vpop.f32.mrb[84].mxu1  ;;  %v8764_v63 = vpop.f32.mrb[84].mxu0  ;;  %9345 = vmatprep.subr.bf16.mxu0 %v9344_v2  ;;  %v3463_v28 = vld [vmem:[#allocation2 + $0x108] sm:$0xff]  ;;  %v3412_v47 = vld [vmem:[#allocation3 + $0x70] sm:$0xff] }
 0x7fd   :  { %3159 = vst.msk [vmem:[#allocation2 + $0x128] sm:$0xff] %vm204_vm1, %v8744_v30  ;;  %3277 = vst.msk [vmem:[#allocation2 + $0x168] sm:$0xff] %vm204_vm1, %v8764_v63  ;;  %v3135_v4 = vpop.f32.mrb[85].mxu1  ;;  %v3253_v5 = vpop.f32.mrb[85].mxu0  ;;  %9347 = vmatpush3.bf16.msra.mxu0 %v9346_v52  ;;  %v3462_v11 = vld [vmem:[#allocation2 + $0x100] sm:$0xff]  ;;  %v3471_v32 = vld [vmem:[#allocation2 + $0x148] sm:$0xff] }
 0x7fe   :  { %3158 = vst.msk [vmem:[#allocation2 + $0x120] sm:$0xff] %vm204_vm1, %v3135_v4  ;;  %3276 = vst.msk [vmem:[#allocation2 + $0x160] sm:$0xff] %vm204_vm1, %v3253_v5  ;;  %9349 = vmatprep.subr.bf16.mxu0 %v9348_v57  ;;  %v9365_v55 = vpack.c.bf16 %v3463_v28, %v3462_v11  ;;  %v3470_v15 = vld [vmem:[#allocation2 + $0x140] sm:$0xff] }
 0x7ff   :  { %v9377_v29 = vpack.c.bf16 %v3471_v32, %v3470_v15  ;;  %v3402_v57 = vld [vmem:[#allocation3 + $0x20] sm:$0xff]  ;;  %v3424_v15 = vld [vmem:[#allocation3 + $0xd0] sm:$0xff]  ;;  %v3429_v32 = vld [vmem:[#allocation3 + $0xf8] sm:$0xff] }
 0x800   :  { %v8747_v6 = vpop.f32.mrb[86].mxu1  ;;  %v8767_v41 = vpop.f32.mrb[86].mxu0  ;;  %9366 = vmatpush1.bf16.msra.mxu1 %v9365_v55  ;;  %v3465_v22 = vld [vmem:[#allocation2 + $0x118] sm:$0xff]  ;;  %v3406_v5 = vld [vmem:[#allocation3 + $0x40] sm:$0xff] }
 0x801   :  { %3161 = vst.msk [vmem:[#allocation2 + $0x138] sm:$0xff] %vm204_vm1, %v8747_v6  ;;  %3279 = vst.msk [vmem:[#allocation2 + $0x178] sm:$0xff] %vm204_vm1, %v8767_v41  ;;  %v3145_v31 = vpop.f32.mrb[87].mxu1  ;;  %v3263_v58 = vpop.f32.mrb[87].mxu0  ;;  %9351 = vmatpush3.bf16.msra.mxu0 %v9350_v23  ;;  %9367 = vmatprep.subr.bf16.mxu1 %v9893_v51  ;;  %v3464_v43 = vld [vmem:[#allocation2 + $0x110] sm:$0xff]  ;;  %v3473_v52 = vld [vmem:[#allocation2 + $0x158] sm:$0xff] }
 0x802   :  { %3160 = vst.msk [vmem:[#allocation2 + $0x130] sm:$0xff] %vm204_vm1, %v3145_v31  ;;  %3278 = vst.msk [vmem:[#allocation2 + $0x170] sm:$0xff] %vm204_vm1, %v3263_v58  ;;  %9353 = vmatprep.subr.bf16.mxu0 %v9352_v25  ;;  %v9368_v12 = vpack.c.bf16 %v3465_v22, %v3464_v43  ;;  %v3472_v2 = vld [vmem:[#allocation2 + $0x150] sm:$0xff]  ;;  %v3410_v23 = vld [vmem:[#allocation3 + $0x60] sm:$0xff] }
 0x803   :  { %v9380_v28 = vpack.c.bf16 %v3473_v52, %v3472_v2  ;;  %v3415_v41 = vld [vmem:[#allocation3 + $0x88] sm:$0xff] }
 0x804   :  { %v8778_v33 = vpop.f32.mrb[88].mxu1  ;;  %9369 = vmatpush1.bf16.msra.mxu1 %v9368_v12  ;;  %v3467_v21 = vld [vmem:[#allocation2 + $0x128] sm:$0xff] }
 0x805   :  { %3391 = vst.msk [vmem:[#allocation2 + $0x188] sm:$0xff] %vm204_vm1, %v8778_v33  ;;  %v3351_v36 = vpop.f32.mrb[89].mxu1  ;;  %9355 = vmatpush3.bf16.msra.mxu0 %v9354_v27  ;;  %9370 = vmatprep.subr.bf16.mxu1 %v9893_v51  ;;  %v3466_v9 = vld [vmem:[#allocation2 + $0x120] sm:$0xff]  ;;  %v3475_v4 = vld [vmem:[#allocation2 + $0x168] sm:$0xff] }
 0x806   :  { %3390 = vst.msk [vmem:[#allocation2 + $0x180] sm:$0xff] %vm204_vm1, %v3351_v36  ;;  %9357 = vmatprep.subr.bf16.mxu0 %v9356_v62  ;;  %v9371_v0 = vpack.c.bf16 %v3467_v21, %v3466_v9  ;;  %v3474_v49 = vld [vmem:[#allocation2 + $0x160] sm:$0xff]  ;;  %v3419_v31 = vld [vmem:[#allocation3 + $0xa8] sm:$0xff] }
 0x807   :  { %v9383_v11 = vpack.c.bf16 %v3475_v4, %v3474_v49  ;;  %v3423_v12 = vld [vmem:[#allocation3 + $0xc8] sm:$0xff]  ;;  %v3422_v62 = vld [vmem:[#allocation3 + $0xc0] sm:$0xff] }
 0x808   :  { %v8781_v17 = vpop.f32.mrb[90].mxu1  ;;  %9372 = vmatpush1.bf16.msra.mxu1 %v9371_v0  ;;  %v3469_v20 = vld [vmem:[#allocation2 + $0x138] sm:$0xff]  ;;  %v3426_v9 = vld [vmem:[#allocation3 + $0xe0] sm:$0xff] }
 0x809   :  { %3393 = vst.msk [vmem:[#allocation2 + $0x198] sm:$0xff] %vm204_vm1, %v8781_v17  ;;  %v3361_v59 = vpop.f32.mrb[91].mxu1  ;;  %9359 = vmatpush3.bf16.msra.mxu0 %v9358_v53  ;;  %9373 = vmatprep.subr.bf16.mxu1 %v9893_v51  ;;  %v3468_v35 = vld [vmem:[#allocation2 + $0x130] sm:$0xff]  ;;  %v3477_v55 = vld [vmem:[#allocation2 + $0x178] sm:$0xff] }
 0x80a   :  { %3392 = vst.msk [vmem:[#allocation2 + $0x190] sm:$0xff] %vm204_vm1, %v3361_v59  ;;  %9361 = vmatprep.subr.bf16.mxu0 %v9360_v50  ;;  %v9374_v61 = vpack.c.bf16 %v3469_v20, %v3468_v35  ;;  %v3476_v13 = vld [vmem:[#allocation2 + $0x170] sm:$0xff]  ;;  %v3405_v0 = vld [vmem:[#allocation3 + $0x38] sm:$0xff] }
 0x80b   :  { %v9386_v6 = vpack.c.bf16 %v3477_v55, %v3476_v13  ;;  %v3404_v53 = vld [vmem:[#allocation3 + $0x30] sm:$0xff]  ;;  %v3409_v17 = vld [vmem:[#allocation3 + $0x58] sm:$0xff] }
 0x80c   :  { %v8784_v34 = vpop.f32.mrb[92].mxu1  ;;  %9375 = vmatpush1.bf16.msra.mxu1 %v9374_v61  ;;  %v3479_v22 = vld [vmem:[#allocation2 + $0x188] sm:$0xff]  ;;  %v3408_v50 = vld [vmem:[#allocation3 + $0x50] sm:$0xff]  ;;  %v3413_v20 = vld [vmem:[#allocation3 + $0x78] sm:$0xff] }
 0x80d   :  { %3395 = vst.msk [vmem:[#allocation2 + $0x1a8] sm:$0xff] %vm204_vm1, %v8784_v34  ;;  %v3371_v42 = vpop.f32.mrb[93].mxu1  ;;  %9363 = vmatpush3.bf16.msra.mxu0 %v9362_v46  ;;  %9376 = vmatprep.subr.bf16.mxu1 %v9893_v51  ;;  %v3478_v25 = vld [vmem:[#allocation2 + $0x180] sm:$0xff]  ;;  %v3416_v59 = vld [vmem:[#allocation3 + $0x90] sm:$0xff]  ;;  %v3421_v35 = vld [vmem:[#allocation3 + $0xb8] sm:$0xff] }
 0x80e   :  { %3394 = vst.msk [vmem:[#allocation2 + $0x1a0] sm:$0xff] %vm204_vm1, %v3371_v42  ;;  %v9389_v10 = vpack.c.bf16 %v3479_v22, %v3478_v25  ;;  %v3420_v61 = vld [vmem:[#allocation3 + $0xb0] sm:$0xff]  ;;  %v3425_v46 = vld [vmem:[#allocation3 + $0xd8] sm:$0xff] }
 0x80f   :  { %v3428_v34 = vld [vmem:[#allocation3 + $0xf0] sm:$0xff] }
 0x810   :  { %v8787_v30 = vpop.f32.mrb[94].mxu1  ;;  %9378 = vmatpush1.bf16.msra.mxu1 %v9377_v29  ;;  %3575 = vmatmul.mubr.f32.vlgmr.msra.gmra.mrb[88].mxu0 %v3398_v48  ;;  %v3481_v43 = vld [vmem:[#allocation2 + $0x198] sm:$0xff] }
 0x811   :  { %3397 = vst.msk [vmem:[#allocation2 + $0x1b8] sm:$0xff] %vm204_vm1, %v8787_v30  ;;  %v3381_v63 = vpop.f32.mrb[95].mxu1  ;;  %9379 = vmatprep.subr.bf16.mxu1 %v9893_v51  ;;  %3579 = vmatprep.mubr.f32.mxu0 %v3403_v8  ;;  %v3480_v58 = vld [vmem:[#allocation2 + $0x190] sm:$0xff] }
 0x812   :  { %3396 = vst.msk [vmem:[#allocation2 + $0x1b0] sm:$0xff] %vm204_vm1, %v3381_v63  ;;  %v9392_v38 = vpack.c.bf16 %v3481_v43, %v3480_v58 }
 0x814   :  { %9381 = vmatpush1.bf16.msra.mxu1 %v9380_v28  ;;  %3580 = vmatmul.mubr.f32.gmra.mrb[90].mxu0 %v3402_v57  ;;  %v3483_v33 = vld [vmem:[#allocation2 + $0x1a8] sm:$0xff] }
 0x815   :  { %9382 = vmatprep.subr.bf16.mxu1 %v9893_v51  ;;  %3584 = vmatprep.mubr.f32.mxu0 %v3407_v56  ;;  %v3482_v27 = vld [vmem:[#allocation2 + $0x1a0] sm:$0xff] }
 0x816   :  { %v9395_v21 = vpack.c.bf16 %v3483_v33, %v3482_v27 }
 0x818   :  { %9384 = vmatpush1.bf16.msra.mxu1 %v9383_v11  ;;  %3585 = vmatmul.mubr.f32.gmra.mrb[92].mxu0 %v3406_v5  ;;  %v3485_v36 = vld [vmem:[#allocation2 + $0x1b8] sm:$0xff] }
 0x819   :  { %9385 = vmatprep.subr.bf16.mxu1 %v9893_v51  ;;  %3589 = vmatprep.mubr.f32.mxu0 %v3411_v3  ;;  %v3484_v16 = vld [vmem:[#allocation2 + $0x1b0] sm:$0xff] }
 0x81a   :  { %v9398_v26 = vpack.c.bf16 %v3485_v36, %v3484_v16 }
 0x81c   :  { %9387 = vmatpush1.bf16.msra.mxu1 %v9386_v6  ;;  %3590 = vmatmul.mubr.f32.gmra.mrb[94].mxu0 %v3410_v23 }
 0x81d   :  { %9388 = vmatprep.subr.bf16.mxu1 %v9893_v51  ;;  %3594 = vmatprep.mubr.f32.mxu0 %v3415_v41 }
 0x820   :  { %9390 = vmatpush1.bf16.msra.mxu1 %v9389_v10  ;;  %3595 = vmatmul.mubr.f32.gmra.mrb[96].mxu0 %v3414_v40 }
 0x821   :  { %9391 = vmatprep.subr.bf16.mxu1 %v9893_v51  ;;  %3599 = vmatprep.mubr.f32.mxu0 %v3419_v31 }
 0x824   :  { %9393 = vmatpush1.bf16.msra.mxu1 %v9392_v38  ;;  %3600 = vmatmul.mubr.f32.gmra.mrb[98].mxu0 %v3418_v18 }
 0x825   :  { %9394 = vmatprep.subr.bf16.mxu1 %v9893_v51  ;;  %3604 = vmatprep.mubr.f32.mxu0 %v3423_v12 }
 0x828   :  { %9396 = vmatpush1.bf16.msra.mxu1 %v9395_v21  ;;  %3605 = vmatmul.mubr.f32.gmra.mrb[100].mxu0 %v3422_v62 }
 0x829   :  { %9397 = vmatprep.subr.bf16.mxu1 %v9893_v51  ;;  %3609 = vmatprep.mubr.f32.mxu0 %v3427_v44 }
 0x82c   :  { %9399 = vmatpush1.bf16.msra.mxu1 %v9398_v26  ;;  %3610 = vmatmul.mubr.f32.gmra.mrb[102].mxu0 %v3426_v9 }
 0x82f   :  { %3680 = vmatmul.mubr.f32.vlgmr.msra.gmra.mrb[96].mxu1 %v3400_v45 }
 0x830   :  { %7599 = vmatprep.mubr.msk.f32.mxu1 %vm1863_vm2, %v3405_v0 }
 0x833   :  { %3685 = vmatmul.mubr.f32.gmra.mrb[98].mxu1 %v3404_v53 }
 0x834   :  { %7600 = vmatprep.mubr.msk.f32.mxu1 %vm1863_vm2, %v3409_v17 }
 0x837   :  { %3690 = vmatmul.mubr.f32.gmra.mrb[100].mxu1 %v3408_v50 }
 0x838   :  { %7601 = vmatprep.mubr.msk.f32.mxu1 %vm1863_vm2, %v3413_v20 }
 0x83b   :  { %3695 = vmatmul.mubr.f32.gmra.mrb[102].mxu1 %v3412_v47 }
 0x83c   :  { %7602 = vmatprep.mubr.msk.f32.mxu1 %vm1863_vm2, %v3417_v24 }
 0x83f   :  { %3700 = vmatmul.mubr.f32.gmra.mrb[104].mxu1 %v3416_v59 }
 0x840   :  { %7603 = vmatprep.mubr.msk.f32.mxu1 %vm1863_vm2, %v3421_v35 }
 0x843   :  { %3705 = vmatmul.mubr.f32.gmra.mrb[106].mxu1 %v3420_v61 }
 0x844   :  { %7604 = vmatprep.mubr.msk.f32.mxu1 %vm1863_vm2, %v3425_v46 }
 0x847   :  { %3710 = vmatmul.mubr.f32.gmra.mrb[108].mxu1 %v3424_v15 }
 0x848   :  { %7605 = vmatprep.mubr.msk.f32.mxu1 %vm1863_vm2, %v3429_v32 }
 0x84b   :  { %3715 = vmatmul.mubr.f32.gmra.mrb[110].mxu1 %v3428_v34  ;;  %v3875_v34 = vld [vmem:[#allocation5 + $0x1e0] sm:$0xff] }
 0x8e3   :  { %v8080_v42 = vpop.f32.mrb[88].mxu0 }
 0x8e4   :  { %v8081_v48 = vpop.f32.mrb[89].mxu0 }
 0x8e5   :  { %v8082_v29 = vadd.f32 %v8081_v48, %v8080_v42  ;;  %v3876_v42 = vld [vmem:[#allocation5 + $0x1e8] sm:$0xff] }
 0x8e7   :  { %v8083_v8 = vpop.f32.mrb[90].mxu0 }
 0x8e8   :  { %v8084_v2 = vpop.f32.mrb[91].mxu0 }
 0x8e9   :  { %v8085_v52 = vadd.f32 %v8084_v2, %v8083_v8  ;;  %v9400_v8 = vpack.c.bf16 %v3876_v42, %v3875_v34 }
 0x8eb   :  { %v8086_v30 = vpop.f32.mrb[92].mxu0  ;;  %9401 = vmatprep.subr.bf16.mxu0 %v9400_v8 }
 0x8ec   :  { %v8087_v63 = vpop.f32.mrb[93].mxu0  ;;  %9403 = vmatpush3.bf16.msra.mxu0 %v9400_v8 }
 0x8ed   :  { %v8088_v57 = vadd.f32 %v8087_v63, %v8086_v30 }
 0x8ef   :  { %v8089_v28 = vpop.f32.mrb[94].mxu0 }
 0x8f0   :  { %v8090_v56 = vpop.f32.mrb[95].mxu0 }
 0x8f1   :  { %v8091_v49 = vadd.f32 %v8090_v56, %v8089_v28 }
 0x8f3   :  { %v8092_v4 = vpop.f32.mrb[96].mxu0 }
 0x8f4   :  { %v8093_v5 = vpop.f32.mrb[97].mxu0 }
 0x8f5   :  { %v8094_v11 = vadd.f32 %v8093_v5, %v8092_v4 }
 0x8f7   :  { %v8095_v3 = vpop.f32.mrb[98].mxu0 }
 0x8f8   :  { %v8096_v13 = vpop.f32.mrb[99].mxu0 }
 0x8f9   :  { %v8097_v55 = vadd.f32 %v8096_v13, %v8095_v3 }
 0x8fb   :  { %v8098_v23 = vpop.f32.mrb[100].mxu0 }
 0x8fc   :  { %v8099_v6 = vpop.f32.mrb[101].mxu0 }
 0x8fd   :  { %v8100_v41 = vadd.f32 %v8099_v6, %v8098_v23 }
 0x8ff   :  { %v8101_v25 = vpop.f32.mrb[102].mxu0 }
 0x900   :  { %v8102_v22 = vpop.f32.mrb[103].mxu0 }
 0x901   :  { %v8103_v40 = vadd.f32 %v8102_v22, %v8101_v25  ;;  %v3878_v25 = vld [vmem:[#allocation5 + $0x1f8] sm:$0xff] }
 0x902   :  { %v3681_v10 = vpop.f32.mrb[96].mxu1 }
 0x903   :  { %v10992_v31 = vadd.f32 %v8082_v29, %v3681_v10  ;;  %v3683_v58 = vpop.f32.mrb[97].mxu1 }
 0x905   :  { %v3722_v43 = vsel %vm204_vm1, %v10992_v31, 0.0  ;;  %v3746_v18 = vmul.f32 %v10992_v31, %v10992_v31 }
 0x906   :  { %v3686_v38 = vpop.f32.mrb[98].mxu1  ;;  %3723 = vadd.xlane.f32.xlu0 %v3722_v43 }
 0x907   :  { %v10998_v12 = vadd.f32 %v8085_v52, %v3686_v38  ;;  %v3688_v27 = vpop.f32.mrb[99].mxu1  ;;  %v3754_v62 = vsel %vm204_vm1, %v3746_v18, 0.0 }
 0x909   :  { %v3725_v33 = vsel %vm204_vm1, %v10998_v12, 0.0  ;;  %v3747_v21 = vmul.f32 %v10998_v12, %v10998_v12 }
 0x90a   :  { %v3691_v44 = vpop.f32.mrb[100].mxu1  ;;  %3726 = vadd.xlane.f32.xlu1 %v3725_v33  ;;  %3755 = vadd.xlane.f32.xlu0 %v3754_v62 }
 0x90b   :  { %v11005_v16 = vadd.f32 %v8088_v57, %v3691_v44  ;;  %v3693_v36 = vpop.f32.mrb[101].mxu1  ;;  %v3757_v9 = vsel %vm204_vm1, %v3747_v21, 0.0 }
 0x90d   :  { %v3728_v26 = vsel %vm204_vm1, %v11005_v16, 0.0  ;;  %v3748_v45 = vmul.f32 %v11005_v16, %v11005_v16 }
 0x90e   :  { %v3696_v0 = vpop.f32.mrb[102].mxu1  ;;  %3758 = vadd.xlane.f32.xlu1 %v3757_v9  ;;  %3729 = vadd.xlane.f32.xlu0 %v3728_v26 }
 0x90f   :  { %v11012_v53 = vadd.f32 %v8091_v49, %v3696_v0  ;;  %v3698_v17 = vpop.f32.mrb[103].mxu1  ;;  %v3760_v20 = vsel %vm204_vm1, %v3748_v45, 0.0 }
 0x911   :  { %v3731_v50 = vsel %vm204_vm1, %v11012_v53, 0.0  ;;  %v3749_v47 = vmul.f32 %v11012_v53, %v11012_v53 }
 0x912   :  { %v3701_v24 = vpop.f32.mrb[104].mxu1  ;;  %3732 = vadd.xlane.f32.xlu1 %v3731_v50  ;;  %3761 = vadd.xlane.f32.xlu0 %v3760_v20 }
 0x913   :  { %v11019_v59 = vadd.f32 %v8094_v11, %v3701_v24  ;;  %v3703_v35 = vpop.f32.mrb[105].mxu1  ;;  %v3763_v61 = vsel %vm204_vm1, %v3749_v47, 0.0 }
 0x915   :  { %v3734_v46 = vsel %vm204_vm1, %v11019_v59, 0.0  ;;  %v3750_v15 = vmul.f32 %v11019_v59, %v11019_v59 }
 0x916   :  { %v3706_v32 = vpop.f32.mrb[106].mxu1  ;;  %3764 = vadd.xlane.f32.xlu1 %v3763_v61  ;;  %3735 = vadd.xlane.f32.xlu0 %v3734_v46 }
 0x917   :  { %v11026_v48 = vadd.f32 %v8097_v55, %v3706_v32  ;;  %v3708_v29 = vpop.f32.mrb[107].mxu1  ;;  %v3766_v52 = vsel %vm204_vm1, %v3750_v15, 0.0 }
 0x919   :  { %v3737_v2 = vsel %vm204_vm1, %v11026_v48, 0.0  ;;  %v3751_v30 = vmul.f32 %v11026_v48, %v11026_v48 }
 0x91a   :  { %v3711_v63 = vpop.f32.mrb[108].mxu1  ;;  %3738 = vadd.xlane.f32.xlu1 %v3737_v2  ;;  %3767 = vadd.xlane.f32.xlu0 %v3766_v52 }
 0x91b   :  { %v11033_v57 = vadd.f32 %v8100_v41, %v3711_v63  ;;  %v3713_v28 = vpop.f32.mrb[109].mxu1  ;;  %v3769_v56 = vsel %vm204_vm1, %v3751_v30, 0.0  ;;  %v3877_v41 = vld [vmem:[#allocation5 + $0x1f0] sm:$0xff]  ;;  %v11058_v63 = vld [vmem:[%s12168_s4 + $0xa] ss:$0 sm:$0xff] }
 0x91c   :  { %v9404_v22 = vpack.c.bf16 %v3878_v25, %v3877_v41 }
 0x91d   :  { %v3740_v49 = vsel %vm204_vm1, %v11033_v57, 0.0  ;;  %v3752_v4 = vmul.f32 %v11033_v57, %v11033_v57 }
 0x91e   :  { %v3716_v5 = vpop.f32.mrb[110].mxu1  ;;  %3770 = vadd.xlane.f32.xlu1 %v3769_v56  ;;  %3741 = vadd.xlane.f32.xlu0 %v3740_v49 }
 0x91f   :  { %v11040_v11 = vadd.f32 %v8103_v40, %v3716_v5  ;;  %v3718_v3 = vpop.f32.mrb[111].mxu1  ;;  %v3772_v55 = vsel %vm204_vm1, %v3752_v4, 0.0  ;;  %9405 = vmatprep.subr.bf16.mxu0 %v9404_v22 }
 0x920   :  { %9407 = vmatpush3.bf16.msra.mxu0 %v9404_v22 }
 0x921   :  { %v3743_v13 = vsel %vm204_vm1, %v11040_v11, 0.0  ;;  %v3753_v23 = vmul.f32 %v11040_v11, %v11040_v11 }
 0x922   :  { %3744 = vadd.xlane.f32.xlu1 %v3743_v13  ;;  %3773 = vadd.xlane.f32.xlu0 %v3772_v55 }
 0x923   :  { %v3775_v6 = vsel %vm204_vm1, %v3753_v23, 0.0 }
 0x926   :  { %3776 = vadd.xlane.f32.xlu1 %v3775_v6 }
 0x993   :  { %v3724_v40 = vpop.xlane.xlu0 %3723 }
 0x994   :  { %v3778_v10 = vmul.f32 0.03125, %v3724_v40 }
 0x996   :  { %v3794_v18 = vmul.f32 %v3778_v10, %v3778_v10  ;;  %v3810_v8 = vsub.f32 %v10992_v31, %v3778_v10  ;;  %v11067_v31 = vld [vmem:[%s12168_s4 + $0xb] ss:$0 sm:$0xff] }
 0x997   :  { %v3727_v58 = vpop.xlane.xlu1 %3726  ;;  %v3756_v43 = vpop.xlane.xlu0 %3755 }
 0x998   :  { %v3779_v38 = vmul.f32 0.03125, %v3727_v58  ;;  %v3786_v27 = vmul.f32 0.03125, %v3756_v43 }
 0x99a   :  { %v3802_v33 = vsub.f32 %v3786_v27, %v3794_v18  ;;  %v3795_v44 = vmul.f32 %v3779_v38, %v3779_v38  ;;  %v3811_v13 = vsub.f32 %v10998_v12, %v3779_v38 }
 0x99b   :  { %v3759_v62 = vpop.xlane.xlu1 %3758  ;;  %v3730_v21 = vpop.xlane.xlu0 %3729 }
 0x99c   :  { %v3818_v36 = vadd.f32 1e-05, %v3802_v33  ;;  %v3787_v9 = vmul.f32 0.03125, %v3759_v62  ;;  %v3780_v26 = vmul.f32 0.03125, %v3730_v21 }
 0x99e   :  { %9743 = vrsqrt.f32 %v3818_v36  ;;  %v3803_v45 = vsub.f32 %v3787_v9, %v3795_v44  ;;  %v3796_v20 = vmul.f32 %v3780_v26, %v3780_v26  ;;  %v3812_v12 = vsub.f32 %v11005_v16, %v3780_v26 }
 0x99f   :  { %v3733_v0 = vpop.xlane.xlu1 %3732  ;;  %v3762_v17 = vpop.xlane.xlu0 %3761 }
 0x9a0   :  { %v3819_v50 = vadd.f32 1e-05, %v3803_v45  ;;  %v11048_v47 = vmul.f32 0.03125, %v3733_v0  ;;  %v3788_v24 = vmul.f32 0.03125, %v3762_v17 }
 0x9a2   :  { %9745 = vrsqrt.f32 %v3819_v50  ;;  %v3804_v35 = vsub.f32 %v3788_v24, %v3796_v20  ;;  %v3797_v15 = vmul.f32 %v11048_v47, %v11048_v47  ;;  %v3813_v20 = vsub.f32 %v11012_v53, %v11048_v47 }
 0x9a3   :  { %v3765_v61 = vpop.xlane.xlu1 %3764  ;;  %v3736_v46 = vpop.xlane.xlu0 %3735 }
 0x9a4   :  { %v3820_v32 = vadd.f32 1e-05, %v3804_v35  ;;  %v3789_v34 = vmul.f32 0.03125, %v3765_v61  ;;  %v11052_v42 = vmul.f32 0.03125, %v3736_v46 }
 0x9a6   :  { %9747 = vrsqrt.f32 %v3820_v32  ;;  %v3805_v29 = vsub.f32 %v3789_v34, %v3797_v15  ;;  %v3798_v56 = vmul.f32 %v11052_v42, %v11052_v42 }
 0x9a7   :  { %v3739_v2 = vpop.xlane.xlu1 %3738  ;;  %v3768_v52 = vpop.xlane.xlu0 %3767 }
 0x9a8   :  { %v9744_v30 = vpop.eup %9743  ;;  %v3821_v28 = vadd.f32 1e-05, %v3805_v29  ;;  %v11062_v49 = vmul.f32 0.03125, %v3739_v2  ;;  %v3790_v4 = vmul.f32 0.03125, %v3768_v52 }
 0x9a9   :  { %v3834_v5 = vmul.f32 %v9744_v30, %v3810_v8  ;;  %v3814_v8 = vsub.f32 %v11019_v59, %v11052_v42 }
 0x9aa   :  { %9749 = vrsqrt.f32 %v3821_v28  ;;  %v3806_v3 = vsub.f32 %v3790_v4, %v3798_v56  ;;  %v3799_v25 = vmul.f32 %v11062_v49, %v11062_v49  ;;  %v3815_v56 = vsub.f32 %v11026_v48, %v11062_v49 }
 0x9ab   :  { %v3771_v55 = vpop.xlane.xlu1 %3770  ;;  %v3742_v23 = vpop.xlane.xlu0 %3741  ;;  %v3846_v6 = vmul.f32 %v11058_v63, %v3834_v5 }
 0x9ac   :  { %v9746_v41 = vpop.eup %9745  ;;  %v3822_v22 = vadd.f32 1e-05, %v3806_v3  ;;  %v3791_v40 = vmul.f32 0.03125, %v3771_v55  ;;  %v3784_v10 = vmul.f32 0.03125, %v3742_v23 }
 0x9ad   :  { %v3835_v58 = vmul.f32 %v9746_v41, %v3811_v13  ;;  %v3858_v43 = vadd.f32 %v11067_v31, %v3846_v6 }
 0x9ae   :  { %9751 = vrsqrt.f32 %v3822_v22  ;;  %v3807_v18 = vsub.f32 %v3791_v40, %v3799_v25  ;;  %v3800_v36 = vmul.f32 %v3784_v10, %v3784_v10  ;;  %v3816_v13 = vsub.f32 %v11033_v57, %v3784_v10 }
 0x9af   :  { %v3847_v27 = vmul.f32 %v11058_v63, %v3835_v58  ;;  %v3745_v38 = vpop.xlane.xlu1 %3744  ;;  %v3774_v33 = vpop.xlane.xlu0 %3773  ;;  %v3866_v62 = vmax.f32 %v3858_v43, 0.0 }
 0x9b0   :  { %v9748_v21 = vpop.eup %9747  ;;  %v3823_v44 = vadd.f32 1e-05, %v3807_v18  ;;  %v3785_v9 = vmul.f32 0.03125, %v3745_v38  ;;  %v3792_v45 = vmul.f32 0.03125, %v3774_v33 }
 0x9b1   :  { %8796 = vmatprep.mubr.msk.f32.mxu0 %vm204_vm1, %v3866_v62  ;;  %v3859_v0 = vadd.f32 %v11067_v31, %v3847_v27  ;;  %v3836_v17 = vmul.f32 %v9748_v21, %v3812_v12 }
 0x9b2   :  { %9753 = vrsqrt.f32 %v3823_v44  ;;  %v3808_v50 = vsub.f32 %v3792_v45, %v3800_v36  ;;  %v3801_v61 = vmul.f32 %v3785_v9, %v3785_v9  ;;  %v3817_v49 = vsub.f32 %v11040_v11, %v3785_v9 }
 0x9b3   :  { %v3777_v24 = vpop.xlane.xlu1 %3776  ;;  %v3867_v16 = vmax.f32 %v3859_v0, 0.0  ;;  %v3848_v26 = vmul.f32 %v11058_v63, %v3836_v17 }
 0x9b4   :  { %v9750_v35 = vpop.eup %9749  ;;  %v3824_v46 = vadd.f32 1e-05, %v3808_v50  ;;  %v3793_v15 = vmul.f32 0.03125, %v3777_v24 }
 0x9b5   :  { %8797 = vmatmul.mubr.msk.f32.vlgmr.msra.gmra.mrb[104].mxu0 %vm204_vm1, %v3867_v16  ;;  %v3860_v32 = vadd.f32 %v11067_v31, %v3848_v26  ;;  %v3837_v34 = vmul.f32 %v9750_v35, %v3813_v20 }
 0x9b6   :  { %9755 = vrsqrt.f32 %v3824_v46  ;;  %v3809_v29 = vsub.f32 %v3793_v15, %v3801_v61 }
 0x9b7   :  { %v3868_v2 = vmax.f32 %v3860_v32, 0.0  ;;  %v3849_v53 = vmul.f32 %v11058_v63, %v3837_v34 }
 0x9b8   :  { %v9752_v47 = vpop.eup %9751  ;;  %v3825_v52 = vadd.f32 1e-05, %v3809_v29 }
 0x9b9   :  { %8799 = vmatprep.mubr.msk.f32.mxu0 %vm204_vm1, %v3868_v2  ;;  %v3861_v30 = vadd.f32 %v11067_v31, %v3849_v53  ;;  %v3838_v28 = vmul.f32 %v9752_v47, %v3814_v8 }
 0x9ba   :  { %9757 = vrsqrt.f32 %v3825_v52 }
 0x9bb   :  { %v3869_v4 = vmax.f32 %v3861_v30, 0.0  ;;  %v3850_v5 = vmul.f32 %v11058_v63, %v3838_v28  ;;  %v4171_v28 = vld [vmem:[#allocation5 + $0x200] sm:$0xff] }
 0x9bc   :  { %v9754_v3 = vpop.eup %9753 }
 0x9bd   :  { %8800 = vmatmul.mubr.msk.f32.gmra.mrb[106].mxu0 %vm204_vm1, %v3869_v4  ;;  %v3862_v59 = vadd.f32 %v11067_v31, %v3850_v5  ;;  %v3839_v42 = vmul.f32 %v9754_v3, %v3815_v56  ;;  %v4172_v56 = vld [vmem:[#allocation5 + $0x208] sm:$0xff]  ;;  %v4313_v4 = vld [vmem:[#allocation5 + $0x220] sm:$0xff] }
 0x9be   :  { %v9408_v5 = vpack.c.bf16 %v4172_v56, %v4171_v28  ;;  %v4314_v3 = vld [vmem:[#allocation5 + $0x228] sm:$0xff] }
 0x9bf   :  { %v3870_v55 = vmax.f32 %v3862_v59, 0.0  ;;  %v3851_v23 = vmul.f32 %v11058_v63, %v3839_v42  ;;  %v9416_v59 = vpack.c.bf16 %v4314_v3, %v4313_v4  ;;  %v4173_v42 = vld [vmem:[#allocation5 + $0x210] sm:$0xff] }
 0x9c0   :  { %v9756_v6 = vpop.eup %9755  ;;  %9409 = vmatprep.subr.bf16.mxu0 %v9408_v5 }
 0x9c1   :  { %8802 = vmatprep.mubr.msk.f32.mxu0 %vm204_vm1, %v3870_v55  ;;  %v3863_v41 = vadd.f32 %v11067_v31, %v3851_v23  ;;  %v3840_v48 = vmul.f32 %v9756_v6, %v3816_v13  ;;  %9417 = vmatprep.subr.bf16.mxu1 %v9416_v59  ;;  %v4174_v13 = vld [vmem:[#allocation5 + $0x218] sm:$0xff]  ;;  %v4315_v55 = vld [vmem:[#allocation5 + $0x230] sm:$0xff] }
 0x9c2   :  { %9411 = vmatpush3.bf16.msra.mxu0 %v9408_v5  ;;  %9419 = vmatpush3.bf16.msra.mxu1 %v9416_v59  ;;  %v9412_v23 = vpack.c.bf16 %v4174_v13, %v4173_v42  ;;  %v4316_v6 = vld [vmem:[#allocation5 + $0x238] sm:$0xff]  ;;  %v11184_v13 = vld [vmem:[%s12168_s4 + $0xc] ss:$0 sm:$0xff] }
 0x9c3   :  { %v3871_v25 = vmax.f32 %v3863_v41, 0.0  ;;  %v3852_v22 = vmul.f32 %v11058_v63, %v3840_v48  ;;  %v9420_v41 = vpack.c.bf16 %v4316_v6, %v4315_v55  ;;  %v4431_v48 = vld [vmem:[#allocation5 + $0x240] sm:$0xff] }
 0x9c4   :  { %v9758_v40 = vpop.eup %9757  ;;  %9413 = vmatprep.subr.bf16.mxu0 %v9412_v23 }
 0x9c5   :  { %8803 = vmatmul.mubr.msk.f32.gmra.mrb[108].mxu0 %vm204_vm1, %v3871_v25  ;;  %v3864_v58 = vadd.f32 %v11067_v31, %v3852_v22  ;;  %v3841_v57 = vmul.f32 %v9758_v40, %v3817_v49  ;;  %9421 = vmatprep.subr.bf16.mxu1 %v9420_v41  ;;  %v4432_v49 = vld [vmem:[#allocation5 + $0x248] sm:$0xff]  ;;  %v4549_v25 = vld [vmem:[#allocation5 + $0x260] sm:$0xff] }
 0x9c6   :  { %9415 = vmatpush3.bf16.msra.mxu0 %v9412_v23  ;;  %9423 = vmatpush3.bf16.msra.mxu1 %v9420_v41  ;;  %v11161_v22 = vpack.c.bf16 %v4432_v49, %v4431_v48  ;;  %v4550_v40 = vld [vmem:[#allocation5 + $0x268] sm:$0xff] }
 0x9c7   :  { %v3872_v10 = vmax.f32 %v3864_v58, 0.0  ;;  %v3853_v43 = vmul.f32 %v11058_v63, %v3841_v57  ;;  %v11163_v58 = vpack.c.bf16 %v4550_v40, %v4549_v25 }
 0x9c8   :  { %9425 = vmatprep.subr.bf16.mxu0 %v11161_v22 }
 0x9c9   :  { %8805 = vmatprep.mubr.msk.f32.mxu0 %vm204_vm1, %v3872_v10  ;;  %v3865_v18 = vadd.f32 %v11067_v31, %v3853_v43  ;;  %9433 = vmatprep.subr.bf16.mxu1 %v11163_v58 }
 0x9cb   :  { %v3873_v27 = vmax.f32 %v3865_v18, 0.0 }
 0x9cd   :  { %8806 = vmatmul.mubr.msk.f32.gmra.mrb[110].mxu0 %vm204_vm1, %v3873_v27 }
 0xa88   :  { %v11105_v11 = vpop.f32.mrb[104].mxu0 }
 0xa89   :  { %v11107_v12 = vpop.f32.mrb[105].mxu0  ;;  %v4013_v38 = vsel %vm204_vm1, %v11105_v11, 0.0  ;;  %v4035_v33 = vmul.f32 %v11105_v11, %v11105_v11 }
 0xa8a   :  { %4014 = vadd.xlane.f32.xlu1 %v4013_v38  ;;  %v4010_v63 = vsel %vm204_vm1, %v11107_v12, 0.0  ;;  %v4034_v31 = vmul.f32 %v11107_v12, %v11107_v12 }
 0xa8b   :  { %4011 = vadd.xlane.f32.xlu0 %v4010_v63  ;;  %v4045_v62 = vsel %vm204_vm1, %v4035_v33, 0.0 }
 0xa8c   :  { %v4042_v21 = vsel %vm204_vm1, %v4034_v31, 0.0 }
 0xa8e   :  { %4046 = vadd.xlane.f32.xlu1 %v4045_v62 }
 0xa8f   :  { %4043 = vadd.xlane.f32.xlu0 %v4042_v21 }
 0xa90   :  { %v11119_v44 = vpop.f32.mrb[106].mxu0 }
 0xa91   :  { %v11121_v36 = vpop.f32.mrb[107].mxu0  ;;  %v4019_v9 = vsel %vm204_vm1, %v11119_v44, 0.0  ;;  %v4037_v45 = vmul.f32 %v11119_v44, %v11119_v44 }
 0xa92   :  { %4020 = vadd.xlane.f32.xlu1 %v4019_v9  ;;  %v4016_v0 = vsel %vm204_vm1, %v11121_v36, 0.0  ;;  %v4036_v17 = vmul.f32 %v11121_v36, %v11121_v36 }
 0xa93   :  { %4017 = vadd.xlane.f32.xlu0 %v4016_v0  ;;  %v4051_v50 = vsel %vm204_vm1, %v4037_v45, 0.0 }
 0xa94   :  { %v4048_v20 = vsel %vm204_vm1, %v4036_v17, 0.0 }
 0xa96   :  { %4052 = vadd.xlane.f32.xlu1 %v4051_v50 }
 0xa97   :  { %4049 = vadd.xlane.f32.xlu0 %v4048_v20 }
 0xa98   :  { %v11133_v24 = vpop.f32.mrb[108].mxu0 }
 0xa99   :  { %v11135_v16 = vpop.f32.mrb[109].mxu0  ;;  %v4025_v26 = vsel %vm204_vm1, %v11133_v24, 0.0  ;;  %v4039_v35 = vmul.f32 %v11133_v24, %v11133_v24 }
 0xa9a   :  { %4026 = vadd.xlane.f32.xlu1 %v4025_v26  ;;  %v4022_v61 = vsel %vm204_vm1, %v11135_v16, 0.0  ;;  %v4038_v46 = vmul.f32 %v11135_v16, %v11135_v16 }
 0xa9b   :  { %4023 = vadd.xlane.f32.xlu0 %v4022_v61  ;;  %v4057_v15 = vsel %vm204_vm1, %v4039_v35, 0.0 }
 0xa9c   :  { %v4054_v32 = vsel %vm204_vm1, %v4038_v46, 0.0 }
 0xa9e   :  { %4058 = vadd.xlane.f32.xlu1 %v4057_v15 }
 0xa9f   :  { %4055 = vadd.xlane.f32.xlu0 %v4054_v32 }
 0xaa0   :  { %v11147_v34 = vpop.f32.mrb[110].mxu0 }
 0xaa1   :  { %v11149_v29 = vpop.f32.mrb[111].mxu0  ;;  %v4031_v8 = vsel %vm204_vm1, %v11147_v34, 0.0  ;;  %v4041_v2 = vmul.f32 %v11147_v34, %v11147_v34 }
 0xaa2   :  { %4032 = vadd.xlane.f32.xlu1 %v4031_v8  ;;  %v4028_v53 = vsel %vm204_vm1, %v11149_v29, 0.0  ;;  %v4040_v47 = vmul.f32 %v11149_v29, %v11149_v29 }
 0xaa3   :  { %4029 = vadd.xlane.f32.xlu0 %v4028_v53  ;;  %v4063_v52 = vsel %vm204_vm1, %v4041_v2, 0.0 }
 0xaa4   :  { %v4060_v30 = vsel %vm204_vm1, %v4040_v47, 0.0 }
 0xaa6   :  { %4064 = vadd.xlane.f32.xlu1 %v4063_v52 }
 0xaa7   :  { %4061 = vadd.xlane.f32.xlu0 %v4060_v30 }
 0xb17   :  { %v4015_v57 = vpop.xlane.xlu1 %4014 }
 0xb18   :  { %v4067_v10 = vmul.f32 0.03125, %v4015_v57  ;;  %v4012_v43 = vpop.xlane.xlu0 %4011 }
 0xb19   :  { %v4066_v18 = vmul.f32 0.03125, %v4012_v43 }
 0xb1a   :  { %v4083_v38 = vmul.f32 %v4067_v10, %v4067_v10  ;;  %v4099_v5 = vsub.f32 %v11105_v11, %v4067_v10 }
 0xb1b   :  { %v4047_v27 = vpop.xlane.xlu1 %4046  ;;  %v4082_v31 = vmul.f32 %v4066_v18, %v4066_v18  ;;  %v4098_v42 = vsub.f32 %v11107_v12, %v4066_v18  ;;  %v11193_v12 = vld [vmem:[%s12168_s4 + $0xd] ss:$0 sm:$0xff] }
 0xb1c   :  { %v4075_v33 = vmul.f32 0.03125, %v4047_v27  ;;  %v4044_v63 = vpop.xlane.xlu0 %4043 }
 0xb1d   :  { %v4074_v62 = vmul.f32 0.03125, %v4044_v63 }
 0xb1e   :  { %v4091_v21 = vsub.f32 %v4075_v33, %v4083_v38 }
 0xb1f   :  { %v4090_v9 = vsub.f32 %v4074_v62, %v4082_v31  ;;  %v4021_v45 = vpop.xlane.xlu1 %4020 }
 0xb20   :  { %v4107_v0 = vadd.f32 1e-05, %v4091_v21  ;;  %v11167_v17 = vmul.f32 0.03125, %v4021_v45  ;;  %v4018_v50 = vpop.xlane.xlu0 %4017 }
 0xb21   :  { %v4106_v20 = vadd.f32 1e-05, %v4090_v9  ;;  %v11169_v26 = vmul.f32 0.03125, %v4018_v50  ;;  %v4433_v50 = vld [vmem:[#allocation5 + $0x250] sm:$0xff] }
 0xb22   :  { %9759 = vrsqrt.f32 %v4107_v0  ;;  %v4085_v61 = vmul.f32 %v11167_v17, %v11167_v17  ;;  %v4101_v45 = vsub.f32 %v11119_v44, %v11167_v17 }
 0xb23   :  { %9761 = vrsqrt.f32 %v4106_v20  ;;  %v4053_v35 = vpop.xlane.xlu1 %4052  ;;  %v4084_v32 = vmul.f32 %v11169_v26, %v11169_v26  ;;  %v4434_v20 = vld [vmem:[#allocation5 + $0x258] sm:$0xff] }
 0xb24   :  { %v4077_v46 = vmul.f32 0.03125, %v4053_v35  ;;  %v4050_v15 = vpop.xlane.xlu0 %4049 }
 0xb25   :  { %v4076_v8 = vmul.f32 0.03125, %v4050_v15 }
 0xb26   :  { %v4093_v2 = vsub.f32 %v4077_v46, %v4085_v61  ;;  %v4100_v46 = vsub.f32 %v11121_v36, %v11169_v26 }
 0xb27   :  { %v4092_v53 = vsub.f32 %v4076_v8, %v4084_v32  ;;  %v4027_v47 = vpop.xlane.xlu1 %4026 }
 0xb28   :  { %v4109_v52 = vadd.f32 1e-05, %v4093_v2  ;;  %v11175_v30 = vmul.f32 0.03125, %v4027_v47  ;;  %v4024_v28 = vpop.xlane.xlu0 %4023  ;;  %v4551_v2 = vld [vmem:[#allocation5 + $0x270] sm:$0xff] }
 0xb29   :  { %v4108_v56 = vadd.f32 1e-05, %v4092_v53  ;;  %v11177_v4 = vmul.f32 0.03125, %v4024_v28 }
 0xb2a   :  { %9763 = vrsqrt.f32 %v4109_v52  ;;  %v4087_v55 = vmul.f32 %v11175_v30, %v11175_v30 }
 0xb2b   :  { %9765 = vrsqrt.f32 %v4108_v56  ;;  %v4059_v3 = vpop.xlane.xlu1 %4058  ;;  %v4086_v11 = vmul.f32 %v11177_v4, %v11177_v4  ;;  %v9428_v56 = vpack.c.bf16 %v4434_v20, %v4433_v50 }
 0xb2c   :  { %v9760_v59 = vpop.eup %9759  ;;  %v4079_v23 = vmul.f32 0.03125, %v4059_v3  ;;  %v4056_v6 = vpop.xlane.xlu0 %4055 }
 0xb2d   :  { %v9762_v41 = vpop.eup %9761  ;;  %v4123_v48 = vmul.f32 %v9760_v59, %v4099_v5  ;;  %v4078_v49 = vmul.f32 0.03125, %v4056_v6  ;;  %v4667_v59 = vld [vmem:[#allocation5 + $0x280] sm:$0xff] }
 0xb2e   :  { %v4122_v25 = vmul.f32 %v9762_v41, %v4098_v42  ;;  %v4095_v40 = vsub.f32 %v4079_v23, %v4087_v55  ;;  %v4668_v42 = vld [vmem:[#allocation5 + $0x288] sm:$0xff]  ;;  %v4785_v6 = vld [vmem:[#allocation5 + $0x2a0] sm:$0xff] }
 0xb2f   :  { %v4135_v57 = vmul.f32 %v11184_v13, %v4123_v48  ;;  %v4094_v10 = vsub.f32 %v4078_v49, %v4086_v11  ;;  %v4033_v43 = vpop.xlane.xlu1 %4032  ;;  %v4786_v41 = vld [vmem:[#allocation5 + $0x2a8] sm:$0xff] }
 0xb30   :  { %v4134_v18 = vmul.f32 %v11184_v13, %v4122_v25  ;;  %v4111_v27 = vadd.f32 1e-05, %v4095_v40  ;;  %v11197_v38 = vmul.f32 0.03125, %v4033_v43  ;;  %v4030_v33 = vpop.xlane.xlu0 %4029  ;;  %v11231_v25 = vpack.c.bf16 %v4668_v42, %v4667_v59 }
 0xb31   :  { %v4147_v63 = vadd.f32 %v11193_v12, %v4135_v57  ;;  %v4110_v31 = vadd.f32 1e-05, %v4094_v10  ;;  %v11200_v62 = vmul.f32 0.03125, %v4030_v33  ;;  %v4103_v57 = vsub.f32 %v11133_v24, %v11175_v30 }
 0xb32   :  { %v4146_v21 = vadd.f32 %v11193_v12, %v4134_v18  ;;  %9767 = vrsqrt.f32 %v4111_v27  ;;  %v4089_v15 = vmul.f32 %v11197_v38, %v11197_v38  ;;  %v9448_v10 = vpack.c.bf16 %v4786_v41, %v4785_v6 }
 0xb33   :  { %v4155_v9 = vadd.f32 %v4147_v63, %v10758_v37  ;;  %9769 = vrsqrt.f32 %v4110_v31  ;;  %v4065_v0 = vpop.xlane.xlu1 %4064  ;;  %v4552_v37 = vld [vmem:[#allocation5 + $0x278] sm:$0xff]  ;;  %v4088_v44 = vmul.f32 %v11200_v62, %v11200_v62  ;;  %v4102_v27 = vsub.f32 %v11135_v16, %v11177_v4 }
 0xb34   :  { %v9764_v35 = vpop.eup %9763  ;;  %v4154_v61 = vadd.f32 %v4146_v21, %v10756_v54  ;;  %v4081_v32 = vmul.f32 0.03125, %v4065_v0  ;;  %v4062_v8 = vpop.xlane.xlu0 %4061  ;;  %v9436_v3 = vpack.c.bf16 %v4552_v37, %v4551_v2  ;;  %v4105_v31 = vsub.f32 %v11147_v34, %v11197_v38  ;;  %v4903_v2 = vld [vmem:[#allocation5 + $0x2c0] sm:$0xff]  ;;  %v4904_v37 = vld [vmem:[#allocation5 + $0x2c8] sm:$0xff] }
 0xb35   :  { %v9766_v53 = vpop.eup %9765  ;;  %v4125_v47 = vmul.f32 %v9764_v35, %v4101_v45  ;;  %v4080_v17 = vmul.f32 0.03125, %v4062_v8  ;;  %v11215_v5 = vmax.f32 %v4155_v9, 0.0  ;;  %v4104_v45 = vsub.f32 %v11149_v29, %v11200_v62 }
 0xb36   :  { %v11213_v52 = vmax.f32 %v4154_v61, 0.0  ;;  %v4124_v28 = vmul.f32 %v9766_v53, %v4100_v46  ;;  %v4097_v54 = vsub.f32 %v4081_v32, %v4089_v15  ;;  %v4669_v15 = vld [vmem:[#allocation5 + $0x290] sm:$0xff]  ;;  %v9456_v53 = vpack.c.bf16 %v4904_v37, %v4903_v2 }
 0xb37   :  { %v4137_v36 = vmul.f32 %v11184_v13, %v4125_v47  ;;  %v4096_v26 = vsub.f32 %v4080_v17, %v4088_v44  ;;  %v4905_v47 = vld [vmem:[#allocation5 + $0x2d0] sm:$0xff]  ;;  %v4906_v44 = vld [vmem:[#allocation5 + $0x2d8] sm:$0xff] }
 0xb38   :  { %v4136_v55 = vmul.f32 %v11184_v13, %v4124_v28  ;;  %v4113_v23 = vadd.f32 1e-05, %v4097_v54  ;;  %8816 = vmatprep.mubr.msk.f32.mxu0 %vm204_vm1, %v11213_v52  ;;  %8836 = vmatprep.mubr.msk.f32.mxu1 %vm204_vm1, %v11213_v52  ;;  %v9460_v17 = vpack.c.bf16 %v4906_v44, %v4905_v47  ;;  %v5021_v28 = vld [vmem:[#allocation3 + $0x8] sm:$0xff]  ;;  %v5023_v54 = vld [vmem:[#allocation3 + $0x18] sm:$0xff] }
 0xb39   :  { %v4149_v48 = vadd.f32 %v11193_v12, %v4137_v36  ;;  %v4112_v11 = vadd.f32 1e-05, %v4096_v26  ;;  %8817 = vmatmul.mubr.msk.f32.vlgmr.msra.gmra.mrb[112].mxu0 %vm204_vm1, %v11215_v5  ;;  %8837 = vmatmul.mubr.msk.f32.vlgmr.msra.gmra.mrb[112].mxu1 %vm204_vm1, %v11215_v5 }
 0xb3a   :  { %v4148_v49 = vadd.f32 %v11193_v12, %v4136_v55  ;;  %9771 = vrsqrt.f32 %v4113_v23  ;;  %9427 = vmatpush3.bf16.msra.mxu0 %v11161_v22  ;;  %9435 = vmatpush3.bf16.msra.mxu1 %v11163_v58 }
 0xb3b   :  { %v4157_v40 = vadd.f32 %v4149_v48, %v10784_v60  ;;  %9773 = vrsqrt.f32 %v4112_v11  ;;  %9429 = vmatprep.subr.bf16.mxu0 %v9428_v56  ;;  %9437 = vmatprep.subr.bf16.mxu1 %v9436_v3 }
 0xb3c   :  { %v9768_v43 = vpop.eup %9767  ;;  %v4156_v18 = vadd.f32 %v4148_v49, %v10782_v1 }
 0xb3d   :  { %v9770_v22 = vpop.eup %9769  ;;  %v4127_v33 = vmul.f32 %v9768_v43, %v4103_v57  ;;  %v11241_v60 = vmax.f32 %v4157_v40, 0.0 }
 0xb3e   :  { %v11239_v58 = vmax.f32 %v4156_v18, 0.0  ;;  %v4126_v63 = vmul.f32 %v9770_v22, %v4102_v27  ;;  %9431 = vmatpush3.bf16.msra.mxu0 %v9428_v56  ;;  %9439 = vmatpush3.bf16.msra.mxu1 %v9436_v3 }
 0xb3f   :  { %v4139_v24 = vmul.f32 %v11184_v13, %v4127_v33  ;;  %9441 = vmatprep.subr.bf16.mxu0 %v11231_v25  ;;  %9449 = vmatprep.subr.bf16.mxu1 %v9448_v10 }
 0xb40   :  { %v4138_v30 = vmul.f32 %v11184_v13, %v4126_v63  ;;  %8819 = vmatprep.mubr.msk.f32.mxu0 %vm204_vm1, %v11239_v58  ;;  %8839 = vmatprep.mubr.msk.f32.mxu1 %vm204_vm1, %v11239_v58 }
 0xb41   :  { %v4151_v1 = vadd.f32 %v11193_v12, %v4139_v24  ;;  %8820 = vmatmul.mubr.msk.f32.gmra.mrb[114].mxu0 %vm204_vm1, %v11241_v60  ;;  %8840 = vmatmul.mubr.msk.f32.gmra.mrb[114].mxu1 %vm204_vm1, %v11241_v60 }
 0xb42   :  { %v4150_v16 = vadd.f32 %v11193_v12, %v4138_v30 }
 0xb43   :  { %v4159_v4 = vadd.f32 %v4151_v1, %v10807_v39 }
 0xb44   :  { %v9772_v21 = vpop.eup %9771  ;;  %v4158_v9 = vadd.f32 %v4150_v16, %v10805_v19 }
 0xb45   :  { %v9774_v0 = vpop.eup %9773  ;;  %v4129_v50 = vmul.f32 %v9772_v21, %v4105_v31  ;;  %v11264_v61 = vmax.f32 %v4159_v4, 0.0 }
 0xb46   :  { %v11262_v20 = vmax.f32 %v4158_v9, 0.0  ;;  %v4128_v35 = vmul.f32 %v9774_v0, %v4104_v45 }
 0xb47   :  { %v4141_v46 = vmul.f32 %v11184_v13, %v4129_v50 }
 0xb48   :  { %v4140_v39 = vmul.f32 %v11184_v13, %v4128_v35  ;;  %8822 = vmatprep.mubr.msk.f32.mxu0 %vm204_vm1, %v11262_v20  ;;  %8842 = vmatprep.mubr.msk.f32.mxu1 %vm204_vm1, %v11262_v20 }
 0xb49   :  { %v4153_v19 = vadd.f32 %v11193_v12, %v4141_v46  ;;  %8823 = vmatmul.mubr.msk.f32.gmra.mrb[116].mxu0 %vm204_vm1, %v11264_v61  ;;  %8843 = vmatmul.mubr.msk.f32.gmra.mrb[116].mxu1 %vm204_vm1, %v11264_v61 }
 0xb4a   :  { %v4152_v34 = vadd.f32 %v11193_v12, %v4140_v39  ;;  %v4787_v12 = vld [vmem:[#allocation5 + $0x2b0] sm:$0xff] }
 0xb4b   :  { %v4161_v29 = vadd.f32 %v4153_v19, %v10825_v14  ;;  %v4670_v14 = vld [vmem:[#allocation5 + $0x298] sm:$0xff] }
 0xb4c   :  { %v4160_v13 = vadd.f32 %v4152_v34, %v10823_v7  ;;  %v4788_v7 = vld [vmem:[#allocation5 + $0x2b8] sm:$0xff]  ;;  %v9444_v32 = vpack.c.bf16 %v4670_v14, %v4669_v15 }
 0xb4d   :  { %v11282_v62 = vmax.f32 %v4161_v29, 0.0  ;;  %v9452_v8 = vpack.c.bf16 %v4788_v7, %v4787_v12 }
 0xb4e   :  { %v11280_v38 = vmax.f32 %v4160_v13, 0.0 }
 0xb50   :  { %8825 = vmatprep.mubr.msk.f32.mxu0 %vm204_vm1, %v11280_v38  ;;  %8845 = vmatprep.mubr.msk.f32.mxu1 %vm204_vm1, %v11280_v38 }
 0xb51   :  { %8826 = vmatmul.mubr.msk.f32.gmra.mrb[118].mxu0 %vm204_vm1, %v11282_v62  ;;  %8846 = vmatmul.mubr.msk.f32.gmra.mrb[118].mxu1 %vm204_vm1, %v11282_v62 }
 0xb52   :  { %8856 = vmatprep.mubr.msk.f32.mxu0 %vm204_vm1, %v11213_v52  ;;  %8876 = vmatprep.mubr.msk.f32.mxu1 %vm204_vm1, %v11213_v52 }
 0xb55   :  { %8857 = vmatmul.mubr.msk.f32.vlgmr.msra.gmra.mrb[120].mxu0 %vm204_vm1, %v11215_v5  ;;  %8877 = vmatmul.mubr.msk.f32.vlgmr.msra.gmra.mrb[120].mxu1 %vm204_vm1, %v11215_v5 }
 0xb56   :  { %8859 = vmatprep.mubr.msk.f32.mxu0 %vm204_vm1, %v11239_v58  ;;  %8879 = vmatprep.mubr.msk.f32.mxu1 %vm204_vm1, %v11239_v58 }
 0xb57   :  { %9443 = vmatpush3.bf16.msra.mxu0 %v11231_v25  ;;  %9451 = vmatpush3.bf16.msra.mxu1 %v9448_v10 }
 0xb58   :  { %9445 = vmatprep.subr.bf16.mxu0 %v9444_v32  ;;  %9453 = vmatprep.subr.bf16.mxu1 %v9452_v8 }
 0xb59   :  { %8860 = vmatmul.mubr.msk.f32.gmra.mrb[122].mxu0 %vm204_vm1, %v11241_v60  ;;  %8880 = vmatmul.mubr.msk.f32.gmra.mrb[122].mxu1 %vm204_vm1, %v11241_v60 }
 0xb5a   :  { %8862 = vmatprep.mubr.msk.f32.mxu0 %vm204_vm1, %v11262_v20  ;;  %8882 = vmatprep.mubr.msk.f32.mxu1 %vm204_vm1, %v11262_v20 }
 0xb5b   :  { %9447 = vmatpush3.bf16.msra.mxu0 %v9444_v32  ;;  %9455 = vmatpush3.bf16.msra.mxu1 %v9452_v8 }
 0xb5c   :  { %9457 = vmatprep.subr.bf16.mxu0 %v9456_v53 }
 0xb5d   :  { %8863 = vmatmul.mubr.msk.f32.gmra.mrb[124].mxu0 %vm204_vm1, %v11264_v61  ;;  %8883 = vmatmul.mubr.msk.f32.gmra.mrb[124].mxu1 %vm204_vm1, %v11264_v61 }
 0xb5e   :  { %8865 = vmatprep.mubr.msk.f32.mxu0 %vm204_vm1, %v11280_v38  ;;  %8885 = vmatprep.mubr.msk.f32.mxu1 %vm204_vm1, %v11280_v38 }
 0xb61   :  { %8866 = vmatmul.mubr.msk.f32.gmra.mrb[126].mxu0 %vm204_vm1, %v11282_v62  ;;  %8886 = vmatmul.mubr.msk.f32.gmra.mrb[126].mxu1 %vm204_vm1, %v11282_v62 }
 0xb62   :  { %8896 = vmatprep.mubr.msk.f32.mxu0 %vm204_vm1, %v11213_v52  ;;  %8916 = vmatprep.mubr.msk.f32.mxu1 %vm204_vm1, %v11213_v52 }
 0xb65   :  { %8897 = vmatmul.mubr.msk.f32.vlgmr.msra.gmra.mrb[128].mxu0 %vm204_vm1, %v11215_v5  ;;  %8917 = vmatmul.mubr.msk.f32.vlgmr.msra.gmra.mrb[128].mxu1 %vm204_vm1, %v11215_v5 }
 0xb66   :  { %8899 = vmatprep.mubr.msk.f32.mxu0 %vm204_vm1, %v11239_v58  ;;  %8919 = vmatprep.mubr.msk.f32.mxu1 %vm204_vm1, %v11239_v58 }
 0xb67   :  { %9459 = vmatpush3.bf16.msra.mxu0 %v9456_v53 }
 0xb68   :  { %9461 = vmatprep.subr.bf16.mxu0 %v9460_v17 }
 0xb69   :  { %8900 = vmatmul.mubr.msk.f32.gmra.mrb[130].mxu0 %vm204_vm1, %v11241_v60  ;;  %8920 = vmatmul.mubr.msk.f32.gmra.mrb[130].mxu1 %vm204_vm1, %v11241_v60 }
 0xb6a   :  { %8902 = vmatprep.mubr.msk.f32.mxu0 %vm204_vm1, %v11262_v20  ;;  %8922 = vmatprep.mubr.msk.f32.mxu1 %vm204_vm1, %v11262_v20 }
 0xb6b   :  { %9463 = vmatpush3.bf16.msra.mxu0 %v9460_v17 }
 0xb6c   :  { %9496 = vmatprep.subr.bf16.mxu0 %v9893_v51 }
 0xb6d   :  { %8903 = vmatmul.mubr.msk.f32.gmra.mrb[132].mxu0 %vm204_vm1, %v11264_v61  ;;  %8923 = vmatmul.mubr.msk.f32.gmra.mrb[132].mxu1 %vm204_vm1, %v11264_v61 }
 0xb6e   :  { %8905 = vmatprep.mubr.msk.f32.mxu0 %vm204_vm1, %v11280_v38  ;;  %8925 = vmatprep.mubr.msk.f32.mxu1 %vm204_vm1, %v11280_v38 }
 0xb71   :  { %8906 = vmatmul.mubr.msk.f32.gmra.mrb[134].mxu0 %vm204_vm1, %v11282_v62  ;;  %8926 = vmatmul.mubr.msk.f32.gmra.mrb[134].mxu1 %vm204_vm1, %v11282_v62 }
 0xb72   :  { %8936 = vmatprep.mubr.msk.f32.mxu0 %vm204_vm1, %v11213_v52  ;;  %5196 = vmatprep.mubr.f32.mxu1 %v5021_v28 }
 0xb75   :  { %8937 = vmatmul.mubr.msk.f32.vlgmr.msra.gmra.mrb[136].mxu0 %vm204_vm1, %v11215_v5 }
 0xb76   :  { %8939 = vmatprep.mubr.msk.f32.mxu0 %vm204_vm1, %v11239_v58 }
 0xb79   :  { %8940 = vmatmul.mubr.msk.f32.gmra.mrb[138].mxu0 %vm204_vm1, %v11241_v60 }
 0xb7a   :  { %8942 = vmatprep.mubr.msk.f32.mxu0 %vm204_vm1, %v11262_v20 }
 0xb7d   :  { %8943 = vmatmul.mubr.msk.f32.gmra.mrb[140].mxu0 %vm204_vm1, %v11264_v61 }
 0xb7e   :  { %8945 = vmatprep.mubr.msk.f32.mxu0 %vm204_vm1, %v11280_v38 }
 0xb81   :  { %8946 = vmatmul.mubr.msk.f32.gmra.mrb[142].mxu0 %vm204_vm1, %v11282_v62 }
 0xb82   :  { %7674 = vmatprep.mubr.msk.f32.mxu0 %vm1863_vm2, %v5023_v54 }
 0xc0c   :  { %v8818_v56 = vpop.f32.mrb[112].mxu0  ;;  %v8838_v36 = vpop.f32.mrb[112].mxu1 }
 0xc0d   :  { %4305 = vst.msk [vmem:[#allocation2 + $0x8] sm:$0xff] %vm204_vm1, %v8818_v56  ;;  %4423 = vst.msk [vmem:[#allocation2 + $0x48] sm:$0xff] %vm204_vm1, %v8838_v36  ;;  %v4265_v26 = vpop.f32.mrb[113].mxu0  ;;  %v4383_v3 = vpop.f32.mrb[113].mxu1 }
 0xc0e   :  { %4304 = vst.msk [vmem:[#allocation2] sm:$0xff] %vm204_vm1, %v4265_v26  ;;  %4422 = vst.msk [vmem:[#allocation2 + $0x40] sm:$0xff] %vm204_vm1, %v4383_v3 }
 0xc14   :  { %v8821_v59 = vpop.f32.mrb[114].mxu0  ;;  %v8841_v42 = vpop.f32.mrb[114].mxu1  ;;  %v5053_v31 = vld [vmem:[#allocation2 + $0x8] sm:$0xff] }
 0xc15   :  { %4307 = vst.msk [vmem:[#allocation2 + $0x18] sm:$0xff] %vm204_vm1, %v8821_v59  ;;  %4425 = vst.msk [vmem:[#allocation2 + $0x58] sm:$0xff] %vm204_vm1, %v8841_v42  ;;  %v4275_v55 = vpop.f32.mrb[115].mxu0  ;;  %v4393_v23 = vpop.f32.mrb[115].mxu1  ;;  %v5052_v4 = vld [vmem:[#allocation2] sm:$0xff] }
 0xc16   :  { %4306 = vst.msk [vmem:[#allocation2 + $0x10] sm:$0xff] %vm204_vm1, %v4275_v55  ;;  %4424 = vst.msk [vmem:[#allocation2 + $0x50] sm:$0xff] %vm204_vm1, %v4393_v23  ;;  %v9466_v50 = vpack.c.bf16 %v5053_v31, %v5052_v4 }
 0xc1c   :  { %v8824_v6 = vpop.f32.mrb[116].mxu0  ;;  %v8844_v41 = vpop.f32.mrb[116].mxu1  ;;  %v5055_v34 = vld [vmem:[#allocation2 + $0x18] sm:$0xff] }
 0xc1d   :  { %4309 = vst.msk [vmem:[#allocation2 + $0x28] sm:$0xff] %vm204_vm1, %v8824_v6  ;;  %4427 = vst.msk [vmem:[#allocation2 + $0x68] sm:$0xff] %vm204_vm1, %v8844_v41  ;;  %v4285_v48 = vpop.f32.mrb[117].mxu0  ;;  %v4403_v11 = vpop.f32.mrb[117].mxu1  ;;  %v5054_v19 = vld [vmem:[#allocation2 + $0x10] sm:$0xff] }
 0xc1e   :  { %4308 = vst.msk [vmem:[#allocation2 + $0x20] sm:$0xff] %vm204_vm1, %v4285_v48  ;;  %4426 = vst.msk [vmem:[#allocation2 + $0x60] sm:$0xff] %vm204_vm1, %v4403_v11  ;;  %v9470_v12 = vpack.c.bf16 %v5055_v34, %v5054_v19  ;;  %v5062_v31 = vld [vmem:[#allocation2 + $0x50] sm:$0xff] }
 0xc24   :  { %v8827_v49 = vpop.f32.mrb[118].mxu0  ;;  %v8847_v25 = vpop.f32.mrb[118].mxu1  ;;  %v5057_v37 = vld [vmem:[#allocation2 + $0x28] sm:$0xff] }
 0xc25   :  { %4311 = vst.msk [vmem:[#allocation2 + $0x38] sm:$0xff] %vm204_vm1, %v8827_v49  ;;  %4429 = vst.msk [vmem:[#allocation2 + $0x78] sm:$0xff] %vm204_vm1, %v8847_v25  ;;  %v4295_v40 = vpop.f32.mrb[119].mxu0  ;;  %v4413_v57 = vpop.f32.mrb[119].mxu1  ;;  %v5056_v2 = vld [vmem:[#allocation2 + $0x20] sm:$0xff] }
 0xc26   :  { %4310 = vst.msk [vmem:[#allocation2 + $0x30] sm:$0xff] %vm204_vm1, %v4295_v40  ;;  %4428 = vst.msk [vmem:[#allocation2 + $0x70] sm:$0xff] %vm204_vm1, %v4413_v57  ;;  %v9474_v28 = vpack.c.bf16 %v5057_v37, %v5056_v2  ;;  %v5060_v57 = vld [vmem:[#allocation2 + $0x40] sm:$0xff] }
 0xc28   :  { %v8858_v10 = vpop.f32.mrb[120].mxu0  ;;  %v8878_v43 = vpop.f32.mrb[120].mxu1 }
 0xc29   :  { %4541 = vst.msk [vmem:[#allocation2 + $0x88] sm:$0xff] %vm204_vm1, %v8858_v10  ;;  %4659 = vst.msk [vmem:[#allocation2 + $0xc8] sm:$0xff] %vm204_vm1, %v8878_v43  ;;  %v4501_v18 = vpop.f32.mrb[121].mxu0  ;;  %v4619_v27 = vpop.f32.mrb[121].mxu1  ;;  %v5061_v10 = vld [vmem:[#allocation2 + $0x48] sm:$0xff] }
 0xc2a   :  { %4540 = vst.msk [vmem:[#allocation2 + $0x80] sm:$0xff] %vm204_vm1, %v4501_v18  ;;  %4658 = vst.msk [vmem:[#allocation2 + $0xc0] sm:$0xff] %vm204_vm1, %v4619_v27 }
 0xc2c   :  { %v8861_v22 = vpop.f32.mrb[122].mxu0  ;;  %v8881_v33 = vpop.f32.mrb[122].mxu1  ;;  %v5059_v3 = vld [vmem:[#allocation2 + $0x38] sm:$0xff] }
 0xc2d   :  { %4543 = vst.msk [vmem:[#allocation2 + $0x98] sm:$0xff] %vm204_vm1, %v8861_v22  ;;  %4661 = vst.msk [vmem:[#allocation2 + $0xd8] sm:$0xff] %vm204_vm1, %v8881_v33  ;;  %v4511_v63 = vpop.f32.mrb[123].mxu0  ;;  %v4629_v24 = vpop.f32.mrb[123].mxu1  ;;  %v5058_v26 = vld [vmem:[#allocation2 + $0x30] sm:$0xff] }
 0xc2e   :  { %4542 = vst.msk [vmem:[#allocation2 + $0x90] sm:$0xff] %vm204_vm1, %v4511_v63  ;;  %4660 = vst.msk [vmem:[#allocation2 + $0xd0] sm:$0xff] %vm204_vm1, %v4629_v24  ;;  %v9478_v48 = vpack.c.bf16 %v5059_v3, %v5058_v26  ;;  %v9482_v24 = vpack.c.bf16 %v5061_v10, %v5060_v57  ;;  %v5029_v57 = vld [vmem:[#allocation3 + $0x48] sm:$0xff] }
 0xc30   :  { %v8864_v30 = vpop.f32.mrb[124].mxu0  ;;  %v8884_v1 = vpop.f32.mrb[124].mxu1  ;;  %v5069_v16 = vld [vmem:[#allocation2 + $0x88] sm:$0xff] }
 0xc31   :  { %4545 = vst.msk [vmem:[#allocation2 + $0xa8] sm:$0xff] %vm204_vm1, %v8864_v30  ;;  %4663 = vst.msk [vmem:[#allocation2 + $0xe8] sm:$0xff] %vm204_vm1, %v8884_v1  ;;  %v4521_v21 = vpop.f32.mrb[125].mxu0  ;;  %v4639_v9 = vpop.f32.mrb[125].mxu1  ;;  %v5068_v45 = vld [vmem:[#allocation2 + $0x80] sm:$0xff]  ;;  %v5077_v6 = vld [vmem:[#allocation2 + $0xc8] sm:$0xff] }
 0xc32   :  { %4544 = vst.msk [vmem:[#allocation2 + $0xa0] sm:$0xff] %vm204_vm1, %v4521_v21  ;;  %4662 = vst.msk [vmem:[#allocation2 + $0xe0] sm:$0xff] %vm204_vm1, %v4639_v9  ;;  %v9464_v0 = vpack.c.bf16 %v5069_v16, %v5068_v45  ;;  %v5076_v23 = vld [vmem:[#allocation2 + $0xc0] sm:$0xff]  ;;  %v5063_v21 = vld [vmem:[#allocation2 + $0x58] sm:$0xff] }
 0xc33   :  { %v9480_v25 = vpack.c.bf16 %v5077_v6, %v5076_v23  ;;  %v5025_v6 = vld [vmem:[#allocation3 + $0x28] sm:$0xff] }
 0xc34   :  { %v8867_v35 = vpop.f32.mrb[126].mxu0  ;;  %v8887_v46 = vpop.f32.mrb[126].mxu1  ;;  %9465 = vmatprep.subr.bf16.mxu1 %v9464_v0  ;;  %v5071_v39 = vld [vmem:[#allocation2 + $0x98] sm:$0xff] }
 0xc35   :  { %4547 = vst.msk [vmem:[#allocation2 + $0xb8] sm:$0xff] %vm204_vm1, %v8867_v35  ;;  %4665 = vst.msk [vmem:[#allocation2 + $0xf8] sm:$0xff] %vm204_vm1, %v8887_v46  ;;  %v4531_v29 = vpop.f32.mrb[127].mxu0  ;;  %v4649_v13 = vpop.f32.mrb[127].mxu1  ;;  %9467 = vmatpush3.bf16.msra.mxu1 %v9466_v50  ;;  %v5070_v15 = vld [vmem:[#allocation2 + $0x90] sm:$0xff]  ;;  %v5079_v33 = vld [vmem:[#allocation2 + $0xd8] sm:$0xff] }
 0xc36   :  { %4546 = vst.msk [vmem:[#allocation2 + $0xb0] sm:$0xff] %vm204_vm1, %v4531_v29  ;;  %4664 = vst.msk [vmem:[#allocation2 + $0xf0] sm:$0xff] %vm204_vm1, %v4649_v13  ;;  %v9468_v14 = vpack.c.bf16 %v5071_v39, %v5070_v15  ;;  %v5078_v22 = vld [vmem:[#allocation2 + $0xd0] sm:$0xff]  ;;  %v9486_v39 = vpack.c.bf16 %v5063_v21, %v5062_v31  ;;  %v5064_v13 = vld [vmem:[#allocation2 + $0x60] sm:$0xff] }
 0xc37   :  { %v9484_v16 = vpack.c.bf16 %v5079_v33, %v5078_v22  ;;  %v5065_v15 = vld [vmem:[#allocation2 + $0x68] sm:$0xff]  ;;  %v5036_v31 = vld [vmem:[#allocation3 + $0x80] sm:$0xff] }
 0xc38   :  { %v8898_v7 = vpop.f32.mrb[128].mxu0  ;;  %v8918_v32 = vpop.f32.mrb[128].mxu1  ;;  %9469 = vmatprep.subr.bf16.mxu1 %v9468_v14  ;;  %v5073_v8 = vld [vmem:[#allocation2 + $0xa8] sm:$0xff]  ;;  %v9490_v2 = vpack.c.bf16 %v5065_v15, %v5064_v13 }
 0xc39   :  { %4777 = vst.msk [vmem:[#allocation2 + $0x108] sm:$0xff] %vm204_vm1, %v8898_v7  ;;  %4895 = vst.msk [vmem:[#allocation2 + $0x148] sm:$0xff] %vm204_vm1, %v8918_v32  ;;  %v4737_v53 = vpop.f32.mrb[129].mxu0  ;;  %v4855_v47 = vpop.f32.mrb[129].mxu1  ;;  %9471 = vmatpush3.bf16.msra.mxu1 %v9470_v12  ;;  %v5072_v44 = vld [vmem:[#allocation2 + $0xa0] sm:$0xff]  ;;  %v5081_v35 = vld [vmem:[#allocation2 + $0xe8] sm:$0xff] }
 0xc3a   :  { %4776 = vst.msk [vmem:[#allocation2 + $0x100] sm:$0xff] %vm204_vm1, %v4737_v53  ;;  %4894 = vst.msk [vmem:[#allocation2 + $0x140] sm:$0xff] %vm204_vm1, %v4855_v47  ;;  %v9472_v17 = vpack.c.bf16 %v5073_v8, %v5072_v44  ;;  %v5080_v50 = vld [vmem:[#allocation2 + $0xe0] sm:$0xff]  ;;  %v5066_v44 = vld [vmem:[#allocation2 + $0x70] sm:$0xff] }
 0xc3b   :  { %v9488_v34 = vpack.c.bf16 %v5081_v35, %v5080_v50  ;;  %v5033_v22 = vld [vmem:[#allocation3 + $0x68] sm:$0xff]  ;;  %v5040_v50 = vld [vmem:[#allocation3 + $0xa0] sm:$0xff] }
 0xc3c   :  { %v8901_v54 = vpop.f32.mrb[130].mxu0  ;;  %v8921_v56 = vpop.f32.mrb[130].mxu1  ;;  %9473 = vmatprep.subr.bf16.mxu1 %v9472_v17  ;;  %v5075_v36 = vld [vmem:[#allocation2 + $0xb8] sm:$0xff]  ;;  %v5049_v13 = vld [vmem:[#allocation3 + $0xe8] sm:$0xff] }
 0xc3d   :  { %4779 = vst.msk [vmem:[#allocation2 + $0x118] sm:$0xff] %vm204_vm1, %v8901_v54  ;;  %4897 = vst.msk [vmem:[#allocation2 + $0x158] sm:$0xff] %vm204_vm1, %v8921_v56  ;;  %v4747_v59 = vpop.f32.mrb[131].mxu0  ;;  %v4865_v42 = vpop.f32.mrb[131].mxu1  ;;  %9475 = vmatpush3.bf16.msra.mxu1 %v9474_v28  ;;  %v5074_v55 = vld [vmem:[#allocation2 + $0xb0] sm:$0xff]  ;;  %v5083_v32 = vld [vmem:[#allocation2 + $0xf8] sm:$0xff] }
 0xc3e   :  { %4778 = vst.msk [vmem:[#allocation2 + $0x110] sm:$0xff] %vm204_vm1, %v4747_v59  ;;  %4896 = vst.msk [vmem:[#allocation2 + $0x150] sm:$0xff] %vm204_vm1, %v4865_v42  ;;  %v9476_v41 = vpack.c.bf16 %v5075_v36, %v5074_v55  ;;  %v5082_v7 = vld [vmem:[#allocation2 + $0xf0] sm:$0xff]  ;;  %v5067_v17 = vld [vmem:[#allocation2 + $0x78] sm:$0xff] }
 0xc3f   :  { %v9492_v53 = vpack.c.bf16 %v5083_v32, %v5082_v7  ;;  %v9494_v36 = vpack.c.bf16 %v5067_v17, %v5066_v44  ;;  %v5020_v55 = vld [vmem:[#allocation3] sm:$0xff]  ;;  %v5022_v32 = vld [vmem:[#allocation3 + $0x10] sm:$0xff]  ;;  %v5039_v17 = vld [vmem:[#allocation3 + $0x98] sm:$0xff] }
 0xc40   :  { %v8904_v11 = vpop.f32.mrb[132].mxu0  ;;  %v8924_v49 = vpop.f32.mrb[132].mxu1  ;;  %9477 = vmatprep.subr.bf16.mxu1 %v9476_v41  ;;  %v5085_v40 = vld [vmem:[#allocation2 + $0x108] sm:$0xff]  ;;  %v5034_v44 = vld [vmem:[#allocation3 + $0x70] sm:$0xff] }
 0xc41   :  { %4781 = vst.msk [vmem:[#allocation2 + $0x128] sm:$0xff] %vm204_vm1, %v8904_v11  ;;  %4899 = vst.msk [vmem:[#allocation2 + $0x168] sm:$0xff] %vm204_vm1, %v8924_v49  ;;  %v4757_v43 = vpop.f32.mrb[133].mxu0  ;;  %v4875_v18 = vpop.f32.mrb[133].mxu1  ;;  %9479 = vmatpush3.bf16.msra.mxu1 %v9478_v48  ;;  %v5084_v27 = vld [vmem:[#allocation2 + $0x100] sm:$0xff]  ;;  %v5093_v3 = vld [vmem:[#allocation2 + $0x148] sm:$0xff] }
 0xc42   :  { %4780 = vst.msk [vmem:[#allocation2 + $0x120] sm:$0xff] %vm204_vm1, %v4757_v43  ;;  %4898 = vst.msk [vmem:[#allocation2 + $0x160] sm:$0xff] %vm204_vm1, %v4875_v18  ;;  %9481 = vmatprep.subr.bf16.mxu1 %v9480_v25  ;;  %v9497_v63 = vpack.c.bf16 %v5085_v40, %v5084_v27  ;;  %v5092_v26 = vld [vmem:[#allocation2 + $0x140] sm:$0xff] }
 0xc43   :  { %v9509_v23 = vpack.c.bf16 %v5093_v3, %v5092_v26  ;;  %v5024_v25 = vld [vmem:[#allocation3 + $0x20] sm:$0xff]  ;;  %v5046_v26 = vld [vmem:[#allocation3 + $0xd0] sm:$0xff]  ;;  %v5051_v3 = vld [vmem:[#allocation3 + $0xf8] sm:$0xff] }
 0xc44   :  { %v8907_v30 = vpop.f32.mrb[134].mxu0  ;;  %v8927_v1 = vpop.f32.mrb[134].mxu1  ;;  %9498 = vmatpush1.bf16.msra.mxu0 %v9497_v63  ;;  %v5087_v4 = vld [vmem:[#allocation2 + $0x118] sm:$0xff]  ;;  %v5028_v18 = vld [vmem:[#allocation3 + $0x40] sm:$0xff] }
 0xc45   :  { %4783 = vst.msk [vmem:[#allocation2 + $0x138] sm:$0xff] %vm204_vm1, %v8907_v30  ;;  %4901 = vst.msk [vmem:[#allocation2 + $0x178] sm:$0xff] %vm204_vm1, %v8927_v1  ;;  %v4767_v9 = vpop.f32.mrb[135].mxu0  ;;  %v4885_v45 = vpop.f32.mrb[135].mxu1  ;;  %9483 = vmatpush3.bf16.msra.mxu1 %v9482_v24  ;;  %9499 = vmatprep.subr.bf16.mxu0 %v9893_v51  ;;  %v5086_v0 = vld [vmem:[#allocation2 + $0x110] sm:$0xff]  ;;  %v5095_v48 = vld [vmem:[#allocation2 + $0x158] sm:$0xff] }
 0xc46   :  { %4782 = vst.msk [vmem:[#allocation2 + $0x130] sm:$0xff] %vm204_vm1, %v4767_v9  ;;  %4900 = vst.msk [vmem:[#allocation2 + $0x170] sm:$0xff] %vm204_vm1, %v4885_v45  ;;  %9485 = vmatprep.subr.bf16.mxu1 %v9484_v16  ;;  %v9500_v46 = vpack.c.bf16 %v5087_v4, %v5086_v0  ;;  %v5094_v41 = vld [vmem:[#allocation2 + $0x150] sm:$0xff]  ;;  %v5032_v24 = vld [vmem:[#allocation3 + $0x60] sm:$0xff] }
 0xc47   :  { %v9512_v40 = vpack.c.bf16 %v5095_v48, %v5094_v41  ;;  %v5037_v1 = vld [vmem:[#allocation3 + $0x88] sm:$0xff] }
 0xc48   :  { %v8938_v19 = vpop.f32.mrb[136].mxu0  ;;  %9501 = vmatpush1.bf16.msra.mxu0 %v9500_v46  ;;  %v5089_v29 = vld [vmem:[#allocation2 + $0x128] sm:$0xff] }
 0xc49   :  { %5013 = vst.msk [vmem:[#allocation2 + $0x188] sm:$0xff] %vm204_vm1, %v8938_v19  ;;  %v4973_v14 = vpop.f32.mrb[137].mxu0  ;;  %9487 = vmatpush3.bf16.msra.mxu1 %v9486_v39  ;;  %9502 = vmatprep.subr.bf16.mxu0 %v9893_v51  ;;  %v5088_v12 = vld [vmem:[#allocation2 + $0x120] sm:$0xff]  ;;  %v5097_v43 = vld [vmem:[#allocation2 + $0x168] sm:$0xff] }
 0xc4a   :  { %5012 = vst.msk [vmem:[#allocation2 + $0x180] sm:$0xff] %vm204_vm1, %v4973_v14  ;;  %9489 = vmatprep.subr.bf16.mxu1 %v9488_v34  ;;  %v9503_v8 = vpack.c.bf16 %v5089_v29, %v5088_v12  ;;  %v5096_v10 = vld [vmem:[#allocation2 + $0x160] sm:$0xff]  ;;  %v5041_v9 = vld [vmem:[#allocation3 + $0xa8] sm:$0xff] }
 0xc4b   :  { %v9515_v27 = vpack.c.bf16 %v5097_v43, %v5096_v10  ;;  %v5045_v46 = vld [vmem:[#allocation3 + $0xc8] sm:$0xff]  ;;  %v5044_v34 = vld [vmem:[#allocation3 + $0xc0] sm:$0xff] }
 0xc4c   :  { %v8941_v37 = vpop.f32.mrb[138].mxu0  ;;  %9504 = vmatpush1.bf16.msra.mxu0 %v9503_v8  ;;  %v5091_v47 = vld [vmem:[#allocation2 + $0x138] sm:$0xff]  ;;  %v5048_v12 = vld [vmem:[#allocation3 + $0xe0] sm:$0xff] }
 0xc4d   :  { %5015 = vst.msk [vmem:[#allocation2 + $0x198] sm:$0xff] %vm204_vm1, %v8941_v37  ;;  %v4983_v28 = vpop.f32.mrb[139].mxu0  ;;  %9491 = vmatpush3.bf16.msra.mxu1 %v9490_v2  ;;  %9505 = vmatprep.subr.bf16.mxu0 %v9893_v51  ;;  %v5090_v54 = vld [vmem:[#allocation2 + $0x130] sm:$0xff]  ;;  %v5099_v63 = vld [vmem:[#allocation2 + $0x178] sm:$0xff] }
 0xc4e   :  { %5014 = vst.msk [vmem:[#allocation2 + $0x190] sm:$0xff] %vm204_vm1, %v4983_v28  ;;  %9493 = vmatprep.subr.bf16.mxu1 %v9492_v53  ;;  %v9506_v56 = vpack.c.bf16 %v5091_v47, %v5090_v54  ;;  %v5098_v33 = vld [vmem:[#allocation2 + $0x170] sm:$0xff]  ;;  %v5027_v8 = vld [vmem:[#allocation3 + $0x38] sm:$0xff] }
 0xc4f   :  { %v9518_v30 = vpack.c.bf16 %v5099_v63, %v5098_v33  ;;  %v5026_v2 = vld [vmem:[#allocation3 + $0x30] sm:$0xff]  ;;  %v5031_v37 = vld [vmem:[#allocation3 + $0x58] sm:$0xff] }
 0xc50   :  { %v8944_v59 = vpop.f32.mrb[140].mxu0  ;;  %9507 = vmatpush1.bf16.msra.mxu0 %v9506_v56  ;;  %v5101_v4 = vld [vmem:[#allocation2 + $0x188] sm:$0xff]  ;;  %v5030_v53 = vld [vmem:[#allocation3 + $0x50] sm:$0xff]  ;;  %v5035_v47 = vld [vmem:[#allocation3 + $0x78] sm:$0xff] }
 0xc51   :  { %5017 = vst.msk [vmem:[#allocation2 + $0x1a8] sm:$0xff] %vm204_vm1, %v8944_v59  ;;  %v4993_v42 = vpop.f32.mrb[141].mxu0  ;;  %9495 = vmatpush3.bf16.msra.mxu1 %v9494_v36  ;;  %9508 = vmatprep.subr.bf16.mxu0 %v9893_v51  ;;  %v5100_v16 = vld [vmem:[#allocation2 + $0x180] sm:$0xff]  ;;  %v5038_v28 = vld [vmem:[#allocation3 + $0x90] sm:$0xff]  ;;  %v5043_v54 = vld [vmem:[#allocation3 + $0xb8] sm:$0xff] }
 0xc52   :  { %5016 = vst.msk [vmem:[#allocation2 + $0x1a0] sm:$0xff] %vm204_vm1, %v4993_v42  ;;  %v9521_v21 = vpack.c.bf16 %v5101_v4, %v5100_v16  ;;  %v5042_v56 = vld [vmem:[#allocation3 + $0xb0] sm:$0xff]  ;;  %v5047_v36 = vld [vmem:[#allocation3 + $0xd8] sm:$0xff] }
 0xc53   :  { %v5050_v59 = vld [vmem:[#allocation3 + $0xf0] sm:$0xff] }
 0xc54   :  { %v8947_v11 = vpop.f32.mrb[142].mxu0  ;;  %9510 = vmatpush1.bf16.msra.mxu0 %v9509_v23  ;;  %5197 = vmatmul.mubr.f32.vlgmr.msra.gmra.mrb[136].mxu1 %v5020_v55  ;;  %v5103_v0 = vld [vmem:[#allocation2 + $0x198] sm:$0xff] }
 0xc55   :  { %5019 = vst.msk [vmem:[#allocation2 + $0x1b8] sm:$0xff] %vm204_vm1, %v8947_v11  ;;  %v5003_v49 = vpop.f32.mrb[143].mxu0  ;;  %9511 = vmatprep.subr.bf16.mxu0 %v9893_v51  ;;  %5201 = vmatprep.mubr.f32.mxu1 %v5025_v6  ;;  %v5102_v45 = vld [vmem:[#allocation2 + $0x190] sm:$0xff] }
 0xc56   :  { %5018 = vst.msk [vmem:[#allocation2 + $0x1b0] sm:$0xff] %vm204_vm1, %v5003_v49  ;;  %v9524_v35 = vpack.c.bf16 %v5103_v0, %v5102_v45 }
 0xc58   :  { %9513 = vmatpush1.bf16.msra.mxu0 %v9512_v40  ;;  %5202 = vmatmul.mubr.f32.gmra.mrb[138].mxu1 %v5024_v25  ;;  %v5105_v19 = vld [vmem:[#allocation2 + $0x1a8] sm:$0xff] }
 0xc59   :  { %9514 = vmatprep.subr.bf16.mxu0 %v9893_v51  ;;  %5206 = vmatprep.mubr.f32.mxu1 %v5029_v57  ;;  %v5104_v39 = vld [vmem:[#allocation2 + $0x1a0] sm:$0xff] }
 0xc5a   :  { %v9527_v29 = vpack.c.bf16 %v5105_v19, %v5104_v39 }
 0xc5c   :  { %9516 = vmatpush1.bf16.msra.mxu0 %v9515_v27  ;;  %5207 = vmatmul.mubr.f32.gmra.mrb[140].mxu1 %v5028_v18  ;;  %v5107_v14 = vld [vmem:[#allocation2 + $0x1b8] sm:$0xff] }
 0xc5d   :  { %9517 = vmatprep.subr.bf16.mxu0 %v9893_v51  ;;  %5211 = vmatprep.mubr.f32.mxu1 %v5033_v22  ;;  %v5106_v15 = vld [vmem:[#allocation2 + $0x1b0] sm:$0xff] }
 0xc5e   :  { %v9530_v7 = vpack.c.bf16 %v5107_v14, %v5106_v15 }
 0xc60   :  { %9519 = vmatpush1.bf16.msra.mxu0 %v9518_v30  ;;  %5212 = vmatmul.mubr.f32.gmra.mrb[142].mxu1 %v5032_v24 }
 0xc61   :  { %9520 = vmatprep.subr.bf16.mxu0 %v9893_v51  ;;  %5216 = vmatprep.mubr.f32.mxu1 %v5037_v1 }
 0xc64   :  { %9522 = vmatpush1.bf16.msra.mxu0 %v9521_v21  ;;  %5217 = vmatmul.mubr.f32.gmra.mrb[144].mxu1 %v5036_v31 }
 0xc65   :  { %9523 = vmatprep.subr.bf16.mxu0 %v9893_v51  ;;  %5221 = vmatprep.mubr.f32.mxu1 %v5041_v9 }
 0xc68   :  { %9525 = vmatpush1.bf16.msra.mxu0 %v9524_v35  ;;  %5222 = vmatmul.mubr.f32.gmra.mrb[146].mxu1 %v5040_v50 }
 0xc69   :  { %9526 = vmatprep.subr.bf16.mxu0 %v9893_v51  ;;  %5226 = vmatprep.mubr.f32.mxu1 %v5045_v46 }
 0xc6c   :  { %9528 = vmatpush1.bf16.msra.mxu0 %v9527_v29  ;;  %5227 = vmatmul.mubr.f32.gmra.mrb[148].mxu1 %v5044_v34 }
 0xc6d   :  { %9529 = vmatprep.subr.bf16.mxu0 %v9893_v51  ;;  %5231 = vmatprep.mubr.f32.mxu1 %v5049_v13 }
 0xc70   :  { %9531 = vmatpush1.bf16.msra.mxu0 %v9530_v7  ;;  %5232 = vmatmul.mubr.f32.gmra.mrb[150].mxu1 %v5048_v12 }
 0xc73   :  { %5302 = vmatmul.mubr.f32.vlgmr.msra.gmra.mrb[144].mxu0 %v5022_v32 }
 0xc74   :  { %7675 = vmatprep.mubr.msk.f32.mxu0 %vm1863_vm2, %v5027_v8 }
 0xc77   :  { %5307 = vmatmul.mubr.f32.gmra.mrb[146].mxu0 %v5026_v2 }
 0xc78   :  { %7676 = vmatprep.mubr.msk.f32.mxu0 %vm1863_vm2, %v5031_v37 }
 0xc7b   :  { %5312 = vmatmul.mubr.f32.gmra.mrb[148].mxu0 %v5030_v53 }
 0xc7c   :  { %7677 = vmatprep.mubr.msk.f32.mxu0 %vm1863_vm2, %v5035_v47 }
 0xc7f   :  { %5317 = vmatmul.mubr.f32.gmra.mrb[150].mxu0 %v5034_v44 }
 0xc80   :  { %7678 = vmatprep.mubr.msk.f32.mxu0 %vm1863_vm2, %v5039_v17 }
 0xc83   :  { %5322 = vmatmul.mubr.f32.gmra.mrb[152].mxu0 %v5038_v28 }
 0xc84   :  { %7679 = vmatprep.mubr.msk.f32.mxu0 %vm1863_vm2, %v5043_v54 }
 0xc87   :  { %5327 = vmatmul.mubr.f32.gmra.mrb[154].mxu0 %v5042_v56 }
 0xc88   :  { %7680 = vmatprep.mubr.msk.f32.mxu0 %vm1863_vm2, %v5047_v36 }
 0xc8b   :  { %5332 = vmatmul.mubr.f32.gmra.mrb[156].mxu0 %v5046_v26 }
 0xc8c   :  { %7681 = vmatprep.mubr.msk.f32.mxu0 %vm1863_vm2, %v5051_v3 }
 0xc8f   :  { %5337 = vmatmul.mubr.f32.gmra.mrb[158].mxu0 %v5050_v59  ;;  %v5497_v59 = vld [vmem:[#allocation5 + $0x2e0] sm:$0xff] }
 0xd27   :  { %v8232_v42 = vpop.f32.mrb[136].mxu1 }
 0xd28   :  { %v8233_v55 = vpop.f32.mrb[137].mxu1 }
 0xd29   :  { %v8234_v23 = vadd.f32 %v8233_v55, %v8232_v42  ;;  %v5498_v42 = vld [vmem:[#allocation5 + $0x2e8] sm:$0xff] }
 0xd2b   :  { %v8235_v6 = vpop.f32.mrb[138].mxu1 }
 0xd2c   :  { %v8236_v41 = vpop.f32.mrb[139].mxu1 }
 0xd2d   :  { %v8237_v48 = vadd.f32 %v8236_v41, %v8235_v6  ;;  %v9532_v6 = vpack.c.bf16 %v5498_v42, %v5497_v59 }
 0xd2f   :  { %v8238_v11 = vpop.f32.mrb[140].mxu1  ;;  %9533 = vmatprep.subr.bf16.mxu1 %v9532_v6 }
 0xd30   :  { %v8239_v49 = vpop.f32.mrb[141].mxu1  ;;  %9535 = vmatpush3.bf16.msra.mxu1 %v9532_v6 }
 0xd31   :  { %v8240_v25 = vadd.f32 %v8239_v49, %v8238_v11 }
 0xd33   :  { %v8241_v40 = vpop.f32.mrb[142].mxu1 }
 0xd34   :  { %v8242_v57 = vpop.f32.mrb[143].mxu1 }
 0xd35   :  { %v8243_v10 = vadd.f32 %v8242_v57, %v8241_v40 }
 0xd37   :  { %v8244_v43 = vpop.f32.mrb[144].mxu1 }
 0xd38   :  { %v8245_v18 = vpop.f32.mrb[145].mxu1 }
 0xd39   :  { %v8246_v27 = vadd.f32 %v8245_v18, %v8244_v43 }
 0xd3b   :  { %v8247_v22 = vpop.f32.mrb[146].mxu1 }
 0xd3c   :  { %v8248_v33 = vpop.f32.mrb[147].mxu1 }
 0xd3d   :  { %v8249_v63 = vadd.f32 %v8248_v33, %v8247_v22 }
 0xd3f   :  { %v8250_v24 = vpop.f32.mrb[148].mxu1 }
 0xd40   :  { %v8251_v30 = vpop.f32.mrb[149].mxu1 }
 0xd41   :  { %v8252_v1 = vadd.f32 %v8251_v30, %v8250_v24 }
 0xd43   :  { %v8253_v16 = vpop.f32.mrb[150].mxu1 }
 0xd44   :  { %v8254_v4 = vpop.f32.mrb[151].mxu1 }
 0xd45   :  { %v8255_v31 = vadd.f32 %v8254_v4, %v8253_v16  ;;  %v5500_v16 = vld [vmem:[#allocation5 + $0x2f8] sm:$0xff] }
 0xd46   :  { %v5303_v21 = vpop.f32.mrb[144].mxu0 }
 0xd47   :  { %v11449_v9 = vadd.f32 %v8234_v23, %v5303_v21  ;;  %v5305_v45 = vpop.f32.mrb[145].mxu0 }
 0xd49   :  { %v5344_v0 = vsel %vm204_vm1, %v11449_v9, 0.0  ;;  %v5368_v50 = vmul.f32 %v11449_v9, %v11449_v9 }
 0xd4a   :  { %v5308_v35 = vpop.f32.mrb[146].mxu0  ;;  %5345 = vadd.xlane.f32.xlu0 %v5344_v0 }
 0xd4b   :  { %v11455_v46 = vadd.f32 %v8237_v48, %v5308_v35  ;;  %v5310_v39 = vpop.f32.mrb[147].mxu0  ;;  %v5376_v34 = vsel %vm204_vm1, %v5368_v50, 0.0 }
 0xd4d   :  { %v5347_v19 = vsel %vm204_vm1, %v11455_v46, 0.0  ;;  %v5369_v29 = vmul.f32 %v11455_v46, %v11455_v46 }
 0xd4e   :  { %v5313_v13 = vpop.f32.mrb[148].mxu0  ;;  %5348 = vadd.xlane.f32.xlu1 %v5347_v19  ;;  %5377 = vadd.xlane.f32.xlu0 %v5376_v34 }
 0xd4f   :  { %v11462_v15 = vadd.f32 %v8240_v25, %v5313_v13  ;;  %v5315_v14 = vpop.f32.mrb[149].mxu0  ;;  %v5379_v12 = vsel %vm204_vm1, %v5369_v29, 0.0 }
 0xd51   :  { %v5350_v7 = vsel %vm204_vm1, %v11462_v15, 0.0  ;;  %v5370_v32 = vmul.f32 %v11462_v15, %v11462_v15 }
 0xd52   :  { %v5318_v8 = vpop.f32.mrb[150].mxu0  ;;  %5380 = vadd.xlane.f32.xlu1 %v5379_v12  ;;  %5351 = vadd.xlane.f32.xlu0 %v5350_v7 }
 0xd53   :  { %v11469_v2 = vadd.f32 %v8243_v10, %v5318_v8  ;;  %v5320_v37 = vpop.f32.mrb[151].mxu0  ;;  %v5382_v47 = vsel %vm204_vm1, %v5370_v32, 0.0 }
 0xd55   :  { %v5353_v53 = vsel %vm204_vm1, %v11469_v2, 0.0  ;;  %v5371_v44 = vmul.f32 %v11469_v2, %v11469_v2 }
 0xd56   :  { %v5323_v17 = vpop.f32.mrb[152].mxu0  ;;  %5354 = vadd.xlane.f32.xlu1 %v5353_v53  ;;  %5383 = vadd.xlane.f32.xlu0 %v5382_v47 }
 0xd57   :  { %v11476_v28 = vadd.f32 %v8246_v27, %v5323_v17  ;;  %v5325_v54 = vpop.f32.mrb[153].mxu0  ;;  %v5385_v56 = vsel %vm204_vm1, %v5371_v44, 0.0 }
 0xd59   :  { %v5356_v36 = vsel %vm204_vm1, %v11476_v28, 0.0  ;;  %v5372_v26 = vmul.f32 %v11476_v28, %v11476_v28 }
 0xd5a   :  { %v5328_v3 = vpop.f32.mrb[154].mxu0  ;;  %5386 = vadd.xlane.f32.xlu1 %v5385_v56  ;;  %5357 = vadd.xlane.f32.xlu0 %v5356_v36 }
 0xd5b   :  { %v11483_v55 = vadd.f32 %v8249_v63, %v5328_v3  ;;  %v5330_v23 = vpop.f32.mrb[155].mxu0  ;;  %v5388_v48 = vsel %vm204_vm1, %v5372_v26, 0.0 }
 0xd5d   :  { %v5359_v41 = vsel %vm204_vm1, %v11483_v55, 0.0  ;;  %v5373_v11 = vmul.f32 %v11483_v55, %v11483_v55 }
 0xd5e   :  { %v5333_v49 = vpop.f32.mrb[156].mxu0  ;;  %5360 = vadd.xlane.f32.xlu1 %v5359_v41  ;;  %5389 = vadd.xlane.f32.xlu0 %v5388_v48 }
 0xd5f   :  { %v11490_v25 = vadd.f32 %v8252_v1, %v5333_v49  ;;  %v5335_v40 = vpop.f32.mrb[157].mxu0  ;;  %v5391_v57 = vsel %vm204_vm1, %v5373_v11, 0.0  ;;  %v5499_v1 = vld [vmem:[#allocation5 + $0x2f0] sm:$0xff]  ;;  %v11515_v49 = vld [vmem:[%s12168_s4 + $0xe] ss:$0 sm:$0xff] }
 0xd60   :  { %v9536_v4 = vpack.c.bf16 %v5500_v16, %v5499_v1 }
 0xd61   :  { %v5362_v10 = vsel %vm204_vm1, %v11490_v25, 0.0  ;;  %v5374_v43 = vmul.f32 %v11490_v25, %v11490_v25 }
 0xd62   :  { %v5338_v18 = vpop.f32.mrb[158].mxu0  ;;  %5392 = vadd.xlane.f32.xlu1 %v5391_v57  ;;  %5363 = vadd.xlane.f32.xlu0 %v5362_v10 }
 0xd63   :  { %v11497_v27 = vadd.f32 %v8255_v31, %v5338_v18  ;;  %v5340_v22 = vpop.f32.mrb[159].mxu0  ;;  %v5394_v63 = vsel %vm204_vm1, %v5374_v43, 0.0  ;;  %9537 = vmatprep.subr.bf16.mxu1 %v9536_v4 }
 0xd64   :  { %9539 = vmatpush3.bf16.msra.mxu1 %v9536_v4 }
 0xd65   :  { %v5365_v33 = vsel %vm204_vm1, %v11497_v27, 0.0  ;;  %v5375_v24 = vmul.f32 %v11497_v27, %v11497_v27 }
 0xd66   :  { %5366 = vadd.xlane.f32.xlu1 %v5365_v33  ;;  %5395 = vadd.xlane.f32.xlu0 %v5394_v63 }
 0xd67   :  { %v5397_v30 = vsel %vm204_vm1, %v5375_v24, 0.0 }
 0xd6a   :  { %5398 = vadd.xlane.f32.xlu1 %v5397_v30 }
 0xdd7   :  { %v5346_v31 = vpop.xlane.xlu0 %5345 }
 0xdd8   :  { %v5400_v21 = vmul.f32 0.03125, %v5346_v31 }
 0xdda   :  { %v5416_v50 = vmul.f32 %v5400_v21, %v5400_v21  ;;  %v5432_v6 = vsub.f32 %v11449_v9, %v5400_v21  ;;  %v11524_v9 = vld [vmem:[%s12168_s4 + $0xf] ss:$0 sm:$0xff] }
 0xddb   :  { %v5349_v45 = vpop.xlane.xlu1 %5348  ;;  %v5378_v0 = vpop.xlane.xlu0 %5377 }
 0xddc   :  { %v5401_v35 = vmul.f32 0.03125, %v5349_v45  ;;  %v5408_v39 = vmul.f32 0.03125, %v5378_v0 }
 0xdde   :  { %v5424_v19 = vsub.f32 %v5408_v39, %v5416_v50  ;;  %v5417_v13 = vmul.f32 %v5401_v35, %v5401_v35  ;;  %v5433_v33 = vsub.f32 %v11455_v46, %v5401_v35 }
 0xddf   :  { %v5381_v34 = vpop.xlane.xlu1 %5380  ;;  %v5352_v29 = vpop.xlane.xlu0 %5351 }
 0xde0   :  { %v5440_v14 = vadd.f32 1e-05, %v5424_v19  ;;  %v5409_v12 = vmul.f32 0.03125, %v5381_v34  ;;  %v5402_v7 = vmul.f32 0.03125, %v5352_v29 }
 0xde2   :  { %9775 = vrsqrt.f32 %v5440_v14  ;;  %v5425_v32 = vsub.f32 %v5409_v12, %v5417_v13  ;;  %v5418_v47 = vmul.f32 %v5402_v7, %v5402_v7  ;;  %v5434_v46 = vsub.f32 %v11462_v15, %v5402_v7 }
 0xde3   :  { %v5355_v8 = vpop.xlane.xlu1 %5354  ;;  %v5384_v37 = vpop.xlane.xlu0 %5383 }
 0xde4   :  { %v5441_v53 = vadd.f32 1e-05, %v5425_v32  ;;  %v11505_v44 = vmul.f32 0.03125, %v5355_v8  ;;  %v5410_v17 = vmul.f32 0.03125, %v5384_v37 }
 0xde6   :  { %9777 = vrsqrt.f32 %v5441_v53  ;;  %v5426_v54 = vsub.f32 %v5410_v17, %v5418_v47  ;;  %v5419_v26 = vmul.f32 %v11505_v44, %v11505_v44  ;;  %v5435_v47 = vsub.f32 %v11469_v2, %v11505_v44 }
 0xde7   :  { %v5387_v56 = vpop.xlane.xlu1 %5386  ;;  %v5358_v36 = vpop.xlane.xlu0 %5357 }
 0xde8   :  { %v5442_v3 = vadd.f32 1e-05, %v5426_v54  ;;  %v5411_v59 = vmul.f32 0.03125, %v5387_v56  ;;  %v11509_v42 = vmul.f32 0.03125, %v5358_v36 }
 0xdea   :  { %9779 = vrsqrt.f32 %v5442_v3  ;;  %v5427_v23 = vsub.f32 %v5411_v59, %v5419_v26  ;;  %v5420_v57 = vmul.f32 %v11509_v42, %v11509_v42 }
 0xdeb   :  { %v5361_v41 = vpop.xlane.xlu1 %5360  ;;  %v5390_v48 = vpop.xlane.xlu0 %5389 }
 0xdec   :  { %v9776_v11 = vpop.eup %9775  ;;  %v5443_v40 = vadd.f32 1e-05, %v5427_v23  ;;  %v11519_v10 = vmul.f32 0.03125, %v5361_v41  ;;  %v5412_v43 = vmul.f32 0.03125, %v5390_v48 }
 0xded   :  { %v5456_v18 = vmul.f32 %v9776_v11, %v5432_v6  ;;  %v5436_v6 = vsub.f32 %v11476_v28, %v11509_v42 }
 0xdee   :  { %9781 = vrsqrt.f32 %v5443_v40  ;;  %v5428_v22 = vsub.f32 %v5412_v43, %v5420_v57  ;;  %v5421_v16 = vmul.f32 %v11519_v10, %v11519_v10  ;;  %v5437_v57 = vsub.f32 %v11483_v55, %v11519_v10 }
 0xdef   :  { %v5393_v63 = vpop.xlane.xlu1 %5392  ;;  %v5364_v24 = vpop.xlane.xlu0 %5363  ;;  %v5468_v30 = vmul.f32 %v11515_v49, %v5456_v18 }
 0xdf0   :  { %v9778_v1 = vpop.eup %9777  ;;  %v5444_v4 = vadd.f32 1e-05, %v5428_v22  ;;  %v5413_v31 = vmul.f32 0.03125, %v5393_v63  ;;  %v5406_v21 = vmul.f32 0.03125, %v5364_v24 }
 0xdf1   :  { %v5457_v45 = vmul.f32 %v9778_v1, %v5433_v33  ;;  %v5480_v0 = vadd.f32 %v11524_v9, %v5468_v30 }
 0xdf2   :  { %9783 = vrsqrt.f32 %v5444_v4  ;;  %v5429_v50 = vsub.f32 %v5413_v31, %v5421_v16  ;;  %v5422_v14 = vmul.f32 %v5406_v21, %v5406_v21  ;;  %v5438_v33 = vsub.f32 %v11490_v25, %v5406_v21 }
 0xdf3   :  { %v5469_v39 = vmul.f32 %v11515_v49, %v5457_v45  ;;  %v5367_v35 = vpop.xlane.xlu1 %5366  ;;  %v5396_v19 = vpop.xlane.xlu0 %5395  ;;  %v5488_v34 = vmax.f32 %v5480_v0, 0.0 }
 0xdf4   :  { %v9780_v29 = vpop.eup %9779  ;;  %v5445_v13 = vadd.f32 1e-05, %v5429_v50  ;;  %v5407_v12 = vmul.f32 0.03125, %v5367_v35  ;;  %v5414_v32 = vmul.f32 0.03125, %v5396_v19 }
 0xdf5   :  { %8956 = vmatprep.mubr.msk.f32.mxu1 %vm204_vm1, %v5488_v34  ;;  %v5481_v8 = vadd.f32 %v11524_v9, %v5469_v39  ;;  %v5458_v37 = vmul.f32 %v9780_v29, %v5434_v46 }
 0xdf6   :  { %9785 = vrsqrt.f32 %v5445_v13  ;;  %v5430_v53 = vsub.f32 %v5414_v32, %v5422_v14  ;;  %v5423_v56 = vmul.f32 %v5407_v12, %v5407_v12  ;;  %v5439_v10 = vsub.f32 %v11497_v27, %v5407_v12 }
 0xdf7   :  { %v5399_v17 = vpop.xlane.xlu1 %5398  ;;  %v5489_v15 = vmax.f32 %v5481_v8, 0.0  ;;  %v5470_v7 = vmul.f32 %v11515_v49, %v5458_v37 }
 0xdf8   :  { %v9782_v54 = vpop.eup %9781  ;;  %v5446_v36 = vadd.f32 1e-05, %v5430_v53  ;;  %v5415_v26 = vmul.f32 0.03125, %v5399_v17 }
 0xdf9   :  { %8957 = vmatmul.mubr.msk.f32.vlgmr.msra.gmra.mrb[152].mxu1 %vm204_vm1, %v5489_v15  ;;  %v5482_v3 = vadd.f32 %v11524_v9, %v5470_v7  ;;  %v5459_v59 = vmul.f32 %v9782_v54, %v5435_v47 }
 0xdfa   :  { %9787 = vrsqrt.f32 %v5446_v36  ;;  %v5431_v23 = vsub.f32 %v5415_v26, %v5423_v56 }
 0xdfb   :  { %v5490_v41 = vmax.f32 %v5482_v3, 0.0  ;;  %v5471_v2 = vmul.f32 %v11515_v49, %v5459_v59 }
 0xdfc   :  { %v9784_v44 = vpop.eup %9783  ;;  %v5447_v48 = vadd.f32 1e-05, %v5431_v23 }
 0xdfd   :  { %8959 = vmatprep.mubr.msk.f32.mxu1 %vm204_vm1, %v5490_v41  ;;  %v5483_v11 = vadd.f32 %v11524_v9, %v5471_v2  ;;  %v5460_v40 = vmul.f32 %v9784_v44, %v5436_v6 }
 0xdfe   :  { %9789 = vrsqrt.f32 %v5447_v48 }
 0xdff   :  { %v5491_v43 = vmax.f32 %v5483_v11, 0.0  ;;  %v5472_v18 = vmul.f32 %v11515_v49, %v5460_v40  ;;  %v5793_v40 = vld [vmem:[#allocation5 + $0x300] sm:$0xff] }
 0xe00   :  { %v9786_v22 = vpop.eup %9785 }
 0xe01   :  { %8960 = vmatmul.mubr.msk.f32.gmra.mrb[154].mxu1 %vm204_vm1, %v5491_v43  ;;  %v5484_v28 = vadd.f32 %v11524_v9, %v5472_v18  ;;  %v5461_v42 = vmul.f32 %v9786_v22, %v5437_v57  ;;  %v5794_v57 = vld [vmem:[#allocation5 + $0x308] sm:$0xff]  ;;  %v5935_v43 = vld [vmem:[#allocation5 + $0x320] sm:$0xff] }
 0xe02   :  { %v9540_v18 = vpack.c.bf16 %v5794_v57, %v5793_v40  ;;  %v5936_v22 = vld [vmem:[#allocation5 + $0x328] sm:$0xff] }
 0xe03   :  { %v5492_v63 = vmax.f32 %v5484_v28, 0.0  ;;  %v5473_v24 = vmul.f32 %v11515_v49, %v5461_v42  ;;  %v9548_v28 = vpack.c.bf16 %v5936_v22, %v5935_v43  ;;  %v5795_v42 = vld [vmem:[#allocation5 + $0x310] sm:$0xff] }
 0xe04   :  { %v9788_v30 = vpop.eup %9787  ;;  %9541 = vmatprep.subr.bf16.mxu1 %v9540_v18 }
 0xe05   :  { %8962 = vmatprep.mubr.msk.f32.mxu1 %vm204_vm1, %v5492_v63  ;;  %v5485_v1 = vadd.f32 %v11524_v9, %v5473_v24  ;;  %v5462_v55 = vmul.f32 %v9788_v30, %v5438_v33  ;;  %9549 = vmatprep.subr.bf16.mxu0 %v9548_v28  ;;  %v5796_v33 = vld [vmem:[#allocation5 + $0x318] sm:$0xff]  ;;  %v5937_v63 = vld [vmem:[#allocation5 + $0x330] sm:$0xff] }
 0xe06   :  { %9543 = vmatpush3.bf16.msra.mxu1 %v9540_v18  ;;  %9551 = vmatpush3.bf16.msra.mxu0 %v9548_v28  ;;  %v9544_v24 = vpack.c.bf16 %v5796_v33, %v5795_v42  ;;  %v5938_v30 = vld [vmem:[#allocation5 + $0x338] sm:$0xff]  ;;  %v11641_v33 = vld [vmem:[%s12168_s4 + $0x10] ss:$0 sm:$0xff] }
 0xe07   :  { %v5493_v16 = vmax.f32 %v5485_v1, 0.0  ;;  %v5474_v4 = vmul.f32 %v11515_v49, %v5462_v55  ;;  %v9552_v1 = vpack.c.bf16 %v5938_v30, %v5937_v63  ;;  %v6053_v55 = vld [vmem:[#allocation5 + $0x340] sm:$0xff] }
 0xe08   :  { %v9790_v31 = vpop.eup %9789  ;;  %9545 = vmatprep.subr.bf16.mxu1 %v9544_v24 }
 0xe09   :  { %8963 = vmatmul.mubr.msk.f32.gmra.mrb[156].mxu1 %vm204_vm1, %v5493_v16  ;;  %v5486_v45 = vadd.f32 %v11524_v9, %v5474_v4  ;;  %v5463_v25 = vmul.f32 %v9790_v31, %v5439_v10  ;;  %9553 = vmatprep.subr.bf16.mxu0 %v9552_v1  ;;  %v6054_v10 = vld [vmem:[#allocation5 + $0x348] sm:$0xff]  ;;  %v6171_v16 = vld [vmem:[#allocation5 + $0x360] sm:$0xff] }
 0xe0a   :  { %9547 = vmatpush3.bf16.msra.mxu1 %v9544_v24  ;;  %9555 = vmatpush3.bf16.msra.mxu0 %v9552_v1  ;;  %v11618_v4 = vpack.c.bf16 %v6054_v10, %v6053_v55  ;;  %v6172_v31 = vld [vmem:[#allocation5 + $0x368] sm:$0xff] }
 0xe0b   :  { %v5494_v21 = vmax.f32 %v5486_v45, 0.0  ;;  %v5475_v0 = vmul.f32 %v11515_v49, %v5463_v25  ;;  %v11620_v45 = vpack.c.bf16 %v6172_v31, %v6171_v16 }
 0xe0c   :  { %9557 = vmatprep.subr.bf16.mxu1 %v11618_v4 }
 0xe0d   :  { %8965 = vmatprep.mubr.msk.f32.mxu1 %vm204_vm1, %v5494_v21  ;;  %v5487_v50 = vadd.f32 %v11524_v9, %v5475_v0  ;;  %9565 = vmatprep.subr.bf16.mxu0 %v11620_v45 }
 0xe0f   :  { %v5495_v39 = vmax.f32 %v5487_v50, 0.0 }
 0xe11   :  { %8966 = vmatmul.mubr.msk.f32.gmra.mrb[158].mxu1 %vm204_vm1, %v5495_v39 }
 0xecc   :  { %v11562_v27 = vpop.f32.mrb[152].mxu1 }
 0xecd   :  { %v5657_v46 = vmul.f32 %v11562_v27, %v11562_v27  ;;  %v11566_v35 = vpop.f32.mrb[153].mxu1  ;;  %v5635_v19 = vsel %vm204_vm1, %v11562_v27, 0.0 }
 0xece   :  { %v5656_v49 = vmul.f32 %v11566_v35, %v11566_v35  ;;  %5636 = vadd.xlane.f32.xlu1 %v5635_v19  ;;  %v5632_v9 = vsel %vm204_vm1, %v11566_v35, 0.0 }
 0xecf   :  { %5633 = vadd.xlane.f32.xlu0 %v5632_v9  ;;  %v5667_v34 = vsel %vm204_vm1, %v5657_v46, 0.0 }
 0xed0   :  { %v5664_v29 = vsel %vm204_vm1, %v5656_v49, 0.0 }
 0xed2   :  { %5668 = vadd.xlane.f32.xlu1 %v5667_v34 }
 0xed3   :  { %5665 = vadd.xlane.f32.xlu0 %v5664_v29 }
 0xed4   :  { %v11576_v13 = vpop.f32.mrb[154].mxu1 }
 0xed5   :  { %v5659_v14 = vmul.f32 %v11576_v13, %v11576_v13  ;;  %v11580_v12 = vpop.f32.mrb[155].mxu1  ;;  %v5641_v32 = vsel %vm204_vm1, %v11576_v13, 0.0 }
 0xed6   :  { %v5658_v8 = vmul.f32 %v11580_v12, %v11580_v12  ;;  %5642 = vadd.xlane.f32.xlu1 %v5641_v32  ;;  %v5638_v37 = vsel %vm204_vm1, %v11580_v12, 0.0 }
 0xed7   :  { %5639 = vadd.xlane.f32.xlu0 %v5638_v37  ;;  %v5673_v53 = vsel %vm204_vm1, %v5659_v14, 0.0 }
 0xed8   :  { %v5670_v47 = vsel %vm204_vm1, %v5658_v8, 0.0 }
 0xeda   :  { %5674 = vadd.xlane.f32.xlu1 %v5673_v53 }
 0xedb   :  { %5671 = vadd.xlane.f32.xlu0 %v5670_v47 }
 0xedc   :  { %v11590_v17 = vpop.f32.mrb[156].mxu1 }
 0xedd   :  { %v5661_v15 = vmul.f32 %v11590_v17, %v11590_v17  ;;  %v11594_v7 = vpop.f32.mrb[157].mxu1  ;;  %v5647_v54 = vsel %vm204_vm1, %v11590_v17, 0.0 }
 0xede   :  { %v5660_v56 = vmul.f32 %v11594_v7, %v11594_v7  ;;  %5648 = vadd.xlane.f32.xlu1 %v5647_v54  ;;  %v5644_v36 = vsel %vm204_vm1, %v11594_v7, 0.0 }
 0xedf   :  { %5645 = vadd.xlane.f32.xlu0 %v5644_v36  ;;  %v5679_v26 = vsel %vm204_vm1, %v5661_v15, 0.0 }
 0xee0   :  { %v5676_v3 = vsel %vm204_vm1, %v5660_v56, 0.0 }
 0xee2   :  { %5680 = vadd.xlane.f32.xlu1 %v5679_v26 }
 0xee3   :  { %5677 = vadd.xlane.f32.xlu0 %v5676_v3 }
 0xee4   :  { %v11604_v59 = vpop.f32.mrb[158].mxu1 }
 0xee5   :  { %v5663_v23 = vmul.f32 %v11604_v59, %v11604_v59  ;;  %v11608_v6 = vpop.f32.mrb[159].mxu1  ;;  %v5653_v41 = vsel %vm204_vm1, %v11604_v59, 0.0 }
 0xee6   :  { %v5662_v2 = vmul.f32 %v11608_v6, %v11608_v6  ;;  %5654 = vadd.xlane.f32.xlu1 %v5653_v41  ;;  %v5650_v44 = vsel %vm204_vm1, %v11608_v6, 0.0 }
 0xee7   :  { %5651 = vadd.xlane.f32.xlu0 %v5650_v44  ;;  %v5685_v48 = vsel %vm204_vm1, %v5663_v23, 0.0 }
 0xee8   :  { %v5682_v11 = vsel %vm204_vm1, %v5662_v2, 0.0 }
 0xeea   :  { %5686 = vadd.xlane.f32.xlu1 %v5685_v48 }
 0xeeb   :  { %5683 = vadd.xlane.f32.xlu0 %v5682_v11 }
 0xf5b   :  { %v5637_v25 = vpop.xlane.xlu1 %5636 }
 0xf5c   :  { %v5689_v21 = vmul.f32 0.03125, %v5637_v25  ;;  %v5634_v0 = vpop.xlane.xlu0 %5633 }
 0xf5d   :  { %v5688_v50 = vmul.f32 0.03125, %v5634_v0 }
 0xf5e   :  { %v5705_v46 = vmul.f32 %v5689_v21, %v5689_v21  ;;  %v5721_v18 = vsub.f32 %v11562_v27, %v5689_v21 }
 0xf5f   :  { %v5669_v39 = vpop.xlane.xlu1 %5668  ;;  %v5704_v9 = vmul.f32 %v5688_v50, %v5688_v50  ;;  %v5720_v42 = vsub.f32 %v11566_v35, %v5688_v50  ;;  %v11650_v35 = vld [vmem:[%s12168_s4 + $0x11] ss:$0 sm:$0xff] }
 0xf60   :  { %v5697_v19 = vmul.f32 0.03125, %v5669_v39  ;;  %v5666_v49 = vpop.xlane.xlu0 %5665 }
 0xf61   :  { %v5696_v34 = vmul.f32 0.03125, %v5666_v49 }
 0xf62   :  { %v5713_v29 = vsub.f32 %v5697_v19, %v5705_v46 }
 0xf63   :  { %v5712_v14 = vsub.f32 %v5696_v34, %v5704_v9  ;;  %v5643_v32 = vpop.xlane.xlu1 %5642 }
 0xf64   :  { %v5729_v8 = vadd.f32 1e-05, %v5713_v29  ;;  %v11624_v37 = vmul.f32 0.03125, %v5643_v32  ;;  %v5640_v53 = vpop.xlane.xlu0 %5639 }
 0xf65   :  { %v5728_v47 = vadd.f32 1e-05, %v5712_v14  ;;  %v11626_v15 = vmul.f32 0.03125, %v5640_v53  ;;  %v6055_v53 = vld [vmem:[#allocation5 + $0x350] sm:$0xff] }
 0xf66   :  { %9791 = vrsqrt.f32 %v5729_v8  ;;  %v5707_v56 = vmul.f32 %v11624_v37, %v11624_v37  ;;  %v5723_v32 = vsub.f32 %v11576_v13, %v11624_v37 }
 0xf67   :  { %9793 = vrsqrt.f32 %v5728_v47  ;;  %v5675_v54 = vpop.xlane.xlu1 %5674  ;;  %v5706_v3 = vmul.f32 %v11626_v15, %v11626_v15  ;;  %v6056_v47 = vld [vmem:[#allocation5 + $0x358] sm:$0xff] }
 0xf68   :  { %v5699_v36 = vmul.f32 0.03125, %v5675_v54  ;;  %v5672_v26 = vpop.xlane.xlu0 %5671 }
 0xf69   :  { %v5698_v23 = vmul.f32 0.03125, %v5672_v26 }
 0xf6a   :  { %v5715_v41 = vsub.f32 %v5699_v36, %v5707_v56  ;;  %v5722_v36 = vsub.f32 %v11580_v12, %v11626_v15 }
 0xf6b   :  { %v5714_v2 = vsub.f32 %v5698_v23, %v5706_v3  ;;  %v5649_v44 = vpop.xlane.xlu1 %5648 }
 0xf6c   :  { %v5731_v48 = vadd.f32 1e-05, %v5715_v41  ;;  %v11632_v11 = vmul.f32 0.03125, %v5649_v44  ;;  %v5646_v40 = vpop.xlane.xlu0 %5645  ;;  %v6173_v41 = vld [vmem:[#allocation5 + $0x370] sm:$0xff] }
 0xf6d   :  { %v5730_v57 = vadd.f32 1e-05, %v5714_v2  ;;  %v11634_v43 = vmul.f32 0.03125, %v5646_v40 }
 0xf6e   :  { %9795 = vrsqrt.f32 %v5731_v48  ;;  %v5709_v63 = vmul.f32 %v11632_v11, %v11632_v11 }
 0xf6f   :  { %9797 = vrsqrt.f32 %v5730_v57  ;;  %v5681_v22 = vpop.xlane.xlu1 %5680  ;;  %v5708_v27 = vmul.f32 %v11634_v43, %v11634_v43  ;;  %v9560_v57 = vpack.c.bf16 %v6056_v47, %v6055_v53 }
 0xf70   :  { %v9792_v28 = vpop.eup %9791  ;;  %v5701_v24 = vmul.f32 0.03125, %v5681_v22  ;;  %v5678_v30 = vpop.xlane.xlu0 %5677 }
 0xf71   :  { %v9794_v1 = vpop.eup %9793  ;;  %v5745_v55 = vmul.f32 %v9792_v28, %v5721_v18  ;;  %v5700_v10 = vmul.f32 0.03125, %v5678_v30  ;;  %v6289_v28 = vld [vmem:[#allocation5 + $0x380] sm:$0xff] }
 0xf72   :  { %v5744_v16 = vmul.f32 %v9794_v1, %v5720_v42  ;;  %v5717_v31 = vsub.f32 %v5701_v24, %v5709_v63  ;;  %v6290_v42 = vld [vmem:[#allocation5 + $0x388] sm:$0xff]  ;;  %v6407_v30 = vld [vmem:[#allocation5 + $0x3a0] sm:$0xff] }
 0xf73   :  { %v5757_v25 = vmul.f32 %v11641_v33, %v5745_v55  ;;  %v5716_v21 = vsub.f32 %v5700_v10, %v5708_v27  ;;  %v5655_v0 = vpop.xlane.xlu1 %5654  ;;  %v6408_v1 = vld [vmem:[#allocation5 + $0x3a8] sm:$0xff] }
 0xf74   :  { %v5756_v50 = vmul.f32 %v11641_v33, %v5744_v16  ;;  %v5733_v39 = vadd.f32 1e-05, %v5717_v31  ;;  %v11654_v46 = vmul.f32 0.03125, %v5655_v0  ;;  %v5652_v19 = vpop.xlane.xlu0 %5651  ;;  %v11688_v16 = vpack.c.bf16 %v6290_v42, %v6289_v28 }
 0xf75   :  { %v5769_v49 = vadd.f32 %v11650_v35, %v5757_v25  ;;  %v5732_v9 = vadd.f32 1e-05, %v5716_v21  ;;  %v11657_v34 = vmul.f32 0.03125, %v5652_v19  ;;  %v5725_v25 = vsub.f32 %v11590_v17, %v11632_v11 }
 0xf76   :  { %v5768_v29 = vadd.f32 %v11650_v35, %v5756_v50  ;;  %9799 = vrsqrt.f32 %v5733_v39  ;;  %v5711_v26 = vmul.f32 %v11654_v46, %v11654_v46  ;;  %v9580_v21 = vpack.c.bf16 %v6408_v1, %v6407_v30 }
 0xf77   :  { %v5777_v14 = vadd.f32 %v5769_v49, %v11215_v5  ;;  %9801 = vrsqrt.f32 %v5732_v9  ;;  %v5687_v8 = vpop.xlane.xlu1 %5686  ;;  %v6174_v5 = vld [vmem:[#allocation5 + $0x378] sm:$0xff]  ;;  %v5710_v13 = vmul.f32 %v11657_v34, %v11657_v34  ;;  %v5724_v39 = vsub.f32 %v11594_v7, %v11634_v43 }
 0xf78   :  { %v9796_v54 = vpop.eup %9795  ;;  %v5776_v56 = vadd.f32 %v5768_v29, %v11213_v52  ;;  %v5703_v3 = vmul.f32 0.03125, %v5687_v8  ;;  %v5684_v23 = vpop.xlane.xlu0 %5683  ;;  %v9568_v22 = vpack.c.bf16 %v6174_v5, %v6173_v41  ;;  %v5727_v9 = vsub.f32 %v11604_v59, %v11654_v46  ;;  %v6525_v41 = vld [vmem:[#allocation5 + $0x3c0] sm:$0xff]  ;;  %v6526_v5 = vld [vmem:[#allocation5 + $0x3c8] sm:$0xff] }
 0xf79   :  { %v9798_v2 = vpop.eup %9797  ;;  %v5747_v44 = vmul.f32 %v9796_v54, %v5723_v32  ;;  %v5702_v37 = vmul.f32 0.03125, %v5684_v23  ;;  %v11672_v18 = vmax.f32 %v5777_v14, 0.0  ;;  %v5726_v32 = vsub.f32 %v11608_v6, %v11657_v34 }
 0xf7a   :  { %v11670_v48 = vmax.f32 %v5776_v56, 0.0  ;;  %v5746_v40 = vmul.f32 %v9798_v2, %v5722_v36  ;;  %v5719_v52 = vsub.f32 %v5703_v3, %v5711_v26  ;;  %v6291_v26 = vld [vmem:[#allocation5 + $0x390] sm:$0xff]  ;;  %v9588_v2 = vpack.c.bf16 %v6526_v5, %v6525_v41 }
 0xf7b   :  { %v5759_v12 = vmul.f32 %v11641_v33, %v5747_v44  ;;  %v5718_v15 = vsub.f32 %v5702_v37, %v5710_v13  ;;  %v6527_v44 = vld [vmem:[#allocation5 + $0x3d0] sm:$0xff]  ;;  %v6528_v13 = vld [vmem:[#allocation5 + $0x3d8] sm:$0xff] }
 0xf7c   :  { %v5758_v63 = vmul.f32 %v11641_v33, %v5746_v40  ;;  %v5735_v24 = vadd.f32 1e-05, %v5719_v52  ;;  %8976 = vmatprep.mubr.msk.f32.mxu1 %vm204_vm1, %v11670_v48  ;;  %8996 = vmatprep.mubr.msk.f32.mxu0 %vm204_vm1, %v11670_v48  ;;  %v9592_v37 = vpack.c.bf16 %v6528_v13, %v6527_v44  ;;  %v6643_v40 = vld [vmem:[#allocation3 + $0x8] sm:$0xff]  ;;  %v6645_v52 = vld [vmem:[#allocation3 + $0x18] sm:$0xff] }
 0xf7d   :  { %v5771_v55 = vadd.f32 %v11650_v35, %v5759_v12  ;;  %v5734_v27 = vadd.f32 1e-05, %v5718_v15  ;;  %8977 = vmatmul.mubr.msk.f32.vlgmr.msra.gmra.mrb[160].mxu1 %vm204_vm1, %v11672_v18  ;;  %8997 = vmatmul.mubr.msk.f32.vlgmr.msra.gmra.mrb[160].mxu0 %vm204_vm1, %v11672_v18 }
 0xf7e   :  { %v5770_v10 = vadd.f32 %v11650_v35, %v5758_v63  ;;  %9803 = vrsqrt.f32 %v5735_v24  ;;  %9559 = vmatpush3.bf16.msra.mxu1 %v11618_v4  ;;  %9567 = vmatpush3.bf16.msra.mxu0 %v11620_v45 }
 0xf7f   :  { %v5779_v31 = vadd.f32 %v5771_v55, %v11241_v60  ;;  %9805 = vrsqrt.f32 %v5734_v27  ;;  %9561 = vmatprep.subr.bf16.mxu1 %v9560_v57  ;;  %9569 = vmatprep.subr.bf16.mxu0 %v9568_v22 }
 0xf80   :  { %v9800_v0 = vpop.eup %9799  ;;  %v5778_v50 = vadd.f32 %v5770_v10, %v11239_v58 }
 0xf81   :  { %v9802_v4 = vpop.eup %9801  ;;  %v5749_v19 = vmul.f32 %v9800_v0, %v5725_v25  ;;  %v11698_v60 = vmax.f32 %v5779_v31, 0.0 }
 0xf82   :  { %v11696_v45 = vmax.f32 %v5778_v50, 0.0  ;;  %v5748_v49 = vmul.f32 %v9802_v4, %v5724_v39  ;;  %9563 = vmatpush3.bf16.msra.mxu1 %v9560_v57  ;;  %9571 = vmatpush3.bf16.msra.mxu0 %v9568_v22 }
 0xf83   :  { %v5761_v17 = vmul.f32 %v11641_v33, %v5749_v19  ;;  %9573 = vmatprep.subr.bf16.mxu1 %v11688_v16  ;;  %9581 = vmatprep.subr.bf16.mxu0 %v9580_v21 }
 0xf84   :  { %v5760_v11 = vmul.f32 %v11641_v33, %v5748_v49  ;;  %8979 = vmatprep.mubr.msk.f32.mxu1 %vm204_vm1, %v11696_v45  ;;  %8999 = vmatprep.mubr.msk.f32.mxu0 %vm204_vm1, %v11696_v45 }
 0xf85   :  { %v5773_v58 = vadd.f32 %v11650_v35, %v5761_v17  ;;  %8980 = vmatmul.mubr.msk.f32.gmra.mrb[162].mxu1 %vm204_vm1, %v11698_v60  ;;  %9000 = vmatmul.mubr.msk.f32.gmra.mrb[162].mxu0 %vm204_vm1, %v11698_v60 }
 0xf86   :  { %v5772_v7 = vadd.f32 %v11650_v35, %v5760_v11 }
 0xf87   :  { %v5781_v43 = vadd.f32 %v5773_v58, %v11264_v61 }
 0xf88   :  { %v9804_v29 = vpop.eup %9803  ;;  %v5780_v14 = vadd.f32 %v5772_v7, %v11262_v20 }
 0xf89   :  { %v9806_v8 = vpop.eup %9805  ;;  %v5751_v53 = vmul.f32 %v9804_v29, %v5727_v9  ;;  %v11721_v56 = vmax.f32 %v5781_v43, 0.0 }
 0xf8a   :  { %v11719_v47 = vmax.f32 %v5780_v14, 0.0  ;;  %v5750_v54 = vmul.f32 %v9806_v8, %v5726_v32 }
 0xf8b   :  { %v5763_v36 = vmul.f32 %v11641_v33, %v5751_v53 }
 0xf8c   :  { %v5762_v61 = vmul.f32 %v11641_v33, %v5750_v54  ;;  %8982 = vmatprep.mubr.msk.f32.mxu1 %vm204_vm1, %v11719_v47  ;;  %9002 = vmatprep.mubr.msk.f32.mxu0 %vm204_vm1, %v11719_v47 }
 0xf8d   :  { %v5775_v20 = vadd.f32 %v11650_v35, %v5763_v36  ;;  %8983 = vmatmul.mubr.msk.f32.gmra.mrb[164].mxu1 %vm204_vm1, %v11721_v56  ;;  %9003 = vmatmul.mubr.msk.f32.gmra.mrb[164].mxu0 %vm204_vm1, %v11721_v56 }
 0xf8e   :  { %v5774_v59 = vadd.f32 %v11650_v35, %v5762_v61  ;;  %v6409_v35 = vld [vmem:[#allocation5 + $0x3b0] sm:$0xff] }
 0xf8f   :  { %v5783_v6 = vadd.f32 %v5775_v20, %v11282_v62  ;;  %v6292_v62 = vld [vmem:[#allocation5 + $0x398] sm:$0xff] }
 0xf90   :  { %v5782_v33 = vadd.f32 %v5774_v59, %v11280_v38  ;;  %v6410_v38 = vld [vmem:[#allocation5 + $0x3b8] sm:$0xff]  ;;  %v9576_v3 = vpack.c.bf16 %v6292_v62, %v6291_v26 }
 0xf91   :  { %v11739_v34 = vmax.f32 %v5783_v6, 0.0  ;;  %v9584_v23 = vpack.c.bf16 %v6410_v38, %v6409_v35 }
 0xf92   :  { %v11737_v46 = vmax.f32 %v5782_v33, 0.0 }
 0xf94   :  { %8985 = vmatprep.mubr.msk.f32.mxu1 %vm204_vm1, %v11737_v46  ;;  %9005 = vmatprep.mubr.msk.f32.mxu0 %vm204_vm1, %v11737_v46 }
 0xf95   :  { %8986 = vmatmul.mubr.msk.f32.gmra.mrb[166].mxu1 %vm204_vm1, %v11739_v34  ;;  %9006 = vmatmul.mubr.msk.f32.gmra.mrb[166].mxu0 %vm204_vm1, %v11739_v34 }
 0xf96   :  { %9016 = vmatprep.mubr.msk.f32.mxu1 %vm204_vm1, %v11670_v48  ;;  %9036 = vmatprep.mubr.msk.f32.mxu0 %vm204_vm1, %v11670_v48 }
 0xf99   :  { %9017 = vmatmul.mubr.msk.f32.vlgmr.msra.gmra.mrb[168].mxu1 %vm204_vm1, %v11672_v18  ;;  %9037 = vmatmul.mubr.msk.f32.vlgmr.msra.gmra.mrb[168].mxu0 %vm204_vm1, %v11672_v18 }
 0xf9a   :  { %9019 = vmatprep.mubr.msk.f32.mxu1 %vm204_vm1, %v11696_v45  ;;  %9039 = vmatprep.mubr.msk.f32.mxu0 %vm204_vm1, %v11696_v45 }
 0xf9b   :  { %9575 = vmatpush3.bf16.msra.mxu1 %v11688_v16  ;;  %9583 = vmatpush3.bf16.msra.mxu0 %v9580_v21 }
 0xf9c   :  { %9577 = vmatprep.subr.bf16.mxu1 %v9576_v3  ;;  %9585 = vmatprep.subr.bf16.mxu0 %v9584_v23 }
 0xf9d   :  { %9020 = vmatmul.mubr.msk.f32.gmra.mrb[170].mxu1 %vm204_vm1, %v11698_v60  ;;  %9040 = vmatmul.mubr.msk.f32.gmra.mrb[170].mxu0 %vm204_vm1, %v11698_v60 }
 0xf9e   :  { %9022 = vmatprep.mubr.msk.f32.mxu1 %vm204_vm1, %v11719_v47  ;;  %9042 = vmatprep.mubr.msk.f32.mxu0 %vm204_vm1, %v11719_v47 }
 0xf9f   :  { %9579 = vmatpush3.bf16.msra.mxu1 %v9576_v3  ;;  %9587 = vmatpush3.bf16.msra.mxu0 %v9584_v23 }
 0xfa0   :  { %9589 = vmatprep.subr.bf16.mxu1 %v9588_v2 }
 0xfa1   :  { %9023 = vmatmul.mubr.msk.f32.gmra.mrb[172].mxu1 %vm204_vm1, %v11721_v56  ;;  %9043 = vmatmul.mubr.msk.f32.gmra.mrb[172].mxu0 %vm204_vm1, %v11721_v56 }
 0xfa2   :  { %9025 = vmatprep.mubr.msk.f32.mxu1 %vm204_vm1, %v11737_v46  ;;  %9045 = vmatprep.mubr.msk.f32.mxu0 %vm204_vm1, %v11737_v46 }
 0xfa5   :  { %9026 = vmatmul.mubr.msk.f32.gmra.mrb[174].mxu1 %vm204_vm1, %v11739_v34  ;;  %9046 = vmatmul.mubr.msk.f32.gmra.mrb[174].mxu0 %vm204_vm1, %v11739_v34 }
 0xfa6   :  { %9056 = vmatprep.mubr.msk.f32.mxu1 %vm204_vm1, %v11670_v48  ;;  %9076 = vmatprep.mubr.msk.f32.mxu0 %vm204_vm1, %v11670_v48 }
 0xfa9   :  { %9057 = vmatmul.mubr.msk.f32.vlgmr.msra.gmra.mrb[176].mxu1 %vm204_vm1, %v11672_v18  ;;  %9077 = vmatmul.mubr.msk.f32.vlgmr.msra.gmra.mrb[176].mxu0 %vm204_vm1, %v11672_v18 }
 0xfaa   :  { %9059 = vmatprep.mubr.msk.f32.mxu1 %vm204_vm1, %v11696_v45  ;;  %9079 = vmatprep.mubr.msk.f32.mxu0 %vm204_vm1, %v11696_v45 }
 0xfab   :  { %9591 = vmatpush3.bf16.msra.mxu1 %v9588_v2 }
 0xfac   :  { %9593 = vmatprep.subr.bf16.mxu1 %v9592_v37 }
 0xfad   :  { %9060 = vmatmul.mubr.msk.f32.gmra.mrb[178].mxu1 %vm204_vm1, %v11698_v60  ;;  %9080 = vmatmul.mubr.msk.f32.gmra.mrb[178].mxu0 %vm204_vm1, %v11698_v60 }
 0xfae   :  { %9062 = vmatprep.mubr.msk.f32.mxu1 %vm204_vm1, %v11719_v47  ;;  %9082 = vmatprep.mubr.msk.f32.mxu0 %vm204_vm1, %v11719_v47 }
 0xfaf   :  { %9595 = vmatpush3.bf16.msra.mxu1 %v9592_v37 }
 0xfb0   :  { %9628 = vmatprep.subr.bf16.mxu1 %v9893_v51 }
 0xfb1   :  { %9063 = vmatmul.mubr.msk.f32.gmra.mrb[180].mxu1 %vm204_vm1, %v11721_v56  ;;  %9083 = vmatmul.mubr.msk.f32.gmra.mrb[180].mxu0 %vm204_vm1, %v11721_v56 }
 0xfb2   :  { %9065 = vmatprep.mubr.msk.f32.mxu1 %vm204_vm1, %v11737_v46  ;;  %9085 = vmatprep.mubr.msk.f32.mxu0 %vm204_vm1, %v11737_v46 }
 0xfb5   :  { %9066 = vmatmul.mubr.msk.f32.gmra.mrb[182].mxu1 %vm204_vm1, %v11739_v34  ;;  %9086 = vmatmul.mubr.msk.f32.gmra.mrb[182].mxu0 %vm204_vm1, %v11739_v34 }
 0xfb6   :  { %9096 = vmatprep.mubr.msk.f32.mxu1 %vm204_vm1, %v11670_v48  ;;  %6818 = vmatprep.mubr.f32.mxu0 %v6643_v40 }
 0xfb9   :  { %9097 = vmatmul.mubr.msk.f32.vlgmr.msra.gmra.mrb[184].mxu1 %vm204_vm1, %v11672_v18 }
 0xfba   :  { %9099 = vmatprep.mubr.msk.f32.mxu1 %vm204_vm1, %v11696_v45 }
 0xfbd   :  { %9100 = vmatmul.mubr.msk.f32.gmra.mrb[186].mxu1 %vm204_vm1, %v11698_v60 }
 0xfbe   :  { %9102 = vmatprep.mubr.msk.f32.mxu1 %vm204_vm1, %v11719_v47 }
 0xfc1   :  { %9103 = vmatmul.mubr.msk.f32.gmra.mrb[188].mxu1 %vm204_vm1, %v11721_v56 }
 0xfc2   :  { %9105 = vmatprep.mubr.msk.f32.mxu1 %vm204_vm1, %v11737_v46 }
 0xfc5   :  { %9106 = vmatmul.mubr.msk.f32.gmra.mrb[190].mxu1 %vm204_vm1, %v11739_v34 }
 0xfc6   :  { %7750 = vmatprep.mubr.msk.f32.mxu1 %vm1863_vm2, %v6645_v52 }
0x1050   :  { %v8978_v57 = vpop.f32.mrb[160].mxu1  ;;  %v8998_v12 = vpop.f32.mrb[160].mxu0 }
0x1051   :  { %5927 = vst.msk [vmem:[#allocation2 + $0x8] sm:$0xff] %vm204_vm1, %v8978_v57  ;;  %6045 = vst.msk [vmem:[#allocation2 + $0x48] sm:$0xff] %vm204_vm1, %v8998_v12  ;;  %v5887_v15 = vpop.f32.mrb[161].mxu1  ;;  %v6005_v22 = vpop.f32.mrb[161].mxu0 }
0x1052   :  { %5926 = vst.msk [vmem:[#allocation2] sm:$0xff] %vm204_vm1, %v5887_v15  ;;  %6044 = vst.msk [vmem:[#allocation2 + $0x40] sm:$0xff] %vm204_vm1, %v6005_v22 }
0x1058   :  { %v8981_v28 = vpop.f32.mrb[162].mxu1  ;;  %v9001_v42 = vpop.f32.mrb[162].mxu0  ;;  %v6675_v9 = vld [vmem:[#allocation2 + $0x8] sm:$0xff] }
0x1059   :  { %5929 = vst.msk [vmem:[#allocation2 + $0x18] sm:$0xff] %vm204_vm1, %v8981_v28  ;;  %6047 = vst.msk [vmem:[#allocation2 + $0x58] sm:$0xff] %vm204_vm1, %v9001_v42  ;;  %v5897_v63 = vpop.f32.mrb[163].mxu1  ;;  %v6015_v24 = vpop.f32.mrb[163].mxu0  ;;  %v6674_v43 = vld [vmem:[#allocation2] sm:$0xff] }
0x105a   :  { %5928 = vst.msk [vmem:[#allocation2 + $0x10] sm:$0xff] %vm204_vm1, %v5897_v63  ;;  %6046 = vst.msk [vmem:[#allocation2 + $0x50] sm:$0xff] %vm204_vm1, %v6015_v24  ;;  %v9598_v53 = vpack.c.bf16 %v6675_v9, %v6674_v43 }
0x1060   :  { %v8984_v30 = vpop.f32.mrb[164].mxu1  ;;  %v9004_v1 = vpop.f32.mrb[164].mxu0  ;;  %v6677_v59 = vld [vmem:[#allocation2 + $0x18] sm:$0xff] }
0x1061   :  { %5931 = vst.msk [vmem:[#allocation2 + $0x28] sm:$0xff] %vm204_vm1, %v8984_v30  ;;  %6049 = vst.msk [vmem:[#allocation2 + $0x68] sm:$0xff] %vm204_vm1, %v9004_v1  ;;  %v5907_v55 = vpop.f32.mrb[165].mxu1  ;;  %v6025_v27 = vpop.f32.mrb[165].mxu0  ;;  %v6676_v20 = vld [vmem:[#allocation2 + $0x10] sm:$0xff] }
0x1062   :  { %5930 = vst.msk [vmem:[#allocation2 + $0x20] sm:$0xff] %vm204_vm1, %v5907_v55  ;;  %6048 = vst.msk [vmem:[#allocation2 + $0x60] sm:$0xff] %vm204_vm1, %v6025_v27  ;;  %v9602_v35 = vpack.c.bf16 %v6677_v59, %v6676_v20  ;;  %v6684_v9 = vld [vmem:[#allocation2 + $0x50] sm:$0xff] }
0x1068   :  { %v8987_v10 = vpop.f32.mrb[166].mxu1  ;;  %v9007_v16 = vpop.f32.mrb[166].mxu0  ;;  %v6679_v5 = vld [vmem:[#allocation2 + $0x28] sm:$0xff] }
0x1069   :  { %5933 = vst.msk [vmem:[#allocation2 + $0x38] sm:$0xff] %vm204_vm1, %v8987_v10  ;;  %6051 = vst.msk [vmem:[#allocation2 + $0x78] sm:$0xff] %vm204_vm1, %v9007_v16  ;;  %v5917_v31 = vpop.f32.mrb[167].mxu1  ;;  %v6035_v25 = vpop.f32.mrb[167].mxu0  ;;  %v6678_v41 = vld [vmem:[#allocation2 + $0x20] sm:$0xff] }
0x106a   :  { %5932 = vst.msk [vmem:[#allocation2 + $0x30] sm:$0xff] %vm204_vm1, %v5917_v31  ;;  %6050 = vst.msk [vmem:[#allocation2 + $0x70] sm:$0xff] %vm204_vm1, %v6035_v25  ;;  %v9606_v40 = vpack.c.bf16 %v6679_v5, %v6678_v41  ;;  %v6682_v25 = vld [vmem:[#allocation2 + $0x40] sm:$0xff] }
0x106c   :  { %v9018_v21 = vpop.f32.mrb[168].mxu1  ;;  %v9038_v0 = vpop.f32.mrb[168].mxu0 }
0x106d   :  { %6163 = vst.msk [vmem:[#allocation2 + $0x88] sm:$0xff] %vm204_vm1, %v9018_v21  ;;  %6281 = vst.msk [vmem:[#allocation2 + $0xc8] sm:$0xff] %vm204_vm1, %v9038_v0  ;;  %v6123_v50 = vpop.f32.mrb[169].mxu1  ;;  %v6241_v39 = vpop.f32.mrb[169].mxu0  ;;  %v6683_v21 = vld [vmem:[#allocation2 + $0x48] sm:$0xff] }
0x106e   :  { %6162 = vst.msk [vmem:[#allocation2 + $0x80] sm:$0xff] %vm204_vm1, %v6123_v50  ;;  %6280 = vst.msk [vmem:[#allocation2 + $0xc0] sm:$0xff] %vm204_vm1, %v6241_v39 }
0x1070   :  { %v9021_v4 = vpop.f32.mrb[170].mxu1  ;;  %v9041_v19 = vpop.f32.mrb[170].mxu0  ;;  %v6681_v22 = vld [vmem:[#allocation2 + $0x38] sm:$0xff] }
0x1071   :  { %6165 = vst.msk [vmem:[#allocation2 + $0x98] sm:$0xff] %vm204_vm1, %v9021_v4  ;;  %6283 = vst.msk [vmem:[#allocation2 + $0xd8] sm:$0xff] %vm204_vm1, %v9041_v19  ;;  %v6133_v49 = vpop.f32.mrb[171].mxu1  ;;  %v6251_v17 = vpop.f32.mrb[171].mxu0  ;;  %v6680_v15 = vld [vmem:[#allocation2 + $0x30] sm:$0xff] }
0x1072   :  { %6164 = vst.msk [vmem:[#allocation2 + $0x90] sm:$0xff] %vm204_vm1, %v6133_v49  ;;  %6282 = vst.msk [vmem:[#allocation2 + $0xd0] sm:$0xff] %vm204_vm1, %v6251_v17  ;;  %v9610_v55 = vpack.c.bf16 %v6681_v22, %v6680_v15  ;;  %v9614_v17 = vpack.c.bf16 %v6683_v21, %v6682_v25  ;;  %v6651_v25 = vld [vmem:[#allocation3 + $0x48] sm:$0xff] }
0x1074   :  { %v9024_v11 = vpop.f32.mrb[172].mxu1  ;;  %v9044_v58 = vpop.f32.mrb[172].mxu0  ;;  %v6691_v7 = vld [vmem:[#allocation2 + $0x88] sm:$0xff] }
0x1075   :  { %6167 = vst.msk [vmem:[#allocation2 + $0xa8] sm:$0xff] %vm204_vm1, %v9024_v11  ;;  %6285 = vst.msk [vmem:[#allocation2 + $0xe8] sm:$0xff] %vm204_vm1, %v9044_v58  ;;  %v6143_v29 = vpop.f32.mrb[173].mxu1  ;;  %v6261_v14 = vpop.f32.mrb[173].mxu0  ;;  %v6690_v32 = vld [vmem:[#allocation2 + $0x80] sm:$0xff]  ;;  %v6699_v30 = vld [vmem:[#allocation2 + $0xc8] sm:$0xff] }
0x1076   :  { %6166 = vst.msk [vmem:[#allocation2 + $0xa0] sm:$0xff] %vm204_vm1, %v6143_v29  ;;  %6284 = vst.msk [vmem:[#allocation2 + $0xe0] sm:$0xff] %vm204_vm1, %v6261_v14  ;;  %v9596_v8 = vpack.c.bf16 %v6691_v7, %v6690_v32  ;;  %v6698_v24 = vld [vmem:[#allocation2 + $0xc0] sm:$0xff]  ;;  %v6685_v29 = vld [vmem:[#allocation2 + $0x58] sm:$0xff] }
0x1077   :  { %v9612_v16 = vpack.c.bf16 %v6699_v30, %v6698_v24  ;;  %v6647_v30 = vld [vmem:[#allocation3 + $0x28] sm:$0xff] }
0x1078   :  { %v9027_v54 = vpop.f32.mrb[174].mxu1  ;;  %v9047_v36 = vpop.f32.mrb[174].mxu0  ;;  %9597 = vmatprep.subr.bf16.mxu0 %v9596_v8  ;;  %v6693_v61 = vld [vmem:[#allocation2 + $0x98] sm:$0xff] }
0x1079   :  { %6169 = vst.msk [vmem:[#allocation2 + $0xb8] sm:$0xff] %vm204_vm1, %v9027_v54  ;;  %6287 = vst.msk [vmem:[#allocation2 + $0xf8] sm:$0xff] %vm204_vm1, %v9047_v36  ;;  %v6153_v6 = vpop.f32.mrb[175].mxu1  ;;  %v6271_v33 = vpop.f32.mrb[175].mxu0  ;;  %9599 = vmatpush3.bf16.msra.mxu0 %v9598_v53  ;;  %v6692_v26 = vld [vmem:[#allocation2 + $0x90] sm:$0xff]  ;;  %v6701_v19 = vld [vmem:[#allocation2 + $0xd8] sm:$0xff] }
0x107a   :  { %6168 = vst.msk [vmem:[#allocation2 + $0xb0] sm:$0xff] %vm204_vm1, %v6153_v6  ;;  %6286 = vst.msk [vmem:[#allocation2 + $0xf0] sm:$0xff] %vm204_vm1, %v6271_v33  ;;  %v9600_v62 = vpack.c.bf16 %v6693_v61, %v6692_v26  ;;  %v6700_v4 = vld [vmem:[#allocation2 + $0xd0] sm:$0xff]  ;;  %v9618_v61 = vpack.c.bf16 %v6685_v29, %v6684_v9  ;;  %v6686_v33 = vld [vmem:[#allocation2 + $0x60] sm:$0xff] }
0x107b   :  { %v9616_v7 = vpack.c.bf16 %v6701_v19, %v6700_v4  ;;  %v6687_v26 = vld [vmem:[#allocation2 + $0x68] sm:$0xff]  ;;  %v6658_v9 = vld [vmem:[#allocation3 + $0x80] sm:$0xff] }
0x107c   :  { %v9058_v38 = vpop.f32.mrb[176].mxu1  ;;  %v9078_v3 = vpop.f32.mrb[176].mxu0  ;;  %9601 = vmatprep.subr.bf16.mxu0 %v9600_v62  ;;  %v6695_v23 = vld [vmem:[#allocation2 + $0xa8] sm:$0xff]  ;;  %v9622_v41 = vpack.c.bf16 %v6687_v26, %v6686_v33 }
0x107d   :  { %6399 = vst.msk [vmem:[#allocation2 + $0x108] sm:$0xff] %vm204_vm1, %v9058_v38  ;;  %6517 = vst.msk [vmem:[#allocation2 + $0x148] sm:$0xff] %vm204_vm1, %v9078_v3  ;;  %v6359_v2 = vpop.f32.mrb[177].mxu1  ;;  %v6477_v44 = vpop.f32.mrb[177].mxu0  ;;  %9603 = vmatpush3.bf16.msra.mxu0 %v9602_v35  ;;  %v6694_v13 = vld [vmem:[#allocation2 + $0xa0] sm:$0xff]  ;;  %v6703_v54 = vld [vmem:[#allocation2 + $0xe8] sm:$0xff] }
0x107e   :  { %6398 = vst.msk [vmem:[#allocation2 + $0x100] sm:$0xff] %vm204_vm1, %v6359_v2  ;;  %6516 = vst.msk [vmem:[#allocation2 + $0x140] sm:$0xff] %vm204_vm1, %v6477_v44  ;;  %v9604_v37 = vpack.c.bf16 %v6695_v23, %v6694_v13  ;;  %v6702_v53 = vld [vmem:[#allocation2 + $0xe0] sm:$0xff]  ;;  %v6688_v13 = vld [vmem:[#allocation2 + $0x70] sm:$0xff] }
0x107f   :  { %v9620_v59 = vpack.c.bf16 %v6703_v54, %v6702_v53  ;;  %v6655_v4 = vld [vmem:[#allocation3 + $0x68] sm:$0xff]  ;;  %v6662_v53 = vld [vmem:[#allocation3 + $0xa0] sm:$0xff] }
0x1080   :  { %v9061_v52 = vpop.f32.mrb[178].mxu1  ;;  %v9081_v57 = vpop.f32.mrb[178].mxu0  ;;  %9605 = vmatprep.subr.bf16.mxu0 %v9604_v37  ;;  %v6697_v12 = vld [vmem:[#allocation2 + $0xb8] sm:$0xff]  ;;  %v6671_v33 = vld [vmem:[#allocation3 + $0xe8] sm:$0xff] }
0x1081   :  { %6401 = vst.msk [vmem:[#allocation2 + $0x118] sm:$0xff] %vm204_vm1, %v9061_v52  ;;  %6519 = vst.msk [vmem:[#allocation2 + $0x158] sm:$0xff] %vm204_vm1, %v9081_v57  ;;  %v6369_v28 = vpop.f32.mrb[179].mxu1  ;;  %v6487_v42 = vpop.f32.mrb[179].mxu0  ;;  %9607 = vmatpush3.bf16.msra.mxu0 %v9606_v40  ;;  %v6696_v63 = vld [vmem:[#allocation2 + $0xb0] sm:$0xff]  ;;  %v6705_v3 = vld [vmem:[#allocation2 + $0xf8] sm:$0xff] }
0x1082   :  { %6400 = vst.msk [vmem:[#allocation2 + $0x110] sm:$0xff] %vm204_vm1, %v6369_v28  ;;  %6518 = vst.msk [vmem:[#allocation2 + $0x150] sm:$0xff] %vm204_vm1, %v6487_v42  ;;  %v9608_v1 = vpack.c.bf16 %v6697_v12, %v6696_v63  ;;  %v6704_v38 = vld [vmem:[#allocation2 + $0xf0] sm:$0xff]  ;;  %v6689_v37 = vld [vmem:[#allocation2 + $0x78] sm:$0xff] }
0x1083   :  { %v9624_v2 = vpack.c.bf16 %v6705_v3, %v6704_v38  ;;  %v9626_v12 = vpack.c.bf16 %v6689_v37, %v6688_v13  ;;  %v6642_v63 = vld [vmem:[#allocation3] sm:$0xff]  ;;  %v6644_v3 = vld [vmem:[#allocation3 + $0x10] sm:$0xff]  ;;  %v6661_v13 = vld [vmem:[#allocation3 + $0x98] sm:$0xff] }
0x1084   :  { %v9064_v27 = vpop.f32.mrb[180].mxu1  ;;  %v9084_v10 = vpop.f32.mrb[180].mxu0  ;;  %9609 = vmatprep.subr.bf16.mxu0 %v9608_v1  ;;  %v6707_v31 = vld [vmem:[#allocation2 + $0x108] sm:$0xff]  ;;  %v6660_v37 = vld [vmem:[#allocation3 + $0x90] sm:$0xff] }
0x1085   :  { %6403 = vst.msk [vmem:[#allocation2 + $0x128] sm:$0xff] %vm204_vm1, %v9064_v27  ;;  %6521 = vst.msk [vmem:[#allocation2 + $0x168] sm:$0xff] %vm204_vm1, %v9084_v10  ;;  %v6379_v0 = vpop.f32.mrb[181].mxu1  ;;  %v6497_v50 = vpop.f32.mrb[181].mxu0  ;;  %9611 = vmatpush3.bf16.msra.mxu0 %v9610_v55  ;;  %v6706_v39 = vld [vmem:[#allocation2 + $0x100] sm:$0xff]  ;;  %v6715_v22 = vld [vmem:[#allocation2 + $0x148] sm:$0xff] }
0x1086   :  { %6402 = vst.msk [vmem:[#allocation2 + $0x120] sm:$0xff] %vm204_vm1, %v6379_v0  ;;  %6520 = vst.msk [vmem:[#allocation2 + $0x160] sm:$0xff] %vm204_vm1, %v6497_v50  ;;  %9613 = vmatprep.subr.bf16.mxu0 %v9612_v16  ;;  %v9629_v49 = vpack.c.bf16 %v6707_v31, %v6706_v39  ;;  %v6714_v15 = vld [vmem:[#allocation2 + $0x140] sm:$0xff] }
0x1087   :  { %v9641_v24 = vpack.c.bf16 %v6715_v22, %v6714_v15  ;;  %v6646_v16 = vld [vmem:[#allocation3 + $0x20] sm:$0xff]  ;;  %v6673_v15 = vld [vmem:[#allocation3 + $0xf8] sm:$0xff]  ;;  %v6672_v22 = vld [vmem:[#allocation3 + $0xf0] sm:$0xff] }
0x1088   :  { %v9067_v11 = vpop.f32.mrb[182].mxu1  ;;  %v9087_v58 = vpop.f32.mrb[182].mxu0  ;;  %9630 = vmatpush1.bf16.msra.mxu1 %v9629_v49  ;;  %v6709_v43 = vld [vmem:[#allocation2 + $0x118] sm:$0xff]  ;;  %v6650_v50 = vld [vmem:[#allocation3 + $0x40] sm:$0xff] }
0x1089   :  { %6405 = vst.msk [vmem:[#allocation2 + $0x138] sm:$0xff] %vm204_vm1, %v9067_v11  ;;  %6523 = vst.msk [vmem:[#allocation2 + $0x178] sm:$0xff] %vm204_vm1, %v9087_v58  ;;  %v6389_v14 = vpop.f32.mrb[183].mxu1  ;;  %v6507_v32 = vpop.f32.mrb[183].mxu0  ;;  %9615 = vmatpush3.bf16.msra.mxu0 %v9614_v17  ;;  %9631 = vmatprep.subr.bf16.mxu1 %v9893_v51  ;;  %v6708_v8 = vld [vmem:[#allocation2 + $0x110] sm:$0xff]  ;;  %v6717_v55 = vld [vmem:[#allocation2 + $0x158] sm:$0xff] }
0x108a   :  { %6404 = vst.msk [vmem:[#allocation2 + $0x130] sm:$0xff] %vm204_vm1, %v6389_v14  ;;  %6522 = vst.msk [vmem:[#allocation2 + $0x170] sm:$0xff] %vm204_vm1, %v6507_v32  ;;  %9617 = vmatprep.subr.bf16.mxu0 %v9616_v7  ;;  %v9632_v36 = vpack.c.bf16 %v6709_v43, %v6708_v8  ;;  %v6716_v1 = vld [vmem:[#allocation2 + $0x150] sm:$0xff]  ;;  %v6654_v17 = vld [vmem:[#allocation3 + $0x60] sm:$0xff] }
0x108b   :  { %v9644_v31 = vpack.c.bf16 %v6717_v55, %v6716_v1  ;;  %v6659_v58 = vld [vmem:[#allocation3 + $0x88] sm:$0xff] }
0x108c   :  { %v9098_v20 = vpop.f32.mrb[184].mxu1  ;;  %9633 = vmatpush1.bf16.msra.mxu1 %v9632_v36  ;;  %v6711_v6 = vld [vmem:[#allocation2 + $0x128] sm:$0xff] }
0x108d   :  { %6635 = vst.msk [vmem:[#allocation2 + $0x188] sm:$0xff] %vm204_vm1, %v9098_v20  ;;  %v6595_v62 = vpop.f32.mrb[185].mxu1  ;;  %9619 = vmatpush3.bf16.msra.mxu0 %v9618_v61  ;;  %9634 = vmatprep.subr.bf16.mxu1 %v9893_v51  ;;  %v6710_v35 = vld [vmem:[#allocation2 + $0x120] sm:$0xff]  ;;  %v6719_v0 = vld [vmem:[#allocation2 + $0x168] sm:$0xff] }
0x108e   :  { %6634 = vst.msk [vmem:[#allocation2 + $0x180] sm:$0xff] %vm204_vm1, %v6595_v62  ;;  %9621 = vmatprep.subr.bf16.mxu0 %v9620_v59  ;;  %v9635_v23 = vpack.c.bf16 %v6711_v6, %v6710_v35  ;;  %v6718_v21 = vld [vmem:[#allocation2 + $0x160] sm:$0xff]  ;;  %v6663_v14 = vld [vmem:[#allocation3 + $0xa8] sm:$0xff] }
0x108f   :  { %v9647_v39 = vpack.c.bf16 %v6719_v0, %v6718_v21  ;;  %v6667_v36 = vld [vmem:[#allocation3 + $0xc8] sm:$0xff]  ;;  %v6666_v59 = vld [vmem:[#allocation3 + $0xc0] sm:$0xff] }
0x1090   :  { %v9101_v5 = vpop.f32.mrb[186].mxu1  ;;  %9636 = vmatpush1.bf16.msra.mxu1 %v9635_v23  ;;  %v6713_v44 = vld [vmem:[#allocation2 + $0x138] sm:$0xff]  ;;  %v6670_v35 = vld [vmem:[#allocation3 + $0xe0] sm:$0xff] }
0x1091   :  { %6637 = vst.msk [vmem:[#allocation2 + $0x198] sm:$0xff] %vm204_vm1, %v9101_v5  ;;  %v6605_v40 = vpop.f32.mrb[187].mxu1  ;;  %9623 = vmatpush3.bf16.msra.mxu0 %v9622_v41  ;;  %9637 = vmatprep.subr.bf16.mxu1 %v9893_v51  ;;  %v6712_v52 = vld [vmem:[#allocation2 + $0x130] sm:$0xff]  ;;  %v6721_v49 = vld [vmem:[#allocation2 + $0x178] sm:$0xff] }
0x1092   :  { %6636 = vst.msk [vmem:[#allocation2 + $0x190] sm:$0xff] %vm204_vm1, %v6605_v40  ;;  %9625 = vmatprep.subr.bf16.mxu0 %v9624_v2  ;;  %v9638_v57 = vpack.c.bf16 %v6713_v44, %v6712_v52  ;;  %v6720_v19 = vld [vmem:[#allocation2 + $0x170] sm:$0xff]  ;;  %v6649_v23 = vld [vmem:[#allocation3 + $0x38] sm:$0xff] }
0x1093   :  { %v9650_v11 = vpack.c.bf16 %v6721_v49, %v6720_v19  ;;  %v6648_v41 = vld [vmem:[#allocation3 + $0x30] sm:$0xff]  ;;  %v6653_v5 = vld [vmem:[#allocation3 + $0x58] sm:$0xff] }
0x1094   :  { %v9104_v28 = vpop.f32.mrb[188].mxu1  ;;  %9639 = vmatpush1.bf16.msra.mxu1 %v9638_v57  ;;  %v6723_v43 = vld [vmem:[#allocation2 + $0x188] sm:$0xff]  ;;  %v6652_v2 = vld [vmem:[#allocation3 + $0x50] sm:$0xff]  ;;  %v6657_v44 = vld [vmem:[#allocation3 + $0x78] sm:$0xff] }
0x1095   :  { %6639 = vst.msk [vmem:[#allocation2 + $0x1a8] sm:$0xff] %vm204_vm1, %v9104_v28  ;;  %v6615_v42 = vpop.f32.mrb[189].mxu1  ;;  %9627 = vmatpush3.bf16.msra.mxu0 %v9626_v12  ;;  %9640 = vmatprep.subr.bf16.mxu1 %v9893_v51  ;;  %v6722_v7 = vld [vmem:[#allocation2 + $0x180] sm:$0xff]  ;;  %v6665_v40 = vld [vmem:[#allocation3 + $0xb8] sm:$0xff]  ;;  %v6664_v52 = vld [vmem:[#allocation3 + $0xb0] sm:$0xff] }
0x1096   :  { %6638 = vst.msk [vmem:[#allocation2 + $0x1a0] sm:$0xff] %vm204_vm1, %v6615_v42  ;;  %v9653_v29 = vpack.c.bf16 %v6723_v43, %v6722_v7  ;;  %v6669_v57 = vld [vmem:[#allocation3 + $0xd8] sm:$0xff]  ;;  %v6668_v12 = vld [vmem:[#allocation3 + $0xd0] sm:$0xff] }
0x1098   :  { %v9107_v27 = vpop.f32.mrb[190].mxu1  ;;  %9642 = vmatpush1.bf16.msra.mxu1 %v9641_v24  ;;  %6819 = vmatmul.mubr.f32.vlgmr.msra.gmra.mrb[184].mxu0 %v6642_v63  ;;  %v6725_v8 = vld [vmem:[#allocation2 + $0x198] sm:$0xff] }
0x1099   :  { %6641 = vst.msk [vmem:[#allocation2 + $0x1b8] sm:$0xff] %vm204_vm1, %v9107_v27  ;;  %v6625_v10 = vpop.f32.mrb[191].mxu1  ;;  %9643 = vmatprep.subr.bf16.mxu1 %v9893_v51  ;;  %6823 = vmatprep.mubr.f32.mxu0 %v6647_v30  ;;  %v6724_v32 = vld [vmem:[#allocation2 + $0x190] sm:$0xff] }
0x109a   :  { %6640 = vst.msk [vmem:[#allocation2 + $0x1b0] sm:$0xff] %vm204_vm1, %v6625_v10  ;;  %v9656_v54 = vpack.c.bf16 %v6725_v8, %v6724_v32 }
0x109c   :  { %9645 = vmatpush1.bf16.msra.mxu1 %v9644_v31  ;;  %6824 = vmatmul.mubr.f32.gmra.mrb[186].mxu0 %v6646_v16  ;;  %v6727_v20 = vld [vmem:[#allocation2 + $0x1a8] sm:$0xff] }
0x109d   :  { %9646 = vmatprep.subr.bf16.mxu1 %v9893_v51  ;;  %6828 = vmatprep.mubr.f32.mxu0 %v6651_v25  ;;  %v6726_v61 = vld [vmem:[#allocation2 + $0x1a0] sm:$0xff] }
0x109e   :  { %v9659_v6 = vpack.c.bf16 %v6727_v20, %v6726_v61 }
0x10a0   :  { %9648 = vmatpush1.bf16.msra.mxu1 %v9647_v39  ;;  %6829 = vmatmul.mubr.f32.gmra.mrb[188].mxu0 %v6650_v50  ;;  %v6729_v62 = vld [vmem:[#allocation2 + $0x1b8] sm:$0xff] }
0x10a1   :  { %9649 = vmatprep.subr.bf16.mxu1 %v9893_v51  ;;  %6833 = vmatprep.mubr.f32.mxu0 %v6655_v4  ;;  %v6728_v26 = vld [vmem:[#allocation2 + $0x1b0] sm:$0xff] }
0x10a2   :  { %v9662_v38 = vpack.c.bf16 %v6729_v62, %v6728_v26 }
0x10a4   :  { %9651 = vmatpush1.bf16.msra.mxu1 %v9650_v11  ;;  %6834 = vmatmul.mubr.f32.gmra.mrb[190].mxu0 %v6654_v17 }
0x10a5   :  { %9652 = vmatprep.subr.bf16.mxu1 %v9893_v51  ;;  %6838 = vmatprep.mubr.f32.mxu0 %v6659_v58 }
0x10a8   :  { %9654 = vmatpush1.bf16.msra.mxu1 %v9653_v29  ;;  %6839 = vmatmul.mubr.f32.gmra.mrb[192].mxu0 %v6658_v9 }
0x10a9   :  { %9655 = vmatprep.subr.bf16.mxu1 %v9893_v51  ;;  %6843 = vmatprep.mubr.f32.mxu0 %v6663_v14 }
0x10ac   :  { %9657 = vmatpush1.bf16.msra.mxu1 %v9656_v54  ;;  %6844 = vmatmul.mubr.f32.gmra.mrb[194].mxu0 %v6662_v53 }
0x10ad   :  { %9658 = vmatprep.subr.bf16.mxu1 %v9893_v51  ;;  %6848 = vmatprep.mubr.f32.mxu0 %v6667_v36 }
0x10b0   :  { %9660 = vmatpush1.bf16.msra.mxu1 %v9659_v6  ;;  %6849 = vmatmul.mubr.f32.gmra.mrb[196].mxu0 %v6666_v59 }
0x10b1   :  { %9661 = vmatprep.subr.bf16.mxu1 %v9893_v51  ;;  %6853 = vmatprep.mubr.f32.mxu0 %v6671_v33  ;;  %v6656_v51 = vld [vmem:[#allocation3 + $0x70] sm:$0xff] }
0x10b4   :  { %9663 = vmatpush1.bf16.msra.mxu1 %v9662_v38  ;;  %6854 = vmatmul.mubr.f32.gmra.mrb[198].mxu0 %v6670_v35 }
0x10b7   :  { %6924 = vmatmul.mubr.f32.vlgmr.msra.gmra.mrb[192].mxu1 %v6644_v3 }
0x10b8   :  { %7751 = vmatprep.mubr.msk.f32.mxu1 %vm1863_vm2, %v6649_v23 }
0x10bb   :  { %6929 = vmatmul.mubr.f32.gmra.mrb[194].mxu1 %v6648_v41 }
0x10bc   :  { %7752 = vmatprep.mubr.msk.f32.mxu1 %vm1863_vm2, %v6653_v5 }
0x10bf   :  { %6934 = vmatmul.mubr.f32.gmra.mrb[196].mxu1 %v6652_v2 }
0x10c0   :  { %7753 = vmatprep.mubr.msk.f32.mxu1 %vm1863_vm2, %v6657_v44 }
0x10c3   :  { %6939 = vmatmul.mubr.f32.gmra.mrb[198].mxu1 %v6656_v51 }
0x10c4   :  { %7754 = vmatprep.mubr.msk.f32.mxu1 %vm1863_vm2, %v6661_v13 }
0x10c7   :  { %6944 = vmatmul.mubr.f32.gmra.mrb[200].mxu1 %v6660_v37 }
0x10c8   :  { %7755 = vmatprep.mubr.msk.f32.mxu1 %vm1863_vm2, %v6665_v40 }
0x10cb   :  { %6949 = vmatmul.mubr.f32.gmra.mrb[202].mxu1 %v6664_v52 }
0x10cc   :  { %7756 = vmatprep.mubr.msk.f32.mxu1 %vm1863_vm2, %v6669_v57 }
0x10cf   :  { %6954 = vmatmul.mubr.f32.gmra.mrb[204].mxu1 %v6668_v12 }
0x10d0   :  { %7757 = vmatprep.mubr.msk.f32.mxu1 %vm1863_vm2, %v6673_v15  ;;  %v7119_v15 = vld [vmem:[#allocation5 + $0x3e0] sm:$0xff] }
0x10d3   :  { %6959 = vmatmul.mubr.f32.gmra.mrb[206].mxu1 %v6672_v22  ;;  %v7120_v22 = vld [vmem:[#allocation5 + $0x3e8] sm:$0xff] }
0x116b   :  { %v8384_v28 = vpop.f32.mrb[184].mxu0 }
0x116c   :  { %v8385_v42 = vpop.f32.mrb[185].mxu0 }
0x116d   :  { %v8386_v63 = vadd.f32 %v8385_v42, %v8384_v28 }
0x116f   :  { %v8387_v24 = vpop.f32.mrb[186].mxu0 }
0x1170   :  { %v8388_v30 = vpop.f32.mrb[187].mxu0 }
0x1171   :  { %v8389_v1 = vadd.f32 %v8388_v30, %v8387_v24 }
0x1173   :  { %v8390_v55 = vpop.f32.mrb[188].mxu0 }
0x1174   :  { %v8391_v27 = vpop.f32.mrb[189].mxu0 }
0x1175   :  { %v8392_v10 = vadd.f32 %v8391_v27, %v8390_v55 }
0x1177   :  { %v8393_v16 = vpop.f32.mrb[190].mxu0 }
0x1178   :  { %v8394_v31 = vpop.f32.mrb[191].mxu0 }
0x1179   :  { %v8395_v25 = vadd.f32 %v8394_v31, %v8393_v16 }
0x117b   :  { %v8396_v21 = vpop.f32.mrb[192].mxu0 }
0x117c   :  { %v8397_v0 = vpop.f32.mrb[193].mxu0 }
0x117d   :  { %v8398_v50 = vadd.f32 %v8397_v0, %v8396_v21 }
0x117f   :  { %v8399_v39 = vpop.f32.mrb[194].mxu0 }
0x1180   :  { %v8400_v4 = vpop.f32.mrb[195].mxu0 }
0x1181   :  { %v8401_v19 = vadd.f32 %v8400_v4, %v8399_v39 }
0x1183   :  { %v8402_v49 = vpop.f32.mrb[196].mxu0 }
0x1184   :  { %v8403_v17 = vpop.f32.mrb[197].mxu0 }
0x1185   :  { %v8404_v11 = vadd.f32 %v8403_v17, %v8402_v49  ;;  %v7121_v17 = vld [vmem:[#allocation5 + $0x3f0] sm:$0xff] }
0x1187   :  { %v8405_v58 = vpop.f32.mrb[198].mxu0 }
0x1188   :  { %v8406_v7 = vpop.f32.mrb[199].mxu0 }
0x1189   :  { %v8407_v43 = vadd.f32 %v8406_v7, %v8405_v58 }
0x118a   :  { %v6925_v9 = vpop.f32.mrb[192].mxu1 }
0x118b   :  { %v11906_v29 = vadd.f32 %v8386_v63, %v6925_v9  ;;  %v6927_v14 = vpop.f32.mrb[193].mxu1  ;;  %v9664_v63 = vpack.c.bf16 %v7120_v22, %v7119_v15 }
0x118d   :  { %v6966_v32 = vsel %vm204_vm1, %v11906_v29, 0.0  ;;  %v6990_v8 = vmul.f32 %v11906_v29, %v11906_v29  ;;  %9665 = vmatprep.subr.bf16.mxu0 %v9664_v63 }
0x118e   :  { %v6930_v53 = vpop.f32.mrb[194].mxu1  ;;  %6967 = vadd.xlane.f32.xlu0 %v6966_v32  ;;  %9667 = vmatpush3.bf16.msra.mxu0 %v9664_v63 }
0x118f   :  { %v11912_v54 = vadd.f32 %v8389_v1, %v6930_v53  ;;  %v6932_v36 = vpop.f32.mrb[195].mxu1  ;;  %v6998_v20 = vsel %vm204_vm1, %v6990_v8, 0.0 }
0x1191   :  { %v6969_v61 = vsel %vm204_vm1, %v11912_v54, 0.0  ;;  %v6991_v59 = vmul.f32 %v11912_v54, %v11912_v54 }
0x1192   :  { %v6935_v6 = vpop.f32.mrb[196].mxu1  ;;  %6970 = vadd.xlane.f32.xlu1 %v6969_v61  ;;  %6999 = vadd.xlane.f32.xlu0 %v6998_v20 }
0x1193   :  { %v11919_v33 = vadd.f32 %v8392_v10, %v6935_v6  ;;  %v6937_v26 = vpop.f32.mrb[197].mxu1  ;;  %v7001_v62 = vsel %vm204_vm1, %v6991_v59, 0.0 }
0x1195   :  { %v6972_v35 = vsel %vm204_vm1, %v11919_v33, 0.0  ;;  %v6992_v38 = vmul.f32 %v11919_v33, %v11919_v33 }
0x1196   :  { %v6940_v3 = vpop.f32.mrb[198].mxu1  ;;  %7002 = vadd.xlane.f32.xlu1 %v7001_v62  ;;  %6973 = vadd.xlane.f32.xlu0 %v6972_v35 }
0x1197   :  { %v11926_v23 = vadd.f32 %v8395_v25, %v6940_v3  ;;  %v6942_v41 = vpop.f32.mrb[199].mxu1  ;;  %v7004_v2 = vsel %vm204_vm1, %v6992_v38, 0.0 }
0x1199   :  { %v6975_v5 = vsel %vm204_vm1, %v11926_v23, 0.0  ;;  %v6993_v44 = vmul.f32 %v11926_v23, %v11926_v23 }
0x119a   :  { %v6945_v51 = vpop.f32.mrb[200].mxu1  ;;  %6976 = vadd.xlane.f32.xlu1 %v6975_v5  ;;  %7005 = vadd.xlane.f32.xlu0 %v7004_v2 }
0x119b   :  { %v11933_v13 = vadd.f32 %v8398_v50, %v6945_v51  ;;  %v6947_v37 = vpop.f32.mrb[201].mxu1  ;;  %v7007_v40 = vsel %vm204_vm1, %v6993_v44, 0.0 }
0x119d   :  { %v6978_v52 = vsel %vm204_vm1, %v11933_v13, 0.0  ;;  %v6994_v57 = vmul.f32 %v11933_v13, %v11933_v13 }
0x119e   :  { %v6950_v12 = vpop.f32.mrb[202].mxu1  ;;  %7008 = vadd.xlane.f32.xlu1 %v7007_v40  ;;  %6979 = vadd.xlane.f32.xlu0 %v6978_v52 }
0x119f   :  { %v11940_v28 = vadd.f32 %v8401_v19, %v6950_v12  ;;  %v6952_v42 = vpop.f32.mrb[203].mxu1  ;;  %v7010_v30 = vsel %vm204_vm1, %v6994_v57, 0.0 }
0x11a1   :  { %v6981_v24 = vsel %vm204_vm1, %v11940_v28, 0.0  ;;  %v6995_v1 = vmul.f32 %v11940_v28, %v11940_v28 }
0x11a2   :  { %v6955_v55 = vpop.f32.mrb[204].mxu1  ;;  %6982 = vadd.xlane.f32.xlu1 %v6981_v24  ;;  %7011 = vadd.xlane.f32.xlu0 %v7010_v30 }
0x11a3   :  { %v11947_v27 = vadd.f32 %v8404_v11, %v6955_v55  ;;  %v6957_v10 = vpop.f32.mrb[205].mxu1  ;;  %v7013_v16 = vsel %vm204_vm1, %v6995_v1, 0.0  ;;  %v7122_v11 = vld [vmem:[#allocation5 + $0x3f8] sm:$0xff]  ;;  %v11972_v1 = vld [vmem:[%s12168_s4 + $0x12] ss:$0 sm:$0xff] }
0x11a4   :  { %v9668_v58 = vpack.c.bf16 %v7122_v11, %v7121_v17 }
0x11a5   :  { %v6984_v31 = vsel %vm204_vm1, %v11947_v27, 0.0  ;;  %v6996_v25 = vmul.f32 %v11947_v27, %v11947_v27 }
0x11a6   :  { %v6960_v21 = vpop.f32.mrb[206].mxu1  ;;  %7014 = vadd.xlane.f32.xlu1 %v7013_v16  ;;  %6985 = vadd.xlane.f32.xlu0 %v6984_v31 }
0x11a7   :  { %v11954_v0 = vadd.f32 %v8407_v43, %v6960_v21  ;;  %v6962_v50 = vpop.f32.mrb[207].mxu1  ;;  %v7016_v4 = vsel %vm204_vm1, %v6996_v25, 0.0  ;;  %9669 = vmatprep.subr.bf16.mxu0 %v9668_v58 }
0x11a8   :  { %9671 = vmatpush3.bf16.msra.mxu0 %v9668_v58 }
0x11a9   :  { %v6987_v39 = vsel %vm204_vm1, %v11954_v0, 0.0  ;;  %v6997_v19 = vmul.f32 %v11954_v0, %v11954_v0 }
0x11aa   :  { %6988 = vadd.xlane.f32.xlu1 %v6987_v39  ;;  %7017 = vadd.xlane.f32.xlu0 %v7016_v4 }
0x11ab   :  { %v7019_v49 = vsel %vm204_vm1, %v6997_v19, 0.0 }
0x11ae   :  { %7020 = vadd.xlane.f32.xlu1 %v7019_v49 }
0x121b   :  { %v6968_v7 = vpop.xlane.xlu0 %6967 }
0x121c   :  { %v7022_v43 = vmul.f32 0.03125, %v6968_v7 }
0x121e   :  { %v7038_v32 = vmul.f32 %v7022_v43, %v7022_v43  ;;  %v7054_v42 = vsub.f32 %v11906_v29, %v7022_v43  ;;  %v11981_v29 = vld [vmem:[%s12168_s4 + $0x13] ss:$0 sm:$0xff] }
0x121f   :  { %v6971_v9 = vpop.xlane.xlu1 %6970  ;;  %v7000_v14 = vpop.xlane.xlu0 %6999 }
0x1220   :  { %v7023_v8 = vmul.f32 0.03125, %v6971_v9  ;;  %v7030_v53 = vmul.f32 0.03125, %v7000_v14 }
0x1222   :  { %v7046_v36 = vsub.f32 %v7030_v53, %v7038_v32  ;;  %v7039_v59 = vmul.f32 %v7023_v8, %v7023_v8  ;;  %v7055_v50 = vsub.f32 %v11912_v54, %v7023_v8 }
0x1223   :  { %v7003_v61 = vpop.xlane.xlu1 %7002  ;;  %v6974_v20 = vpop.xlane.xlu0 %6973 }
0x1224   :  { %v7062_v6 = vadd.f32 1e-05, %v7046_v36  ;;  %v7031_v26 = vmul.f32 0.03125, %v7003_v61  ;;  %v7024_v62 = vmul.f32 0.03125, %v6974_v20 }
0x1226   :  { %9807 = vrsqrt.f32 %v7062_v6  ;;  %v7047_v35 = vsub.f32 %v7031_v26, %v7039_v59  ;;  %v7040_v5 = vmul.f32 %v7024_v62, %v7024_v62  ;;  %v7056_v54 = vsub.f32 %v11919_v33, %v7024_v62 }
0x1227   :  { %v6977_v38 = vpop.xlane.xlu1 %6976  ;;  %v7006_v3 = vpop.xlane.xlu0 %7005 }
0x1228   :  { %v7063_v41 = vadd.f32 1e-05, %v7047_v35  ;;  %v11962_v2 = vmul.f32 0.03125, %v6977_v38  ;;  %v7032_v44 = vmul.f32 0.03125, %v7006_v3 }
0x122a   :  { %9809 = vrsqrt.f32 %v7063_v41  ;;  %v7048_v51 = vsub.f32 %v7032_v44, %v7040_v5  ;;  %v7041_v52 = vmul.f32 %v11962_v2, %v11962_v2  ;;  %v7057_v41 = vsub.f32 %v11926_v23, %v11962_v2 }
0x122b   :  { %v7009_v37 = vpop.xlane.xlu1 %7008  ;;  %v6980_v40 = vpop.xlane.xlu0 %6979 }
0x122c   :  { %v7064_v57 = vadd.f32 1e-05, %v7048_v51  ;;  %v7033_v12 = vmul.f32 0.03125, %v7009_v37  ;;  %v11966_v15 = vmul.f32 0.03125, %v6980_v40 }
0x122e   :  { %9811 = vrsqrt.f32 %v7064_v57  ;;  %v7049_v22 = vsub.f32 %v7033_v12, %v7041_v52  ;;  %v7042_v10 = vmul.f32 %v11966_v15, %v11966_v15 }
0x122f   :  { %v6983_v63 = vpop.xlane.xlu1 %6982  ;;  %v7012_v24 = vpop.xlane.xlu0 %7011 }
0x1230   :  { %v9808_v30 = vpop.eup %9807  ;;  %v7065_v55 = vadd.f32 1e-05, %v7049_v22  ;;  %v11976_v16 = vmul.f32 0.03125, %v6983_v63  ;;  %v7034_v31 = vmul.f32 0.03125, %v7012_v24  ;;  %v7058_v22 = vsub.f32 %v11933_v13, %v11966_v15 }
0x1231   :  { %v7078_v25 = vmul.f32 %v9808_v30, %v7054_v42 }
0x1232   :  { %9813 = vrsqrt.f32 %v7065_v55  ;;  %v7050_v21 = vsub.f32 %v7034_v31, %v7042_v10  ;;  %v7043_v17 = vmul.f32 %v11976_v16, %v11976_v16  ;;  %v7059_v55 = vsub.f32 %v11940_v28, %v11976_v16 }
0x1233   :  { %v7015_v39 = vpop.xlane.xlu1 %7014  ;;  %v6986_v4 = vpop.xlane.xlu0 %6985  ;;  %v7090_v19 = vmul.f32 %v11972_v1, %v7078_v25 }
0x1234   :  { %v9810_v49 = vpop.eup %9809  ;;  %v7066_v11 = vadd.f32 1e-05, %v7050_v21  ;;  %v7035_v58 = vmul.f32 0.03125, %v7015_v39  ;;  %v7028_v7 = vmul.f32 0.03125, %v6986_v4 }
0x1235   :  { %v7079_v43 = vmul.f32 %v9810_v49, %v7055_v50  ;;  %v7102_v9 = vadd.f32 %v11981_v29, %v7090_v19 }
0x1236   :  { %9815 = vrsqrt.f32 %v7066_v11  ;;  %v7051_v14 = vsub.f32 %v7035_v58, %v7043_v17  ;;  %v7044_v59 = vmul.f32 %v7028_v7, %v7028_v7  ;;  %v7060_v21 = vsub.f32 %v11947_v27, %v7028_v7 }
0x1237   :  { %v7091_v32 = vmul.f32 %v11972_v1, %v7079_v43  ;;  %v6989_v8 = vpop.xlane.xlu1 %6988  ;;  %v7018_v53 = vpop.xlane.xlu0 %7017  ;;  %v7110_v36 = vmax.f32 %v7102_v9, 0.0 }
0x1238   :  { %v9812_v61 = vpop.eup %9811  ;;  %v7067_v20 = vadd.f32 1e-05, %v7051_v14  ;;  %v7029_v6 = vmul.f32 0.03125, %v6989_v8  ;;  %v7036_v26 = vmul.f32 0.03125, %v7018_v53 }
0x1239   :  { %9116 = vmatprep.mubr.msk.f32.mxu0 %vm204_vm1, %v7110_v36  ;;  %v7103_v35 = vadd.f32 %v11981_v29, %v7091_v32  ;;  %v7080_v38 = vmul.f32 %v9812_v61, %v7056_v54 }
0x123a   :  { %9817 = vrsqrt.f32 %v7067_v20  ;;  %v7052_v3 = vsub.f32 %v7036_v26, %v7044_v59  ;;  %v7045_v51 = vmul.f32 %v7029_v6, %v7029_v6  ;;  %v7061_v16 = vsub.f32 %v11954_v0, %v7029_v6 }
0x123b   :  { %v7021_v5 = vpop.xlane.xlu1 %7020  ;;  %v7111_v33 = vmax.f32 %v7103_v35, 0.0  ;;  %v7092_v62 = vmul.f32 %v11972_v1, %v7080_v38 }
0x123c   :  { %v9814_v44 = vpop.eup %9813  ;;  %v7068_v37 = vadd.f32 1e-05, %v7052_v3  ;;  %v7037_v40 = vmul.f32 0.03125, %v7021_v5 }
0x123d   :  { %9117 = vmatmul.mubr.msk.f32.vlgmr.msra.gmra.mrb[200].mxu0 %vm204_vm1, %v7111_v33  ;;  %v7104_v52 = vadd.f32 %v11981_v29, %v7092_v62  ;;  %v7081_v57 = vmul.f32 %v9814_v44, %v7057_v41 }
0x123e   :  { %9819 = vrsqrt.f32 %v7068_v37  ;;  %v7053_v12 = vsub.f32 %v7037_v40, %v7045_v51 }
0x123f   :  { %v7112_v42 = vmax.f32 %v7104_v52, 0.0  ;;  %v7093_v23 = vmul.f32 %v11972_v1, %v7081_v57 }
0x1240   :  { %v9816_v2 = vpop.eup %9815  ;;  %v7069_v63 = vadd.f32 1e-05, %v7053_v12 }
0x1241   :  { %9119 = vmatprep.mubr.msk.f32.mxu0 %vm204_vm1, %v7112_v42  ;;  %v7105_v24 = vadd.f32 %v11981_v29, %v7093_v23  ;;  %v7082_v30 = vmul.f32 %v9816_v2, %v7058_v22 }
0x1242   :  { %9821 = vrsqrt.f32 %v7069_v63 }
0x1243   :  { %v7113_v10 = vmax.f32 %v7105_v24, 0.0  ;;  %v7094_v31 = vmul.f32 %v11972_v1, %v7082_v30 }
0x1244   :  { %v9818_v25 = vpop.eup %9817 }
0x1245   :  { %9120 = vmatmul.mubr.msk.f32.gmra.mrb[202].mxu0 %vm204_vm1, %v7113_v10  ;;  %v7106_v13 = vadd.f32 %v11981_v29, %v7094_v31  ;;  %v7083_v15 = vmul.f32 %v9818_v25, %v7059_v55 }
0x1247   :  { %v7114_v50 = vmax.f32 %v7106_v13, 0.0  ;;  %v7095_v39 = vmul.f32 %v11972_v1, %v7083_v15 }
0x1248   :  { %v9820_v4 = vpop.eup %9819 }
0x1249   :  { %9122 = vmatprep.mubr.msk.f32.mxu0 %vm204_vm1, %v7114_v50  ;;  %v7107_v19 = vadd.f32 %v11981_v29, %v7095_v39  ;;  %v7084_v28 = vmul.f32 %v9820_v4, %v7060_v21 }
0x124b   :  { %v7115_v49 = vmax.f32 %v7107_v19, 0.0  ;;  %v7096_v17 = vmul.f32 %v11972_v1, %v7084_v28 }
0x124c   :  { %v9822_v11 = vpop.eup %9821 }
0x124d   :  { %9123 = vmatmul.mubr.msk.f32.gmra.mrb[204].mxu0 %vm204_vm1, %v7115_v49  ;;  %v7108_v58 = vadd.f32 %v11981_v29, %v7096_v17  ;;  %v7085_v27 = vmul.f32 %v9822_v11, %v7061_v16 }
0x124f   :  { %v7116_v7 = vmax.f32 %v7108_v58, 0.0  ;;  %v7097_v43 = vmul.f32 %v11972_v1, %v7085_v27 }
0x1251   :  { %9125 = vmatprep.mubr.msk.f32.mxu0 %vm204_vm1, %v7116_v7  ;;  %v7109_v9 = vadd.f32 %v11981_v29, %v7097_v43 }
0x1253   :  { %v7117_v14 = vmax.f32 %v7109_v9, 0.0 }
0x1255   :  { %9126 = vmatmul.mubr.msk.f32.gmra.mrb[206].mxu0 %vm204_vm1, %v7117_v14 }
0x1310   :  { %v12019_v0 = vpop.f32.mrb[200].mxu0 }
0x1311   :  { %v7279_v32 = vmul.f32 %v12019_v0, %v12019_v0  ;;  %v12023_v54 = vpop.f32.mrb[201].mxu0  ;;  %v7257_v8 = vsel %vm204_vm1, %v12019_v0, 0.0 }
0x1312   :  { %v7278_v1 = vmul.f32 %v12023_v54, %v12023_v54  ;;  %7258 = vadd.xlane.f32.xlu1 %v7257_v8  ;;  %v7254_v29 = vsel %vm204_vm1, %v12023_v54, 0.0 }
0x1313   :  { %7255 = vadd.xlane.f32.xlu0 %v7254_v29  ;;  %v7289_v53 = vsel %vm204_vm1, %v7279_v32, 0.0 }
0x1314   :  { %v7286_v36 = vsel %vm204_vm1, %v7278_v1, 0.0 }
0x1316   :  { %7290 = vadd.xlane.f32.xlu1 %v7289_v53 }
0x1317   :  { %7287 = vadd.xlane.f32.xlu0 %v7286_v36 }
0x1318   :  { %v12033_v61 = vpop.f32.mrb[202].mxu0 }
0x1319   :  { %v7281_v20 = vmul.f32 %v12033_v61, %v12033_v61  ;;  %v12037_v59 = vpop.f32.mrb[203].mxu0  ;;  %v7263_v6 = vsel %vm204_vm1, %v12033_v61, 0.0 }
0x131a   :  { %v7280_v26 = vmul.f32 %v12037_v59, %v12037_v59  ;;  %7264 = vadd.xlane.f32.xlu1 %v7263_v6  ;;  %v7260_v35 = vsel %vm204_vm1, %v12037_v59, 0.0 }
0x131b   :  { %7261 = vadd.xlane.f32.xlu0 %v7260_v35  ;;  %v7295_v38 = vsel %vm204_vm1, %v7281_v20, 0.0 }
0x131c   :  { %v7292_v3 = vsel %vm204_vm1, %v7280_v26, 0.0 }
0x131e   :  { %7296 = vadd.xlane.f32.xlu1 %v7295_v38 }
0x131f   :  { %7293 = vadd.xlane.f32.xlu0 %v7292_v3 }
0x1320   :  { %v12047_v41 = vpop.f32.mrb[204].mxu0 }
0x1321   :  { %v7283_v5 = vmul.f32 %v12047_v41, %v12047_v41  ;;  %v12051_v33 = vpop.f32.mrb[205].mxu0  ;;  %v7269_v62 = vsel %vm204_vm1, %v12047_v41, 0.0 }
0x1322   :  { %v7282_v44 = vmul.f32 %v12051_v33, %v12051_v33  ;;  %7270 = vadd.xlane.f32.xlu1 %v7269_v62  ;;  %v7266_v51 = vsel %vm204_vm1, %v12051_v33, 0.0 }
0x1323   :  { %7267 = vadd.xlane.f32.xlu0 %v7266_v51  ;;  %v7301_v37 = vsel %vm204_vm1, %v7283_v5, 0.0  ;;  %v12088_v5 = vld [vmem:[%s12168_s4 + $0x14] ss:$0 sm:$0xff] }
0x1324   :  { %v7298_v40 = vsel %vm204_vm1, %v7282_v44, 0.0 }
0x1326   :  { %7302 = vadd.xlane.f32.xlu1 %v7301_v37 }
0x1327   :  { %7299 = vadd.xlane.f32.xlu0 %v7298_v40 }
0x1328   :  { %v12061_v52 = vpop.f32.mrb[206].mxu0 }
0x1329   :  { %v7285_v57 = vmul.f32 %v12061_v52, %v12061_v52  ;;  %v12065_v12 = vpop.f32.mrb[207].mxu0  ;;  %v7275_v22 = vsel %vm204_vm1, %v12061_v52, 0.0 }
0x132a   :  { %v7284_v42 = vmul.f32 %v12065_v12, %v12065_v12  ;;  %7276 = vadd.xlane.f32.xlu1 %v7275_v22  ;;  %v7272_v23 = vsel %vm204_vm1, %v12065_v12, 0.0 }
0x132b   :  { %7273 = vadd.xlane.f32.xlu0 %v7272_v23  ;;  %v7307_v2 = vsel %vm204_vm1, %v7285_v57, 0.0 }
0x132c   :  { %v7304_v63 = vsel %vm204_vm1, %v7284_v42, 0.0 }
0x132e   :  { %7308 = vadd.xlane.f32.xlu1 %v7307_v2 }
0x132f   :  { %7305 = vadd.xlane.f32.xlu0 %v7304_v63 }
0x139f   :  { %v7259_v24 = vpop.xlane.xlu1 %7258 }
0x13a0   :  { %v7311_v30 = vmul.f32 0.03125, %v7259_v24  ;;  %v7256_v55 = vpop.xlane.xlu0 %7255 }
0x13a1   :  { %v7310_v10 = vmul.f32 0.03125, %v7256_v55 }
0x13a2   :  { %v7327_v25 = vmul.f32 %v7311_v30, %v7311_v30  ;;  %v7343_v26 = vsub.f32 %v12019_v0, %v7311_v30 }
0x13a3   :  { %v7291_v31 = vpop.xlane.xlu1 %7290  ;;  %v7326_v21 = vmul.f32 %v7310_v10, %v7310_v10  ;;  %v7342_v3 = vsub.f32 %v12023_v54, %v7310_v10  ;;  %v12097_v54 = vld [vmem:[%s12168_s4 + $0x15] ss:$0 sm:$0xff] }
0x13a4   :  { %v7319_v13 = vmul.f32 0.03125, %v7291_v31  ;;  %v7288_v15 = vpop.xlane.xlu0 %7287 }
0x13a5   :  { %v7318_v50 = vmul.f32 0.03125, %v7288_v15 }
0x13a6   :  { %v7335_v39 = vsub.f32 %v7319_v13, %v7327_v25 }
0x13a7   :  { %v7334_v4 = vsub.f32 %v7318_v50, %v7326_v21  ;;  %v7265_v19 = vpop.xlane.xlu1 %7264 }
0x13a8   :  { %v7351_v28 = vadd.f32 1e-05, %v7335_v39  ;;  %v7313_v16 = vmul.f32 0.03125, %v7265_v19  ;;  %v7262_v49 = vpop.xlane.xlu0 %7261 }
0x13a9   :  { %v7350_v17 = vadd.f32 1e-05, %v7334_v4  ;;  %v12075_v11 = vmul.f32 0.03125, %v7262_v49 }
0x13aa   :  { %9823 = vrsqrt.f32 %v7351_v28  ;;  %v7329_v27 = vmul.f32 %v7313_v16, %v7313_v16  ;;  %v7345_v50 = vsub.f32 %v12033_v61, %v7313_v16 }
0x13ab   :  { %9825 = vrsqrt.f32 %v7350_v17  ;;  %v7297_v58 = vpop.xlane.xlu1 %7296  ;;  %v7328_v9 = vmul.f32 %v12075_v11, %v12075_v11  ;;  %v7344_v28 = vsub.f32 %v12037_v59, %v12075_v11 }
0x13ac   :  { %v7321_v7 = vmul.f32 0.03125, %v7297_v58  ;;  %v7294_v43 = vpop.xlane.xlu0 %7293 }
0x13ad   :  { %v7320_v14 = vmul.f32 0.03125, %v7294_v43 }
0x13ae   :  { %v7337_v32 = vsub.f32 %v7321_v7, %v7329_v27 }
0x13af   :  { %v7336_v8 = vsub.f32 %v7320_v14, %v7328_v9  ;;  %v7271_v1 = vpop.xlane.xlu1 %7270 }
0x13b0   :  { %v7353_v29 = vadd.f32 1e-05, %v7337_v32  ;;  %v12079_v53 = vmul.f32 0.03125, %v7271_v1  ;;  %v7268_v36 = vpop.xlane.xlu0 %7267 }
0x13b1   :  { %v7352_v20 = vadd.f32 1e-05, %v7336_v8  ;;  %v12081_v6 = vmul.f32 0.03125, %v7268_v36 }
0x13b2   :  { %9827 = vrsqrt.f32 %v7353_v29  ;;  %v7331_v62 = vmul.f32 %v12079_v53, %v12079_v53 }
0x13b3   :  { %9829 = vrsqrt.f32 %v7352_v20  ;;  %v7303_v35 = vpop.xlane.xlu1 %7302  ;;  %v7330_v0 = vmul.f32 %v12081_v6, %v12081_v6  ;;  %v7347_v20 = vsub.f32 %v12047_v41, %v12079_v53 }
0x13b4   :  { %v9824_v38 = vpop.eup %9823  ;;  %v7323_v44 = vmul.f32 0.03125, %v7303_v35  ;;  %v7300_v51 = vpop.xlane.xlu0 %7299 }
0x13b5   :  { %v9826_v37 = vpop.eup %9825  ;;  %v7367_v40 = vmul.f32 %v9824_v38, %v7343_v26  ;;  %v7322_v57 = vmul.f32 0.03125, %v7300_v51  ;;  %v7346_v38 = vsub.f32 %v12051_v33, %v12081_v6 }
0x13b6   :  { %v7366_v22 = vmul.f32 %v9826_v37, %v7342_v3  ;;  %v7339_v42 = vsub.f32 %v7323_v44, %v7331_v62 }
0x13b7   :  { %v7379_v23 = vmul.f32 %v12088_v5, %v7367_v40  ;;  %v7338_v2 = vsub.f32 %v7322_v57, %v7330_v0  ;;  %v7277_v63 = vpop.xlane.xlu1 %7276 }
0x13b8   :  { %v7378_v24 = vmul.f32 %v12088_v5, %v7366_v22  ;;  %v7355_v30 = vadd.f32 1e-05, %v7339_v42  ;;  %v7317_v55 = vmul.f32 0.03125, %v7277_v63  ;;  %v7274_v10 = vpop.xlane.xlu0 %7273 }
0x13b9   :  { %v7391_v31 = vadd.f32 %v12097_v54, %v7379_v23  ;;  %v7354_v25 = vadd.f32 1e-05, %v7338_v2  ;;  %v7316_v13 = vmul.f32 0.03125, %v7274_v10 }
0x13ba   :  { %v7390_v15 = vadd.f32 %v12097_v54, %v7378_v24  ;;  %9831 = vrsqrt.f32 %v7355_v30  ;;  %v7333_v49 = vmul.f32 %v7317_v55, %v7317_v55  ;;  %v7349_v6 = vsub.f32 %v12061_v52, %v7317_v55 }
0x13bb   :  { %v7399_v21 = vadd.f32 %v7391_v31, %v11672_v18  ;;  %9833 = vrsqrt.f32 %v7354_v25  ;;  %v7309_v39 = vpop.xlane.xlu1 %7308  ;;  %v7332_v9 = vmul.f32 %v7316_v13, %v7316_v13  ;;  %v7348_v57 = vsub.f32 %v12065_v12, %v7316_v13 }
0x13bc   :  { %v9828_v4 = vpop.eup %9827  ;;  %v7398_v19 = vadd.f32 %v7390_v15, %v11670_v48  ;;  %v7325_v17 = vmul.f32 0.03125, %v7309_v39  ;;  %v7306_v58 = vpop.xlane.xlu0 %7305 }
0x13bd   :  { %v9830_v27 = vpop.eup %9829  ;;  %v7407_v7 = vmax.f32 %v7399_v21, 0.0  ;;  %v7369_v43 = vmul.f32 %v9828_v4, %v7345_v50  ;;  %v7324_v14 = vmul.f32 0.03125, %v7306_v58 }
0x13be   :  { %v7406_v32 = vmax.f32 %v7398_v19, 0.0  ;;  %v7368_v18 = vmul.f32 %v9830_v27, %v7344_v28  ;;  %v7341_v8 = vsub.f32 %v7325_v17, %v7333_v49 }
0x13bf   :  { %7415 = vst.msk [vmem:[%s12169_s5 + $0x8] sm:$0xff] %vm204_vm1, %v7407_v7  ;;  %v7381_v48 = vmul.f32 %v12088_v5, %v7369_v43  ;;  %v7340_v61 = vsub.f32 %v7324_v14, %v7332_v9 }
0x13c0   :  { %7414 = vst.msk [vmem:[%s12169_s5] sm:$0xff] %vm204_vm1, %v7406_v32  ;;  %v7380_v59 = vmul.f32 %v12088_v5, %v7368_v18  ;;  %v7357_v16 = vadd.f32 1e-05, %v7341_v8 }
0x13c1   :  { %v7393_v11 = vadd.f32 %v12097_v54, %v7381_v48  ;;  %v7356_v1 = vadd.f32 1e-05, %v7340_v61 }
0x13c2   :  { %v7392_v29 = vadd.f32 %v12097_v54, %v7380_v59  ;;  %9835 = vrsqrt.f32 %v7357_v16 }
0x13c3   :  { %v7401_v36 = vadd.f32 %v7393_v11, %v11698_v60  ;;  %9837 = vrsqrt.f32 %v7356_v1 }
0x13c4   :  { %v9832_v26 = vpop.eup %9831  ;;  %v7400_v35 = vadd.f32 %v7392_v29, %v11696_v45 }
0x13c5   :  { %v9834_v3 = vpop.eup %9833  ;;  %v7409_v62 = vmax.f32 %v7401_v36, 0.0  ;;  %v7371_v44 = vmul.f32 %v9832_v26, %v7347_v20 }
0x13c6   :  { %v7408_v51 = vmax.f32 %v7400_v35, 0.0  ;;  %v7370_v37 = vmul.f32 %v9834_v3, %v7346_v38 }
0x13c7   :  { %7417 = vst.msk [vmem:[%s12169_s5 + $0x18] sm:$0xff] %vm204_vm1, %v7409_v62  ;;  %v7383_v60 = vmul.f32 %v12088_v5, %v7371_v44 }
0x13c8   :  { %7416 = vst.msk [vmem:[%s12169_s5 + $0x10] sm:$0xff] %vm204_vm1, %v7408_v51  ;;  %v7382_v45 = vmul.f32 %v12088_v5, %v7370_v37 }
0x13c9   :  { %v7395_v41 = vadd.f32 %v12097_v54, %v7383_v60 }
0x13ca   :  { %v7394_v33 = vadd.f32 %v12097_v54, %v7382_v45 }
0x13cb   :  { %v7403_v53 = vadd.f32 %v7395_v41, %v11721_v56 }
0x13cc   :  { %v9836_v40 = vpop.eup %9835  ;;  %v7402_v0 = vadd.f32 %v7394_v33, %v11719_v47 }
0x13cd   :  { %v9838_v22 = vpop.eup %9837  ;;  %v7411_v42 = vmax.f32 %v7403_v53, 0.0  ;;  %v7373_v23 = vmul.f32 %v9836_v40, %v7349_v6 }
0x13ce   :  { %v7410_v2 = vmax.f32 %v7402_v0, 0.0  ;;  %v7372_v63 = vmul.f32 %v9838_v22, %v7348_v57 }
0x13cf   :  { %7419 = vst.msk [vmem:[%s12169_s5 + $0x28] sm:$0xff] %vm204_vm1, %v7411_v42  ;;  %v7385_v24 = vmul.f32 %v12088_v5, %v7373_v23 }
0x13d0   :  { %7418 = vst.msk [vmem:[%s12169_s5 + $0x20] sm:$0xff] %vm204_vm1, %v7410_v2  ;;  %v7384_v47 = vmul.f32 %v12088_v5, %v7372_v63 }
0x13d1   :  { %v7397_v56 = vadd.f32 %v12097_v54, %v7385_v24 }
0x13d2   :  { %v7396_v52 = vadd.f32 %v12097_v54, %v7384_v47 }
0x13d3   :  { %v7405_v12 = vadd.f32 %v7397_v56, %v11739_v34 }
0x13d4   :  { %v7404_v30 = vadd.f32 %v7396_v52, %v11737_v46 }
0x13d5   :  { %v7413_v55 = vmax.f32 %v7405_v12, 0.0 }
0x13d6   :  { %v7412_v10 = vmax.f32 %v7404_v30, 0.0 }
0x13d7   :  { %7421 = vst.msk [vmem:[%s12169_s5 + $0x38] sm:$0xff] %vm204_vm1, %v7413_v55 }
0x13d8   :  { %7420 = vst.msk [vmem:[%s12169_s5 + $0x30] sm:$0xff] %vm204_vm1, %v7412_v10 }
0x13d9   :  { %7426 = vsyncpa [#allocation4], 1 }
0x13da   :  { %7427 = vsyncpa [#allocation6], 1 }

</bundles_post_ra>
